<compile_context>
chip_gen: v6e
topology: v6e:2x2x1
jax: 0.10.0
libtpu: 0.0.40
codegen_flags: <defaults>
</compile_context>

<pallas_src>
import functools

import jax
import jax.numpy as jnp
from jax import lax
from jax.experimental import pallas as pl
from jax.experimental.pallas import tpu as pltpu


# ----------------------------- in-kernel 3x3 im2col (pad=1) ----------------------------------
def _im2col(f, H, W):
    """(HW, C) h-major feature map -> (HW, 9*C) zero-padded 3x3 patches, cast to bf16."""
    C = f.shape[-1]
    x = f.reshape(H, W, C)
    zc = jnp.zeros((H, 1, C), f.dtype)
    zr = jnp.zeros((1, W + 2, C), f.dtype)
    xp = jnp.concatenate([zr, jnp.concatenate([zc, x, zc], axis=1), zr], axis=0)  # (H+2, W+2, C)
    cols = [xp[dy:dy + H, dx:dx + W, :].reshape(H * W, C)
            for dy in range(3) for dx in range(3)]
    return jnp.concatenate(cols, axis=-1).astype(jnp.bfloat16)                    # (HW, 9C)


# ----------------------------- fused DANet head + neck kernel --------------------------------
def _danet_head_fused_kernel(gammas_ref,                       # SMEM (2,): [pam_gamma, cam_gamma]
                             x_ref,                            # (1, HW, C) backbone features
                             w_ac_ref, s_ac_ref,               # conv5a|conv5c fused (9C, 2I), (1, 2I)
                             w_qk_ref, b_qk_ref,               # PAM q|k   (I, 2*C8), (1, 2*C8)
                             w_v_ref, b_v_ref,                 # PAM value (I, I), (1, I)
                             w51_ref, s51_ref,                 # conv51    (9I, I), (1, I)
                             w52_ref, s52_ref,                 # conv52    (9I, I), (1, I)
                             w53_ref, s53_ref,                 # conv53    (9I, C), (1, C)
                             bn1s_ref, bn1b_ref,               # bottleneck  (1, C) scale/shift
                             bn2s_ref, bn2b_ref,               # bottleneck2 (1, C) scale/shift
                             out_ref,                          # (1, 1, 2C)
                             *, H, W):
    x = x_ref[0]                                               # (HW, C) f32
    inter = w_v_ref.shape[0]
    c8 = w_qk_ref.shape[1] // 2

    # --- conv5a + conv5c: one im2col matmul, BN(eval) scale folded into weights, ReLU ---
    cols_x = _im2col(x, H, W)                                                       # (HW, 9C) bf16
    f12 = jnp.dot(cols_x, w_ac_ref[...], preferred_element_type=jnp.float32) + s_ac_ref[...]
    f12 = jnp.maximum(f12, 0.0)
    feat1 = f12[:, :inter]                                     # PAM branch input
    feat2 = f12[:, inter:]                                     # CAM branch input

    # --- PAM_Module: position attention (fused Q/K projection) ---
    f1b = feat1.astype(jnp.bfloat16)
    qk = jnp.dot(f1b, w_qk_ref[...], preferred_element_type=jnp.float32) + b_qk_ref[...]
    q = qk[:, :c8].astype(jnp.bfloat16)
    k = qk[:, c8:].astype(jnp.bfloat16)
    v = jnp.dot(f1b, w_v_ref[...], preferred_element_type=jnp.float32) + b_v_ref[...]
    energy = lax.dot_general(q, k, (((1,), (1,)), ((), ())),
                             preferred_element_type=jnp.float32)                    # (HW, HW)
    energy = energy - jnp.max(energy, axis=-1, keepdims=True)                       # stable softmax
    pe = jnp.exp(energy)
    att = pe * pl.reciprocal(jnp.sum(pe, axis=-1, keepdims=True), approx=True)
    pam_out = jnp.dot(att.astype(jnp.bfloat16), v.astype(jnp.bfloat16),
                      preferred_element_type=jnp.float32)                           # (HW, I)
    sa = gammas_ref[0] * pam_out + feat1                                            # gamma*out + x

    # --- CAM_Module: channel attention (contract leading HW axis directly, no transpose) ---
    f2b = feat2.astype(jnp.bfloat16)
    ce = lax.dot_general(f2b, f2b, (((0,), (0,)), ((), ())),
                         preferred_element_type=jnp.float32)                        # (I, I)
    ce = jnp.max(ce, axis=-1, keepdims=True) - ce                                   # max - energy
    ce = ce - jnp.max(ce, axis=-1, keepdims=True)                                   # stable softmax
    pc = jnp.exp(ce)
    catt = pc * pl.reciprocal(jnp.sum(pc, axis=-1, keepdims=True), approx=True)     # (I, I)
    cam_out = lax.dot_general(f2b, catt.astype(jnp.bfloat16), (((1,), (1,)), ((), ())),
                              preferred_element_type=jnp.float32)                   # (HW, I)
    sc = gammas_ref[1] * cam_out + feat2                                            # gamma*out + x

    # --- conv51(sa), conv52(sc), sum, conv53 (all im2col matmuls, folded BN, ReLU) ---
    sa_conv = jnp.maximum(
        jnp.dot(_im2col(sa, H, W), w51_ref[...], preferred_element_type=jnp.float32)
        + s51_ref[...], 0.0)
    sc_conv = jnp.maximum(
        jnp.dot(_im2col(sc, H, W), w52_ref[...], preferred_element_type=jnp.float32)
        + s52_ref[...], 0.0)
    feat_sum = sa_conv + sc_conv
    head = jnp.maximum(
        jnp.dot(_im2col(feat_sum, H, W), w53_ref[...], preferred_element_type=jnp.float32)
        + s53_ref[...], 0.0)                                                        # (HW, C)

    # --- GAP + BatchNorm1d (eval) bottlenecks; eval path neck='bnneck', neck_feat='after' ---
    gx = jnp.mean(x, axis=0, keepdims=True) * bn1s_ref[...] + bn1b_ref[...]         # (1, C)
    gh = jnp.mean(head, axis=0, keepdims=True) * bn2s_ref[...] + bn2b_ref[...]      # (1, C)
    out_ref[0] = jnp.concatenate([gx, gh], axis=-1)                                 # (1, 2C)


# ----------------------------- Baseline forward (eval) ---------------------------------------
def baseline_forward(x_nchw, p):
    # TODO(synk): the ResNet/SENet backbone (`self.base`) and ImageNet checkpoint loading are
    # external to this module file; `x` is treated as the backbone output feature map.
    x = jnp.transpose(x_nchw, (0, 2, 3, 1)).astype(jnp.float32)        # NCHW -> NHWC
    B, H, W, C = x.shape
    HW = H * W
    f = x.reshape(B, HW, C)
    inter = p["w_v"].shape[0]
    c8 = p["w_qk"].shape[1] // 2

    out = pl.pallas_call(
        functools.partial(_danet_head_fused_kernel, H=H, W=W),
        out_shape=jax.ShapeDtypeStruct((B, 1, 2 * C), jnp.float32),
        grid=(B,),
        in_specs=[
            pl.BlockSpec(memory_space=pltpu.MemorySpace.SMEM),          # gammas (2,)
            pl.BlockSpec((1, HW, C), lambda b: (b, 0, 0)),              # x per batch
            pl.BlockSpec((9 * C, 2 * inter), lambda b: (0, 0)),         # w_ac
            pl.BlockSpec((1, 2 * inter), lambda b: (0, 0)),             # s_ac
            pl.BlockSpec((inter, 2 * c8), lambda b: (0, 0)),            # w_qk
            pl.BlockSpec((1, 2 * c8), lambda b: (0, 0)),                # b_qk
            pl.BlockSpec((inter, inter), lambda b: (0, 0)),             # w_v
            pl.BlockSpec((1, inter), lambda b: (0, 0)),                 # b_v
            pl.BlockSpec((9 * inter, inter), lambda b: (0, 0)),         # w51
            pl.BlockSpec((1, inter), lambda b: (0, 0)),                 # s51
            pl.BlockSpec((9 * inter, inter), lambda b: (0, 0)),         # w52
            pl.BlockSpec((1, inter), lambda b: (0, 0)),                 # s52
            pl.BlockSpec((9 * inter, C), lambda b: (0, 0)),             # w53
            pl.BlockSpec((1, C), lambda b: (0, 0)),                     # s53
            pl.BlockSpec((1, C), lambda b: (0, 0)),                     # bn1_scale
            pl.BlockSpec((1, C), lambda b: (0, 0)),                     # bn1_shift
            pl.BlockSpec((1, C), lambda b: (0, 0)),                     # bn2_scale
            pl.BlockSpec((1, C), lambda b: (0, 0)),                     # bn2_shift
        ],
        out_specs=pl.BlockSpec((1, 1, 2 * C), lambda b: (b, 0, 0)),
        compiler_params=pltpu.CompilerParams(dimension_semantics=("parallel",)),
    )(p["gammas"], f,
      p["w_ac"], p["s_ac"],
      p["w_qk"], p["b_qk"], p["w_v"], p["b_v"],
      p["w51"], p["s51"], p["w52"], p["s52"], p["w53"], p["s53"],
      p["bn1_scale"], p["bn1_shift"], p["bn2_scale"], p["bn2_shift"])
    return out.reshape(B, 2 * C)                                        # cat((feat, feat2), 1)


# ----------------------------- deterministic parameter init ----------------------------------
def init_params(key, c_in):
    inter = c_in // 4
    c8 = max(inter // 8, 1)
    ks = jax.random.split(key, 13)
    eps = 1e-5

    def conv_w(k, cin, cout):
        # (3, 3, Cin, Cout) == torch (Cout, Cin, 3, 3) permuted; reshaped to (9*Cin, Cout)
        return jax.random.normal(k, (3, 3, cin, cout), jnp.float32) / jnp.sqrt(9.0 * cin)

    def bn_fold(k, c):
        k1, k2, k3, k4 = jax.random.split(k, 4)
        gamma = 1.0 + 0.1 * jax.random.normal(k1, (c,), jnp.float32)
        beta = 0.1 * jax.random.normal(k2, (c,), jnp.float32)
        mean = 0.1 * jax.random.normal(k3, (c,), jnp.float32)
        var = 0.5 + jnp.abs(jax.random.normal(k4, (c,), jnp.float32))
        scale = gamma / jnp.sqrt(var + eps)
        return scale, beta - mean * scale

    def fold(w, scale):
        # fold BN(eval) scale into conv weights (bias-free conv): y = x*(w*scale) + shift
        cin, cout = w.shape[2], w.shape[3]
        return (w * scale).reshape(9 * cin, cout).astype(jnp.bfloat16)

    p = {}
    w5a = conv_w(ks[0], c_in, inter); sc5a, sh5a = bn_fold(ks[1], inter)
    w5c = conv_w(ks[2], c_in, inter); sc5c, sh5c = bn_fold(ks[3], inter)
    p["w_ac"] = jnp.concatenate([fold(w5a, sc5a), fold(w5c, sc5c)], axis=1)   # (9C, 2I) bf16
    p["s_ac"] = jnp.concatenate([sh5a, sh5c]).reshape(1, 2 * inter)

    w51 = conv_w(ks[4], inter, inter); sc51, sh51 = bn_fold(ks[5], inter)
    p["w51"], p["s51"] = fold(w51, sc51), sh51.reshape(1, inter)
    w52 = conv_w(ks[6], inter, inter); sc52, sh52 = bn_fold(ks[7], inter)
    p["w52"], p["s52"] = fold(w52, sc52), sh52.reshape(1, inter)
    w53 = conv_w(ks[8], inter, c_in); sc53, sh53 = bn_fold(ks[9], c_in)       # 2048-ch out -> c_in
    p["w53"], p["s53"] = fold(w53, sc53), sh53.reshape(1, c_in)

    # PAM 1x1 convs (query/key: inter -> inter//8 fused, value: inter -> inter)
    wq = jax.random.normal(ks[10], (inter, c8), jnp.float32) / jnp.sqrt(float(inter))
    wk = jax.random.normal(ks[11], (inter, c8), jnp.float32) / jnp.sqrt(float(inter))
    p["w_qk"] = jnp.concatenate([wq, wk], axis=1).astype(jnp.bfloat16)        # (I, 2*C8)
    p["b_qk"] = jnp.zeros((1, 2 * c8), jnp.float32)
    p["w_v"] = (jax.random.normal(ks[12], (inter, inter), jnp.float32)
                / jnp.sqrt(float(inter))).astype(jnp.bfloat16)
    p["b_v"] = jnp.zeros((1, inter), jnp.float32)
    p["gammas"] = jnp.zeros((2,), jnp.float32)           # [pam_gamma, cam_gamma] = torch.zeros(1)

    # BatchNorm1d bottlenecks: weights_init_kaiming -> weight=1, bias=0; running mean=0, var=1
    bn_scale = jnp.full((1, c_in), 1.0 / jnp.sqrt(1.0 + eps), jnp.float32)
    p["bn1_scale"], p["bn1_shift"] = bn_scale, jnp.zeros((1, c_in), jnp.float32)
    p["bn2_scale"], p["bn2_shift"] = bn_scale, jnp.zeros((1, c_in), jnp.float32)
    return p


if __name__ == "__main__":
    B, C_IN, H, W = 2, 64, 16, 16            # scaled-down stand-in for (B, 2048, 16, 8)
    key = jax.random.PRNGKey(0)
    kx, kp = jax.random.split(key)
    x = jax.random.normal(kx, (B, C_IN, H, W), jnp.float32)
    params = init_params(kp, C_IN)

    fwd = jax.jit(baseline_forward)
    out = fwd(x, params)
    jax.block_until_ready(out)

    assert out.shape == (B, 2 * C_IN), out.shape
    assert bool(jnp.all(jnp.isfinite(out)))
    print("KERNEL_OK")
</pallas_src>

<mosaic_0001>
module attributes {stable_mosaic.version = 11 : i64} {
  func.func @_danet_head_fused_kernel(%arg0: i32, %arg1: memref<2xf32, #tpu.memory_space<smem>>, %arg2: memref<1x256x64xf32, #tpu.memory_space<vmem>>, %arg3: memref<576x32xbf16, #tpu.memory_space<vmem>>, %arg4: memref<1x32xf32, #tpu.memory_space<vmem>>, %arg5: memref<16x4xbf16, #tpu.memory_space<vmem>>, %arg6: memref<1x4xf32, #tpu.memory_space<vmem>>, %arg7: memref<16x16xbf16, #tpu.memory_space<vmem>>, %arg8: memref<1x16xf32, #tpu.memory_space<vmem>>, %arg9: memref<144x16xbf16, #tpu.memory_space<vmem>>, %arg10: memref<1x16xf32, #tpu.memory_space<vmem>>, %arg11: memref<144x16xbf16, #tpu.memory_space<vmem>>, %arg12: memref<1x16xf32, #tpu.memory_space<vmem>>, %arg13: memref<144x64xbf16, #tpu.memory_space<vmem>>, %arg14: memref<1x64xf32, #tpu.memory_space<vmem>>, %arg15: memref<1x64xf32, #tpu.memory_space<vmem>>, %arg16: memref<1x64xf32, #tpu.memory_space<vmem>>, %arg17: memref<1x64xf32, #tpu.memory_space<vmem>>, %arg18: memref<1x64xf32, #tpu.memory_space<vmem>>, %arg19: memref<1x1x128xf32, #tpu.memory_space<vmem>>) attributes {dimension_semantics = [#tpu.dimension_semantics<parallel>], iteration_bounds = array<i64: 2>, scalar_prefetch = 0 : i64, scratch_operands = 0 : i64, tpu.core_type = #tpu.core_type<tc>, window_params = [{transform_indices = @transform_0, window_bounds = array<i64: 2>}, {transform_indices = @transform_1, window_bounds = array<i64: 1, 256, 64>}, {pipeline_mode = #tpu.pipeline_mode<synchronous>, transform_indices = @transform_2, window_bounds = array<i64: 576, 32>}, {pipeline_mode = #tpu.pipeline_mode<synchronous>, transform_indices = @transform_3, window_bounds = array<i64: 1, 32>}, {pipeline_mode = #tpu.pipeline_mode<synchronous>, transform_indices = @transform_4, window_bounds = array<i64: 16, 4>}, {pipeline_mode = #tpu.pipeline_mode<synchronous>, transform_indices = @transform_5, window_bounds = array<i64: 1, 4>}, {pipeline_mode = #tpu.pipeline_mode<synchronous>, transform_indices = @transform_6, window_bounds = array<i64: 16, 16>}, {pipeline_mode = #tpu.pipeline_mode<synchronous>, transform_indices = @transform_7, window_bounds = array<i64: 1, 16>}, {pipeline_mode = #tpu.pipeline_mode<synchronous>, transform_indices = @transform_8, window_bounds = array<i64: 144, 16>}, {pipeline_mode = #tpu.pipeline_mode<synchronous>, transform_indices = @transform_9, window_bounds = array<i64: 1, 16>}, {pipeline_mode = #tpu.pipeline_mode<synchronous>, transform_indices = @transform_10, window_bounds = array<i64: 144, 16>}, {pipeline_mode = #tpu.pipeline_mode<synchronous>, transform_indices = @transform_11, window_bounds = array<i64: 1, 16>}, {pipeline_mode = #tpu.pipeline_mode<synchronous>, transform_indices = @transform_12, window_bounds = array<i64: 144, 64>}, {pipeline_mode = #tpu.pipeline_mode<synchronous>, transform_indices = @transform_13, window_bounds = array<i64: 1, 64>}, {pipeline_mode = #tpu.pipeline_mode<synchronous>, transform_indices = @transform_14, window_bounds = array<i64: 1, 64>}, {pipeline_mode = #tpu.pipeline_mode<synchronous>, transform_indices = @transform_15, window_bounds = array<i64: 1, 64>}, {pipeline_mode = #tpu.pipeline_mode<synchronous>, transform_indices = @transform_16, window_bounds = array<i64: 1, 64>}, {pipeline_mode = #tpu.pipeline_mode<synchronous>, transform_indices = @transform_17, window_bounds = array<i64: 1, 64>}, {transform_indices = @transform_18, window_bounds = array<i64: 1, 1, 128>}]} {
    %c0 = arith.constant 0 : index
    %c0_0 = arith.constant 0 : index
    %c0_1 = arith.constant 0 : index
    %0 = vector.load %arg2[%c0, %c0_0, %c0_1] : memref<1x256x64xf32, #tpu.memory_space<vmem>>, vector<1x256x64xf32>
    %1 = vector.shape_cast %0 : vector<1x256x64xf32> to vector<256x64xf32>
    %2 = vector.shape_cast %1 : vector<256x64xf32> to vector<16x16x64xf32>
    %cst = arith.constant 0.000000e+00 : f32
    %3 = vector.broadcast %cst : f32 to vector<16x1x64xf32>
    %cst_2 = arith.constant 0.000000e+00 : f32
    %4 = vector.broadcast %cst_2 : f32 to vector<1x18x64xf32>
    %5 = tpu.concatenate %3, %2, %3 in 1 : vector<16x1x64xf32>, vector<16x16x64xf32>, vector<16x1x64xf32> -> vector<16x18x64xf32>
    %6 = tpu.concatenate %4, %5, %4 in 0 : vector<1x18x64xf32>, vector<16x18x64xf32>, vector<1x18x64xf32> -> vector<18x18x64xf32>
    %7 = vector.extract_strided_slice %6 {offsets = [0, 0, 0], sizes = [16, 16, 64], strides = [1, 1, 1]} : vector<18x18x64xf32> to vector<16x16x64xf32>
    %8 = vector.shape_cast %7 : vector<16x16x64xf32> to vector<256x64xf32>
    %9 = vector.extract_strided_slice %6 {offsets = [0, 1, 0], sizes = [16, 16, 64], strides = [1, 1, 1]} : vector<18x18x64xf32> to vector<16x16x64xf32>
    %10 = vector.shape_cast %9 : vector<16x16x64xf32> to vector<256x64xf32>
    %11 = vector.extract_strided_slice %6 {offsets = [0, 2, 0], sizes = [16, 16, 64], strides = [1, 1, 1]} : vector<18x18x64xf32> to vector<16x16x64xf32>
    %12 = vector.shape_cast %11 : vector<16x16x64xf32> to vector<256x64xf32>
    %13 = vector.extract_strided_slice %6 {offsets = [1, 0, 0], sizes = [16, 16, 64], strides = [1, 1, 1]} : vector<18x18x64xf32> to vector<16x16x64xf32>
    %14 = vector.shape_cast %13 : vector<16x16x64xf32> to vector<256x64xf32>
    %15 = vector.extract_strided_slice %6 {offsets = [1, 1, 0], sizes = [16, 16, 64], strides = [1, 1, 1]} : vector<18x18x64xf32> to vector<16x16x64xf32>
    %16 = vector.shape_cast %15 : vector<16x16x64xf32> to vector<256x64xf32>
    %17 = vector.extract_strided_slice %6 {offsets = [1, 2, 0], sizes = [16, 16, 64], strides = [1, 1, 1]} : vector<18x18x64xf32> to vector<16x16x64xf32>
    %18 = vector.shape_cast %17 : vector<16x16x64xf32> to vector<256x64xf32>
    %19 = vector.extract_strided_slice %6 {offsets = [2, 0, 0], sizes = [16, 16, 64], strides = [1, 1, 1]} : vector<18x18x64xf32> to vector<16x16x64xf32>
    %20 = vector.shape_cast %19 : vector<16x16x64xf32> to vector<256x64xf32>
    %21 = vector.extract_strided_slice %6 {offsets = [2, 1, 0], sizes = [16, 16, 64], strides = [1, 1, 1]} : vector<18x18x64xf32> to vector<16x16x64xf32>
    %22 = vector.shape_cast %21 : vector<16x16x64xf32> to vector<256x64xf32>
    %23 = vector.extract_strided_slice %6 {offsets = [2, 2, 0], sizes = [16, 16, 64], strides = [1, 1, 1]} : vector<18x18x64xf32> to vector<16x16x64xf32>
    %24 = vector.shape_cast %23 : vector<16x16x64xf32> to vector<256x64xf32>
    %25 = tpu.concatenate %8, %10, %12, %14, %16, %18, %20, %22, %24 in 1 : vector<256x64xf32>, vector<256x64xf32>, vector<256x64xf32>, vector<256x64xf32>, vector<256x64xf32>, vector<256x64xf32>, vector<256x64xf32>, vector<256x64xf32>, vector<256x64xf32> -> vector<256x576xf32>
    %26 = arith.truncf %25 : vector<256x576xf32> to vector<256x576xbf16>
    %c0_3 = arith.constant 0 : index
    %c0_4 = arith.constant 0 : index
    %27 = vector.load %arg3[%c0_3, %c0_4] : memref<576x32xbf16, #tpu.memory_space<vmem>>, vector<576x32xbf16>
    %cst_5 = arith.constant dense<0.000000e+00> : vector<256x32xf32>
    %28 = tpu.matmul %26, %27, %cst_5 {dimension_numbers = #tpu.dot_dimension_numbers<[1], [0], [0], [1], [0, 0, 1, 1], [], []>} : vector<256x576xbf16>, vector<576x32xbf16>, vector<256x32xf32> -> vector<256x32xf32>
    %c0_6 = arith.constant 0 : index
    %c0_7 = arith.constant 0 : index
    %29 = vector.load %arg4[%c0_6, %c0_7] : memref<1x32xf32, #tpu.memory_space<vmem>>, vector<1x32xf32>
    %30 = vector.broadcast %29 : vector<1x32xf32> to vector<256x32xf32>
    %31 = arith.addf %28, %30 : vector<256x32xf32>
    %cst_8 = arith.constant 0.000000e+00 : f32
    %32 = vector.broadcast %cst_8 : f32 to vector<256x32xf32>
    %33 = arith.maximumf %31, %32 : vector<256x32xf32>
    %34 = vector.extract_strided_slice %33 {offsets = [0, 0], sizes = [256, 16], strides = [1, 1]} : vector<256x32xf32> to vector<256x16xf32>
    %35 = vector.extract_strided_slice %33 {offsets = [0, 16], sizes = [256, 16], strides = [1, 1]} : vector<256x32xf32> to vector<256x16xf32>
    %36 = arith.truncf %34 : vector<256x16xf32> to vector<256x16xbf16>
    %c0_9 = arith.constant 0 : index
    %c0_10 = arith.constant 0 : index
    %37 = vector.load %arg5[%c0_9, %c0_10] : memref<16x4xbf16, #tpu.memory_space<vmem>>, vector<16x4xbf16>
    %cst_11 = arith.constant dense<0.000000e+00> : vector<256x4xf32>
    %38 = tpu.matmul %36, %37, %cst_11 {dimension_numbers = #tpu.dot_dimension_numbers<[1], [0], [0], [1], [0, 0, 1, 1], [], []>} : vector<256x16xbf16>, vector<16x4xbf16>, vector<256x4xf32> -> vector<256x4xf32>
    %c0_12 = arith.constant 0 : index
    %c0_13 = arith.constant 0 : index
    %39 = vector.load %arg6[%c0_12, %c0_13] : memref<1x4xf32, #tpu.memory_space<vmem>>, vector<1x4xf32>
    %40 = vector.broadcast %39 : vector<1x4xf32> to vector<256x4xf32>
    %41 = arith.addf %38, %40 : vector<256x4xf32>
    %42 = vector.extract_strided_slice %41 {offsets = [0, 0], sizes = [256, 2], strides = [1, 1]} : vector<256x4xf32> to vector<256x2xf32>
    %43 = arith.truncf %42 : vector<256x2xf32> to vector<256x2xbf16>
    %44 = vector.extract_strided_slice %41 {offsets = [0, 2], sizes = [256, 2], strides = [1, 1]} : vector<256x4xf32> to vector<256x2xf32>
    %45 = arith.truncf %44 : vector<256x2xf32> to vector<256x2xbf16>
    %c0_14 = arith.constant 0 : index
    %c0_15 = arith.constant 0 : index
    %46 = vector.load %arg7[%c0_14, %c0_15] : memref<16x16xbf16, #tpu.memory_space<vmem>>, vector<16x16xbf16>
    %cst_16 = arith.constant dense<0.000000e+00> : vector<256x16xf32>
    %47 = tpu.matmul %36, %46, %cst_16 {dimension_numbers = #tpu.dot_dimension_numbers<[1], [0], [0], [1], [0, 0, 1, 1], [], []>} : vector<256x16xbf16>, vector<16x16xbf16>, vector<256x16xf32> -> vector<256x16xf32>
    %c0_17 = arith.constant 0 : index
    %c0_18 = arith.constant 0 : index
    %48 = vector.load %arg8[%c0_17, %c0_18] : memref<1x16xf32, #tpu.memory_space<vmem>>, vector<1x16xf32>
    %49 = vector.broadcast %48 : vector<1x16xf32> to vector<256x16xf32>
    %50 = arith.addf %47, %49 : vector<256x16xf32>
    %cst_19 = arith.constant dense<0.000000e+00> : vector<256x256xf32>
    %51 = tpu.matmul %43, %45, %cst_19 {dimension_numbers = #tpu.dot_dimension_numbers<[1], [1], [0], [0], [0, 0, 1, 0], [], []>} : vector<256x2xbf16>, vector<256x2xbf16>, vector<256x256xf32> -> vector<256x256xf32>
    %cst_20 = arith.constant dense<0xFF800000> : vector<256xf32>
    %52 = vector.multi_reduction <maximumf>, %51, %cst_20 [1] : vector<256x256xf32> to vector<256xf32>
    %53 = vector.shape_cast %52 : vector<256xf32> to vector<256x1xf32>
    %54 = vector.broadcast %53 : vector<256x1xf32> to vector<256x256xf32>
    %55 = arith.subf %51, %54 : vector<256x256xf32>
    %56 = math.exp %55 : vector<256x256xf32>
    %cst_21 = arith.constant dense<0.000000e+00> : vector<256xf32>
    %57 = vector.multi_reduction <add>, %56, %cst_21 [1] : vector<256x256xf32> to vector<256xf32>
    %58 = vector.shape_cast %57 : vector<256xf32> to vector<256x1xf32>
    %59 = tpu.reciprocal %58 {approx = true} : vector<256x1xf32> -> vector<256x1xf32>
    %60 = vector.broadcast %59 : vector<256x1xf32> to vector<256x256xf32>
    %61 = arith.mulf %56, %60 : vector<256x256xf32>
    %62 = arith.truncf %61 : vector<256x256xf32> to vector<256x256xbf16>
    %63 = arith.truncf %50 : vector<256x16xf32> to vector<256x16xbf16>
    %cst_22 = arith.constant dense<0.000000e+00> : vector<256x16xf32>
    %64 = tpu.matmul %62, %63, %cst_22 {dimension_numbers = #tpu.dot_dimension_numbers<[1], [0], [0], [1], [0, 0, 1, 1], [], []>} : vector<256x256xbf16>, vector<256x16xbf16>, vector<256x16xf32> -> vector<256x16xf32>
    %c0_23 = arith.constant 0 : index
    %65 = memref.load %arg1[%c0_23] : memref<2xf32, #tpu.memory_space<smem>>
    %66 = vector.broadcast %65 : f32 to vector<256x16xf32>
    %67 = arith.mulf %66, %64 : vector<256x16xf32>
    %68 = arith.addf %67, %34 : vector<256x16xf32>
    %69 = arith.truncf %35 : vector<256x16xf32> to vector<256x16xbf16>
    %cst_24 = arith.constant dense<0.000000e+00> : vector<16x16xf32>
    %70 = tpu.matmul %69, %69, %cst_24 {dimension_numbers = #tpu.dot_dimension_numbers<[0], [0], [1], [1], [0, 1, 1, 1], [], []>} : vector<256x16xbf16>, vector<256x16xbf16>, vector<16x16xf32> -> vector<16x16xf32>
    %cst_25 = arith.constant dense<0xFF800000> : vector<16xf32>
    %71 = vector.multi_reduction <maximumf>, %70, %cst_25 [1] : vector<16x16xf32> to vector<16xf32>
    %72 = vector.shape_cast %71 : vector<16xf32> to vector<16x1xf32>
    %73 = vector.broadcast %72 : vector<16x1xf32> to vector<16x16xf32>
    %74 = arith.subf %73, %70 : vector<16x16xf32>
    %cst_26 = arith.constant dense<0xFF800000> : vector<16xf32>
    %75 = vector.multi_reduction <maximumf>, %74, %cst_26 [1] : vector<16x16xf32> to vector<16xf32>
    %76 = vector.shape_cast %75 : vector<16xf32> to vector<16x1xf32>
    %77 = vector.broadcast %76 : vector<16x1xf32> to vector<16x16xf32>
    %78 = arith.subf %74, %77 : vector<16x16xf32>
    %79 = math.exp %78 : vector<16x16xf32>
    %cst_27 = arith.constant dense<0.000000e+00> : vector<16xf32>
    %80 = vector.multi_reduction <add>, %79, %cst_27 [1] : vector<16x16xf32> to vector<16xf32>
    %81 = vector.shape_cast %80 : vector<16xf32> to vector<16x1xf32>
    %82 = tpu.reciprocal %81 {approx = true} : vector<16x1xf32> -> vector<16x1xf32>
    %83 = vector.broadcast %82 : vector<16x1xf32> to vector<16x16xf32>
    %84 = arith.mulf %79, %83 : vector<16x16xf32>
    %85 = arith.truncf %84 : vector<16x16xf32> to vector<16x16xbf16>
    %cst_28 = arith.constant dense<0.000000e+00> : vector<256x16xf32>
    %86 = tpu.matmul %69, %85, %cst_28 {dimension_numbers = #tpu.dot_dimension_numbers<[1], [1], [0], [0], [0, 0, 1, 0], [], []>} : vector<256x16xbf16>, vector<16x16xbf16>, vector<256x16xf32> -> vector<256x16xf32>
    %c1 = arith.constant 1 : index
    %87 = memref.load %arg1[%c1] : memref<2xf32, #tpu.memory_space<smem>>
    %88 = vector.broadcast %87 : f32 to vector<256x16xf32>
    %89 = arith.mulf %88, %86 : vector<256x16xf32>
    %90 = arith.addf %89, %35 : vector<256x16xf32>
    %91 = vector.shape_cast %68 : vector<256x16xf32> to vector<16x16x16xf32>
    %cst_29 = arith.constant 0.000000e+00 : f32
    %92 = vector.broadcast %cst_29 : f32 to vector<16x1x16xf32>
    %cst_30 = arith.constant 0.000000e+00 : f32
    %93 = vector.broadcast %cst_30 : f32 to vector<1x18x16xf32>
    %94 = tpu.concatenate %92, %91, %92 in 1 : vector<16x1x16xf32>, vector<16x16x16xf32>, vector<16x1x16xf32> -> vector<16x18x16xf32>
    %95 = tpu.concatenate %93, %94, %93 in 0 : vector<1x18x16xf32>, vector<16x18x16xf32>, vector<1x18x16xf32> -> vector<18x18x16xf32>
    %96 = vector.extract_strided_slice %95 {offsets = [0, 0, 0], sizes = [16, 16, 16], strides = [1, 1, 1]} : vector<18x18x16xf32> to vector<16x16x16xf32>
    %97 = vector.shape_cast %96 : vector<16x16x16xf32> to vector<256x16xf32>
    %98 = vector.extract_strided_slice %95 {offsets = [0, 1, 0], sizes = [16, 16, 16], strides = [1, 1, 1]} : vector<18x18x16xf32> to vector<16x16x16xf32>
    %99 = vector.shape_cast %98 : vector<16x16x16xf32> to vector<256x16xf32>
    %100 = vector.extract_strided_slice %95 {offsets = [0, 2, 0], sizes = [16, 16, 16], strides = [1, 1, 1]} : vector<18x18x16xf32> to vector<16x16x16xf32>
    %101 = vector.shape_cast %100 : vector<16x16x16xf32> to vector<256x16xf32>
    %102 = vector.extract_strided_slice %95 {offsets = [1, 0, 0], sizes = [16, 16, 16], strides = [1, 1, 1]} : vector<18x18x16xf32> to vector<16x16x16xf32>
    %103 = vector.shape_cast %102 : vector<16x16x16xf32> to vector<256x16xf32>
    %104 = vector.extract_strided_slice %95 {offsets = [1, 1, 0], sizes = [16, 16, 16], strides = [1, 1, 1]} : vector<18x18x16xf32> to vector<16x16x16xf32>
    %105 = vector.shape_cast %104 : vector<16x16x16xf32> to vector<256x16xf32>
    %106 = vector.extract_strided_slice %95 {offsets = [1, 2, 0], sizes = [16, 16, 16], strides = [1, 1, 1]} : vector<18x18x16xf32> to vector<16x16x16xf32>
    %107 = vector.shape_cast %106 : vector<16x16x16xf32> to vector<256x16xf32>
    %108 = vector.extract_strided_slice %95 {offsets = [2, 0, 0], sizes = [16, 16, 16], strides = [1, 1, 1]} : vector<18x18x16xf32> to vector<16x16x16xf32>
    %109 = vector.shape_cast %108 : vector<16x16x16xf32> to vector<256x16xf32>
    %110 = vector.extract_strided_slice %95 {offsets = [2, 1, 0], sizes = [16, 16, 16], strides = [1, 1, 1]} : vector<18x18x16xf32> to vector<16x16x16xf32>
    %111 = vector.shape_cast %110 : vector<16x16x16xf32> to vector<256x16xf32>
    %112 = vector.extract_strided_slice %95 {offsets = [2, 2, 0], sizes = [16, 16, 16], strides = [1, 1, 1]} : vector<18x18x16xf32> to vector<16x16x16xf32>
    %113 = vector.shape_cast %112 : vector<16x16x16xf32> to vector<256x16xf32>
    %114 = tpu.concatenate %97, %99, %101, %103, %105, %107, %109, %111, %113 in 1 : vector<256x16xf32>, vector<256x16xf32>, vector<256x16xf32>, vector<256x16xf32>, vector<256x16xf32>, vector<256x16xf32>, vector<256x16xf32>, vector<256x16xf32>, vector<256x16xf32> -> vector<256x144xf32>
    %115 = arith.truncf %114 : vector<256x144xf32> to vector<256x144xbf16>
    %c0_31 = arith.constant 0 : index
    %c0_32 = arith.constant 0 : index
    %116 = vector.load %arg9[%c0_31, %c0_32] : memref<144x16xbf16, #tpu.memory_space<vmem>>, vector<144x16xbf16>
    %cst_33 = arith.constant dense<0.000000e+00> : vector<256x16xf32>
    %117 = tpu.matmul %115, %116, %cst_33 {dimension_numbers = #tpu.dot_dimension_numbers<[1], [0], [0], [1], [0, 0, 1, 1], [], []>} : vector<256x144xbf16>, vector<144x16xbf16>, vector<256x16xf32> -> vector<256x16xf32>
    %c0_34 = arith.constant 0 : index
    %c0_35 = arith.constant 0 : index
    %118 = vector.load %arg10[%c0_34, %c0_35] : memref<1x16xf32, #tpu.memory_space<vmem>>, vector<1x16xf32>
    %119 = vector.broadcast %118 : vector<1x16xf32> to vector<256x16xf32>
    %120 = arith.addf %117, %119 : vector<256x16xf32>
    %cst_36 = arith.constant 0.000000e+00 : f32
    %121 = vector.broadcast %cst_36 : f32 to vector<256x16xf32>
    %122 = arith.maximumf %120, %121 : vector<256x16xf32>
    %123 = vector.shape_cast %90 : vector<256x16xf32> to vector<16x16x16xf32>
    %cst_37 = arith.constant 0.000000e+00 : f32
    %124 = vector.broadcast %cst_37 : f32 to vector<16x1x16xf32>
    %cst_38 = arith.constant 0.000000e+00 : f32
    %125 = vector.broadcast %cst_38 : f32 to vector<1x18x16xf32>
    %126 = tpu.concatenate %124, %123, %124 in 1 : vector<16x1x16xf32>, vector<16x16x16xf32>, vector<16x1x16xf32> -> vector<16x18x16xf32>
    %127 = tpu.concatenate %125, %126, %125 in 0 : vector<1x18x16xf32>, vector<16x18x16xf32>, vector<1x18x16xf32> -> vector<18x18x16xf32>
    %128 = vector.extract_strided_slice %127 {offsets = [0, 0, 0], sizes = [16, 16, 16], strides = [1, 1, 1]} : vector<18x18x16xf32> to vector<16x16x16xf32>
    %129 = vector.shape_cast %128 : vector<16x16x16xf32> to vector<256x16xf32>
    %130 = vector.extract_strided_slice %127 {offsets = [0, 1, 0], sizes = [16, 16, 16], strides = [1, 1, 1]} : vector<18x18x16xf32> to vector<16x16x16xf32>
    %131 = vector.shape_cast %130 : vector<16x16x16xf32> to vector<256x16xf32>
    %132 = vector.extract_strided_slice %127 {offsets = [0, 2, 0], sizes = [16, 16, 16], strides = [1, 1, 1]} : vector<18x18x16xf32> to vector<16x16x16xf32>
    %133 = vector.shape_cast %132 : vector<16x16x16xf32> to vector<256x16xf32>
    %134 = vector.extract_strided_slice %127 {offsets = [1, 0, 0], sizes = [16, 16, 16], strides = [1, 1, 1]} : vector<18x18x16xf32> to vector<16x16x16xf32>
    %135 = vector.shape_cast %134 : vector<16x16x16xf32> to vector<256x16xf32>
    %136 = vector.extract_strided_slice %127 {offsets = [1, 1, 0], sizes = [16, 16, 16], strides = [1, 1, 1]} : vector<18x18x16xf32> to vector<16x16x16xf32>
    %137 = vector.shape_cast %136 : vector<16x16x16xf32> to vector<256x16xf32>
    %138 = vector.extract_strided_slice %127 {offsets = [1, 2, 0], sizes = [16, 16, 16], strides = [1, 1, 1]} : vector<18x18x16xf32> to vector<16x16x16xf32>
    %139 = vector.shape_cast %138 : vector<16x16x16xf32> to vector<256x16xf32>
    %140 = vector.extract_strided_slice %127 {offsets = [2, 0, 0], sizes = [16, 16, 16], strides = [1, 1, 1]} : vector<18x18x16xf32> to vector<16x16x16xf32>
    %141 = vector.shape_cast %140 : vector<16x16x16xf32> to vector<256x16xf32>
    %142 = vector.extract_strided_slice %127 {offsets = [2, 1, 0], sizes = [16, 16, 16], strides = [1, 1, 1]} : vector<18x18x16xf32> to vector<16x16x16xf32>
    %143 = vector.shape_cast %142 : vector<16x16x16xf32> to vector<256x16xf32>
    %144 = vector.extract_strided_slice %127 {offsets = [2, 2, 0], sizes = [16, 16, 16], strides = [1, 1, 1]} : vector<18x18x16xf32> to vector<16x16x16xf32>
    %145 = vector.shape_cast %144 : vector<16x16x16xf32> to vector<256x16xf32>
    %146 = tpu.concatenate %129, %131, %133, %135, %137, %139, %141, %143, %145 in 1 : vector<256x16xf32>, vector<256x16xf32>, vector<256x16xf32>, vector<256x16xf32>, vector<256x16xf32>, vector<256x16xf32>, vector<256x16xf32>, vector<256x16xf32>, vector<256x16xf32> -> vector<256x144xf32>
    %147 = arith.truncf %146 : vector<256x144xf32> to vector<256x144xbf16>
    %c0_39 = arith.constant 0 : index
    %c0_40 = arith.constant 0 : index
    %148 = vector.load %arg11[%c0_39, %c0_40] : memref<144x16xbf16, #tpu.memory_space<vmem>>, vector<144x16xbf16>
    %cst_41 = arith.constant dense<0.000000e+00> : vector<256x16xf32>
    %149 = tpu.matmul %147, %148, %cst_41 {dimension_numbers = #tpu.dot_dimension_numbers<[1], [0], [0], [1], [0, 0, 1, 1], [], []>} : vector<256x144xbf16>, vector<144x16xbf16>, vector<256x16xf32> -> vector<256x16xf32>
    %c0_42 = arith.constant 0 : index
    %c0_43 = arith.constant 0 : index
    %150 = vector.load %arg12[%c0_42, %c0_43] : memref<1x16xf32, #tpu.memory_space<vmem>>, vector<1x16xf32>
    %151 = vector.broadcast %150 : vector<1x16xf32> to vector<256x16xf32>
    %152 = arith.addf %149, %151 : vector<256x16xf32>
    %cst_44 = arith.constant 0.000000e+00 : f32
    %153 = vector.broadcast %cst_44 : f32 to vector<256x16xf32>
    %154 = arith.maximumf %152, %153 : vector<256x16xf32>
    %155 = arith.addf %122, %154 : vector<256x16xf32>
    %156 = vector.shape_cast %155 : vector<256x16xf32> to vector<16x16x16xf32>
    %cst_45 = arith.constant 0.000000e+00 : f32
    %157 = vector.broadcast %cst_45 : f32 to vector<16x1x16xf32>
    %cst_46 = arith.constant 0.000000e+00 : f32
    %158 = vector.broadcast %cst_46 : f32 to vector<1x18x16xf32>
    %159 = tpu.concatenate %157, %156, %157 in 1 : vector<16x1x16xf32>, vector<16x16x16xf32>, vector<16x1x16xf32> -> vector<16x18x16xf32>
    %160 = tpu.concatenate %158, %159, %158 in 0 : vector<1x18x16xf32>, vector<16x18x16xf32>, vector<1x18x16xf32> -> vector<18x18x16xf32>
    %161 = vector.extract_strided_slice %160 {offsets = [0, 0, 0], sizes = [16, 16, 16], strides = [1, 1, 1]} : vector<18x18x16xf32> to vector<16x16x16xf32>
    %162 = vector.shape_cast %161 : vector<16x16x16xf32> to vector<256x16xf32>
    %163 = vector.extract_strided_slice %160 {offsets = [0, 1, 0], sizes = [16, 16, 16], strides = [1, 1, 1]} : vector<18x18x16xf32> to vector<16x16x16xf32>
    %164 = vector.shape_cast %163 : vector<16x16x16xf32> to vector<256x16xf32>
    %165 = vector.extract_strided_slice %160 {offsets = [0, 2, 0], sizes = [16, 16, 16], strides = [1, 1, 1]} : vector<18x18x16xf32> to vector<16x16x16xf32>
    %166 = vector.shape_cast %165 : vector<16x16x16xf32> to vector<256x16xf32>
    %167 = vector.extract_strided_slice %160 {offsets = [1, 0, 0], sizes = [16, 16, 16], strides = [1, 1, 1]} : vector<18x18x16xf32> to vector<16x16x16xf32>
    %168 = vector.shape_cast %167 : vector<16x16x16xf32> to vector<256x16xf32>
    %169 = vector.extract_strided_slice %160 {offsets = [1, 1, 0], sizes = [16, 16, 16], strides = [1, 1, 1]} : vector<18x18x16xf32> to vector<16x16x16xf32>
    %170 = vector.shape_cast %169 : vector<16x16x16xf32> to vector<256x16xf32>
    %171 = vector.extract_strided_slice %160 {offsets = [1, 2, 0], sizes = [16, 16, 16], strides = [1, 1, 1]} : vector<18x18x16xf32> to vector<16x16x16xf32>
    %172 = vector.shape_cast %171 : vector<16x16x16xf32> to vector<256x16xf32>
    %173 = vector.extract_strided_slice %160 {offsets = [2, 0, 0], sizes = [16, 16, 16], strides = [1, 1, 1]} : vector<18x18x16xf32> to vector<16x16x16xf32>
    %174 = vector.shape_cast %173 : vector<16x16x16xf32> to vector<256x16xf32>
    %175 = vector.extract_strided_slice %160 {offsets = [2, 1, 0], sizes = [16, 16, 16], strides = [1, 1, 1]} : vector<18x18x16xf32> to vector<16x16x16xf32>
    %176 = vector.shape_cast %175 : vector<16x16x16xf32> to vector<256x16xf32>
    %177 = vector.extract_strided_slice %160 {offsets = [2, 2, 0], sizes = [16, 16, 16], strides = [1, 1, 1]} : vector<18x18x16xf32> to vector<16x16x16xf32>
    %178 = vector.shape_cast %177 : vector<16x16x16xf32> to vector<256x16xf32>
    %179 = tpu.concatenate %162, %164, %166, %168, %170, %172, %174, %176, %178 in 1 : vector<256x16xf32>, vector<256x16xf32>, vector<256x16xf32>, vector<256x16xf32>, vector<256x16xf32>, vector<256x16xf32>, vector<256x16xf32>, vector<256x16xf32>, vector<256x16xf32> -> vector<256x144xf32>
    %180 = arith.truncf %179 : vector<256x144xf32> to vector<256x144xbf16>
    %c0_47 = arith.constant 0 : index
    %c0_48 = arith.constant 0 : index
    %181 = vector.load %arg13[%c0_47, %c0_48] : memref<144x64xbf16, #tpu.memory_space<vmem>>, vector<144x64xbf16>
    %cst_49 = arith.constant dense<0.000000e+00> : vector<256x64xf32>
    %182 = tpu.matmul %180, %181, %cst_49 {dimension_numbers = #tpu.dot_dimension_numbers<[1], [0], [0], [1], [0, 0, 1, 1], [], []>} : vector<256x144xbf16>, vector<144x64xbf16>, vector<256x64xf32> -> vector<256x64xf32>
    %c0_50 = arith.constant 0 : index
    %c0_51 = arith.constant 0 : index
    %183 = vector.load %arg14[%c0_50, %c0_51] : memref<1x64xf32, #tpu.memory_space<vmem>>, vector<1x64xf32>
    %184 = vector.broadcast %183 : vector<1x64xf32> to vector<256x64xf32>
    %185 = arith.addf %182, %184 : vector<256x64xf32>
    %cst_52 = arith.constant 0.000000e+00 : f32
    %186 = vector.broadcast %cst_52 : f32 to vector<256x64xf32>
    %187 = arith.maximumf %185, %186 : vector<256x64xf32>
    %cst_53 = arith.constant dense<0.000000e+00> : vector<64xf32>
    %188 = vector.multi_reduction <add>, %1, %cst_53 [0] : vector<256x64xf32> to vector<64xf32>
    %189 = vector.shape_cast %188 : vector<64xf32> to vector<1x64xf32>
    %cst_54 = arith.constant 2.560000e+02 : f32
    %190 = vector.broadcast %cst_54 : f32 to vector<1x64xf32>
    %191 = arith.divf %189, %190 : vector<1x64xf32>
    %c0_55 = arith.constant 0 : index
    %c0_56 = arith.constant 0 : index
    %192 = vector.load %arg15[%c0_55, %c0_56] : memref<1x64xf32, #tpu.memory_space<vmem>>, vector<1x64xf32>
    %193 = arith.mulf %191, %192 : vector<1x64xf32>
    %c0_57 = arith.constant 0 : index
    %c0_58 = arith.constant 0 : index
    %194 = vector.load %arg16[%c0_57, %c0_58] : memref<1x64xf32, #tpu.memory_space<vmem>>, vector<1x64xf32>
    %195 = arith.addf %193, %194 : vector<1x64xf32>
    %cst_59 = arith.constant dense<0.000000e+00> : vector<64xf32>
    %196 = vector.multi_reduction <add>, %187, %cst_59 [0] : vector<256x64xf32> to vector<64xf32>
    %197 = vector.shape_cast %196 : vector<64xf32> to vector<1x64xf32>
    %cst_60 = arith.constant 2.560000e+02 : f32
    %198 = vector.broadcast %cst_60 : f32 to vector<1x64xf32>
    %199 = arith.divf %197, %198 : vector<1x64xf32>
    %c0_61 = arith.constant 0 : index
    %c0_62 = arith.constant 0 : index
    %200 = vector.load %arg17[%c0_61, %c0_62] : memref<1x64xf32, #tpu.memory_space<vmem>>, vector<1x64xf32>
    %201 = arith.mulf %199, %200 : vector<1x64xf32>
    %c0_63 = arith.constant 0 : index
    %c0_64 = arith.constant 0 : index
    %202 = vector.load %arg18[%c0_63, %c0_64] : memref<1x64xf32, #tpu.memory_space<vmem>>, vector<1x64xf32>
    %203 = arith.addf %201, %202 : vector<1x64xf32>
    %204 = tpu.concatenate %195, %203 in 1 : vector<1x64xf32>, vector<1x64xf32> -> vector<1x128xf32>
    %c0_65 = arith.constant 0 : index
    %c0_66 = arith.constant 0 : index
    %c0_67 = arith.constant 0 : index
    %205 = vector.load %arg19[%c0_65, %c0_66, %c0_67] : memref<1x1x128xf32, #tpu.memory_space<vmem>>, vector<1x1x128xf32>
    %206 = vector.shape_cast %205 : vector<1x1x128xf32> to vector<1x128xf32>
    %207 = vector.shape_cast %204 : vector<1x128xf32> to vector<1x1x128xf32>
    tpu.vector_store %arg19[%c0_65, %c0_66, %c0_67], %207 {strides = array<i32>} : memref<1x1x128xf32, #tpu.memory_space<vmem>>, vector<1x1x128xf32>,
    return
  }
  func.func @transform_0(%arg0: i32) -> i32 {
    %c0_i32 = arith.constant 0 : i32
    %c0_i32_0 = arith.constant 0 : i32
    return %c0_i32 : i32
  }
  func.func @transform_1(%arg0: i32) -> (i32, i32, i32) {
    %c0_i32 = arith.constant 0 : i32
    %c0_i32_0 = arith.constant 0 : i32
    %c0_i32_1 = arith.constant 0 : i32
    return %arg0, %c0_i32, %c0_i32_0 : i32, i32, i32
  }
  func.func @transform_2(%arg0: i32) -> (i32, i32) {
    %c0_i32 = arith.constant 0 : i32
    %c0_i32_0 = arith.constant 0 : i32
    %c0_i32_1 = arith.constant 0 : i32
    return %c0_i32, %c0_i32_0 : i32, i32
  }
  func.func @transform_3(%arg0: i32) -> (i32, i32) {
    %c0_i32 = arith.constant 0 : i32
    %c0_i32_0 = arith.constant 0 : i32
    %c0_i32_1 = arith.constant 0 : i32
    return %c0_i32, %c0_i32_0 : i32, i32
  }
  func.func @transform_4(%arg0: i32) -> (i32, i32) {
    %c0_i32 = arith.constant 0 : i32
    %c0_i32_0 = arith.constant 0 : i32
    %c0_i32_1 = arith.constant 0 : i32
    return %c0_i32, %c0_i32_0 : i32, i32
  }
  func.func @transform_5(%arg0: i32) -> (i32, i32) {
    %c0_i32 = arith.constant 0 : i32
    %c0_i32_0 = arith.constant 0 : i32
    %c0_i32_1 = arith.constant 0 : i32
    return %c0_i32, %c0_i32_0 : i32, i32
  }
  func.func @transform_6(%arg0: i32) -> (i32, i32) {
    %c0_i32 = arith.constant 0 : i32
    %c0_i32_0 = arith.constant 0 : i32
    %c0_i32_1 = arith.constant 0 : i32
    return %c0_i32, %c0_i32_0 : i32, i32
  }
  func.func @transform_7(%arg0: i32) -> (i32, i32) {
    %c0_i32 = arith.constant 0 : i32
    %c0_i32_0 = arith.constant 0 : i32
    %c0_i32_1 = arith.constant 0 : i32
    return %c0_i32, %c0_i32_0 : i32, i32
  }
  func.func @transform_8(%arg0: i32) -> (i32, i32) {
    %c0_i32 = arith.constant 0 : i32
    %c0_i32_0 = arith.constant 0 : i32
    %c0_i32_1 = arith.constant 0 : i32
    return %c0_i32, %c0_i32_0 : i32, i32
  }
  func.func @transform_9(%arg0: i32) -> (i32, i32) {
    %c0_i32 = arith.constant 0 : i32
    %c0_i32_0 = arith.constant 0 : i32
    %c0_i32_1 = arith.constant 0 : i32
    return %c0_i32, %c0_i32_0 : i32, i32
  }
  func.func @transform_10(%arg0: i32) -> (i32, i32) {
    %c0_i32 = arith.constant 0 : i32
    %c0_i32_0 = arith.constant 0 : i32
    %c0_i32_1 = arith.constant 0 : i32
    return %c0_i32, %c0_i32_0 : i32, i32
  }
  func.func @transform_11(%arg0: i32) -> (i32, i32) {
    %c0_i32 = arith.constant 0 : i32
    %c0_i32_0 = arith.constant 0 : i32
    %c0_i32_1 = arith.constant 0 : i32
    return %c0_i32, %c0_i32_0 : i32, i32
  }
  func.func @transform_12(%arg0: i32) -> (i32, i32) {
    %c0_i32 = arith.constant 0 : i32
    %c0_i32_0 = arith.constant 0 : i32
    %c0_i32_1 = arith.constant 0 : i32
    return %c0_i32, %c0_i32_0 : i32, i32
  }
  func.func @transform_13(%arg0: i32) -> (i32, i32) {
    %c0_i32 = arith.constant 0 : i32
    %c0_i32_0 = arith.constant 0 : i32
    %c0_i32_1 = arith.constant 0 : i32
    return %c0_i32, %c0_i32_0 : i32, i32
  }
  func.func @transform_14(%arg0: i32) -> (i32, i32) {
    %c0_i32 = arith.constant 0 : i32
    %c0_i32_0 = arith.constant 0 : i32
    %c0_i32_1 = arith.constant 0 : i32
    return %c0_i32, %c0_i32_0 : i32, i32
  }
  func.func @transform_15(%arg0: i32) -> (i32, i32) {
    %c0_i32 = arith.constant 0 : i32
    %c0_i32_0 = arith.constant 0 : i32
    %c0_i32_1 = arith.constant 0 : i32
    return %c0_i32, %c0_i32_0 : i32, i32
  }
  func.func @transform_16(%arg0: i32) -> (i32, i32) {
    %c0_i32 = arith.constant 0 : i32
    %c0_i32_0 = arith.constant 0 : i32
    %c0_i32_1 = arith.constant 0 : i32
    return %c0_i32, %c0_i32_0 : i32, i32
  }
  func.func @transform_17(%arg0: i32) -> (i32, i32) {
    %c0_i32 = arith.constant 0 : i32
    %c0_i32_0 = arith.constant 0 : i32
    %c0_i32_1 = arith.constant 0 : i32
    return %c0_i32, %c0_i32_0 : i32, i32
  }
  func.func @transform_18(%arg0: i32) -> (i32, i32, i32) {
    %c0_i32 = arith.constant 0 : i32
    %c0_i32_0 = arith.constant 0 : i32
    %c0_i32_1 = arith.constant 0 : i32
    return %arg0, %c0_i32, %c0_i32_0 : i32, i32, i32
  }
}

</mosaic_0001>

<bundles_post_ra>
// kernel: baseline_forward.1
= control target key start
LH: loop header
LB: loop body
LE: loop exit
PB: predicated region body
PF: predicated region fallthrough
CT: control target
= control target key end

     0   :  { %s20299_s0 = inlined_call_operand.vmem [shape: f32[2], index: 0, kind: input, shape index: {}]   ;;  %s20300_s1 = inlined_call_operand.vmem [shape: f32[2,256,64], index: 1, kind: input, shape index: {}]   ;;  %s20301_s2 = inlined_call_operand.vmem [shape: bf16[576,32], index: 2, kind: input, shape index: {}]   ;;  %s20302_s3 = inlined_call_operand.vmem [shape: f32[1,32], index: 3, kind: input, shape index: {}]   ;;  %s20303_s4 = inlined_call_operand.vmem [shape: bf16[16,4], index: 4, kind: input, shape index: {}]   ;;  %s20304_s5 = inlined_call_operand.vmem [shape: f32[1,4], index: 5, kind: input, shape index: {}]   ;;  %s20305_s6 = inlined_call_operand.vmem [shape: bf16[16,16], index: 6, kind: input, shape index: {}]   ;;  %s20306_s7 = inlined_call_operand.vmem [shape: f32[1,16], index: 7, kind: input, shape index: {}]   ;;  %s20307_s8 = inlined_call_operand.vmem [shape: bf16[144,16], index: 8, kind: input, shape index: {}]   ;;  %s20308_s9 = inlined_call_operand.vmem [shape: f32[1,16], index: 9, kind: input, shape index: {}]   ;;  %s20309_s10 = inlined_call_operand.vmem [shape: bf16[144,16], index: 10, kind: input, shape index: {}]   ;;  %s20310_s11 = inlined_call_operand.vmem [shape: f32[1,16], index: 11, kind: input, shape index: {}]   ;;  %s20311_s12 = inlined_call_operand.vmem [shape: bf16[144,64], index: 12, kind: input, shape index: {}]   ;;  %s20312_s13 = inlined_call_operand.vmem [shape: f32[1,64], index: 13, kind: input, shape index: {}]   ;;  %s20313_s14 = inlined_call_operand.vmem [shape: f32[1,64], index: 14, kind: input, shape index: {}]   ;;  %s20314_s15 = inlined_call_operand.vmem [shape: f32[1,64], index: 15, kind: input, shape index: {}]   ;;  %s20315_s16 = inlined_call_operand.vmem [shape: f32[1,64], index: 16, kind: input, shape index: {}]   ;;  %s20316_s17 = inlined_call_operand.vmem [shape: f32[1,64], index: 17, kind: input, shape index: {}]   ;;  %s20317_s18 = inlined_call_operand.hbm [shape: f32[2,1,128], index: 18, kind: output, shape index: {}]  }
   0x1   :  { %20660 = sst [smem:[#allocation115_spill]] %s20299_s0 }
   0x2   :  { %20661 = sst [smem:[#allocation116_spill]] %s20300_s1 }
   0x3   :  { %20662 = sst [smem:[#allocation117_spill]] %s20301_s2 }
   0x4   :  { %20663 = sst [smem:[#allocation118_spill]] %s20302_s3 }
   0x5   :  { %20664 = sst [smem:[#allocation119_spill]] %s20317_s18 }
   0x6   :  { %23 = vsyncpa [#allocation4], 0 }
   0x7   :  { %24 = vsyncpa [#allocation3], 0 }
   0x8   :  { %26 = vsyncpa [#allocation3 + $0x1], 0  ;;  %s12779_s27 = smov 0   ;;  %s12781_s28 = smov 0  }
   0x9   :  { %s12783_s29 = smov 0   ;;  %s12785_s30 = smov 0  }
   0xa LB: > { %20665 = sst [smem:[#allocation8_spill]] %s12658_s27  ;;  %s12800_s0 = sadd.s32 4294967295, %s12670_s30   ;;  %s12670_s30 = sphi %s12785_s30, %s21488_s30   ;;  %s12666_s29 = sphi %s12783_s29, %s21490_s29   ;;  %s12662_s28 = sphi %s12781_s28, %s21492_s28   ;;  %s12658_s27 = sphi %s12779_s27, %s21491_s27  }
   0xb   : > { %20666 = sst [smem:[#allocation9_spill]] %s12666_s29  ;;  %s9536_s19 = sadd.s32 4294967294, %s12670_s30  }
   0xc   : > { %20667 = sst [smem:[#allocation10_spill]] %s12670_s30  ;;  %s12804_s1 = sadd.s32 1, %s12670_s30  }
   0xd   : > { %20668 = sst [smem:[#allocation11_spill]] %s12804_s1  ;;  %s422_s20 = sadd.s32 1, %s12666_s29 }
   0xe   : > { %s419_s21 = ssub.s32 %s12670_s30, %s12804_s1  ;;  %p432_p0 = scmp.ne.s32.totalorder %s12666_s29, %s12662_s28 }
   0xf   : > { %p420_p1 = scmp.eq.s32.totalorder %s419_s21, 0  ;;  %p433_p2 = scmp.eq.s32.totalorder %s12800_s0, 1 }
  0x10   : > { %p438_p3 = scmp.ne.s32.totalorder %s12662_s28, %s12658_s27  ;;  %p439_p4 = scmp.eq.s32.totalorder %s9536_s19, 1 }
  0x11   : > { %s12815_s22 = scalar_select %p420_p1, %s12666_s29, %s422_s20  }
  0x12   : > { %p12817_p5 = por %p433_p2, %p432_p0  ;;  %p12821_p6 = por %p439_p4, %p438_p3 }
  0x13   : > { %20669 = sst [smem:[#allocation12_spill]] %s12815_s22  ;;  %p9537_p7 = scmp.ge.s32.totalorder %s12670_s30, 1 }
  0x14   : > { %s20671_s23 = scalar_select %p12821_p6, 1, 0 }
  0x15   : > { %p446_p8 = scmp.lt.s32.totalorder %s12670_s30, 3  ;;  %p10416_p9 = scmp.eq.s32.totalorder %s12800_s0, 0 }
  0x16   : > { %20672 = sst [smem:[#allocation13_spill]] %s20671_s23 }
  0x17   : > { %p12828_p10 = pnand %p9537_p7, %p446_p8  ;;  %s20674_s19 = sld [smem:[#allocation115_spill]] }
  0x19   : > { %p10408_p11 = pneg %p12828_p10 }
  0x1b   : > { %p10409_p12 = pnand %p10416_p9, %p10408_p11 }
  0x1d   : > { %s459_s20 = sshll.u32 %s20674_s19, 4  ;;  %p12593_p0 = pneg %p10409_p12  ;;  %s460_s20 = int_to_ptr.vmem [resolvable:$true] %s459_s20 }
  0x1e   : > { %s12591_s21 = scalar_lea.vmem %s460_s20, 16  ;;  %p12599_p3 = scmp.lt.s32.totalorder %s460_s20, %s460_s20 }
  0x1f   : > { %p12592_p13 = scmp.ne.s32.totalorder %s460_s20, %s12591_s21  ;;  %p12600_p4 = scmp.lt.s32.totalorder %s12591_s21, %s12591_s21 }
  0x21   : > { %p12594_p1 = pnand %p12593_p0, %p12592_p13  ;;  %p12601_p7 = por %p12600_p4, %p12599_p3 }
  0x23   : > { %p12595_p2 = pneg %p12594_p1 }
  0x25   : > { %p12602_p8 = pnand %p12601_p7, %p12595_p2 }
  0x27   : > { %12605 = shalt.err (!%p12602_p8)
}
  0x28   : > { %s12672_s22 = smov [#allocation2]   ;;  %528 = sbr.rel (%p12828_p10) target bundleno = 3222 (0xc96), region = 92 }
  0x29   : > { %10411 = dma.vmem_to_smem (!%p10409_p12), %s460_s20, 16, %s12672_s22, [#allocation4]  }
  0x2d   : > { %12649 = dma.done.wait (%p10416_p9), [#allocation4], 16  }
  0x2e   : > { %12651 = vsyncadd (%p10416_p9), [#allocation4], 4294967280 }
  0x2f   : > { %534 = sfence }
  0x30   : > { %p582_p11 = scmp.lt.s32.totalorder %s12800_s0, 1  ;;  %s20675_s21 = sld [smem:[#allocation117_spill]]  ;;  %vm652_vm0 = vcmask 1040384   ;;  %vm1336_vm1 = vcmask 523264   ;;  %vm812_vm2 = vcmask 1046528   ;;  %v20326_v29 = vmov 0.0  }
  0x31   : > { %s20676_s30 = sld [smem:[#allocation116_spill]]  ;;  %v12922_v30 = vrot.slane %v20326_v29, 1  ;;  %s12674_s27 = smov 64   ;;  %vm890_vm3 = vcmask 1045504   ;;  %vm13808_vm4 = vmneg %vm1336_vm1  ;;  %vm2388_vm6 = vcmask 130048   ;;  %vm2838_vm7 = vcmask 15360  }
  0x32   : > { %s583_s25 = scalar_select %p582_p11, %s12800_s0, 1  ;;  %vm9583_vm5 = vmpackc.low %vm13808_vm4, %vm13808_vm4  ;;  %vm5529_vm8 = vcmask 261120   ;;  %vm5561_vm9 = vcmask 392192   ;;  %vm5626_vm10 = vcmask 654336   ;;  %vm5659_vm11 = vcmask 785408  }
  0x33   : > { %20677 = vst [vmem:[#allocation14_spill] sm:$0xff] %v12922_v30  ;;  %s20834_s3 = sld [smem:[#allocation118_spill]]  ;;  %s12675_s26 = smov 126   ;;  %vm5692_vm12 = vcmask 916480  }
  0x34   : > { %s9757_s24 = sshll.u32 %s583_s25, 8  ;;  %s12678_s1 = smov 48  }
  0x35   : > { %s12679_s19 = smov 16   ;;  %s12680_s20 = smov 32  }
  0x36   : > { %v12322_v0 = vld [vmem:[%s20675_s21 + $0x78] sm:$0xff]   ;;  %v12324_v2 = vld [vmem:[%s20675_s21 + $0x70] sm:$0xff]   ;;  %s12681_s25 = smov 80   ;;  %s12682_s22 = smov 96  }
  0x37   : > { %v12323_v1 = vld [vmem:[%s20675_s21 + $0x38] sm:$0xff]   ;;  %10377 = vmatprep.subr.bf16.mxu1 %v12322_v0  ;;  %9758 = vmatprep.subr.bf16.mxu0 %v12322_v0  ;;  %s12859_s18 = scalar_lea.vmem %s20676_s30, %s9757_s24  ;;  %v12325_v3 = vld [vmem:[%s20675_s21 + $0x30] sm:$0xff]   ;;  %v12326_v0 = vld [vmem:[%s20675_s21 + $0x68] sm:$0xff]   ;;  %s12676_s30 = smov 112  }
  0x38   : > { %10385 = vmatpush3.bf16.msra.mxu1 %v12323_v1  ;;  %9759 = vmatpush3.bf16.msra.mxu0 %v12323_v1  ;;  %v606_v4 = vld [vmem:[%s12859_s18 + $0x90] sm:$0xff]  ;;  %v12866_v5 = vld [vmem:[%s12859_s18 + $0x98] sm:$0xff]  ;;  %v12870_v8 = vld [vmem:[%s12859_s18] sm:$0xff]  ;;  %s9675_s24 = sld [smem:[#allocation2 + $0x1]]  ;;  %s580_s29 = sand.u32 1, %s12662_s28  }
  0x39   : > { %10378 = vmatprep.subr.bf16.mxu1 %v12324_v2  ;;  %9760 = vmatprep.subr.bf16.mxu0 %v12324_v2  ;;  %v680_v6 = vrot.slane %v606_v4, 7  ;;  %v681_v7 = vrot.slane %v12866_v5, 7  ;;  %v12873_v9 = vld [vmem:[%s12859_s18 + $0x8] sm:$0xff]  ;;  %v12876_v10 = vld [vmem:[%s12859_s18 + $0x10] sm:$0xff]  ;;  %v9301_v11 = vsel %vm1336_vm1, %v12870_v8, 0.0  ;;  %v12891_v16 = vld [vmem:[%s12859_s18 + $0x18] sm:$0xff] }
  0x3a   : > { %v9302_v12 = vsel %vm1336_vm1, %v12873_v9, 0.0  ;;  %v9304_v13 = vsel %vm1336_vm1, %v12876_v10, 0.0  ;;  %v12894_v17 = vld [vmem:[%s12859_s18 + $0x20] sm:$0xff]  ;;  %v12899_v20 = vld [vmem:[%s12859_s18 + $0x28] sm:$0xff]  ;;  %v12902_v21 = vld [vmem:[%s12859_s18 + $0x30] sm:$0xff]  ;;  %v9306_v23 = vsel %vm1336_vm1, %v12891_v16, 0.0 }
  0x3b   : > { %v12885_v14 = vsel %vm652_vm0, %v680_v6, %v681_v7  ;;  %v12888_v15 = vsel %vm652_vm0, 0.0, %v680_v6  ;;  %v9303_v18 = vadd.f32 %v9302_v12, %v9301_v11  ;;  %v12905_v22 = vld [vmem:[%s12859_s18 + $0x38] sm:$0xff]  ;;  %v12910_v24 = vsel %vm1336_vm1, %v606_v4, 0.0  ;;  %v12913_v25 = vld [vmem:[%s12859_s18 + $0x40] sm:$0xff]  ;;  %v12916_v26 = vld [vmem:[%s12859_s18 + $0x48] sm:$0xff]  ;;  %s581_s23 = scalar_lea.vmem [#allocation5], %s580_s29 }
  0x3c   : > { %10386 = vmatpush3.bf16.msra.mxu1 %v12325_v3  ;;  %9761 = vmatpush3.bf16.msra.mxu0 %v12325_v3  ;;  %v10462_v19 = vpack.i.bf16 %v12885_v14, %v12888_v15  ;;  %v12919_v27 = vld [vmem:[%s12859_s18 + $0x50] sm:$0xff]  ;;  %v12926_v31 = vsel %vm1336_vm1, %v12866_v5, 0.0  ;;  %v12930_v32 = vld [vmem:[%s12859_s18 + $0x58] sm:$0xff]  ;;  %v12933_v33 = vld [vmem:[%s12859_s18 + $0x60] sm:$0xff]  ;;  %v9308_v35 = vsel %vm1336_vm1, %v12894_v17, 0.0  ;;  %v9310_v36 = vsel %vm1336_vm1, %v12899_v20, 0.0 }
  0x3d   : > { %v9305_v28 = vadd.f32 %v9304_v13, %v9303_v18  ;;  %v12936_v34 = vld [vmem:[%s12859_s18 + $0x80] sm:$0xff]  ;;  %v12943_v37 = vld [vmem:[%s12859_s18 + $0x88] sm:$0xff]  ;;  %v9312_v39 = vsel %vm1336_vm1, %v12902_v21, 0.0  ;;  %v9314_v40 = vsel %vm1336_vm1, %v12905_v22, 0.0  ;;  %v9316_v41 = vsel %vm1336_vm1, %v12913_v25, 0.0  ;;  %v12975_v49 = vld [vmem:[%s12859_s18 + $0x70] sm:$0xff]  ;;  %10379 = vmatprep.subr.bf16.mxu1 %v12326_v0  ;;  %9762 = vmatprep.subr.bf16.mxu0 %v12326_v0 }
  0x3e   : > { %10463 = vrot.lane.b32.xlu0 %v10462_v19, %s12674_s27  ;;  %v12952_v42 = vld [vmem:[%s12859_s18 + $0xa0] sm:$0xff]  ;;  %v12955_v43 = vld [vmem:[%s12859_s18 + $0xa8] sm:$0xff]  ;;  %v9318_v45 = vsel %vm1336_vm1, %v12916_v26, 0.0  ;;  %v12964_v46 = vsel %vm1336_vm1, %v12919_v27, 0.0  ;;  %v12968_v47 = vsel %vm1336_vm1, %v12930_v32, 0.0  ;;  %v12972_v48 = vsel %vm1336_vm1, %v12933_v33, 0.0 }
  0x3f   : > { %v9307_v38 = vadd.f32 %v9306_v23, %v9305_v28  ;;  %v12958_v44 = vld [vmem:[%s12859_s18 + $0x68] sm:$0xff]  ;;  %v12978_v50 = vld [vmem:[%s12859_s18 + $0x78] sm:$0xff]  ;;  %v683_v53 = vrot.slane %v12952_v42, 7  ;;  %v684_v54 = vrot.slane %v12955_v43, 7  ;;  %v12988_v55 = vsel %vm1336_vm1, %v12975_v49, 0.0  ;;  %v13006_v63 = vld [vmem:[%s12859_s18 + $0xb0] sm:$0xff] }
  0x40   : > { %v12982_v52 = vsel %vm1336_vm1, %v12958_v44, 0.0  ;;  %v12992_v56 = vsel %vm1336_vm1, %v12978_v50, 0.0  ;;  %v677_v57 = vrot.slane %v12936_v34, 7  ;;  %v678_v58 = vrot.slane %v12943_v37, 7  ;;  %v13018_v4 = vld [vmem:[%s12859_s18 + $0xb8] sm:$0xff]  ;;  %v12327_v12 = vld [vmem:[%s20675_s21 + $0x28] sm:$0xff]  }
  0x41   : > { %v9309_v51 = vadd.f32 %v9308_v35, %v9307_v38  ;;  %v12997_v60 = vsel %vm652_vm0, %v683_v53, %v684_v54  ;;  %v13000_v61 = vsel %vm652_vm0, 0.0, %v683_v53  ;;  %v13003_v62 = vsel %vm652_vm0, %v681_v7, 0.0  ;;  %v13038_v38 = vld [vmem:[%s12859_s18 + $0xc0] sm:$0xff]  ;;  %10387 = vmatpush3.bf16.msra.mxu1 %v12327_v12  ;;  %9763 = vmatpush3.bf16.msra.mxu0 %v12327_v12 }
  0x42   : > { %v10472_v1 = vpack.i.bf16 %v12997_v60, %v13000_v61  ;;  %v13014_v2 = vsel %vm652_vm0, %v677_v57, %v678_v58  ;;  %v860_v3 = vrot.slane %v12888_v15, 1  ;;  %v13021_v6 = vsel %vm652_vm0, 0.0, %v677_v57 }
  0x43   : > { %v9311_v59 = vadd.f32 %v9310_v36, %v9309_v51  ;;  %v13024_v7 = vsel %vm652_vm0, %v678_v58, 0.0  ;;  %v856_v11 = vrot.slane %v13014_v2, 1  ;;  %v855_v13 = vrot.slane %v13021_v6, 1  ;;  %v12328_v51 = vld [vmem:[%s20675_s21 + $0x60] sm:$0xff]  }
  0x44   : > { %10473 = vrot.lane.b32.xlu1 %v10472_v1, %s12674_s27  ;;  %v858_v18 = vrot.slane %v13024_v7, 1  ;;  %v861_v19 = vrot.slane %v12885_v14, 1  ;;  %v863_v23 = vrot.slane %v13003_v62, 1  ;;  %v686_v35 = vrot.slane %v13006_v63, 7  ;;  %10380 = vmatprep.subr.bf16.mxu1 %v12328_v51 }
  0x45   : > { %v9313_v5 = vadd.f32 %v9312_v39, %v9311_v59  ;;  %v687_v36 = vrot.slane %v13018_v4, 7  ;;  %v13041_v39 = vld [vmem:[%s12859_s18 + $0xc8] sm:$0xff]  ;;  %v13047_v53 = vsel %vm812_vm2, %v855_v13, %v856_v11  ;;  %v12329_v59 = vld [vmem:[%s20675_s21 + $0x20] sm:$0xff]   ;;  %v13073_v12 = vsel %vm1336_vm1, %v12936_v34, 0.0  ;;  %9764 = vmatprep.subr.bf16.mxu0 %v12328_v51  ;;  %v12331_v51 = vld [vmem:[%s20675_s21 + $0x18] sm:$0xff]  }
  0x46   : > { %20678 = vst [vmem:[#allocation15_spill] sm:$0xff] %v13047_v53  ;;  %v13050_v57 = vsel %vm812_vm2, %v856_v11, %v858_v18  ;;  %v13056_v58 = vsel %vm812_vm2, %v861_v19, %v863_v23  ;;  %v13080_v13 = vsel %vm652_vm0, 0.0, %v686_v35  ;;  %v13083_v18 = vsel %vm652_vm0, %v684_v54, 0.0  ;;  %10388 = vmatpush3.bf16.msra.mxu1 %v12329_v59  ;;  %9765 = vmatpush3.bf16.msra.mxu0 %v12329_v59  ;;  %v12332_v59 = vld [vmem:[%s20675_s21 + $0x50] sm:$0xff]  }
  0x47   : > { %v9315_v28 = vadd.f32 %v9314_v40, %v9313_v5  ;;  %20679 = vst [vmem:[#allocation16_spill] sm:$0xff] %v13050_v57  ;;  %v13053_v40 = vsel %vm812_vm2, %v860_v3, %v861_v19  ;;  %20681 = vst [vmem:[#allocation18_spill] sm:$0xff] %v13056_v58  ;;  %v10467_v1 = vpack.i.bf16 %v13050_v57, %v13047_v53  ;;  %v12330_v3 = vld [vmem:[%s20675_s21 + $0x58] sm:$0xff]   ;;  %v865_v23 = vrot.slane %v13000_v61, 1  ;;  %v12334_v57 = vld [vmem:[%s20675_s21 + $0x48] sm:$0xff]  }
  0x48   : > { %20680 = vst [vmem:[#allocation17_spill] sm:$0xff] %v13053_v40  ;;  %v10477_v5 = vpack.i.bf16 %v13056_v58, %v13053_v40  ;;  %v13066_v11 = vsel %vm652_vm0, %v686_v35, %v687_v36  ;;  %v868_v35 = vrot.slane %v13083_v18, 1  ;;  %v689_v54 = vrot.slane %v13038_v38, 7  ;;  %v13113_v58 = vld [vmem:[%s12859_s18 + $0xd8] sm:$0xff]  ;;  %10381 = vmatprep.subr.bf16.mxu1 %v12330_v3  ;;  %9766 = vmatprep.subr.bf16.mxu0 %v12330_v3 }
  0x49   : > { %v9317_v0 = vadd.f32 %v9316_v41, %v9315_v28  ;;  %20682 = vst [vmem:[#allocation19_spill] sm:$0xff] %v13066_v11  ;;  %v13077_v41 = vsel %vm1336_vm1, %v12943_v37, 0.0  ;;  %10468 = vrot.lane.b32.xlu0 %v10467_v1, %s12674_s27  ;;  %v10482_v34 = vpack.i.bf16 %v13066_v11, %v13080_v13  ;;  %v866_v37 = vrot.slane %v12997_v60, 1  ;;  %v13092_v28 = vld [vmem:[%s12859_s18 + $0xd0] sm:$0xff] }
  0x4a   : > { %10478 = vrot.lane.b32.xlu1 %v10477_v5, %s12674_s27  ;;  %v13103_v1 = vsel %vm1336_vm1, %v12952_v42, 0.0  ;;  %v13107_v5 = vsel %vm1336_vm1, %v12955_v43, 0.0  ;;  %v13125_v43 = vsel %vm652_vm0, 0.0, %v689_v54  ;;  %10389 = vmatpush3.bf16.msra.mxu1 %v12331_v51 }
  0x4b   : > { %v9319_v19 = vadd.f32 %v9318_v45, %v9317_v0  ;;  %v690_v45 = vrot.slane %v13041_v39, 7  ;;  %v13110_v29 = vsel %vm812_vm2, %v865_v23, %v866_v37  ;;  %20686 = vst [vmem:[#allocation23_spill] sm:$0xff] %v13125_v43  ;;  %9767 = vmatpush3.bf16.msra.mxu0 %v12331_v51  ;;  %10382 = vmatprep.subr.bf16.mxu1 %v12332_v59 }
  0x4c   : > { %20683 = vst [vmem:[#allocation20_spill] sm:$0xff] %v13110_v29  ;;  %9768 = vmatprep.subr.bf16.mxu0 %v12332_v59 }
  0x4d   : > { %v9321_v0 = vadd.f32 %v12964_v46, %v9319_v19  ;;  %v13119_v46 = vsel %vm812_vm2, %v866_v37, %v868_v35  ;;  %v13122_v42 = vsel %vm652_vm0, %v689_v54, %v690_v45  ;;  %v13128_v19 = vsel %vm652_vm0, %v687_v36, 0.0  ;;  %10483 = vrot.lane.b32.xlu0 %v10482_v34, %s12674_s27 }
  0x4e   : > { %20684 = vst [vmem:[#allocation21_spill] sm:$0xff] %v13119_v46  ;;  %20685 = vst [vmem:[#allocation22_spill] sm:$0xff] %v13122_v42  ;;  %v10487_v40 = vpack.i.bf16 %v13119_v46, %v13110_v29  ;;  %v10492_v3 = vpack.i.bf16 %v13122_v42, %v13125_v43  ;;  %v870_v37 = vrot.slane %v13080_v13, 1  ;;  %v871_v35 = vrot.slane %v13066_v11, 1 }
  0x4f   : > { %v9323_v23 = vadd.f32 %v12968_v47, %v9321_v0  ;;  %v873_v54 = vrot.slane %v13128_v19, 1  ;;  %v692_v36 = vrot.slane %v13092_v28, 7  ;;  %v12333_v47 = vld [vmem:[%s20675_s21 + $0x10] sm:$0xff]   ;;  %v13146_v0 = vsel %vm1336_vm1, %v13006_v63, 0.0 }
  0x50   : > { %v13150_v46 = vsel %vm1336_vm1, %v13018_v4, 0.0  ;;  %10488 = vrot.lane.b32.xlu1 %v10487_v40, %s12674_s27  ;;  %v693_v29 = vrot.slane %v13113_v58, 7  ;;  %v13158_v51 = vsel %vm812_vm2, %v870_v37, %v871_v35  ;;  %v13167_v4 = vsel %vm652_vm0, %v690_v45, 0.0  ;;  %v616_v40 = vld [vmem:[%s12859_s18 + $0xe0] sm:$0xff]  ;;  %10390 = vmatpush3.bf16.msra.mxu1 %v12333_v47 }
  0x51   : > { %v9325_v34 = vadd.f32 %v12972_v48, %v9323_v23  ;;  %20687 = vst [vmem:[#allocation24_spill] sm:$0xff] %v13158_v51  ;;  %v13161_v48 = vsel %vm812_vm2, %v871_v35, %v873_v54  ;;  %v13164_v63 = vsel %vm652_vm0, 0.0, %v692_v36  ;;  %20689 = vst [vmem:[#allocation26_spill] sm:$0xff] %v13167_v4  ;;  %v617_v23 = vld [vmem:[%s12859_s18 + $0xe8] sm:$0xff]  ;;  %10493 = vrot.lane.b32.xlu0 %v10492_v3, %s12674_s27  ;;  %v875_v54 = vrot.slane %v13125_v43, 1  ;;  %v618_v3 = vld [vmem:[%s12859_s18 + $0xf0] sm:$0xff] }
  0x52   : > { %20688 = vst [vmem:[#allocation25_spill] sm:$0xff] %v13161_v48  ;;  %v10497_v37 = vpack.i.bf16 %v13161_v48, %v13158_v51  ;;  %v13176_v35 = vsel %vm652_vm0, %v692_v36, %v693_v29  ;;  %v13181_v11 = vsel %vm1336_vm1, %v13038_v38, 0.0  ;;  %v876_v59 = vrot.slane %v13122_v42, 1  ;;  %v12335_v36 = vld [vmem:[%s20675_s21 + $0x8] sm:$0xff]   ;;  %9769 = vmatpush3.bf16.msra.mxu0 %v12333_v47  ;;  %10383 = vmatprep.subr.bf16.mxu1 %v12334_v57  ;;  %v12336_v43 = vld [vmem:[%s20675_s21 + $0x40] sm:$0xff]  }
  0x53   : > { %v9327_v53 = vadd.f32 %v12982_v52, %v9325_v34  ;;  %20690 = vst [vmem:[#allocation27_spill] sm:$0xff] %v13176_v35  ;;  %v10502_v45 = vpack.i.bf16 %v13176_v35, %v13164_v63  ;;  %v878_v52 = vrot.slane %v13167_v4, 1  ;;  %v13189_v34 = vld [vmem:[%s12859_s18 + $0xf8] sm:$0xff]  ;;  %v13197_v38 = vsel %vm1336_vm1, %v13041_v39, 0.0  ;;  %9770 = vmatprep.subr.bf16.mxu0 %v12334_v57  ;;  %s3817_s18 = sld [smem:[#allocation2]] }
  0x54   : > { %10498 = vrot.lane.b32.xlu1 %v10497_v37, %s12674_s27  ;;  %v695_v51 = vrot.slane %v616_v40, 7  ;;  %v696_v42 = vrot.slane %v617_v23, 7  ;;  %v13205_v4 = vsel %vm1336_vm1, %v13092_v28, 0.0  ;;  %v13208_v47 = vsel %vm812_vm2, %v875_v54, %v876_v59  ;;  %10391 = vmatpush3.bf16.msra.mxu1 %v12335_v36 }
  0x55   : > { %v9329_v48 = vadd.f32 %v12988_v55, %v9327_v53  ;;  %20691 = vst [vmem:[#allocation28_spill] sm:$0xff] %v13208_v47  ;;  %v13211_v55 = vsel %vm812_vm2, %v876_v59, %v878_v52  ;;  %v13214_v39 = vsel %vm652_vm0, %v693_v29, 0.0  ;;  %10503 = vrot.lane.b32.xlu0 %v10502_v45, %s12674_s27  ;;  %v880_v29 = vrot.slane %v13164_v63, 1  ;;  %10384 = vmatprep.subr.bf16.mxu1 %v12336_v43 }
  0x56   : > { %20692 = vst [vmem:[#allocation29_spill] sm:$0xff] %v13211_v55  ;;  %v10507_v37 = vpack.i.bf16 %v13211_v55, %v13208_v47  ;;  %v13221_v28 = vsel %vm652_vm0, %v695_v51, %v696_v42  ;;  %v13224_v54 = vsel %vm652_vm0, 0.0, %v695_v51  ;;  %v881_v57 = vrot.slane %v13176_v35, 1  ;;  %9771 = vmatpush3.bf16.msra.mxu0 %v12335_v36  ;;  %v12338_v47 = vld [vmem:[%s20675_s21 + $0xf8] sm:$0xff]  }
  0x57   : > { %v9331_v53 = vadd.f32 %v12992_v56, %v9329_v48  ;;  %v10512_v59 = vpack.i.bf16 %v13221_v28, %v13224_v54  ;;  %v883_v56 = vrot.slane %v13214_v39, 1  ;;  %v12337_v48 = vld [vmem:[%s20675_s21] sm:$0xff]   ;;  %v13237_v51 = vsel %vm1336_vm1, %v13113_v58, 0.0  ;;  %9772 = vmatprep.subr.bf16.mxu0 %v12336_v43 }
  0x58   : > { %10508 = vrot.lane.b32.xlu1 %v10507_v37, %s12674_s27  ;;  %v698_v52 = vrot.slane %v618_v3, 7  ;;  %v20347_v55 = vrot.slane %v13189_v34, 7  ;;  %v13245_v35 = vsel %vm1336_vm1, %v616_v40, 0.0  ;;  %v13251_v58 = vsel %vm812_vm2, %v880_v29, %v881_v57  ;;  %10392 = vmatpush3.bf16.msra.mxu1 %v12337_v48 }
  0x59   : > { %v9333_v45 = vadd.f32 %v13073_v12, %v9331_v53  ;;  %v13248_v12 = vsel %vm1336_vm1, %v617_v23, 0.0  ;;  %20693 = vst [vmem:[#allocation30_spill] sm:$0xff] %v13251_v58  ;;  %v13254_v36 = vsel %vm812_vm2, %v881_v57, %v883_v56  ;;  %10513 = vrot.lane.b32.xlu0 %v10512_v59, %s12674_s27  ;;  %v13271_v43 = vsel %vm652_vm0, %v696_v42, 0.0  ;;  %9870 = vmatprep.subr.bf16.mxu1 %v12338_v47 }
  0x5a   : > { %20694 = vst [vmem:[#allocation31_spill] sm:$0xff] %v13254_v36  ;;  %v10517_v37 = vpack.i.bf16 %v13254_v36, %v13251_v58  ;;  %v13263_v40 = vsel %vm652_vm0, %v698_v52, %v20347_v55  ;;  %v13266_v23 = vsel %vm652_vm0, 0.0, %v698_v52  ;;  %v886_v59 = vrot.slane %v13221_v28, 1  ;;  %9773 = vmatpush3.bf16.msra.mxu0 %v12337_v48 }
  0x5b   : > { %v9335_v53 = vadd.f32 %v13077_v41, %v9333_v45  ;;  %20695 = vst [vmem:[#allocation32_spill] sm:$0xff] %v13263_v40  ;;  %20696 = vst [vmem:[#allocation33_spill] sm:$0xff] %v13266_v23  ;;  %v10522_v29 = vpack.i.bf16 %v13263_v40, %v13266_v23  ;;  %v885_v41 = vrot.slane %v13224_v54, 1  ;;  %v13278_v56 = vsel %vm1336_vm1, %v618_v3, 0.0 }
  0x5c   : > { %10518 = vrot.lane.b32.xlu1 %v10517_v37, %s12674_s27  ;;  %v888_v45 = vrot.slane %v13271_v43, 1  ;;  %v653_v52 = vrot.slane %v12870_v8, 7  ;;  %v654_v55 = vrot.slane %v12873_v9, 7  ;;  %v656_v36 = vrot.slane %v12876_v10, 7 }
  0x5d   : > { %v9337_v57 = vadd.f32 %v12910_v24, %v9335_v53  ;;  %v13283_v42 = vsel %vm812_vm2, %v885_v41, %v886_v59  ;;  %v657_v48 = vrot.slane %v12891_v16, 7  ;;  %10523 = vrot.lane.b32.xlu0 %v10522_v29, %s12674_s27  ;;  %v659_v8 = vrot.slane %v12894_v17, 7 }
  0x5e   : > { %20697 = vst [vmem:[#allocation34_spill] sm:$0xff] %v13283_v42  ;;  %v13291_v3 = vsel %vm812_vm2, %v886_v59, %v888_v45  ;;  %v13294_v53 = vsel %vm652_vm0, 0.0, %v653_v52  ;;  %v13300_v9 = vsel %vm652_vm0, %v653_v52, %v654_v55  ;;  %v13306_v16 = vsel %vm652_vm0, 0.0, %v656_v36 }
  0x5f   : > { %v9339_v24 = vadd.f32 %v12926_v31, %v9337_v57  ;;  %20698 = vst [vmem:[#allocation35_spill] sm:$0xff] %v13291_v3  ;;  %v10527_v47 = vpack.i.bf16 %v13291_v3, %v13283_v42  ;;  %v13303_v10 = vsel %vm652_vm0, %v656_v36, %v657_v48  ;;  %v10532_v37 = vpack.i.bf16 %v13300_v9, %v13294_v53 }
  0x60   : > { %v820_v29 = vrot.slane %v13306_v16, 1  ;;  %v821_v17 = vrot.slane %v13303_v10, 1  ;;  %v766_v41 = vsel %vm652_vm0, %v657_v48, 0.0  ;;  %v893_v59 = vrot.slane %v13294_v53, 2 }
  0x61   : > { %v9341_v31 = vadd.f32 %v13103_v1, %v9339_v24  ;;  %10528 = vrot.lane.b32.xlu1 %v10527_v47, %s12674_s27  ;;  %v894_v57 = vrot.slane %v13300_v9, 2  ;;  %v765_v36 = vsel %vm652_vm0, %v654_v55, 0.0  ;;  %10533 = vrot.lane.b32.xlu0 %v10532_v37, %s12674_s27  ;;  %v823_v52 = vrot.slane %v766_v41, 1 }
  0x62   : > { %v13321_v1 = vsel %vm812_vm2, %v820_v29, %v821_v17  ;;  %v896_v24 = vrot.slane %v765_v36, 2  ;;  %v815_v3 = vrot.slane %v13294_v53, 1  ;;  %v816_v42 = vrot.slane %v13300_v9, 1 }
  0x63   : > { %v9343_v45 = vadd.f32 %v13107_v5, %v9341_v31  ;;  %20699 = vst [vmem:[#allocation36_spill] sm:$0xff] %v13321_v1  ;;  %v10537_v47 = vpack.i.bf16 %v13321_v1, %v12922_v30  ;;  %v13326_v48 = vsel %vm890_vm3, %v893_v59, %v894_v57  ;;  %v13332_v5 = vsel %vm812_vm2, %v821_v17, %v823_v52 }
  0x64   : > { %20700 = vst [vmem:[#allocation37_spill] sm:$0xff] %v13332_v5  ;;  %v13335_v31 = vsel %vm890_vm3, %v894_v57, %v896_v24  ;;  %v660_v37 = vrot.slane %v12899_v20, 7  ;;  %v10542_v29 = vpack.i.bf16 %v13326_v48, %v13332_v5  ;;  %v13344_v30 = vsel %vm812_vm2, %v815_v3, %v816_v42 }
  0x65   : > { %v9345_v55 = vadd.f32 %v13146_v0, %v9343_v45  ;;  %10538 = vrot.lane.b32.xlu1 %v10537_v47, %s12674_s27  ;;  %v10547_v59 = vpack.i.bf16 %v13306_v16, %v13335_v31  ;;  %v13347_v0 = vsel %vm652_vm0, 0.0, %v659_v8  ;;  %v10552_v57 = vpack.i.bf16 %v13344_v30, %v13303_v10 }
  0x66   : > { %v13353_v20 = vsel %vm652_vm0, %v659_v8, %v660_v37  ;;  %v818_v45 = vrot.slane %v765_v36, 1  ;;  %10543 = vrot.lane.b32.xlu0 %v10542_v29, %s12674_s27  ;;  %v825_v52 = vrot.slane %v13347_v0, 1  ;;  %v767_v3 = vsel %vm652_vm0, %v660_v37, 0.0 }
  0x67   : > { %v9347_v17 = vadd.f32 %v13150_v46, %v9345_v55  ;;  %v826_v24 = vrot.slane %v13353_v20, 1  ;;  %v898_v47 = vrot.slane %v13306_v16, 2  ;;  %v828_v55 = vrot.slane %v767_v3, 1 }
  0x68   : > { %v13362_v46 = vsel %vm812_vm2, %v816_v42, %v818_v45  ;;  %v899_v8 = vrot.slane %v13303_v10, 2  ;;  %v901_v29 = vrot.slane %v766_v41, 2  ;;  %v662_v5 = vrot.slane %v12902_v21, 7 }
  0x69   : > { %v9349_v58 = vadd.f32 %v13181_v11, %v9347_v17  ;;  %10548 = vrot.lane.b32.xlu1 %v10547_v59, %s12674_s27  ;;  %v13367_v36 = vsel %vm812_vm2, %v825_v52, %v826_v24  ;;  %v663_v37 = vrot.slane %v12905_v22, 7  ;;  %v13375_v42 = vsel %vm812_vm2, %v826_v24, %v828_v55 }
  0x6a   : > { %20701 = vst [vmem:[#allocation38_spill] sm:$0xff] %v13367_v36  ;;  %v10557_v11 = vpack.i.bf16 %v13367_v36, %v13362_v46  ;;  %20702 = vst [vmem:[#allocation39_spill] sm:$0xff] %v13375_v42  ;;  %v13378_v17 = vsel %vm890_vm3, %v898_v47, %v899_v8  ;;  %10553 = vrot.lane.b32.xlu0 %v10552_v57, %s12674_s27  ;;  %v13384_v21 = vsel %vm890_vm3, %v899_v8, %v901_v29 }
  0x6b   : > { %v9351_v1 = vadd.f32 %v13197_v38, %v9349_v58  ;;  %v10562_v41 = vpack.i.bf16 %v13378_v17, %v13375_v42  ;;  %v13387_v22 = vsel %vm652_vm0, %v662_v5, %v663_v37  ;;  %v13390_v38 = vsel %vm652_vm0, 0.0, %v662_v5 }
  0x6c   : > { %v10567_v59 = vpack.i.bf16 %v13347_v0, %v13384_v21  ;;  %v830_v45 = vrot.slane %v13390_v38, 1  ;;  %v831_v57 = vrot.slane %v13387_v22, 1  ;;  %v768_v52 = vsel %vm652_vm0, %v663_v37, 0.0 }
  0x6d   : > { %v9353_v58 = vadd.f32 %v13205_v4, %v9351_v1  ;;  %10558 = vrot.lane.b32.xlu1 %v10557_v11, %s12674_s27  ;;  %v903_v24 = vrot.slane %v13347_v0, 2  ;;  %v904_v47 = vrot.slane %v13353_v20, 2  ;;  %v665_v5 = vrot.slane %v12913_v25, 7 }
  0x6e   : > { %v13404_v4 = vsel %vm812_vm2, %v830_v45, %v831_v57  ;;  %v833_v1 = vrot.slane %v768_v52, 1  ;;  %v666_v8 = vrot.slane %v12916_v26, 7  ;;  %10563 = vrot.lane.b32.xlu0 %v10562_v41, %s12674_s27  ;;  %v906_v25 = vrot.slane %v767_v3, 2 }
  0x6f   : > { %v9355_v55 = vadd.f32 %v13237_v51, %v9353_v58  ;;  %20703 = vst [vmem:[#allocation40_spill] sm:$0xff] %v13404_v4  ;;  %v10572_v29 = vpack.i.bf16 %v13404_v4, %v13353_v20  ;;  %v13411_v37 = vsel %vm890_vm3, %v903_v24, %v904_v47  ;;  %v13414_v11 = vsel %vm652_vm0, 0.0, %v665_v5 }
  0x70   : > { %20704 = vst [vmem:[#allocation41_spill] sm:$0xff] %v13414_v11  ;;  %v13418_v58 = vsel %vm812_vm2, %v831_v57, %v833_v1  ;;  %v13421_v45 = vsel %vm652_vm0, %v665_v5, %v666_v8  ;;  %v835_v26 = vrot.slane %v13414_v11, 1  ;;  %v13429_v4 = vsel %vm890_vm3, %v904_v47, %v906_v25 }
  0x71   : > { %v9357_v51 = vadd.f32 %v13245_v35, %v9355_v55  ;;  %20705 = vst [vmem:[#allocation42_spill] sm:$0xff] %v13418_v58  ;;  %20706 = vst [vmem:[#allocation43_spill] sm:$0xff] %v13421_v45  ;;  %10568 = vrot.lane.b32.xlu1 %v10567_v59, %s12674_s27  ;;  %v10577_v41 = vpack.i.bf16 %v13411_v37, %v13418_v58  ;;  %v836_v24 = vrot.slane %v13421_v45, 1  ;;  %v769_v35 = vsel %vm652_vm0, %v666_v8, 0.0 }
  0x72   : > { %v9362_v3 = vsel %vm1336_vm1, %v13189_v34, 0.0  ;;  %v10582_v5 = vpack.i.bf16 %v13390_v38, %v13429_v4  ;;  %v838_v55 = vrot.slane %v769_v35, 1  ;;  %10573 = vrot.lane.b32.xlu0 %v10572_v29, %s12674_s27  ;;  %v908_v1 = vrot.slane %v13390_v38, 2 }
  0x73   : > { %v9359_v57 = vadd.f32 %v13248_v12, %v9357_v51  ;;  %v13439_v59 = vsel %vm812_vm2, %v835_v26, %v836_v24  ;;  %v909_v47 = vrot.slane %v13387_v22, 2  ;;  %v911_v25 = vrot.slane %v768_v52, 2 }
  0x74   : > { %20707 = vst [vmem:[#allocation44_spill] sm:$0xff] %v13439_v59  ;;  %v10587_v58 = vpack.i.bf16 %v13439_v59, %v13387_v22  ;;  %v13447_v12 = vsel %vm812_vm2, %v836_v24, %v838_v55  ;;  %v668_v51 = vrot.slane %v12919_v27, 7  ;;  %v669_v52 = vrot.slane %v12930_v32, 7 }
  0x75   : > { %v9361_v8 = vadd.f32 %v13278_v56, %v9359_v57  ;;  %20708 = vst [vmem:[#allocation45_spill] sm:$0xff] %v13447_v12  ;;  %10578 = vrot.lane.b32.xlu1 %v10577_v41, %s12674_s27  ;;  %v13452_v29 = vsel %vm890_vm3, %v908_v1, %v909_v47  ;;  %v13455_v26 = vsel %vm890_vm3, %v909_v47, %v911_v25  ;;  %v913_v56 = vrot.slane %v13414_v11, 2  ;;  %v13462_v57 = vld [vmem:[%s20675_s21 + $0x118] sm:$0xff]  }
  0x76   : > { %v10592_v27 = vpack.i.bf16 %v13452_v29, %v13447_v12  ;;  %v10597_v41 = vpack.i.bf16 %v13414_v11, %v13455_v26  ;;  %v13471_v55 = vsel %vm652_vm0, 0.0, %v668_v51  ;;  %10583 = vrot.lane.b32.xlu0 %v10582_v5, %s12674_s27  ;;  %v13475_v32 = vsel %vm652_vm0, %v668_v51, %v669_v52  ;;  %10235 = vmatprep.subr.bf16.mxu0 %v13462_v57 }
  0x77   : > { %v13464_v24 = vadd.f32 %v9362_v3, %v9361_v8  ;;  %20710 = vst [vmem:[#allocation47_spill] sm:$0xff] %v13471_v55  ;;  %20711 = vst [vmem:[#allocation48_spill] sm:$0xff] %v13475_v32  ;;  %v840_v1 = vrot.slane %v13471_v55, 1  ;;  %v770_v47 = vsel %vm652_vm0, %v669_v52, 0.0  ;;  %v914_v3 = vrot.slane %v13421_v45, 2 }
  0x78   : > { %v841_v25 = vrot.slane %v13475_v32, 1  ;;  %v843_v8 = vrot.slane %v770_v47, 1  ;;  %v672_v12 = vrot.slane %v12958_v44, 7  ;;  %v916_v51 = vrot.slane %v769_v35, 2 }
  0x79   : > { %20709 = vst [vmem:[#allocation46_spill] sm:$0xff] %v13464_v24  ;;  %v671_v24 = vrot.slane %v12933_v33, 7  ;;  %10588 = vrot.lane.b32.xlu1 %v10587_v58, %s12674_s27  ;;  %v13486_v5 = vsel %vm890_vm3, %v913_v56, %v914_v3  ;;  %v918_v59 = vrot.slane %v13471_v55, 2  ;;  %v919_v52 = vrot.slane %v13475_v32, 2 }
  0x7a   : > { %v13491_v42 = vsel %vm812_vm2, %v840_v1, %v841_v25  ;;  %v13494_v36 = vsel %vm812_vm2, %v841_v25, %v843_v8  ;;  %10593 = vrot.lane.b32.xlu0 %v10592_v27, %s12674_s27  ;;  %v13508_v1 = vsel %vm890_vm3, %v914_v3, %v916_v51  ;;  %v771_v25 = vsel %vm652_vm0, %v672_v12, 0.0 }
  0x7b   : > { %20712 = vst [vmem:[#allocation49_spill] sm:$0xff] %v13491_v42  ;;  %20713 = vst [vmem:[#allocation50_spill] sm:$0xff] %v13494_v36  ;;  %v13497_v33 = vsel %vm652_vm0, %v671_v24, %v672_v12  ;;  %v13500_v44 = vsel %vm652_vm0, 0.0, %v671_v24  ;;  %v10602_v58 = vpack.i.bf16 %v13491_v42, %v13421_v45  ;;  %v10607_v24 = vpack.i.bf16 %v13486_v5, %v13494_v36 }
  0x7c   : > { %20714 = vst [vmem:[#allocation51_spill] sm:$0xff] %v13497_v33  ;;  %20715 = vst [vmem:[#allocation52_spill] sm:$0xff] %v13500_v44  ;;  %v845_v35 = vrot.slane %v13500_v44, 1  ;;  %v846_v56 = vrot.slane %v13497_v33, 1  ;;  %v848_v8 = vrot.slane %v771_v25, 1  ;;  %v674_v27 = vrot.slane %v12975_v49, 7 }
  0x7d   : > { %10598 = vrot.lane.b32.xlu1 %v10597_v41, %s12674_s27  ;;  %v921_v42 = vrot.slane %v770_v47, 2  ;;  %v675_v45 = vrot.slane %v12978_v50, 7  ;;  %v10612_v3 = vpack.i.bf16 %v13471_v55, %v13508_v1  ;;  %v13523_v12 = vsel %vm890_vm3, %v918_v59, %v919_v52 }
  0x7e   : > { %v13516_v11 = vsel %vm812_vm2, %v845_v35, %v846_v56  ;;  %10603 = vrot.lane.b32.xlu0 %v10602_v58, %s12674_s27  ;;  %20717 = vst [vmem:[#allocation54_spill] sm:$0xff] %v13523_v12  ;;  %v13526_v41 = vsel %vm652_vm0, 0.0, %v674_v27  ;;  %v13529_v51 = vsel %vm812_vm2, %v846_v56, %v848_v8  ;;  %v923_v56 = vrot.slane %v13500_v44, 2 }
  0x7f   : > { %20716 = vst [vmem:[#allocation53_spill] sm:$0xff] %v13516_v11  ;;  %20718 = vst [vmem:[#allocation55_spill] sm:$0xff] %v13526_v41  ;;  %v13532_v49 = vsel %vm652_vm0, %v674_v27, %v675_v45  ;;  %v850_v47 = vrot.slane %v13526_v41, 1  ;;  %v772_v50 = vsel %vm652_vm0, %v675_v45, 0.0  ;;  %v10617_v58 = vpack.i.bf16 %v13516_v11, %v13475_v32 }
  0x80   : > { %20719 = vst [vmem:[#allocation56_spill] sm:$0xff] %v13529_v51  ;;  %20720 = vst [vmem:[#allocation57_spill] sm:$0xff] %v13532_v49  ;;  %v851_v59 = vrot.slane %v13532_v49, 1  ;;  %v13541_v35 = vsel %vm890_vm3, %v919_v52, %v921_v42  ;;  %v853_v36 = vrot.slane %v772_v50, 1  ;;  %v924_v8 = vrot.slane %v13497_v33, 2 }
  0x81   : > { %10608 = vrot.lane.b32.xlu1 %v10607_v24, %s12674_s27  ;;  %20721 = vst [vmem:[#allocation58_spill] sm:$0xff] %v13541_v35  ;;  %v10622_v45 = vpack.i.bf16 %v13523_v12, %v13529_v51  ;;  %v926_v27 = vrot.slane %v771_v25, 2  ;;  %v933_v24 = vrot.slane %v13021_v6, 2  ;;  %v10627_v42 = vpack.i.bf16 %v13500_v44, %v13541_v35 }
  0x82   : > { %10613 = vrot.lane.b32.xlu0 %v10612_v3, %s12674_s27  ;;  %v13550_v11 = vsel %vm812_vm2, %v850_v47, %v851_v59  ;;  %v928_v52 = vrot.slane %v13526_v41, 2  ;;  %v934_v32 = vrot.slane %v13014_v2, 2  ;;  %v936_v3 = vrot.slane %v13024_v7, 2 }
  0x83   : > { %20722 = vst [vmem:[#allocation59_spill] sm:$0xff] %v13550_v11  ;;  %v13559_v55 = vsel %vm812_vm2, %v851_v59, %v853_v36  ;;  %v13562_v25 = vsel %vm890_vm3, %v923_v56, %v924_v8  ;;  %v10632_v47 = vpack.i.bf16 %v13550_v11, %v13497_v33  ;;  %v13574_v44 = vsel %vm890_vm3, %v924_v8, %v926_v27 }
  0x84   : > { %20723 = vst [vmem:[#allocation60_spill] sm:$0xff] %v13559_v55  ;;  %20724 = vst [vmem:[#allocation61_spill] sm:$0xff] %v13562_v25  ;;  %v13571_v51 = vsel %vm890_vm3, %v934_v32, %v936_v3  ;;  %v929_v7 = vrot.slane %v13532_v49, 2  ;;  %v931_v36 = vrot.slane %v772_v50, 2  ;;  %v10637_v56 = vpack.i.bf16 %v13562_v25, %v13559_v55  ;;  %v20737_v25 = vld [vmem:[#allocation22_spill] sm:$0xff] }
  0x85   : > { %10618 = vrot.lane.b32.xlu1 %v10617_v58, %s12674_s27  ;;  %v13568_v58 = vsel %vm890_vm3, %v933_v24, %v934_v32  ;;  %20726 = vst [vmem:[#allocation63_spill] sm:$0xff] %v13574_v44  ;;  %v10642_v32 = vpack.i.bf16 %v13526_v41, %v13574_v44  ;;  %v20729_v50 = vrot.slane %v13189_v34, 7  ;;  %v1038_v24 = vrot.slane %v13266_v23, 2 }
  0x86   : > { %10623 = vrot.lane.b32.xlu0 %v10622_v45, %s12674_s27  ;;  %20725 = vst [vmem:[#allocation62_spill] sm:$0xff] %v13568_v58  ;;  %v13586_v45 = vsel %vm890_vm3, %v928_v52, %v929_v7  ;;  %v13589_v8 = vsel %vm890_vm3, %v929_v7, %v931_v36  ;;  %v1039_v3 = vrot.slane %v13263_v40, 2  ;;  %v939_v7 = vrot.slane %v12885_v14, 2 }
  0x87   : > { %20727 = vst [vmem:[#allocation64_spill] sm:$0xff] %v13586_v45  ;;  %20728 = vst [vmem:[#allocation65_spill] sm:$0xff] %v13589_v8  ;;  %v780_v27 = vsel %vm652_vm0, %v20729_v50, 0.0  ;;  %v941_v36 = vrot.slane %v13003_v62, 2  ;;  %v10652_v34 = vpack.i.bf16 %v13014_v2, %v13021_v6  ;;  %v943_v50 = vrot.slane %v13000_v61, 2 }
  0x88   : > { %v1041_v52 = vrot.slane %v780_v27, 2  ;;  %v944_v59 = vrot.slane %v12997_v60, 2  ;;  %v946_v55 = vrot.slane %v13083_v18, 2  ;;  %v951_v11 = vrot.slane %v13128_v19, 2  ;;  %v20733_v18 = vld [vmem:[#allocation26_spill] sm:$0xff] }
  0x89   : > { %10628 = vrot.lane.b32.xlu1 %v10627_v42, %s12674_s27  ;;  %v10647_v42 = vpack.i.bf16 %v13589_v8, %v13586_v45  ;;  %v13628_v8 = vsel %vm890_vm3, %v939_v7, %v941_v36  ;;  %v956_v45 = vrot.slane %v20733_v18, 2  ;;  %v961_v62 = vrot.slane %v13214_v39, 2  ;;  %v20738_v18 = vld [vmem:[#allocation27_spill] sm:$0xff] }
  0x8a   : > { %10633 = vrot.lane.b32.xlu0 %v10632_v47, %s12674_s27  ;;  %v938_v47 = vrot.slane %v12888_v15, 2  ;;  %v13639_v33 = vsel %vm890_vm3, %v944_v59, %v946_v55  ;;  %v959_v55 = vrot.slane %v20738_v18, 2  ;;  %v1002_v35 = vrot.slane %v13263_v40, 1 }
  0x8b   : > { %20735 = vst [vmem:[#allocation26_spill] sm:$0xff] %v13639_v33  ;;  %v1004_v12 = vrot.slane %v780_v27, 1  ;;  %v963_v27 = vrot.slane %v13224_v54, 2 }
  0x8c   : > { %v13625_v41 = vsel %vm890_vm3, %v938_v47, %v939_v7  ;;  %v20736_v47 = vld [vmem:[#allocation23_spill] sm:$0xff]  ;;  %v954_v7 = vrot.slane %v20737_v25, 2 }
  0x8d   : > { %10638 = vrot.lane.b32.xlu1 %v10637_v56, %s12674_s27  ;;  %v13608_v56 = vsel %vm890_vm3, %v1038_v24, %v1039_v3  ;;  %v10657_v24 = vpack.i.bf16 %v13571_v51, %v13568_v58  ;;  %v10662_v19 = vpack.i.bf16 %v13628_v8, %v13625_v41  ;;  %v953_v44 = vrot.slane %v20736_v47, 2 }
  0x8e   : > { %10643 = vrot.lane.b32.xlu0 %v10642_v32, %s12674_s27  ;;  %20730 = vst [vmem:[#allocation66_spill] sm:$0xff] %v13608_v56  ;;  %v13611_v32 = vsel %vm890_vm3, %v1039_v3, %v1041_v52  ;;  %v20732_v3 = vld [vmem:[#allocation19_spill] sm:$0xff] }
  0x8f   : > { %20731 = vst [vmem:[#allocation67_spill] sm:$0xff] %v13611_v32  ;;  %v949_v52 = vrot.slane %v20732_v3, 2 }
  0x91   : > { %1168 = vrot.lane.b32.xlu1 %v13532_v49, %s12674_s27  ;;  %v948_v49 = vrot.slane %v13080_v13, 2 }
  0x92   : > { %10648 = vrot.lane.b32.xlu0 %v10647_v42, %s12674_s27  ;;  %v13636_v42 = vsel %vm890_vm3, %v943_v50, %v944_v59  ;;  %v958_v50 = vrot.slane %v13164_v63, 2  ;;  %v1001_v59 = vrot.slane %v13266_v23, 1 }
  0x93   : > { %20734 = vst [vmem:[#allocation19_spill] sm:$0xff] %v13636_v42  ;;  %v10667_v39 = vpack.i.bf16 %v13639_v33, %v13636_v42  ;;  %v13647_v36 = vsel %vm890_vm3, %v948_v49, %v949_v52  ;;  %v13660_v49 = vsel %vm890_vm3, %v953_v44, %v954_v7  ;;  %v13675_v44 = vsel %vm890_vm3, %v959_v55, %v961_v62 }
  0x94   : > { %20739 = vst [vmem:[#allocation23_spill] sm:$0xff] %v13660_v49  ;;  %v13672_v40 = vsel %vm890_vm3, %v958_v50, %v959_v55 }
  0x95   : > { %10653 = vrot.lane.b32.xlu1 %v10652_v34, %s12674_s27  ;;  %v13650_v34 = vsel %vm890_vm3, %v949_v52, %v951_v11  ;;  %v13663_v11 = vsel %vm890_vm3, %v954_v7, %v956_v45  ;;  %v966_v52 = vrot.slane %v13271_v43, 2  ;;  %v13678_v45 = vsel %vm812_vm2, %v1001_v59, %v1002_v35 }
  0x96   : > { %10658 = vrot.lane.b32.xlu0 %v10657_v24, %s12674_s27  ;;  %v10672_v24 = vpack.i.bf16 %v13650_v34, %v13647_v36  ;;  %20740 = vst [vmem:[#allocation22_spill] sm:$0xff] %v13663_v11  ;;  %v10677_v23 = vpack.i.bf16 %v13663_v11, %v13660_v49  ;;  %20741 = vst [vmem:[#allocation27_spill] sm:$0xff] %v13678_v45  ;;  %v13681_v43 = vsel %vm812_vm2, %v1002_v35, %v1004_v12 }
  0x97   : > { %20742 = vst [vmem:[#allocation68_spill] sm:$0xff] %v13681_v43  ;;  %v10682_v7 = vpack.i.bf16 %v13675_v44, %v13672_v40  ;;  %v10697_v35 = vpack.i.bf16 %v13611_v32, %v13608_v56 }
  0x99   : > { %10663 = vrot.lane.b32.xlu1 %v10662_v19, %s12674_s27  ;;  %v964_v19 = vrot.slane %v13221_v28, 2 }
  0x9a   : > { %10668 = vrot.lane.b32.xlu0 %v10667_v39, %s12674_s27  ;;  %v10687_v39 = vpack.i.bf16 %v13681_v43, %v13678_v45 }
  0x9b   : > { %v13690_v50 = vsel %vm890_vm3, %v963_v27, %v964_v19  ;;  %v13693_v62 = vsel %vm890_vm3, %v964_v19, %v966_v52 }
  0x9c   : > { %v10692_v12 = vpack.i.bf16 %v13693_v62, %v13690_v50 }
  0x9d   : > { %10673 = vrot.lane.b32.xlu1 %v10672_v24, %s12674_s27 }
  0x9e   : > { %10678 = vrot.lane.b32.xlu0 %v10677_v23, %s12674_s27 }
  0xa1   : > { %10683 = vrot.lane.b32.xlu1 %v10682_v7, %s12674_s27 }
  0xa2   : > { %10688 = vrot.lane.b32.xlu0 %v10687_v39, %s12674_s27 }
  0xa5   : > { %10693 = vrot.lane.b32.xlu1 %v10692_v12, %s12674_s27 }
  0xa6   : > { %10698 = vrot.lane.b32.xlu0 %v10697_v35, %s12674_s27 }
  0xb0   : > { %v10464_v23 = vpop.permute.xlu0 %10463 }
  0xb1   : > { %v10466_v55 = vunpack.i.h.bf16 %v10464_v23  ;;  %v10465_v59 = vunpack.i.l.bf16 %v10464_v23 }
  0xb3   : > { %v1386_v24 = vsel %vm1336_vm1, %v13568_v58, %v10465_v59  ;;  %v1387_v52 = vsel %vm1336_vm1, %v13571_v51, %v10466_v55 }
  0xb4   : > { %v1472_v27 = vpack.c.bf16 %v1387_v52, %v1386_v24  ;;  %v12339_v52 = vld [vmem:[%s20675_s21 + $0xb8] sm:$0xff]  }
  0xb6   : > { %1946 = vmatprep.mubr.bf16.mxu1 %v1472_v27  ;;  %v10474_v19 = vpop.permute.xlu1 %10473 }
  0xb7   : > { %v10476_v7 = vunpack.i.h.bf16 %v10474_v19  ;;  %v10475_v39 = vunpack.i.l.bf16 %v10474_v19 }
  0xb9   : > { %v1388_v43 = vsel %vm1336_vm1, %v13625_v41, %v10475_v39  ;;  %v1389_v12 = vsel %vm1336_vm1, %v13628_v8, %v10476_v7  ;;  %v12340_v7 = vld [vmem:[%s20675_s21 + $0xf0] sm:$0xff]  }
  0xba   : > { %v1476_v32 = vpack.c.bf16 %v1389_v12, %v1388_v43  ;;  %v12341_v12 = vld [vmem:[%s20675_s21 + $0xb0] sm:$0xff]  }
  0xbb   : > { %v10469_v35 = vpop.permute.xlu0 %10468 }
  0xbc   : > { %v10479_v45 = vpop.permute.xlu1 %10478  ;;  %v10471_v23 = vunpack.i.h.bf16 %v10469_v35  ;;  %v10470_v56 = vunpack.i.l.bf16 %v10469_v35 }
  0xbd   : > { %v10481_v59 = vunpack.i.h.bf16 %v10479_v45  ;;  %v10480_v58 = vunpack.i.l.bf16 %v10479_v45 }
  0xbe   : > { %v1354_v55 = vsel %vm1336_vm1, %v13021_v6, %v10470_v56  ;;  %v1355_v24 = vsel %vm1336_vm1, %v13014_v2, %v10471_v23  ;;  %v12342_v23 = vld [vmem:[%s20675_s21 + $0xe8] sm:$0xff]  }
  0xbf   : > { %v10484_v27 = vpop.permute.xlu0 %10483  ;;  %v13718_v19 = vpack.c.bf16 %v1355_v24, %v1354_v55  ;;  %v1356_v2 = vsel %vm1336_vm1, %v12888_v15, %v10480_v58  ;;  %v1357_v56 = vsel %vm1336_vm1, %v12885_v14, %v10481_v59 }
  0xc0   : > { %v10486_v43 = vunpack.i.h.bf16 %v10484_v27  ;;  %v10485_v39 = vunpack.i.l.bf16 %v10484_v27  ;;  %v13742_v58 = vpack.c.bf16 %v1357_v56, %v1356_v2  ;;  %v12343_v27 = vld [vmem:[%s20675_s21 + $0xa8] sm:$0xff]   ;;  %v12345_v56 = vld [vmem:[%s20675_s21 + $0xa0] sm:$0xff]  }
  0xc1   : > { %1947 = vmatmul.mubr.bf16.vlgmr.msra.gmra.mxu1 %v13718_v19 }
  0xc2   : > { %v10489_v45 = vpop.permute.xlu1 %10488  ;;  %9871 = vmatpush3.bf16.msra.mxu1 %v12339_v52  ;;  %1954 = vmatprep.mubr.bf16.mxu1 %v1476_v32  ;;  %v1390_v55 = vsel %vm1336_vm1, %v13636_v42, %v10485_v39  ;;  %v1391_v32 = vsel %vm1336_vm1, %v13639_v33, %v10486_v43  ;;  %v12344_v43 = vld [vmem:[%s20675_s21 + $0xe0] sm:$0xff]   ;;  %v20745_v42 = vmov 0 }
  0xc3   : > { %v10494_v35 = vpop.permute.xlu0 %10493  ;;  %9872 = vmatprep.subr.bf16.mxu1 %v12340_v7  ;;  %v10491_v59 = vunpack.i.h.bf16 %v10489_v45  ;;  %v10490_v24 = vunpack.i.l.bf16 %v10489_v45  ;;  %v1480_v52 = vpack.c.bf16 %v1391_v32, %v1390_v55  ;;  %v20746_v42 = vsel %vm13808_vm4, 4294967295, %v20745_v42 }
  0xc4   : > { %v10496_v7 = vunpack.i.h.bf16 %v10494_v35  ;;  %v10495_v6 = vunpack.i.l.bf16 %v10494_v35  ;;  %20747 = vst [vmem:[#allocation70_spill] sm:$0xff] %v20746_v42 }
  0xc5   : > { %v1358_v45 = vsel %vm1336_vm1, %v13000_v61, %v10490_v24  ;;  %v1359_v2 = vsel %vm1336_vm1, %v12997_v60, %v10491_v59  ;;  %v12346_v61 = vld [vmem:[%s20675_s21 + $0xd8] sm:$0xff]   ;;  %v12348_v60 = vld [vmem:[%s20675_s21 + $0xd0] sm:$0xff]  }
  0xc6   : > { %v10499_v14 = vpop.permute.xlu1 %10498  ;;  %9873 = vmatpush3.bf16.msra.mxu1 %v12341_v12  ;;  %v1392_v35 = vsel %vm1336_vm1, %v13647_v36, %v10495_v6  ;;  %v13773_v32 = vpack.c.bf16 %v1359_v2, %v1358_v45  ;;  %v12347_v6 = vld [vmem:[%s20675_s21 + $0x98] sm:$0xff]  }
  0xc7   : > { %v10504_v39 = vpop.permute.xlu0 %10503  ;;  %9874 = vmatprep.subr.bf16.mxu1 %v12342_v23  ;;  %v1393_v23 = vsel %vm1336_vm1, %v13650_v34, %v10496_v7  ;;  %v10501_v59 = vunpack.i.h.bf16 %v10499_v14  ;;  %v10500_v24 = vunpack.i.l.bf16 %v10499_v14  ;;  %v20743_v14 = vmov 0.0  }
  0xc8   : > { %v10505_v7 = vunpack.i.l.bf16 %v10504_v39  ;;  %v13787_v2 = vrot.slane %v20743_v14, 2 }
  0xc9   : > { %1955 = vmatmul.mubr.bf16.gmra.mxu1 %v13742_v58 }
  0xca   : > { %v13750_v15 = vpop.permute.xlu1 %10508  ;;  %1962 = vmatprep.mubr.bf16.mxu1 %v1480_v52  ;;  %9875 = vmatpush3.bf16.msra.mxu1 %v12343_v27  ;;  %v1484_v52 = vpack.c.bf16 %v1393_v23, %v1392_v35  ;;  %v10506_v27 = vunpack.i.h.bf16 %v10504_v39  ;;  %20744 = vst [vmem:[#allocation69_spill] sm:$0xff] %v13787_v2  ;;  %v1361_v39 = vsel %vm1336_vm1, %v20732_v3, %v10501_v59  ;;  %v12349_v35 = vld [vmem:[%s20675_s21 + $0x90] sm:$0xff]  }
  0xcb   : > { %v13760_v12 = vpop.permute.xlu0 %10513  ;;  %9876 = vmatprep.subr.bf16.mxu1 %v12344_v43  ;;  %v10511_v3 = vunpack.i.h.bf16 %v13750_v15  ;;  %v10510_v59 = vunpack.i.l.bf16 %v13750_v15  ;;  %v12351_v15 = vld [vmem:[%s20675_s21 + $0x88] sm:$0xff]  }
  0xce   : > { %v13771_v55 = vpop.permute.xlu1 %10518  ;;  %9877 = vmatpush3.bf16.msra.mxu1 %v12345_v56  ;;  %v1360_v56 = vsel %vm1336_vm1, %v13080_v13, %v10500_v24  ;;  %v12350_v13 = vld [vmem:[%s20675_s21 + $0xc8] sm:$0xff]  }
  0xcf   : > { %v13778_v43 = vpop.permute.xlu0 %10523  ;;  %9878 = vmatprep.subr.bf16.mxu1 %v12346_v61  ;;  %v1394_v61 = vsel %vm1336_vm1, %v13660_v49, %v10505_v7 }
  0xd1   : > { %1963 = vmatmul.mubr.bf16.gmra.mxu1 %v13773_v32 }
  0xd2   : > { %1970 = vmatprep.mubr.bf16.mxu1 %v1484_v52  ;;  %9879 = vmatpush3.bf16.msra.mxu1 %v12347_v6  ;;  %v1395_v52 = vsel %vm1336_vm1, %v13663_v11, %v10506_v27  ;;  %v13805_v6 = vpack.c.bf16 %v1361_v39, %v1360_v56  ;;  %v10516_v56 = vunpack.i.h.bf16 %v13760_v12  ;;  %v10515_v39 = vunpack.i.l.bf16 %v13760_v12 }
  0xd3   : > { %v13784_v45 = vpop.permute.xlu1 %10528  ;;  %v10534_v23 = vpop.permute.xlu0 %10533  ;;  %9880 = vmatprep.subr.bf16.mxu1 %v12348_v60  ;;  %v1362_v12 = vsel %vm1336_vm1, %v20736_v47, %v10510_v59 }
  0xd4   : > { %v10536_v24 = vunpack.i.h.bf16 %v10534_v23  ;;  %v10535_v14 = vunpack.i.l.bf16 %v10534_v23  ;;  %v1488_v23 = vpack.c.bf16 %v1395_v52, %v1394_v61  ;;  %v1363_v61 = vsel %vm1336_vm1, %v20737_v25, %v10511_v3  ;;  %v12355_v52 = vld [vmem:[%s20675_s21 + $0x110] sm:$0xff]  }
  0xd5   : > { %v1396_v25 = vsel %vm1336_vm1, %v13672_v40, %v10515_v39  ;;  %v1397_v47 = vsel %vm1336_vm1, %v13675_v44, %v10516_v56  ;;  %v13859_v59 = vpack.c.bf16 %v1363_v61, %v1362_v12  ;;  %v12356_v56 = vld [vmem:[%s20675_s21 + $0x108] sm:$0xff]   ;;  %v10526_v39 = vunpack.i.h.bf16 %v13778_v43 }
  0xd6   : > { %v1368_v60 = vsel %vm1336_vm1, %v13787_v2, %v10535_v14  ;;  %v1369_v27 = vsel %vm1336_vm1, %v13787_v2, %v10536_v24  ;;  %9881 = vmatpush3.bf16.msra.mxu1 %v12349_v35  ;;  %v12352_v14 = vld [vmem:[%s20675_s21 + $0xc0] sm:$0xff]   ;;  %v10520_v24 = vunpack.i.l.bf16 %v13771_v55  ;;  %v1492_v42 = vpack.c.bf16 %v1397_v47, %v1396_v25 }
  0xd7   : > { %v13812_v7 = vpop.permute.xlu1 %10538  ;;  %v1435_v11 = vpack.c.bf16 %v1369_v27, %v1368_v60  ;;  %9882 = vmatprep.subr.bf16.mxu1 %v12350_v13  ;;  %v10521_v60 = vunpack.i.h.bf16 %v13771_v55  ;;  %v10525_v12 = vunpack.i.l.bf16 %v13778_v43 }
  0xd8   : > { %v10540_v49 = vunpack.i.l.bf16 %v13812_v7  ;;  %v13827_v33 = vpop.permute.xlu0 %10543 }
  0xd9   : > { %1874 = vmatprep.mubr.bf16.mxu0 %v1435_v11  ;;  %1971 = vmatmul.mubr.bf16.gmra.mxu1 %v13805_v6 }
  0xda   : > { %v13832_v35 = vpack.c.bf16 %v10540_v49, %v10540_v49  ;;  %1978 = vmatprep.mubr.bf16.mxu1 %v1488_v23  ;;  %9883 = vmatpush3.bf16.msra.mxu1 %v12351_v15  ;;  %v12353_v49 = vld [vmem:[%s20675_s21 + $0x80] sm:$0xff]  }
  0xdb   : > { %v13842_v13 = vpop.permute.xlu1 %10548  ;;  %9884 = vmatprep.subr.bf16.mxu1 %v12352_v14 }
  0xdc   : > { %20748 = vst [vmem:[#allocation71_spill] sm:$0xff] %v13832_v35  ;;  %v10551_v11 = vunpack.i.h.bf16 %v13842_v13  ;;  %9585 = vmatmul.mubr.msk.bf16.vlgmr.msra.gmra.mxu0 %vm9583_vm5, %v13832_v35  ;;  %v10554_v3 = vpop.permute.xlu0 %10553  ;;  %v10541_v35 = vunpack.i.h.bf16 %v13812_v7 }
  0xdd   : > { %10236 = vmatpush3.bf16.msra.mxu0 %v13462_v57  ;;  %v10556_v27 = vunpack.i.h.bf16 %v10554_v3  ;;  %v10555_v23 = vunpack.i.l.bf16 %v10554_v3  ;;  %v1364_v3 = vsel %vm1336_vm1, %v13164_v63, %v10520_v24  ;;  %v12357_v63 = vld [vmem:[%s20675_s21 + $0x100] sm:$0xff]  }
  0xde   : > { %v1370_v15 = vsel %vm1336_vm1, %v13326_v48, %v10551_v11  ;;  %10237 = vmatprep.subr.bf16.mxu0 %v12355_v52  ;;  %9885 = vmatpush3.bf16.msra.mxu1 %v12353_v49  ;;  %v10545_v49 = vunpack.i.l.bf16 %v13827_v33 }
  0xdf   : > { %v10559_v14 = vpop.permute.xlu1 %10558  ;;  %v1371_v55 = vsel %vm1336_vm1, %v13335_v31, %v10555_v23  ;;  %v1338_v61 = vsel %vm1336_vm1, %v13294_v53, %v10556_v27  ;;  %v1365_v31 = vsel %vm1336_vm1, %v20738_v18, %v10521_v60  ;;  %v1340_v60 = vsel %vm1336_vm1, %v13306_v16, %v10541_v35 }
  0xe0   : > { %v10560_v57 = vunpack.i.l.bf16 %v10559_v14  ;;  %v13874_v48 = vpop.permute.xlu0 %10563  ;;  %v1440_v11 = vpack.c.bf16 %v1371_v55, %v1370_v15  ;;  %v13895_v47 = vpack.c.bf16 %v1365_v31, %v1364_v3  ;;  %v1341_v27 = vsel %vm1336_vm1, %v13303_v10, %v10545_v49 }
  0xe1   : > { %10238 = vmatpush3.bf16.msra.mxu0 %v12355_v52  ;;  %1979 = vmatmul.mubr.bf16.gmra.mxu1 %v13859_v59  ;;  %v1398_v52 = vsel %vm1336_vm1, %v13690_v50, %v10525_v12  ;;  %v10531_v23 = vunpack.i.h.bf16 %v13784_v45  ;;  %v10530_v15 = vunpack.i.l.bf16 %v13784_v45  ;;  %v10561_v16 = vunpack.i.h.bf16 %v10559_v14 }
  0xe2   : > { %v1339_v43 = vsel %vm1336_vm1, %v13300_v9, %v10560_v57  ;;  %10239 = vmatprep.subr.bf16.mxu0 %v12356_v56  ;;  %1882 = vmatprep.mubr.bf16.mxu0 %v1440_v11  ;;  %v1399_v9 = vsel %vm1336_vm1, %v13693_v62, %v10526_v39  ;;  %v10565_v35 = vunpack.i.l.bf16 %v13874_v48 }
  0xe3   : > { %v1439_v53 = vpack.c.bf16 %v1339_v43, %v1338_v61  ;;  %v13885_v25 = vpop.permute.xlu1 %10568  ;;  %1986 = vmatprep.mubr.bf16.mxu1 %v1492_v42  ;;  %v1496_v12 = vpack.c.bf16 %v1399_v9, %v1398_v52  ;;  %v1437_v61 = vpack.c.bf16 %v1341_v27, %v1340_v60  ;;  %v1367_v3 = vsel %vm1336_vm1, %v13221_v28, %v10531_v23 }
  0xe4   : > { %v10571_v7 = vunpack.i.h.bf16 %v13885_v25  ;;  %v10574_v18 = vpop.permute.xlu0 %10573  ;;  %v10546_v9 = vunpack.i.h.bf16 %v13827_v33 }
  0xe5   : > { %1883 = vmatmul.mubr.bf16.gmra.mxu0 %v1439_v53  ;;  %v10575_v24 = vunpack.i.l.bf16 %v10574_v18  ;;  %v10576_v27 = vunpack.i.h.bf16 %v10574_v18 }
  0xe6   : > { %v1372_v42 = vsel %vm1336_vm1, %v13378_v17, %v10571_v7  ;;  %10240 = vmatpush3.bf16.msra.mxu0 %v12356_v56  ;;  %v1366_v56 = vsel %vm1336_vm1, %v13224_v54, %v10530_v15  ;;  %v1343_v54 = vsel %vm1336_vm1, %v13353_v20, %v10565_v35 }
  0xe7   : > { %v13905_v39 = vpop.permute.xlu1 %10578  ;;  %10241 = vmatprep.subr.bf16.mxu0 %v12357_v63  ;;  %v1373_v57 = vsel %vm1336_vm1, %v13384_v21, %v10575_v24  ;;  %v13922_v31 = vpack.c.bf16 %v1367_v3, %v1366_v56  ;;  %v10550_v24 = vunpack.i.l.bf16 %v13842_v13  ;;  %v1400_v13 = vsel %vm1336_vm1, %v13344_v30, %v10546_v9 }
  0xe8   : > { %v1444_v55 = vpack.c.bf16 %v1373_v57, %v1372_v42  ;;  %v13909_v11 = vpop.permute.xlu0 %10583  ;;  %v10580_v23 = vunpack.i.l.bf16 %v13905_v39  ;;  %v10566_v56 = vunpack.i.h.bf16 %v13874_v48  ;;  %v10570_v3 = vunpack.i.l.bf16 %v13885_v25  ;;  %v20749_v48 = vld [vmem:[#allocation36_spill] sm:$0xff] }
  0xe9   : > { %1987 = vmatmul.mubr.bf16.gmra.mxu1 %v13895_v47  ;;  %v10586_v10 = vunpack.i.h.bf16 %v13909_v11  ;;  %v1401_v18 = vsel %vm1336_vm1, %v13362_v46, %v10550_v24  ;;  %v20751_v24 = vld [vmem:[#allocation41_spill] sm:$0xff] }
  0xea   : > { %10242 = vmatpush3.bf16.msra.mxu0 %v12357_v63  ;;  %1890 = vmatprep.mubr.bf16.mxu0 %v1444_v55  ;;  %v1342_v63 = vsel %vm1336_vm1, %v13347_v0, %v10561_v16  ;;  %v1344_v55 = vsel %vm1336_vm1, %v13390_v38, %v10576_v27  ;;  %v1402_v25 = vsel %vm1336_vm1, %v20749_v48, %v10566_v56 }
  0xeb   : > { %v10589_v45 = vpop.permute.xlu1 %10588  ;;  %1994 = vmatprep.mubr.bf16.mxu1 %v1496_v12  ;;  %v1374_v14 = vsel %vm1336_vm1, %v13411_v37, %v10586_v10  ;;  %v1442_v42 = vpack.c.bf16 %v1343_v54, %v1342_v63  ;;  %v1436_v10 = vpack.c.bf16 %v1401_v18, %v1400_v13 }
  0xec   : > { %v10590_v49 = vunpack.i.l.bf16 %v10589_v45  ;;  %v13920_v43 = vpop.permute.xlu0 %10593 }
  0xed   : > { %1891 = vmatmul.mubr.bf16.gmra.mxu0 %v1437_v61 }
  0xee   : > { %v1375_v53 = vsel %vm1336_vm1, %v13429_v4, %v10590_v49 }
  0xef   : > { %v1448_v7 = vpack.c.bf16 %v1375_v53, %v1374_v14  ;;  %v13930_v28 = vpop.permute.xlu1 %10598  ;;  %v10591_v14 = vunpack.i.h.bf16 %v10589_v45 }
  0xf0   : > { %v10601_v52 = vunpack.i.h.bf16 %v13930_v28  ;;  %v13935_v60 = vpop.permute.xlu0 %10603 }
  0xf1   : > { %1898 = vmatprep.mubr.bf16.mxu0 %v1448_v7  ;;  %1995 = vmatmul.mubr.bf16.gmra.mxu1 %v13922_v31  ;;  %v10605_v0 = vunpack.i.l.bf16 %v13935_v60  ;;  %v1346_v27 = vsel %vm1336_vm1, %v20751_v24, %v10591_v14 }
  0xf2   : > { %v1376_v20 = vsel %vm1336_vm1, %v13452_v29, %v10601_v52  ;;  %2035 = vmatprep.mubr.bf16.mxu1 %v1437_v61  ;;  %v1345_v61 = vsel %vm1336_vm1, %v13387_v22, %v10580_v23  ;;  %v10595_v22 = vunpack.i.l.bf16 %v13920_v43  ;;  %v20750_v52 = vld [vmem:[#allocation37_spill] sm:$0xff]  ;;  %v20752_v23 = vld [vmem:[#allocation43_spill] sm:$0xff] }
  0xf3   : > { %v13942_v15 = vpop.permute.xlu1 %10608  ;;  %v1377_v33 = vsel %vm1336_vm1, %v13455_v26, %v10605_v0  ;;  %v1446_v49 = vpack.c.bf16 %v1345_v61, %v1344_v55  ;;  %v1403_v9 = vsel %vm1336_vm1, %v20750_v52, %v10570_v3  ;;  %v10581_v61 = vunpack.i.h.bf16 %v13905_v39  ;;  %v20756_v39 = vld [vmem:[#allocation39_spill] sm:$0xff]  ;;  %v20759_v52 = vld [vmem:[#allocation61_spill] sm:$0xff] }
  0xf4   : > { %v1452_v12 = vpack.c.bf16 %v1377_v33, %v1376_v20  ;;  %v13950_v57 = vpop.permute.xlu0 %10613  ;;  %v20753_v33 = vld [vmem:[#allocation54_spill] sm:$0xff]  ;;  %v1441_v18 = vpack.c.bf16 %v1403_v9, %v1402_v25  ;;  %v10610_v56 = vunpack.i.l.bf16 %v13942_v15  ;;  %v20760_v9 = vld [vmem:[#allocation63_spill] sm:$0xff] }
  0xf5   : > { %1899 = vmatmul.mubr.bf16.gmra.mxu0 %v1442_v42  ;;  %v10616_v16 = vunpack.i.h.bf16 %v13950_v57 }
  0xf6   : > { %1906 = vmatprep.mubr.bf16.mxu0 %v1452_v12  ;;  %v20754_v12 = vld [vmem:[#allocation58_spill] sm:$0xff] }
  0xf7   : > { %v13957_v35 = vpop.permute.xlu1 %10618  ;;  %v1378_v46 = vsel %vm1336_vm1, %v13486_v5, %v10616_v16  ;;  %v10585_v16 = vunpack.i.l.bf16 %v13909_v11 }
  0xf8   : > { %v10620_v30 = vunpack.i.l.bf16 %v13957_v35  ;;  %v13964_v38 = vpop.permute.xlu0 %10623 }
  0xf9   : > { %2036 = vmatmul.mubr.bf16.vlgmr.msra.gmra.mxu1 %v1436_v10  ;;  %v1405_v11 = vsel %vm1336_vm1, %v20756_v39, %v10585_v16 }
  0xfa   : > { %v1379_v53 = vsel %vm1336_vm1, %v13508_v1, %v10620_v30  ;;  %2043 = vmatprep.mubr.bf16.mxu1 %v1442_v42  ;;  %v1347_v42 = vsel %vm1336_vm1, %v20752_v23, %v10595_v22 }
  0xfb   : > { %v1456_v63 = vpack.c.bf16 %v1379_v53, %v1378_v46  ;;  %v13969_v54 = vpop.permute.xlu1 %10628  ;;  %v1450_v10 = vpack.c.bf16 %v1347_v42, %v1346_v27  ;;  %v10606_v46 = vunpack.i.h.bf16 %v13935_v60  ;;  %v20755_v53 = vld [vmem:[#allocation38_spill] sm:$0xff]  ;;  %v20758_v60 = vld [vmem:[#allocation48_spill] sm:$0xff]  ;;  %v10596_v42 = vunpack.i.h.bf16 %v13920_v43 }
  0xfc   : > { %v10631_v7 = vunpack.i.h.bf16 %v13969_v54  ;;  %v13976_v45 = vpop.permute.xlu0 %10633  ;;  %v1349_v25 = vsel %vm1336_vm1, %v20758_v60, %v10610_v56  ;;  %v12358_v56 = vld [vmem:[%s20303_s4] sm:$0xff]   ;;  %v10611_v60 = vunpack.i.h.bf16 %v13942_v15 }
  0xfd   : > { %1907 = vmatmul.mubr.bf16.gmra.mxu0 %v1446_v49  ;;  %v10635_v0 = vunpack.i.l.bf16 %v13976_v45  ;;  %10275 = vmatprep.subr.bf16.mxu1 %v12358_v56 }
  0xfe   : > { %1914 = vmatprep.mubr.bf16.mxu0 %v1456_v63  ;;  %v1380_v13 = vsel %vm1336_vm1, %v20753_v33, %v10631_v7  ;;  %v1404_v63 = vsel %vm1336_vm1, %v20755_v53, %v10581_v61  ;;  %v20757_v7 = vld [vmem:[#allocation47_spill] sm:$0xff]  ;;  %10276 = vmatpush3.bf16.msra.mxu1 %v12358_v56  ;;  %v10630_v56 = vunpack.i.l.bf16 %v13969_v54 }
  0xff   : > { %v13983_v20 = vpop.permute.xlu1 %10638  ;;  %v1381_v55 = vsel %vm1336_vm1, %v20754_v12, %v10635_v0  ;;  %v1348_v48 = vsel %vm1336_vm1, %v20757_v7, %v10606_v46  ;;  %v1445_v27 = vpack.c.bf16 %v1405_v11, %v1404_v63  ;;  %v10600_v0 = vunpack.i.l.bf16 %v13930_v28  ;;  %v20764_v53 = vld [vmem:[#allocation51_spill] sm:$0xff]  ;;  %v20765_v63 = vld [vmem:[#allocation64_spill] sm:$0xff]  ;;  %v20766_v11 = vld [vmem:[#allocation65_spill] sm:$0xff] }
 0x100   : > { %v13991_v30 = vpop.permute.xlu0 %10643  ;;  %v1460_v3 = vpack.c.bf16 %v1381_v55, %v1380_v13  ;;  %v1454_v13 = vpack.c.bf16 %v1349_v25, %v1348_v48  ;;  %v10625_v55 = vunpack.i.l.bf16 %v13964_v38  ;;  %v10615_v25 = vunpack.i.l.bf16 %v13950_v57  ;;  %v20770_v57 = vld [vmem:[#allocation57_spill] sm:$0xff] }
 0x101   : > { %2044 = vmatmul.mubr.bf16.gmra.mxu1 %v1441_v18  ;;  %v10646_v14 = vunpack.i.h.bf16 %v13991_v30  ;;  %v10621_v18 = vunpack.i.h.bf16 %v13957_v35  ;;  %v20763_v35 = vld [vmem:[#allocation52_spill] sm:$0xff] }
 0x102   : > { %2051 = vmatprep.mubr.bf16.mxu1 %v1446_v49 }
 0x103   : > { %v1169_v22 = vpop.permute.xlu1 %1168  ;;  %v1382_v49 = vsel %vm1336_vm1, %v20759_v52, %v10646_v14  ;;  %v20762_v14 = vld [vmem:[#allocation42_spill] sm:$0xff] }
 0x104   : > { %v1383_v24 = vsel %vm1336_vm1, %v20760_v9, %v1169_v22  ;;  %v1407_v28 = vsel %vm1336_vm1, %v20762_v14, %v10600_v0  ;;  %v1350_v22 = vsel %vm1336_vm1, %v20763_v35, %v10621_v18  ;;  %v20768_v18 = vld [vmem:[#allocation45_spill] sm:$0xff] }
 0x105   : > { %1915 = vmatmul.mubr.bf16.gmra.mxu0 %v1450_v10  ;;  %v1464_v61 = vpack.c.bf16 %v1383_v24, %v1382_v49  ;;  %v10636_v24 = vunpack.i.h.bf16 %v13976_v45 }
 0x106   : > { %1922 = vmatprep.mubr.bf16.mxu0 %v1460_v3  ;;  %v20761_v3 = vld [vmem:[#allocation40_spill] sm:$0xff] }
 0x107   : > { %v10654_v23 = vpop.permute.xlu1 %10653  ;;  %v1406_v43 = vsel %vm1336_vm1, %v20761_v3, %v10596_v42  ;;  %v20767_v42 = vld [vmem:[#allocation44_spill] sm:$0xff]  ;;  %v1438_v3 = vpack.c.bf16 %v13384_v21, %v13378_v17  ;;  %v1447_v17 = vpack.c.bf16 %v13455_v26, %v13452_v29  ;;  %v20773_v21 = vld [vmem:[#allocation53_spill] sm:$0xff]  ;;  %v20775_v29 = vld [vmem:[#allocation59_spill] sm:$0xff] }
 0x108   : > { %v10656_v16 = vunpack.i.h.bf16 %v10654_v23  ;;  %v10655_v46 = vunpack.i.l.bf16 %v10654_v23  ;;  %v1449_v48 = vpack.c.bf16 %v1407_v28, %v1406_v43  ;;  %v1408_v0 = vsel %vm1336_vm1, %v20767_v42, %v10611_v60  ;;  %v20771_v43 = vld [vmem:[#allocation49_spill] sm:$0xff]  ;;  %v20772_v28 = vld [vmem:[#allocation50_spill] sm:$0xff]  ;;  %v20778_v42 = vld [vmem:[#allocation16_spill] sm:$0xff] }
 0x109   : > { %2052 = vmatmul.mubr.bf16.gmra.mxu1 %v1445_v27  ;;  %v10640_v27 = vunpack.i.l.bf16 %v13983_v20  ;;  %v1411_v35 = vsel %vm1336_vm1, %v20772_v28, %v10630_v56 }
 0x10a   : > { %2059 = vmatprep.mubr.bf16.mxu1 %v1450_v10  ;;  %v1351_v10 = vsel %vm1336_vm1, %v20764_v53, %v10625_v55  ;;  %v1384_v39 = vsel %vm1336_vm1, %v20765_v63, %v10655_v46  ;;  %v1385_v7 = vsel %vm1336_vm1, %v20766_v11, %v10656_v16  ;;  %v1409_v55 = vsel %vm1336_vm1, %v20768_v18, %v10615_v25  ;;  %v20776_v25 = vld [vmem:[#allocation60_spill] sm:$0xff] }
 0x10b   : > { %v1458_v49 = vpack.c.bf16 %v1351_v10, %v1350_v22  ;;  %v1468_v23 = vpack.c.bf16 %v1385_v7, %v1384_v39  ;;  %v1353_v16 = vsel %vm1336_vm1, %v20770_v57, %v10640_v27  ;;  %v1453_v45 = vpack.c.bf16 %v1409_v55, %v1408_v0  ;;  %v20774_v39 = vld [vmem:[#allocation56_spill] sm:$0xff]  ;;  %v10664_v18 = vpop.permute.xlu1 %10663  ;;  %v20781_v57 = vld [vmem:[#allocation62_spill] sm:$0xff] }
 0x10c   : > { %v10626_v46 = vunpack.i.h.bf16 %v13964_v38  ;;  %v10641_v22 = vunpack.i.h.bf16 %v13983_v20  ;;  %v10645_v38 = vunpack.i.l.bf16 %v13991_v30  ;;  %v1443_v53 = vpack.c.bf16 %v13429_v4, %v13411_v37 }
 0x10d   : > { %1923 = vmatmul.mubr.bf16.gmra.mxu0 %v1454_v13  ;;  %v1451_v4 = vpack.c.bf16 %v13508_v1, %v13486_v5  ;;  %v1455_v37 = vpack.c.bf16 %v20754_v12, %v20753_v33  ;;  %v1459_v1 = vpack.c.bf16 %v20760_v9, %v20759_v52  ;;  %v20777_v33 = vld [vmem:[#allocation15_spill] sm:$0xff]  ;;  %v10665_v52 = vunpack.i.l.bf16 %v10664_v18  ;;  %v20779_v9 = vld [vmem:[#allocation17_spill] sm:$0xff] }
 0x10e   : > { %1930 = vmatprep.mubr.bf16.mxu0 %v1464_v61  ;;  %v20769_v61 = vld [vmem:[#allocation55_spill] sm:$0xff]  ;;  %v1410_v14 = vsel %vm1336_vm1, %v20771_v43, %v10626_v46  ;;  %v1412_v10 = vsel %vm1336_vm1, %v20773_v21, %v10641_v22  ;;  %v1413_v7 = vsel %vm1336_vm1, %v20774_v39, %v10645_v38  ;;  %v20783_v46 = vpack.c.bf16 %v13628_v8, %v13625_v41 }
 0x10f   : > { %v1352_v15 = vsel %vm1336_vm1, %v20769_v61, %v10636_v24  ;;  %v1457_v54 = vpack.c.bf16 %v1411_v35, %v1410_v14  ;;  %v1461_v20 = vpack.c.bf16 %v1413_v7, %v1412_v10  ;;  %v10666_v61 = vunpack.i.h.bf16 %v10664_v18  ;;  %v10674_v28 = vpop.permute.xlu1 %10673  ;;  %v20786_v35 = vld [vmem:[#allocation26_spill] sm:$0xff]  ;;  %v20787_v22 = vld [vmem:[#allocation19_spill] sm:$0xff]  ;;  %v20803_v18 = vld [vmem:[#allocation32_spill] sm:$0xff] }
 0x110   : > { %v20788_v41 = vpack.c.bf16 %v20786_v35, %v20787_v22  ;;  %v10676_v38 = vunpack.i.h.bf16 %v10674_v28  ;;  %v20791_v10 = vld [vmem:[#allocation22_spill] sm:$0xff]  ;;  %v20792_v39 = vld [vmem:[#allocation23_spill] sm:$0xff] }
 0x111   : > { %2060 = vmatmul.mubr.bf16.gmra.mxu1 %v1449_v48  ;;  %v10649_v48 = vpop.permute.xlu0 %10648  ;;  %v20793_v7 = vpack.c.bf16 %v20791_v10, %v20792_v39 }
 0x112   : > { %2067 = vmatprep.mubr.bf16.mxu1 %v1454_v13  ;;  %v1462_v13 = vpack.c.bf16 %v1353_v16, %v1352_v15  ;;  %v10651_v30 = vunpack.i.h.bf16 %v10649_v48  ;;  %v10650_v60 = vunpack.i.l.bf16 %v10649_v48  ;;  %v20782_v16 = vpack.c.bf16 %v13571_v51, %v20781_v57  ;;  %v20785_v51 = vld [vmem:[#allocation21_spill] sm:$0xff] }
 0x114   : > { %v1414_v26 = vsel %vm1336_vm1, %v20775_v29, %v10650_v60  ;;  %v20795_v60 = vld [vmem:[#allocation29_spill] sm:$0xff] }
 0x115   : > { %1931 = vmatmul.mubr.bf16.gmra.mxu0 %v1458_v49  ;;  %v10659_v24 = vpop.permute.xlu0 %10658 }
 0x116   : > { %1938 = vmatprep.mubr.bf16.mxu0 %v1468_v23  ;;  %v10661_v23 = vunpack.i.h.bf16 %v10659_v24  ;;  %v10660_v5 = vunpack.i.l.bf16 %v10659_v24 }
 0x118   : > { %v1416_v12 = vsel %vm1336_vm1, %v20777_v33, %v10660_v5  ;;  %v1417_v0 = vsel %vm1336_vm1, %v20778_v42, %v10661_v23  ;;  %v14133_v23 = vpack.c.bf16 %v13787_v2, %v13787_v2  ;;  %v20800_v5 = vld [vmem:[#allocation30_spill] sm:$0xff]  ;;  %v20802_v42 = vld [vmem:[#allocation33_spill] sm:$0xff] }
 0x119   : > { %2068 = vmatmul.mubr.bf16.gmra.mxu1 %v1453_v45  ;;  %v1469_v55 = vpack.c.bf16 %v1417_v0, %v1416_v12  ;;  %v10669_v15 = vpop.permute.xlu0 %10668 }
 0x11a   : > { %2075 = vmatprep.mubr.bf16.mxu1 %v1458_v49  ;;  %v1415_v49 = vsel %vm1336_vm1, %v20776_v25, %v10651_v30  ;;  %v10671_v56 = vunpack.i.h.bf16 %v10669_v15  ;;  %v20796_v25 = vld [vmem:[#allocation67_spill] sm:$0xff]  ;;  %20799 = vst [vmem:[#allocation36_spill] sm:$0xff] %v14133_v23 }
 0x11b   : > { %v1465_v27 = vpack.c.bf16 %v1415_v49, %v1414_v26  ;;  %v20797_v49 = vld [vmem:[#allocation66_spill] sm:$0xff] }
 0x11c   : > { %v1421_v14 = vsel %vm1336_vm1, %v20785_v51, %v10671_v56  ;;  %v20798_v24 = vpack.c.bf16 %v20796_v25, %v20797_v49  ;;  %v20806_v56 = vld [vmem:[#allocation71_spill] sm:$0xff] }
 0x11d   : > { %1939 = vmatmul.mubr.bf16.gmra.mxu0 %v1462_v13  ;;  %v10679_v21 = vpop.permute.xlu0 %10678 }
 0x11e   : > { %10243 = vmatprep.mubr.msk.bf16.mxu0 %vm1336_vm1, %v1438_v3  ;;  %v20784_v3 = vld [vmem:[#allocation20_spill] sm:$0xff]  ;;  %v10680_v30 = vunpack.i.l.bf16 %v10679_v21 }
 0x121   : > { %2076 = vmatmul.mubr.bf16.gmra.mxu1 %v1457_v54  ;;  %v10675_v54 = vunpack.i.l.bf16 %v10674_v28  ;;  %v10689_v29 = vpop.permute.xlu0 %10688 }
 0x122   : > { %2083 = vmatprep.mubr.bf16.mxu1 %v1462_v13  ;;  %v1479_v13 = vpack.c.bf16 %v13650_v34, %v13647_v36  ;;  %v1487_v36 = vpack.c.bf16 %v13675_v44, %v13672_v40  ;;  %v20789_v34 = vld [vmem:[#allocation24_spill] sm:$0xff]  ;;  %v1491_v40 = vpack.c.bf16 %v13693_v62, %v13690_v50 }
 0x123   : > { %v20794_v44 = vld [vmem:[#allocation28_spill] sm:$0xff] }
 0x125   : > { %10244 = vmatmul.mubr.msk.bf16.vlgmr.msra.gmra.mxu0 %vm1336_vm1, %v1443_v53  ;;  %v20790_v53 = vld [vmem:[#allocation25_spill] sm:$0xff]  ;;  %v10699_v57 = vpop.permute.xlu0 %10698 }
 0x126   : > { %10247 = vmatprep.mubr.msk.bf16.mxu0 %vm1336_vm1, %v1447_v17  ;;  %v1423_v17 = vsel %vm1336_vm1, %v20790_v53, %v10676_v38 }
 0x129   : > { %2084 = vmatmul.mubr.bf16.gmra.mxu1 %v1461_v20  ;;  %v10681_v20 = vunpack.i.h.bf16 %v10679_v21 }
 0x12a   : > { %2091 = vmatprep.mubr.bf16.mxu1 %v13718_v19  ;;  %v1463_v19 = vpack.c.bf16 %v20766_v11, %v20765_v63  ;;  %v20780_v63 = vld [vmem:[#allocation18_spill] sm:$0xff] }
 0x12b   : > { %v1419_v11 = vsel %vm1336_vm1, %v20780_v63, %v10666_v61 }
 0x12d   : > { %10248 = vmatmul.mubr.msk.bf16.gmra.mxu0 %vm1336_vm1, %v1451_v4  ;;  %v1425_v4 = vsel %vm1336_vm1, %v20795_v60, %v10681_v20 }
 0x12e   : > { %10251 = vmatprep.mubr.msk.bf16.mxu0 %vm1336_vm1, %v1455_v37  ;;  %v10684_v37 = vpop.permute.xlu1 %10683 }
 0x12f   : > { %v10686_v50 = vunpack.i.h.bf16 %v10684_v37  ;;  %v10685_v62 = vunpack.i.l.bf16 %v10684_v37 }
 0x131   : > { %2092 = vmatmul.mubr.bf16.gmra.mxu1 %v1465_v27  ;;  %v10691_v27 = vunpack.i.h.bf16 %v10689_v29 }
 0x132   : > { %2099 = vmatprep.mubr.bf16.mxu1 %v13742_v58  ;;  %v1418_v58 = vsel %vm1336_vm1, %v20779_v9, %v10665_v52  ;;  %v10694_v12 = vpop.permute.xlu1 %10693 }
 0x133   : > { %v1473_v45 = vpack.c.bf16 %v1419_v11, %v1418_v58  ;;  %v10696_v52 = vunpack.i.h.bf16 %v10694_v12  ;;  %v10695_v9 = vunpack.i.l.bf16 %v10694_v12  ;;  %v20804_v58 = vld [vmem:[#allocation34_spill] sm:$0xff]  ;;  %v20805_v11 = vld [vmem:[#allocation35_spill] sm:$0xff] }
 0x135   : > { %10252 = vmatmul.mubr.msk.bf16.gmra.mxu0 %vm1336_vm1, %v1459_v1  ;;  %v1426_v1 = vsel %vm1336_vm1, %v20800_v5, %v10685_v62  ;;  %v1428_v63 = vsel %vm1336_vm1, %v20804_v58, %v10695_v9 }
 0x136   : > { %10255 = vmatprep.mubr.msk.bf16.mxu0 %vm1336_vm1, %v1463_v19  ;;  %v20801_v19 = vld [vmem:[#allocation31_spill] sm:$0xff] }
 0x137   : > { %v1427_v33 = vsel %vm1336_vm1, %v20801_v19, %v10686_v50 }
 0x138   : > { %v1489_v61 = vpack.c.bf16 %v1427_v33, %v1426_v1 }
 0x139   : > { %2100 = vmatmul.mubr.bf16.gmra.mxu1 %v1469_v55  ;;  %v1433_v55 = vsel %vm1336_vm1, %v20803_v18, %v10691_v27 }
 0x13a   : > { %2107 = vmatprep.mubr.bf16.mxu1 %v13773_v32  ;;  %v10670_v32 = vunpack.i.l.bf16 %v10669_v15  ;;  %v1429_v15 = vsel %vm1336_vm1, %v20805_v11, %v10696_v52 }
 0x13c   : > { %v1420_v43 = vsel %vm1336_vm1, %v20784_v3, %v10670_v32 }
 0x13d   : > { %10256 = vmatmul.mubr.msk.bf16.gmra.mxu0 %vm1336_vm1, %v20782_v16  ;;  %v1477_v8 = vpack.c.bf16 %v1421_v14, %v1420_v43  ;;  %v1493_v16 = vpack.c.bf16 %v1429_v15, %v1428_v63  ;;  %v20809_v43 = vld [vmem:[#allocation68_spill] sm:$0xff]  ;;  %v12359_v14 = vld [vmem:[%s20305_s6] sm:$0xff]  }
 0x13e   : > { %10259 = vmatprep.mubr.msk.bf16.mxu0 %vm1336_vm1, %v20783_v46  ;;  %v10700_v46 = vunpack.i.l.bf16 %v10699_v57  ;;  %10309 = vmatprep.subr.bf16.mxu0 %v12359_v14 }
 0x13f   : > { %10310 = vmatpush3.bf16.msra.mxu0 %v12359_v14 }
 0x141   : > { %2108 = vmatmul.mubr.bf16.gmra.mxu1 %v1473_v45  ;;  %v10701_v45 = vunpack.i.h.bf16 %v10699_v57 }
 0x142   : > { %2115 = vmatprep.mubr.bf16.mxu1 %v13805_v6  ;;  %v1422_v6 = vsel %vm1336_vm1, %v20789_v34, %v10675_v54 }
 0x143   : > { %v1481_v48 = vpack.c.bf16 %v1423_v17, %v1422_v6  ;;  %v1431_v51 = vsel %vm1336_vm1, %v20809_v43, %v10701_v45 }
 0x145   : > { %10260 = vmatmul.mubr.msk.bf16.gmra.mxu0 %vm1336_vm1, %v20788_v41 }
 0x146   : > { %10263 = vmatprep.mubr.msk.bf16.mxu0 %vm1336_vm1, %v1479_v13  ;;  %v20808_v13 = vld [vmem:[#allocation27_spill] sm:$0xff] }
 0x147   : > { %v1430_v3 = vsel %vm1336_vm1, %v20808_v13, %v10700_v46 }
 0x148   : > { %v1497_v28 = vpack.c.bf16 %v1431_v51, %v1430_v3 }
 0x149   : > { %2116 = vmatmul.mubr.bf16.gmra.mxu1 %v1477_v8 }
 0x14a   : > { %2123 = vmatprep.mubr.bf16.mxu1 %v13859_v59  ;;  %v1424_v59 = vsel %vm1336_vm1, %v20794_v44, %v10680_v30 }
 0x14b   : > { %v1485_v26 = vpack.c.bf16 %v1425_v4, %v1424_v59 }
 0x14d   : > { %10264 = vmatmul.mubr.msk.bf16.gmra.mxu0 %vm1336_vm1, %v20793_v7 }
 0x14e   : > { %10267 = vmatprep.mubr.msk.bf16.mxu0 %vm1336_vm1, %v1487_v36 }
 0x151   : > { %2124 = vmatmul.mubr.bf16.gmra.mxu1 %v1481_v48 }
 0x152   : > { %2131 = vmatprep.mubr.bf16.mxu1 %v13895_v47  ;;  %v10690_v47 = vunpack.i.l.bf16 %v10689_v29 }
 0x154   : > { %v1432_v0 = vsel %vm1336_vm1, %v20802_v42, %v10690_v47 }
 0x155   : > { %10268 = vmatmul.mubr.msk.bf16.gmra.mxu0 %vm1336_vm1, %v1491_v40 }
 0x156   : > { %10271 = vmatprep.mubr.msk.bf16.mxu0 %vm1336_vm1, %v20798_v24 }
 0x159   : > { %2132 = vmatmul.mubr.bf16.gmra.mxu1 %v1485_v26 }
 0x15a   : > { %2139 = vmatprep.mubr.bf16.mxu1 %v13922_v31  ;;  %v1494_v31 = vpack.c.bf16 %v1433_v55, %v1432_v0 }
 0x15d   : > { %10272 = vmatmul.mubr.msk.bf16.gmra.mxu0 %vm1336_vm1, %v14133_v23 }
 0x161   : > { %2140 = vmatmul.mubr.bf16.gmra.mxu1 %v1489_v61 }
 0x162   : > { %2147 = vmatprep.mubr.bf16.mxu1 %v1494_v31 }
 0x169   : > { %2148 = vmatmul.mubr.bf16.gmra.mxu1 %v1493_v16 }
 0x16a   : > { %9590 = vmatprep.mubr.msk.bf16.mxu1 %vm9583_vm5, %v20806_v56 }
 0x171   : > { %2156 = vmatmul.mubr.bf16.gmra.mxu1 %v1497_v28 }
 0x181   : > { %v9828_v35 = vpop.f32.mrf.mxu1 }
 0x183   : > { %v9829_v22 = vpop.f32.mrf.mxu1 }
 0x184   : > { %v14163_v41 = vadd.f32 %v9829_v22, %v9828_v35 }
 0x185   : > { %v14165_v8 = vpop.f32.mrf.mxu1 }
 0x186   : > { %20810 = vst [vmem:[#allocation37_spill] sm:$0xff] %v14163_v41  ;;  %20811 = vst [vmem:[#allocation41_spill] sm:$0xff] %v14165_v8  ;;  %v14290_v8 = vld [vmem:[%s20834_s3] ss:$0 sm:$0xff] }
 0x187   : > { %v14167_v38 = vpop.f32.mrf.mxu1 }
 0x188   : > { %20812 = vst [vmem:[#allocation43_spill] sm:$0xff] %v14167_v38 }
 0x189   : > { %v9834_v54 = vpop.f32.mrf.mxu1 }
 0x18b   : > { %v9835_v36 = vpop.f32.mrf.mxu1 }
 0x18c   : > { %v14169_v34 = vadd.f32 %v9835_v36, %v9834_v54 }
 0x18d   : > { %v14171_v6 = vpop.f32.mrf.mxu1 }
 0x18e   : > { %20813 = vst [vmem:[#allocation54_spill] sm:$0xff] %v14169_v34  ;;  %20814 = vst [vmem:[#allocation58_spill] sm:$0xff] %v14171_v6 }
 0x18f   : > { %v14173_v53 = vpop.f32.mrf.mxu1 }
 0x190   : > { %20815 = vst [vmem:[#allocation38_spill] sm:$0xff] %v14173_v53 }
 0x191   : > { %v9840_v17 = vpop.f32.mrf.mxu1 }
 0x193   : > { %v9841_v21 = vpop.f32.mrf.mxu1 }
 0x194   : > { %v14175_v10 = vadd.f32 %v9841_v21, %v9840_v17 }
 0x195   : > { %v14177_v39 = vpop.f32.mrf.mxu1 }
 0x196   : > { %20816 = vst [vmem:[#allocation39_spill] sm:$0xff] %v14175_v10  ;;  %20817 = vst [vmem:[#allocation47_spill] sm:$0xff] %v14177_v39 }
 0x197   : > { %v14179_v7 = vpop.f32.mrf.mxu1 }
 0x198   : > { %20818 = vst [vmem:[#allocation48_spill] sm:$0xff] %v14179_v7 }
 0x199   : > { %v9846_v48 = vpop.f32.mrf.mxu1 }
 0x19b   : > { %v9847_v30 = vpop.f32.mrf.mxu1 }
 0x19c   : > { %v9774_v20 = vpop.f32.mrf.mxu0  ;;  %v14181_v40 = vadd.f32 %v9847_v30, %v9846_v48 }
 0x19d   : > { %v14183_v59 = vpop.f32.mrf.mxu1 }
 0x19e   : > { %20819 = vst [vmem:[#allocation61_spill] sm:$0xff] %v14181_v40  ;;  %v9775_v44 = vpop.f32.mrf.mxu0  ;;  %20820 = vst [vmem:[#allocation63_spill] sm:$0xff] %v14183_v59 }
 0x19f   : > { %v14185_v60 = vadd.f32 %v9775_v44, %v9774_v20  ;;  %v14189_v37 = vpop.f32.mrf.mxu1 }
 0x1a0   : > { %v14187_v4 = vpop.f32.mrf.mxu0  ;;  %20821 = vst [vmem:[#allocation40_spill] sm:$0xff] %v14189_v37 }
 0x1a1   : > { %v9852_v26 = vpop.f32.mrf.mxu1  ;;  %v1877_v41 = vadd.f32 %v14185_v60, %v14290_v8 }
 0x1a2   : > { %v14191_v29 = vpop.f32.mrf.mxu0 }
 0x1a3   : > { %v9853_v25 = vpop.f32.mrf.mxu1  ;;  %v9779_v53 = vadd.f32 %v14191_v29, %v14187_v4 }
 0x1a4   : > { %v14195_v24 = vadd.f32 %v9853_v25, %v9852_v26 }
 0x1a5   : > { %v14193_v49 = vpop.f32.mrf.mxu0  ;;  %v14197_v50 = vpop.f32.mrf.mxu1 }
 0x1a6   : > { %20822 = vst [vmem:[#allocation42_spill] sm:$0xff] %v14195_v24  ;;  %20823 = vst [vmem:[#allocation52_spill] sm:$0xff] %v14197_v50 }
 0x1a7   : > { %v14199_v62 = vpop.f32.mrf.mxu0  ;;  %v14201_v27 = vpop.f32.mrf.mxu1 }
 0x1a8   : > { %20824 = vst [vmem:[#allocation51_spill] sm:$0xff] %v14201_v27  ;;  %v9782_v39 = vadd.f32 %v14199_v62, %v14193_v49 }
 0x1a9   : > { %v9783_v47 = vpop.f32.mrf.mxu0  ;;  %v9858_v5 = vpop.f32.mrf.mxu1 }
 0x1aa   : > { %v1885_v4 = vadd.f32 %v9782_v39, %v14290_v8 }
 0x1ab   : > { %v9784_v1 = vpop.f32.mrf.mxu0  ;;  %v9859_v19 = vpop.f32.mrf.mxu1 }
 0x1ac   : > { %v14205_v12 = vadd.f32 %v9859_v19, %v9858_v5  ;;  %v9785_v40 = vadd.f32 %v9784_v1, %v9783_v47 }
 0x1ad   : > { %v14203_v33 = vpop.f32.mrf.mxu0  ;;  %v14207_v42 = vpop.f32.mrf.mxu1 }
 0x1ae   : > { %20825 = vst [vmem:[#allocation64_spill] sm:$0xff] %v14205_v12  ;;  %20826 = vst [vmem:[#allocation65_spill] sm:$0xff] %v14207_v42  ;;  %v1888_v49 = vadd.f32 %v9785_v40, %v14290_v8 }
 0x1af   : > { %v14209_v0 = vpop.f32.mrf.mxu0  ;;  %v14211_v18 = vpop.f32.mrf.mxu1 }
 0x1b0   : > { %20827 = vst [vmem:[#allocation44_spill] sm:$0xff] %v14211_v18 }
 0x1b1   : > { %v14213_v55 = vpop.f32.mrf.mxu0  ;;  %v9864_v61 = vpop.f32.mrf.mxu1 }
 0x1b3   : > { %v14215_v52 = vpop.f32.mrf.mxu0  ;;  %v9865_v9 = vpop.f32.mrf.mxu1 }
 0x1b4   : > { %v14219_v58 = vadd.f32 %v9865_v9, %v9864_v61 }
 0x1b5   : > { %v14217_v31 = vpop.f32.mrf.mxu0  ;;  %v14221_v63 = vpop.f32.mrf.mxu1 }
 0x1b6   : > { %20828 = vst [vmem:[#allocation45_spill] sm:$0xff] %v14219_v58  ;;  %20829 = vst [vmem:[#allocation55_spill] sm:$0xff] %v14221_v63 }
 0x1b7   : > { %v14223_v11 = vpop.f32.mrf.mxu0  ;;  %v14225_v15 = vpop.f32.mrf.mxu1 }
 0x1b8   : > { %20830 = vst [vmem:[#allocation57_spill] sm:$0xff] %v14225_v15  ;;  %v9794_v39 = vadd.f32 %v14223_v11, %v14217_v31 }
 0x1b9   : > { %v14227_v57 = vpop.f32.mrf.mxu0  ;;  %v9886_v16 = vpop.f32.mrf.mxu1 }
 0x1bb   : > { %v14229_v45 = vpop.f32.mrf.mxu0  ;;  %v9887_v46 = vpop.f32.mrf.mxu1 }
 0x1bc   : > { %v9888_v6 = vadd.f32 %v9887_v46, %v9886_v16  ;;  %v1880_v16 = vadd.f32 %v9779_v53, %v14290_v8  ;;  %v9797_v60 = vadd.f32 %v14229_v45, %v14227_v57 }
 0x1bd   : > { %v14231_v56 = vpop.f32.mrf.mxu0  ;;  %v9889_v32 = vpop.f32.mrf.mxu1 }
 0x1be   : > { %v2038_v46 = vadd.f32 %v9888_v6, %v1877_v41 }
 0x1bf   : > { %v14233_v13 = vpop.f32.mrf.mxu0  ;;  %v9890_v3 = vpop.f32.mrf.mxu1 }
 0x1c0   : > { %v9891_v62 = vadd.f32 %v9890_v3, %v9889_v32 }
 0x1c1   : > { %v14235_v43 = vpop.f32.mrf.mxu0  ;;  %v9892_v51 = vpop.f32.mrf.mxu1 }
 0x1c2   : > { %v2041_v32 = vadd.f32 %v9891_v62, %v1880_v16 }
 0x1c3   : > { %v14237_v14 = vpop.f32.mrf.mxu0  ;;  %v9893_v28 = vpop.f32.mrf.mxu1 }
 0x1c4   : > { %v9894_v47 = vadd.f32 %v9893_v28, %v9892_v51 }
 0x1c5   : > { %v14239_v35 = vpop.f32.mrf.mxu0  ;;  %v9895_v22 = vpop.f32.mrf.mxu1 }
 0x1c6   : > { %v2046_v51 = vadd.f32 %v9894_v47, %v1885_v4  ;;  %v1904_v4 = vadd.f32 %v9797_v60, %v14290_v8 }
 0x1c7   : > { %v14241_v54 = vpop.f32.mrf.mxu0  ;;  %v9896_v36 = vpop.f32.mrf.mxu1 }
 0x1c8   : > { %v9897_v34 = vadd.f32 %v9896_v36, %v9895_v22 }
 0x1c9   : > { %v14243_v17 = vpop.f32.mrf.mxu0  ;;  %v9898_v21 = vpop.f32.mrf.mxu1 }
 0x1ca   : > { %v2049_v22 = vadd.f32 %v9897_v34, %v1888_v49  ;;  %v9791_v34 = vadd.f32 %v14215_v52, %v14213_v55 }
 0x1cb   : > { %v14245_v48 = vpop.f32.mrf.mxu0  ;;  %v9899_v20 = vpop.f32.mrf.mxu1 }
 0x1cc   : > { %v9900_v6 = vadd.f32 %v9899_v20, %v9898_v21 }
 0x1cd   : > { %v14247_v30 = vpop.f32.mrf.mxu0  ;;  %v9901_v44 = vpop.f32.mrf.mxu1 }
 0x1cf   : > { %v14249_v26 = vpop.f32.mrf.mxu0  ;;  %v9902_v25 = vpop.f32.mrf.mxu1 }
 0x1d1   : > { %v14251_v5 = vpop.f32.mrf.mxu0  ;;  %v9904_v19 = vpop.f32.mrf.mxu1 }
 0x1d3   : > { %v14253_v61 = vpop.f32.mrf.mxu0  ;;  %v9905_v9 = vpop.f32.mrf.mxu1 }
 0x1d4   : > { %v9906_v45 = vadd.f32 %v9905_v9, %v9904_v19 }
 0x1d5   : > { %v14255_v23 = vpop.f32.mrf.mxu0  ;;  %v9907_v2 = vpop.f32.mrf.mxu1 }
 0x1d7   : > { %v14257_v15 = vpop.f32.mrf.mxu0  ;;  %v9908_v63 = vpop.f32.mrf.mxu1 }
 0x1d9   : > { %v14259_v58 = vpop.f32.mrf.mxu0  ;;  %v14261_v18 = vpop.f32.mrf.mxu1 }
 0x1db   : > { %v14263_v42 = vpop.f32.mrf.mxu0  ;;  %v14265_v12 = vpop.f32.mrf.mxu1 }
 0x1dc   : > { %v9912_v60 = vadd.f32 %v14265_v12, %v14261_v18 }
 0x1dd   : > { %v14267_v27 = vpop.f32.mrf.mxu0  ;;  %v14269_v50 = vpop.f32.mrf.mxu1 }
 0x1df   : > { %v14271_v24 = vpop.f32.mrf.mxu0  ;;  %v14273_v37 = vpop.f32.mrf.mxu1 }
 0x1e0   : > { %20831 = vst [vmem:[#allocation49_spill] sm:$0xff] %v14271_v24 }
 0x1e1   : > { %v14275_v59 = vpop.f32.mrf.mxu0  ;;  %v14277_v7 = vpop.f32.mrf.mxu1 }
 0x1e2   : > { %20832 = vst [vmem:[#allocation50_spill] sm:$0xff] %v14275_v59  ;;  %v9788_v59 = vadd.f32 %v14209_v0, %v14203_v33  ;;  %v9909_v33 = vadd.f32 %v9908_v63, %v9907_v2  ;;  %v1901_v2 = vadd.f32 %v9794_v39, %v14290_v8 }
 0x1e3   : > { %v14281_v10 = vpop.f32.mrf.mxu0  ;;  %v14285_v38 = vpop.f32.mrf.mxu1 }
 0x1e4   : > { %20833 = vst [vmem:[#allocation53_spill] sm:$0xff] %v14281_v10  ;;  %v1893_v57 = vadd.f32 %v9788_v59, %v14290_v8  ;;  %v1896_v59 = vadd.f32 %v9791_v34, %v14290_v8  ;;  %v2065_v20 = vadd.f32 %v9909_v33, %v1904_v4  ;;  %v2062_v9 = vadd.f32 %v9906_v45, %v1901_v2 }
 0x1e5   : > { %v10245_v1 = vpop.f32.mrf.mxu0  ;;  %v9919_v10 = vpop.f32.mrf.mxu1 }
 0x1e6   : > { %v2207_v53 = vadd.f32 %v10245_v1, %v2046_v51  ;;  %v2054_v21 = vadd.f32 %v9900_v6, %v1893_v57  ;;  %v9915_v6 = vadd.f32 %v14273_v37, %v14269_v50  ;;  %v9812_v37 = vadd.f32 %v14249_v26, %v14247_v30 }
 0x1e7   : > { %v2198_v29 = vpop.f32.mrf.mxu0  ;;  %v9920_v36 = vpop.f32.mrf.mxu1  ;;  %v9821_v50 = vadd.f32 %v14263_v42, %v14259_v58  ;;  %v9818_v30 = vadd.f32 %v14257_v15, %v14255_v23  ;;  %v9815_v26 = vadd.f32 %v14253_v61, %v14251_v5 }
 0x1e8   : > { %v2199_v24 = vadd.f32 %v2198_v29, %v2038_v46  ;;  %v9903_v29 = vadd.f32 %v9902_v25, %v9901_v44  ;;  %v14320_v55 = vmax.f32 %v2207_v53, 0.0  ;;  %v9800_v44 = vadd.f32 %v14233_v13, %v14231_v56 }
 0x1e9   : > { %v10246_v28 = vpop.f32.mrf.mxu0  ;;  %v14301_v3 = vpop.f32.mrf.mxu1  ;;  %v9809_v25 = vadd.f32 %v14245_v48, %v14243_v17  ;;  %v9806_v56 = vadd.f32 %v14241_v54, %v14239_v35  ;;  %v9803_v48 = vadd.f32 %v14237_v14, %v14235_v43  ;;  %v9918_v35 = vadd.f32 %v14285_v38, %v14277_v7 }
 0x1ea   : > { %v2210_v40 = vadd.f32 %v10246_v28, %v2049_v22  ;;  %v14313_v31 = vmax.f32 %v2199_v24, 0.0  ;;  %20838 = vst [vmem:[#allocation15_spill] sm:$0xff] %v14320_v55  ;;  %v2057_v51 = vadd.f32 %v9903_v29, %v1896_v59  ;;  %v1909_v53 = vadd.f32 %v9800_v44, %v14290_v8 }
 0x1eb   : > { %v2201_v41 = vpop.f32.mrf.mxu0  ;;  %v14307_v47 = vpop.f32.mrf.mxu1  ;;  %v1920_v34 = vadd.f32 %v9809_v25, %v14290_v8  ;;  %v1917_v12 = vadd.f32 %v9806_v56, %v14290_v8  ;;  %v1912_v38 = vadd.f32 %v9803_v48, %v14290_v8 }
 0x1ec   : > { %v2202_v0 = vadd.f32 %v2201_v41, %v2041_v32  ;;  %v14310_v49 = vmax.f32 %v2210_v40, 0.0  ;;  %20836 = vst [vmem:[#allocation59_spill] sm:$0xff] %v14313_v31  ;;  %v9921_v40 = vadd.f32 %v9920_v36, %v9919_v10  ;;  %v2070_v33 = vadd.f32 %v9912_v60, %v1909_v53 }
 0x1ed   : > { %v10249_v62 = vpop.f32.mrf.mxu0  ;;  %v14317_v1 = vpop.f32.mrf.mxu1 }
 0x1ee   : > { %20835 = vst [vmem:[#allocation56_spill] sm:$0xff] %v14310_v49  ;;  %v14315_v11 = vmax.f32 %v2202_v0, 0.0  ;;  %v14335_v19 = vpack.c.bf16 %v14310_v49, %v14320_v55  ;;  %v2223_v13 = vadd.f32 %v10249_v62, %v2062_v9  ;;  %v2081_v0 = vadd.f32 %v9921_v40, %v1920_v34 }
 0x1ef   : > { %v2214_v52 = vpop.f32.mrf.mxu0  ;;  %v14327_v24 = vpop.f32.mrf.mxu1  ;;  %v2078_v62 = vadd.f32 %v9918_v35, %v1917_v12  ;;  %v1925_v9 = vadd.f32 %v9812_v37, %v14290_v8  ;;  %v20854_v12 = vld [vmem:[#allocation53_spill] sm:$0xff] }
 0x1f0   : > { %20837 = vst [vmem:[#allocation60_spill] sm:$0xff] %v14315_v11  ;;  %v14325_v63 = vpack.c.bf16 %v14315_v11, %v14313_v31  ;;  %20839 = vst [vmem:[#allocation16_spill] sm:$0xff] %v14335_v19  ;;  %v2215_v46 = vadd.f32 %v2214_v52, %v2054_v21  ;;  %v14364_v18 = vmax.f32 %v2223_v13, 0.0  ;;  %v2073_v52 = vadd.f32 %v9915_v6, %v1912_v38 }
 0x1f1   : > { %v10250_v16 = vpop.f32.mrf.mxu0  ;;  %v9928_v28 = vpop.f32.mrf.mxu1  ;;  %v9924_v21 = vadd.f32 %v14307_v47, %v14301_v3  ;;  %v1933_v3 = vadd.f32 %v9818_v30, %v14290_v8 }
 0x1f2   : > { %v2226_v22 = vadd.f32 %v10250_v16, %v2065_v20  ;;  %10277 = vmatprep.mubr.msk.bf16.mxu1 %vm2388_vm6, %v14325_v63  ;;  %10311 = vmatprep.mubr.msk.bf16.mxu0 %vm2388_vm6, %v14325_v63  ;;  %v14359_v43 = vmax.f32 %v2215_v46, 0.0  ;;  %20843 = vst [vmem:[#allocation20_spill] sm:$0xff] %v14364_v18  ;;  %v1936_v46 = vadd.f32 %v9821_v50, %v14290_v8  ;;  %v20856_v50 = vld [vmem:[#allocation41_spill] sm:$0xff] }
 0x1f3   : > { %v2217_v17 = vpop.f32.mrf.mxu0  ;;  %10278 = vmatmul.mubr.msk.bf16.vlgmr.msra.gmra.mxu1 %vm2388_vm6, %v14335_v19  ;;  %10312 = vmatmul.mubr.msk.bf16.vlgmr.msra.gmra.mxu0 %vm2388_vm6, %v14335_v19  ;;  %v9929_v39 = vpop.f32.mrf.mxu1 }
 0x1f4   : > { %v2218_v32 = vadd.f32 %v2217_v17, %v2057_v51  ;;  %v14354_v54 = vmax.f32 %v2226_v22, 0.0  ;;  %20841 = vst [vmem:[#allocation18_spill] sm:$0xff] %v14359_v43  ;;  %v9930_v23 = vadd.f32 %v9929_v39, %v9928_v28  ;;  %v9927_v22 = vadd.f32 %v14327_v24, %v14317_v1  ;;  %v20851_v1 = vld [vmem:[#allocation49_spill] sm:$0xff] }
 0x1f5   : > { %v10253_v41 = vpop.f32.mrf.mxu0  ;;  %v9931_v10 = vpop.f32.mrf.mxu1  ;;  %v1928_v28 = vadd.f32 %v9815_v26, %v14290_v8  ;;  %v2086_v17 = vadd.f32 %v9924_v21, %v1925_v9  ;;  %v9824_v24 = vadd.f32 %v20851_v1, %v14267_v27  ;;  %v20853_v27 = vld [vmem:[#allocation50_spill] sm:$0xff] }
 0x1f6   : > { %20840 = vst [vmem:[#allocation17_spill] sm:$0xff] %v14354_v54  ;;  %v14361_v14 = vmax.f32 %v2218_v32, 0.0  ;;  %v14377_v45 = vpack.c.bf16 %v14354_v54, %v14364_v18  ;;  %v2239_v42 = vadd.f32 %v10253_v41, %v2078_v62  ;;  %v2094_v32 = vadd.f32 %v9930_v23, %v1933_v3  ;;  %v20857_v62 = vld [vmem:[#allocation43_spill] sm:$0xff] }
 0x1f7   : > { %v2230_v36 = vpop.f32.mrf.mxu0  ;;  %v9932_v57 = vpop.f32.mrf.mxu1  ;;  %v2089_v41 = vadd.f32 %v9927_v22, %v1928_v28  ;;  %v1941_v30 = vadd.f32 %v9824_v24, %v14290_v8 }
 0x1f8   : > { %20842 = vst [vmem:[#allocation62_spill] sm:$0xff] %v14361_v14  ;;  %v14369_v7 = vpack.c.bf16 %v14361_v14, %v14359_v43  ;;  %20845 = vst [vmem:[#allocation26_spill] sm:$0xff] %v14377_v45  ;;  %v2231_v29 = vadd.f32 %v2230_v36, %v2070_v33  ;;  %v9933_v20 = vadd.f32 %v9932_v57, %v9931_v10  ;;  %v14404_v47 = vmax.f32 %v2239_v42, 0.0  ;;  %v20855_v57 = vld [vmem:[#allocation37_spill] sm:$0xff] }
 0x1f9   : > { %v10254_v4 = vpop.f32.mrf.mxu0  ;;  %v9934_v59 = vpop.f32.mrf.mxu1  ;;  %v9827_v36 = vadd.f32 %v20854_v12, %v20853_v27  ;;  %v1949_v37 = vadd.f32 %v20855_v57, %v14290_v8 }
 0x1fa   : > { %20844 = vst [vmem:[#allocation21_spill] sm:$0xff] %v14369_v7  ;;  %v2242_v2 = vadd.f32 %v10254_v4, %v2081_v0  ;;  %10281 = vmatprep.mubr.msk.bf16.mxu1 %vm2388_vm6, %v14369_v7  ;;  %10315 = vmatprep.mubr.msk.bf16.mxu0 %vm2388_vm6, %v14369_v7  ;;  %v14399_v51 = vmax.f32 %v2231_v29, 0.0  ;;  %20849 = vst [vmem:[#allocation22_spill] sm:$0xff] %v14404_v47  ;;  %v2097_v48 = vadd.f32 %v9933_v20, %v1936_v46 }
 0x1fb   : > { %v2233_v58 = vpop.f32.mrf.mxu0  ;;  %10282 = vmatmul.mubr.msk.bf16.gmra.mxu1 %vm2388_vm6, %v14377_v45  ;;  %10316 = vmatmul.mubr.msk.bf16.gmra.mxu0 %vm2388_vm6, %v14377_v45  ;;  %v9935_v25 = vpop.f32.mrf.mxu1  ;;  %v9833_v4 = vadd.f32 %v20857_v62, %v20856_v50 }
 0x1fc   : > { %v2234_v44 = vadd.f32 %v2233_v58, %v2073_v52  ;;  %v14394_v15 = vmax.f32 %v2242_v2, 0.0  ;;  %20847 = vst [vmem:[#allocation24_spill] sm:$0xff] %v14399_v51  ;;  %v9936_v38 = vadd.f32 %v9935_v25, %v9934_v59  ;;  %v1944_v25 = vadd.f32 %v9827_v36, %v14290_v8 }
 0x1fd   : > { %v10257_v16 = vpop.f32.mrf.mxu0  ;;  %v9937_v61 = vpop.f32.mrf.mxu1  ;;  %v1952_v46 = vadd.f32 %v9833_v4, %v14290_v8 }
 0x1fe   : > { %20846 = vst [vmem:[#allocation19_spill] sm:$0xff] %v14394_v15  ;;  %v14401_v5 = vmax.f32 %v2234_v44, 0.0  ;;  %v14415_v40 = vpack.c.bf16 %v14394_v15, %v14404_v47  ;;  %v2255_v6 = vadd.f32 %v10257_v16, %v2094_v32  ;;  %v2102_v23 = vadd.f32 %v9936_v38, %v1941_v30 }
 0x1ff   : > { %v2246_v56 = vpop.f32.mrf.mxu0  ;;  %v9938_v60 = vpop.f32.mrf.mxu1 }
 0x200   : > { %20848 = vst [vmem:[#allocation25_spill] sm:$0xff] %v14401_v5  ;;  %v14409_v13 = vpack.c.bf16 %v14401_v5, %v14399_v51  ;;  %20852 = vst [vmem:[#allocation28_spill] sm:$0xff] %v14415_v40  ;;  %v2247_v53 = vadd.f32 %v2246_v56, %v2086_v17  ;;  %v9939_v58 = vadd.f32 %v9938_v60, %v9937_v61  ;;  %v14438_v21 = vmax.f32 %v2255_v6, 0.0 }
 0x201   : > { %v10258_v39 = vpop.f32.mrf.mxu0  ;;  %v9940_v34 = vpop.f32.mrf.mxu1 }
 0x202   : > { %20850 = vst [vmem:[#allocation23_spill] sm:$0xff] %v14409_v13  ;;  %v2258_v35 = vadd.f32 %v10258_v39, %v2097_v48  ;;  %10285 = vmatprep.mubr.msk.bf16.mxu1 %vm2388_vm6, %v14409_v13  ;;  %10319 = vmatprep.mubr.msk.bf16.mxu0 %vm2388_vm6, %v14409_v13  ;;  %v14434_v42 = vmax.f32 %v2247_v53, 0.0  ;;  %20861 = vst [vmem:[#allocation30_spill] sm:$0xff] %v14438_v21  ;;  %v2105_v28 = vadd.f32 %v9939_v58, %v1944_v25  ;;  %v20864_v39 = vld [vmem:[#allocation54_spill] sm:$0xff] }
 0x203   : > { %v2249_v10 = vpop.f32.mrf.mxu0  ;;  %10286 = vmatmul.mubr.msk.bf16.gmra.mxu1 %vm2388_vm6, %v14415_v40  ;;  %10320 = vmatmul.mubr.msk.bf16.gmra.mxu0 %vm2388_vm6, %v14415_v40  ;;  %v9941_v0 = vpop.f32.mrf.mxu1  ;;  %v1957_v53 = vadd.f32 %v20864_v39, %v14290_v8 }
 0x204   : > { %v2250_v33 = vadd.f32 %v2249_v10, %v2089_v41  ;;  %v14431_v29 = vmax.f32 %v2258_v35, 0.0  ;;  %v9942_v52 = vadd.f32 %v9941_v0, %v9940_v34  ;;  %20859 = vst [vmem:[#allocation67_spill] sm:$0xff] %v14434_v42  ;;  %v20865_v35 = vld [vmem:[#allocation58_spill] sm:$0xff] }
 0x205   : > { %v10261_v2 = vpop.f32.mrf.mxu0  ;;  %v9943_v59 = vpop.f32.mrf.mxu1  ;;  %v20866_v41 = vld [vmem:[#allocation38_spill] sm:$0xff] }
 0x206   : > { %20858 = vst [vmem:[#allocation29_spill] sm:$0xff] %v14431_v29  ;;  %v14436_v26 = vmax.f32 %v2250_v33, 0.0  ;;  %v2110_v20 = vadd.f32 %v9942_v52, %v1949_v37  ;;  %v14448_v22 = vpack.c.bf16 %v14431_v29, %v14438_v21  ;;  %v9839_v34 = vadd.f32 %v20866_v41, %v20865_v35 }
 0x207   : > { %v2262_v44 = vpop.f32.mrf.mxu0  ;;  %v9944_v16 = vpop.f32.mrf.mxu1 }
 0x208   : > { %20860 = vst [vmem:[#allocation66_spill] sm:$0xff] %v14436_v26  ;;  %v14443_v9 = vpack.c.bf16 %v14436_v26, %v14434_v42  ;;  %20863 = vst [vmem:[#allocation33_spill] sm:$0xff] %v14448_v22  ;;  %v9945_v3 = vadd.f32 %v9944_v16, %v9943_v59  ;;  %v2263_v56 = vadd.f32 %v2262_v44, %v2102_v23  ;;  %v20872_v23 = vld [vmem:[#allocation39_spill] sm:$0xff] }
 0x209   : > { %v10262_v61 = vpop.f32.mrf.mxu0  ;;  %v9946_v17 = vpop.f32.mrf.mxu1  ;;  %v2271_v48 = vadd.f32 %v10261_v2, %v2110_v20  ;;  %v1960_v4 = vadd.f32 %v9839_v34, %v14290_v8  ;;  %v1965_v16 = vadd.f32 %v20872_v23, %v14290_v8 }
 0x20a   : > { %20862 = vst [vmem:[#allocation31_spill] sm:$0xff] %v14443_v9  ;;  %10289 = vmatprep.mubr.msk.bf16.mxu1 %vm2388_vm6, %v14443_v9  ;;  %10323 = vmatprep.mubr.msk.bf16.mxu0 %vm2388_vm6, %v14443_v9  ;;  %v2113_v60 = vadd.f32 %v9945_v3, %v1952_v46  ;;  %v14462_v12 = vmax.f32 %v2263_v56, 0.0  ;;  %v20873_v46 = vld [vmem:[#allocation47_spill] sm:$0xff] }
 0x20b   : > { %v2265_v1 = vpop.f32.mrf.mxu0  ;;  %10290 = vmatmul.mubr.msk.bf16.gmra.mxu1 %vm2388_vm6, %v14448_v22  ;;  %10324 = vmatmul.mubr.msk.bf16.gmra.mxu0 %vm2388_vm6, %v14448_v22  ;;  %v9947_v32 = vpop.f32.mrf.mxu1  ;;  %v14466_v33 = vmax.f32 %v2271_v48, 0.0 }
 0x20c   : > { %v2266_v24 = vadd.f32 %v2265_v1, %v2105_v28  ;;  %v2274_v6 = vadd.f32 %v10262_v61, %v2113_v60  ;;  %v9948_v10 = vadd.f32 %v9947_v32, %v9946_v17  ;;  %20867 = vst [vmem:[#allocation32_spill] sm:$0xff] %v14462_v12  ;;  %v20874_v61 = vld [vmem:[#allocation48_spill] sm:$0xff] }
 0x20d   : > { %v10265_v27 = vpop.f32.mrf.mxu0  ;;  %v9949_v38 = vpop.f32.mrf.mxu1  ;;  %20869 = vst [vmem:[#allocation35_spill] sm:$0xff] %v14466_v33  ;;  %v9845_v3 = vadd.f32 %v20874_v61, %v20873_v46 }
 0x20e   : > { %v14464_v36 = vmax.f32 %v2266_v24, 0.0  ;;  %v14468_v0 = vmax.f32 %v2274_v6, 0.0  ;;  %v2118_v57 = vadd.f32 %v9948_v10, %v1957_v53 }
 0x20f   : > { %v2278_v37 = vpop.f32.mrf.mxu0  ;;  %v9950_v62 = vpop.f32.mrf.mxu1  ;;  %v1968_v39 = vadd.f32 %v9845_v3, %v14290_v8 }
 0x210   : > { %20868 = vst [vmem:[#allocation34_spill] sm:$0xff] %v14464_v36  ;;  %20870 = vst [vmem:[#allocation71_spill] sm:$0xff] %v14468_v0  ;;  %v14472_v50 = vpack.c.bf16 %v14464_v36, %v14462_v12  ;;  %v9951_v2 = vadd.f32 %v9950_v62, %v9949_v38  ;;  %v14477_v30 = vpack.c.bf16 %v14468_v0, %v14466_v33  ;;  %v20878_v62 = vld [vmem:[#allocation63_spill] sm:$0xff] }
 0x211   : > { %v10266_v52 = vpop.f32.mrf.mxu0  ;;  %v9952_v58 = vpop.f32.mrf.mxu1  ;;  %v2279_v59 = vadd.f32 %v2278_v37, %v2118_v57  ;;  %v20877_v57 = vld [vmem:[#allocation61_spill] sm:$0xff] }
 0x212   : > { %20871 = vst [vmem:[#allocation70_spill] sm:$0xff] %v14472_v50  ;;  %10293 = vmatprep.mubr.msk.bf16.mxu1 %vm2388_vm6, %v14472_v50  ;;  %10327 = vmatprep.mubr.msk.bf16.mxu0 %vm2388_vm6, %v14472_v50  ;;  %v2121_v20 = vadd.f32 %v9951_v2, %v1960_v4  ;;  %v1973_v37 = vadd.f32 %v20877_v57, %v14290_v8  ;;  %v20879_v4 = vld [vmem:[#allocation40_spill] sm:$0xff] }
 0x213   : > { %10294 = vmatmul.mubr.msk.bf16.gmra.mxu1 %vm2388_vm6, %v14477_v30  ;;  %10328 = vmatmul.mubr.msk.bf16.gmra.mxu0 %vm2388_vm6, %v14477_v30  ;;  %v2281_v44 = vpop.f32.mrf.mxu0  ;;  %v9953_v25 = vpop.f32.mrf.mxu1  ;;  %v14491_v60 = vmax.f32 %v2279_v59, 0.0  ;;  %v9851_v2 = vadd.f32 %v20879_v4, %v20878_v62 }
 0x214   : > { %v9954_v56 = vadd.f32 %v9953_v25, %v9952_v58  ;;  %v2282_v28 = vadd.f32 %v2281_v44, %v2121_v20 }
 0x215   : > { %v9955_v17 = vpop.f32.mrf.mxu1  ;;  %v10269_v48 = vpop.f32.mrf.mxu0  ;;  %20875 = vst [vmem:[#allocation27_spill] sm:$0xff] %v14491_v60  ;;  %v1976_v46 = vadd.f32 %v9851_v2, %v14290_v8 }
 0x216   : > { %v2126_v1 = vadd.f32 %v9954_v56, %v1965_v16  ;;  %v14493_v24 = vmax.f32 %v2282_v28, 0.0 }
 0x217   : > { %v9956_v32 = vpop.f32.mrf.mxu1  ;;  %v2294_v34 = vpop.f32.mrf.mxu0 }
 0x218   : > { %20876 = vst [vmem:[#allocation68_spill] sm:$0xff] %v14493_v24  ;;  %v14498_v53 = vpack.c.bf16 %v14493_v24, %v14491_v60  ;;  %v9957_v35 = vadd.f32 %v9956_v32, %v9955_v17  ;;  %v2287_v6 = vadd.f32 %v10265_v27, %v2126_v1  ;;  %v20882_v32 = vld [vmem:[#allocation42_spill] sm:$0xff] }
 0x219   : > { %v9958_v41 = vpop.f32.mrf.mxu1  ;;  %v10270_v44 = vpop.f32.mrf.mxu0 }
 0x21a   : > { %v2129_v10 = vadd.f32 %v9957_v35, %v1968_v39  ;;  %10297 = vmatprep.mubr.msk.bf16.mxu1 %vm2388_vm6, %v14498_v53  ;;  %10331 = vmatprep.mubr.msk.bf16.mxu0 %vm2388_vm6, %v14498_v53  ;;  %v14508_v25 = vmax.f32 %v2287_v6, 0.0  ;;  %v1981_v39 = vadd.f32 %v20882_v32, %v14290_v8  ;;  %v20883_v35 = vld [vmem:[#allocation52_spill] sm:$0xff] }
 0x21b   : > { %v9959_v38 = vpop.f32.mrf.mxu1  ;;  %v2297_v28 = vpop.f32.mrf.mxu0 }
 0x21c   : > { %v2290_v58 = vadd.f32 %v10266_v52, %v2129_v10  ;;  %v9960_v59 = vadd.f32 %v9959_v38, %v9958_v41  ;;  %20880 = vst [vmem:[#allocation49_spill] sm:$0xff] %v14508_v25  ;;  %v20884_v41 = vld [vmem:[#allocation51_spill] sm:$0xff] }
 0x21d   : > { %v9961_v20 = vpop.f32.mrf.mxu1  ;;  %v9857_v6 = vadd.f32 %v20884_v41, %v20883_v35 }
 0x21e   : > { %v14510_v27 = vmax.f32 %v2290_v58, 0.0  ;;  %v2134_v23 = vadd.f32 %v9960_v59, %v1973_v37  ;;  %v10273_v37 = vpop.f32.mrf.mxu0 }
 0x21f   : > { %v9962_v16 = vpop.f32.mrf.mxu1  ;;  %v1984_v58 = vadd.f32 %v9857_v6, %v14290_v8 }
 0x220   : > { %20881 = vst [vmem:[#allocation50_spill] sm:$0xff] %v14510_v27  ;;  %v14515_v61 = vpack.c.bf16 %v14510_v27, %v14508_v25  ;;  %v9963_v3 = vadd.f32 %v9962_v16, %v9961_v20  ;;  %v2295_v17 = vadd.f32 %v2294_v34, %v2134_v23  ;;  %v2310_v16 = vpop.f32.mrf.mxu0 }
 0x221   : > { %v9964_v56 = vpop.f32.mrf.mxu1 }
 0x222   : > { %10298 = vmatmul.mubr.msk.bf16.gmra.mxu1 %vm2388_vm6, %v14515_v61  ;;  %10332 = vmatmul.mubr.msk.bf16.gmra.mxu0 %vm2388_vm6, %v14515_v61  ;;  %v2137_v52 = vadd.f32 %v9963_v3, %v1976_v46  ;;  %v14525_v62 = vmax.f32 %v2295_v17, 0.0  ;;  %v10274_v6 = vpop.f32.mrf.mxu0 }
 0x223   : > { %v9965_v1 = vpop.f32.mrf.mxu1 }
 0x224   : > { %v9966_v10 = vadd.f32 %v9965_v1, %v9964_v56  ;;  %v2298_v38 = vadd.f32 %v2297_v28, %v2137_v52  ;;  %20885 = vst [vmem:[#allocation53_spill] sm:$0xff] %v14525_v62  ;;  %v20887_v28 = vld [vmem:[#allocation64_spill] sm:$0xff]  ;;  %v20888_v52 = vld [vmem:[#allocation65_spill] sm:$0xff] }
 0x225   : > { %v9967_v57 = vpop.f32.mrf.mxu1  ;;  %v1989_v17 = vadd.f32 %v20887_v28, %v14290_v8  ;;  %v20889_v1 = vld [vmem:[#allocation44_spill] sm:$0xff]  ;;  %v2313_v28 = vpop.f32.mrf.mxu0 }
 0x226   : > { %v2142_v34 = vadd.f32 %v9966_v10, %v1981_v39  ;;  %v14527_v4 = vmax.f32 %v2298_v38, 0.0  ;;  %v9863_v32 = vadd.f32 %v20889_v1, %v20888_v52 }
 0x227   : > { %v9968_v2 = vpop.f32.mrf.mxu1 }
 0x228   : > { %20886 = vst [vmem:[#allocation37_spill] sm:$0xff] %v14527_v4  ;;  %v14532_v59 = vpack.c.bf16 %v14527_v4, %v14525_v62  ;;  %v9969_v20 = vadd.f32 %v9968_v2, %v9967_v57  ;;  %v2303_v46 = vadd.f32 %v10269_v48, %v2142_v34  ;;  %v1992_v34 = vadd.f32 %v9863_v32, %v14290_v8 }
 0x229   : > { %v9970_v23 = vpop.f32.mrf.mxu1 }
 0x22a   : > { %v2145_v3 = vadd.f32 %v9969_v20, %v1984_v58  ;;  %10301 = vmatprep.mubr.msk.bf16.mxu1 %vm2388_vm6, %v14532_v59  ;;  %10335 = vmatprep.mubr.msk.bf16.mxu0 %vm2388_vm6, %v14532_v59  ;;  %v14542_v10 = vmax.f32 %v2303_v46, 0.0  ;;  %v20892_v46 = vld [vmem:[#allocation45_spill] sm:$0xff] }
 0x22b   : > { %v9971_v56 = vpop.f32.mrf.mxu1 }
 0x22c   : > { %v2306_v39 = vadd.f32 %v10270_v44, %v2145_v3  ;;  %v9972_v35 = vadd.f32 %v9971_v56, %v9970_v23  ;;  %20890 = vst [vmem:[#allocation41_spill] sm:$0xff] %v14542_v10  ;;  %v1997_v3 = vadd.f32 %v20892_v46, %v14290_v8  ;;  %v20893_v56 = vld [vmem:[#allocation55_spill] sm:$0xff] }
 0x22d   : > { %v9973_v41 = vpop.f32.mrf.mxu1 }
 0x22e   : > { %v14544_v48 = vmax.f32 %v2306_v39, 0.0  ;;  %v2150_v38 = vadd.f32 %v9972_v35, %v1989_v17  ;;  %v20894_v17 = vld [vmem:[#allocation57_spill] sm:$0xff] }
 0x22f   : > { %v9974_v57 = vpop.f32.mrf.mxu1  ;;  %v9869_v1 = vadd.f32 %v20894_v17, %v20893_v56 }
 0x230   : > { %20891 = vst [vmem:[#allocation43_spill] sm:$0xff] %v14544_v48  ;;  %v14549_v2 = vpack.c.bf16 %v14544_v48, %v14542_v10  ;;  %v9975_v58 = vadd.f32 %v9974_v57, %v9973_v41  ;;  %v2311_v52 = vadd.f32 %v2310_v16, %v2150_v38 }
 0x231   : > { %v9976_v20 = vpop.f32.mrf.mxu1  ;;  %v2000_v48 = vadd.f32 %v9869_v1, %v14290_v8 }
 0x232   : > { %10302 = vmatmul.mubr.msk.bf16.gmra.mxu1 %vm2388_vm6, %v14549_v2  ;;  %10336 = vmatmul.mubr.msk.bf16.gmra.mxu0 %vm2388_vm6, %v14549_v2  ;;  %v2153_v44 = vadd.f32 %v9975_v58, %v1992_v34  ;;  %v14559_v41 = vmax.f32 %v2311_v52, 0.0 }
 0x233   : > { %v9977_v23 = vpop.f32.mrf.mxu1 }
 0x234   : > { %v9978_v32 = vadd.f32 %v9977_v23, %v9976_v20  ;;  %v2314_v39 = vadd.f32 %v2313_v28, %v2153_v44  ;;  %20895 = vst [vmem:[#allocation54_spill] sm:$0xff] %v14559_v41 }
 0x235   : > { %v9979_v35 = vpop.f32.mrf.mxu1 }
 0x236   : > { %v2158_v16 = vadd.f32 %v9978_v32, %v1997_v3  ;;  %v14561_v38 = vmax.f32 %v2314_v39, 0.0 }
 0x237   : > { %v9980_v57 = vpop.f32.mrf.mxu1 }
 0x238   : > { %20896 = vst [vmem:[#allocation58_spill] sm:$0xff] %v14561_v38  ;;  %v14566_v34 = vpack.c.bf16 %v14561_v38, %v14559_v41  ;;  %v9981_v58 = vadd.f32 %v9980_v57, %v9979_v35  ;;  %v2319_v46 = vadd.f32 %v10273_v37, %v2158_v16 }
 0x23a   : > { %20897 = vst [vmem:[#allocation38_spill] sm:$0xff] %v14566_v34  ;;  %v2161_v4 = vadd.f32 %v9981_v58, %v2000_v48  ;;  %10305 = vmatprep.mubr.msk.bf16.mxu1 %vm2388_vm6, %v14566_v34  ;;  %10339 = vmatprep.mubr.msk.bf16.mxu0 %vm2388_vm6, %v14566_v34  ;;  %v14572_v28 = vmax.f32 %v2319_v46, 0.0 }
 0x23c   : > { %v2322_v20 = vadd.f32 %v10274_v6, %v2161_v4  ;;  %20898 = vst [vmem:[#allocation39_spill] sm:$0xff] %v14572_v28  ;;  %v14587_v4 = vld [vmem:[%s20304_s5] ss:$0 sm:$0xff] }
 0x23d   : > { %v14592_v6 = vld [vmem:[%s20306_s7] ss:$0 sm:$0xff] }
 0x23e   : > { %v14574_v52 = vmax.f32 %v2322_v20, 0.0 }
 0x240   : > { %20899 = vst [vmem:[#allocation47_spill] sm:$0xff] %v14574_v52  ;;  %v14578_v8 = vpack.c.bf16 %v14574_v52, %v14572_v28 }
 0x242   : > { %20900 = vst [vmem:[#allocation48_spill] sm:$0xff] %v14578_v8  ;;  %10306 = vmatmul.mubr.msk.bf16.gmra.mxu1 %vm2388_vm6, %v14578_v8  ;;  %10340 = vmatmul.mubr.msk.bf16.gmra.mxu0 %vm2388_vm6, %v14578_v8 }
 0x2b3   : > { %v10279_v37 = vpop.f32.mrf.mxu1  ;;  %v10313_v48 = vpop.f32.mrf.mxu0 }
 0x2b4   : > { %v2480_v17 = vadd.f32 %v10279_v37, %v14587_v4  ;;  %v14598_v1 = vadd.f32 %v10313_v48, %v14592_v6 }
 0x2b5   : > { %v2471_v44 = vpop.f32.mrf.mxu1  ;;  %v14594_v23 = vpop.f32.mrf.mxu0 }
 0x2b6   : > { %20901 = vst [vmem:[#allocation61_spill] sm:$0xff] %v14598_v1  ;;  %v2472_v57 = vadd.f32 %v14587_v4, %v2471_v44 }
 0x2b7   : > { %v10280_v3 = vpop.f32.mrf.mxu1  ;;  %v10314_v56 = vpop.f32.mrf.mxu0 }
 0x2b8   : > { %v2483_v32 = vadd.f32 %v10280_v3, %v14587_v4  ;;  %v14602_v39 = vadd.f32 %v10314_v56, %v14592_v6 }
 0x2b9   : > { %v2474_v35 = vpop.f32.mrf.mxu1  ;;  %v14604_v16 = vpop.f32.mrf.mxu0 }
 0x2ba   : > { %v14607_v58 = vpack.c.bf16 %v2483_v32, %v2480_v17  ;;  %v2475_v20 = vadd.f32 %v14587_v4, %v2474_v35 }
 0x2bb   : > { %v10283_v37 = vpop.f32.mrf.mxu1  ;;  %v10317_v48 = vpop.f32.mrf.mxu0 }
 0x2bc   : > { %v14612_v52 = vpack.c.bf16 %v2475_v20, %v2472_v57  ;;  %v2496_v32 = vadd.f32 %v10283_v37, %v14587_v4  ;;  %v14622_v46 = vadd.f32 %v10317_v48, %v14592_v6 }
 0x2bd   : > { %v14614_v3 = vpop.f32.mrf.mxu1  ;;  %v14616_v56 = vpop.f32.mrf.mxu0 }
 0x2be   : > { %20902 = vst [vmem:[#allocation63_spill] sm:$0xff] %v14612_v52  ;;  %10052 = vmatprep.mubr.msk.bf16.mxu1 %vm2838_vm7, %v14612_v52  ;;  %v2488_v13 = vadd.f32 %v14587_v4, %v14614_v3 }
 0x2bf   : > { %v10284_v44 = vpop.f32.mrf.mxu1  ;;  %v10318_v17 = vpop.f32.mrf.mxu0 }
 0x2c0   : > { %v2499_v35 = vadd.f32 %v10284_v44, %v14587_v4  ;;  %v14626_v28 = vadd.f32 %v10318_v17, %v14592_v6 }
 0x2c1   : > { %v2490_v57 = vpop.f32.mrf.mxu1  ;;  %v14628_v20 = vpop.f32.mrf.mxu0 }
 0x2c2   : > { %v14630_v38 = vpack.c.bf16 %v2499_v35, %v2496_v32  ;;  %v2491_v22 = vadd.f32 %v14587_v4, %v2490_v57 }
 0x2c3   : > { %v10287_v10 = vpop.f32.mrf.mxu1  ;;  %v14634_v27 = vpop.f32.mrf.mxu0 }
 0x2c4   : > { %v2512_v17 = vadd.f32 %v10287_v10, %v14587_v4  ;;  %v14703_v7 = vpack.c.bf16 %v2491_v22, %v2488_v13 }
 0x2c5   : > { %v14636_v37 = vpop.f32.mrf.mxu1  ;;  %v14638_v48 = vpop.f32.mrf.mxu0 }
 0x2c6   : > { %20906 = vst [vmem:[#allocation51_spill] sm:$0xff] %v14703_v7 }
 0x2c7   : > { %v10288_v62 = vpop.f32.mrf.mxu1  ;;  %v14640_v44 = vpop.f32.mrf.mxu0 }
 0x2c8   : > { %v2515_v24 = vadd.f32 %v10288_v62, %v14587_v4 }
 0x2c9   : > { %v14644_v25 = vpop.f32.mrf.mxu1  ;;  %v14646_v32 = vpop.f32.mrf.mxu0 }
 0x2ca   : > { %v14648_v35 = vpack.c.bf16 %v2515_v24, %v2512_v17 }
 0x2cb   : > { %v10291_v41 = vpop.f32.mrf.mxu1  ;;  %v14650_v0 = vpop.f32.mrf.mxu0 }
 0x2cc   : > { %v2528_v29 = vadd.f32 %v10291_v41, %v14587_v4 }
 0x2cd   : > { %v2519_v60 = vpop.f32.mrf.mxu1  ;;  %v14652_v36 = vpop.f32.mrf.mxu0 }
 0x2ce   : > { %v2520_v24 = vadd.f32 %v14587_v4, %v2519_v60 }
 0x2cf   : > { %v10292_v33 = vpop.f32.mrf.mxu1  ;;  %v10326_v21 = vpop.f32.mrf.mxu0 }
 0x2d0   : > { %v2531_v12 = vadd.f32 %v10292_v33, %v14587_v4 }
 0x2d1   : > { %v2522_v10 = vpop.f32.mrf.mxu1  ;;  %v14664_v15 = vpop.f32.mrf.mxu0 }
 0x2d2   : > { %v14656_v26 = vpack.c.bf16 %v2531_v12, %v2528_v29  ;;  %v2523_v62 = vadd.f32 %v14587_v4, %v2522_v10 }
 0x2d3   : > { %v10295_v42 = vpop.f32.mrf.mxu1  ;;  %v14668_v33 = vpop.f32.mrf.mxu0 }
 0x2d4   : > { %20903 = vst [vmem:[#allocation40_spill] sm:$0xff] %v14656_v26  ;;  %2820 = vrot.lane.b32.xlu1 %v14656_v26, %s12675_s26  ;;  %v14662_v17 = vpack.c.bf16 %v2523_v62, %v2520_v24 }
 0x2d5   : > { %v2535_v29 = vpop.f32.mrf.mxu1  ;;  %v14672_v12 = vpop.f32.mrf.mxu0 }
 0x2d6   : > { %20904 = vst [vmem:[#allocation42_spill] sm:$0xff] %v14662_v17  ;;  %v2536_v8 = vadd.f32 %v14587_v4, %v2535_v29 }
 0x2d7   : > { %v10296_v60 = vpop.f32.mrf.mxu1  ;;  %v14674_v41 = vpop.f32.mrf.mxu0 }
 0x2d8   : > { %2818 = vrot.lane.b32.xlu1 %v14662_v17, %s12675_s26 }
 0x2d9   : > { %v2538_v10 = vpop.f32.mrf.mxu1  ;;  %v14676_v62 = vpop.f32.mrf.mxu0 }
 0x2dc   : > { %2806 = vrot.lane.b32.xlu1 %v14612_v52, %s12675_s26 }
 0x2e2   : > { %v14678_v24 = vpop.f32.mrf.mxu1  ;;  %v14680_v26 = vpop.f32.mrf.mxu0 }
 0x2e4   : > { %v14682_v5 = vpop.f32.mrf.mxu1  ;;  %v14684_v17 = vpop.f32.mrf.mxu0 }
 0x2e6   : > { %v14686_v47 = vpop.f32.mrf.mxu1  ;;  %v14688_v54 = vpop.f32.mrf.mxu0 }
 0x2e8   : > { %v14690_v51 = vpop.f32.mrf.mxu1  ;;  %v14692_v14 = vpop.f32.mrf.mxu0 }
 0x2f2   : > { %v10303_v18 = vpop.f32.mrf.mxu1  ;;  %v10337_v49 = vpop.f32.mrf.mxu0 }
 0x2f3   : > { %v2576_v55 = vadd.f32 %v10303_v18, %v14587_v4 }
 0x2f4   : > { %v2567_v43 = vpop.f32.mrf.mxu1  ;;  %v2759_v11 = vpop.f32.mrf.mxu0 }
 0x2f5   : > { %v2568_v18 = vadd.f32 %v14587_v4, %v2567_v43  ;;  %v2723_v43 = vadd.f32 %v10326_v21, %v14592_v6  ;;  %v2544_v21 = vadd.f32 %v10295_v42, %v14587_v4 }
 0x2f6   : > { %v10304_v31 = vpop.f32.mrf.mxu1  ;;  %v10338_v45 = vpop.f32.mrf.mxu0 }
 0x2f7   : > { %v2579_v52 = vadd.f32 %v10304_v31, %v14587_v4 }
 0x2f8   : > { %v2570_v40 = vpop.f32.mrf.mxu1  ;;  %v2762_v31 = vpop.f32.mrf.mxu0 }
 0x2f9   : > { %v14697_v9 = vpack.c.bf16 %v2579_v52, %v2576_v55  ;;  %v2571_v19 = vadd.f32 %v14587_v4, %v2570_v40  ;;  %v2539_v55 = vadd.f32 %v14587_v4, %v2538_v10 }
 0x2fb   : > { %20905 = vst [vmem:[#allocation52_spill] sm:$0xff] %v14697_v9  ;;  %2832 = vrot.lane.b32.xlu1 %v14697_v9, %s12675_s26  ;;  %v14710_v52 = vpack.c.bf16 %v2571_v19, %v2568_v18  ;;  %v14715_v40 = vpack.c.bf16 %v2539_v55, %v2536_v8  ;;  %v2547_v9 = vadd.f32 %v10296_v60, %v14587_v4 }
 0x2fc   : > { %v2720_v8 = vadd.f32 %v14650_v0, %v14592_v6  ;;  %v2771_v0 = vadd.f32 %v10338_v45, %v14592_v6  ;;  %v2707_v45 = vadd.f32 %v14640_v44, %v14592_v6  ;;  %v2699_v44 = vadd.f32 %v14592_v6, %v14646_v32 }
 0x2fd   : > { %20907 = vst [vmem:[#allocation64_spill] sm:$0xff] %v14710_v52  ;;  %20908 = vst [vmem:[#allocation65_spill] sm:$0xff] %v14715_v40  ;;  %v14735_v1 = vpack.c.bf16 %v2547_v9, %v2544_v21  ;;  %v2731_v21 = vadd.f32 %v14592_v6, %v14676_v62  ;;  %v2552_v62 = vadd.f32 %v14587_v4, %v14682_v5  ;;  %v20912_v5 = vld [vmem:[#allocation38_spill] sm:$0xff] }
 0x2ff   : > { %2810 = vrot.lane.b32.xlu1 %v14703_v7, %s12675_s26 }
 0x302   : > { %v10307_v57 = vpop.f32.mrf.mxu1  ;;  %v10341_v3 = vpop.f32.mrf.mxu0 }
 0x303   : > { %2830 = vrot.lane.b32.xlu1 %v14710_v52, %s12675_s26  ;;  %v2592_v19 = vadd.f32 %v10307_v57, %v14587_v4  ;;  %v2784_v10 = vadd.f32 %v10341_v3, %v14592_v6 }
 0x304   : > { %v2583_v13 = vpop.f32.mrf.mxu1  ;;  %v2775_v22 = vpop.f32.mrf.mxu0 }
 0x305   : > { %v2776_v60 = vadd.f32 %v14592_v6, %v2775_v22  ;;  %v2584_v42 = vadd.f32 %v14587_v4, %v2583_v13 }
 0x306   : > { %v10308_v7 = vpop.f32.mrf.mxu1  ;;  %v10342_v50 = vpop.f32.mrf.mxu0 }
 0x307   : > { %v2595_v18 = vadd.f32 %v10308_v7, %v14587_v4  ;;  %v2787_v29 = vadd.f32 %v10342_v50, %v14592_v6  ;;  %2822 = vrot.lane.b32.xlu1 %v14715_v40, %s12675_s26  ;;  %v3647_v50 = vpack.c.bf16 %v2723_v43, %v2720_v8  ;;  %v2715_v40 = vadd.f32 %v14592_v6, %v14664_v15 }
 0x308   : > { %v2586_v55 = vpop.f32.mrf.mxu1  ;;  %v2778_v52 = vpop.f32.mrf.mxu0  ;;  %v2768_v15 = vadd.f32 %v10337_v49, %v14592_v6  ;;  %v2763_v43 = vadd.f32 %v14592_v6, %v2762_v31  ;;  %v2760_v49 = vadd.f32 %v14592_v6, %v2759_v11  ;;  %v2755_v31 = vadd.f32 %v14688_v54, %v14592_v6 }
 0x309   : > { %v14729_v34 = vpack.c.bf16 %v2595_v18, %v2592_v19  ;;  %v3655_v57 = vpack.c.bf16 %v2787_v29, %v2784_v10  ;;  %v2587_v3 = vadd.f32 %v14587_v4, %v2586_v55  ;;  %v2779_v7 = vadd.f32 %v14592_v6, %v2778_v52  ;;  %v20919_v55 = vld [vmem:[#allocation28_spill] sm:$0xff] }
 0x30a   : > { %v2712_v19 = vadd.f32 %v14592_v6, %v14652_v36  ;;  %v3653_v13 = vpack.c.bf16 %v2771_v0, %v2768_v15  ;;  %v2704_v36 = vadd.f32 %v14634_v27, %v14592_v6  ;;  %v2696_v27 = vadd.f32 %v14592_v6, %v14638_v48 }
 0x30b   : > { %v3654_v22 = vpack.c.bf16 %v2779_v7, %v2776_v60  ;;  %10084 = vmatprep.subr.bf16.mxu0 %v3655_v57  ;;  %2836 = vrot.lane.b32.xlu0 %v14729_v34, %s12675_s26  ;;  %v14746_v9 = vpack.c.bf16 %v2587_v3, %v2584_v42  ;;  %v2507_v11 = vadd.f32 %v14587_v4, %v14644_v25  ;;  %v20918_v60 = vld [vmem:[#allocation23_spill] sm:$0xff]  ;;  %v20921_v3 = vld [vmem:[#allocation33_spill] sm:$0xff] }
 0x30c   : > { %2824 = vrot.lane.b32.xlu1 %v14735_v1, %s12675_s26  ;;  %10085 = vmatpush3.bf16.msra.mxu0 %v3647_v50  ;;  %v3646_v52 = vpack.c.bf16 %v2715_v40, %v2712_v19  ;;  %v3645_v10 = vpack.c.bf16 %v2707_v45, %v2704_v36  ;;  %v3652_v40 = vpack.c.bf16 %v2763_v43, %v2760_v49  ;;  %v20920_v57 = vld [vmem:[#allocation31_spill] sm:$0xff] }
 0x30d   : > { %10086 = vmatprep.subr.bf16.mxu0 %v3654_v22  ;;  %v3644_v32 = vpack.c.bf16 %v2699_v44, %v2696_v27  ;;  %v2504_v54 = vadd.f32 %v14587_v4, %v14636_v37  ;;  %v2747_v29 = vadd.f32 %v14592_v6, %v14692_v14  ;;  %v2683_v25 = vadd.f32 %v14592_v6, %v14628_v20 }
 0x30e   : > { %v2739_v37 = vadd.f32 %v14674_v41, %v14592_v6  ;;  %v20909_v48 = vpack.c.bf16 %v14626_v28, %v14622_v46  ;;  %v2736_v20 = vadd.f32 %v14668_v33, %v14592_v6  ;;  %v2555_v28 = vadd.f32 %v14587_v4, %v14690_v51 }
 0x30f   : > { %2834 = vrot.lane.b32.xlu0 %v14746_v9, %s12675_s26  ;;  %v2667_v46 = vadd.f32 %v14592_v6, %v14604_v16 }
 0x310   : > { %3899 = vrot.lane.b32.xlu1 %v14325_v63, %s12676_s30  ;;  %10087 = vmatpush3.bf16.msra.mxu0 %v3646_v52  ;;  %v2752_v63 = vadd.f32 %v14680_v26, %v14592_v6  ;;  %v2744_v26 = vadd.f32 %v14592_v6, %v14684_v17  ;;  %v2563_v17 = vadd.f32 %v14686_v47, %v14587_v4 }
 0x311   : > { %10088 = vmatprep.subr.bf16.mxu0 %v3653_v13  ;;  %v3649_v8 = vpack.c.bf16 %v2739_v37, %v2736_v20 }
 0x312   : > { %v3651_v18 = vpack.c.bf16 %v2755_v31, %v2752_v63  ;;  %v3650_v14 = vpack.c.bf16 %v2747_v29, %v2744_v26 }
 0x313   : > { %2816 = vrot.lane.b32.xlu0 %v14648_v35, %s12675_s26 }
 0x314   : > { %3917 = vrot.lane.b32.xlu1 %v14477_v30, %s12676_s30  ;;  %10089 = vmatpush3.bf16.msra.mxu0 %v3645_v10  ;;  %v14780_v30 = vpack.c.bf16 %v2507_v11, %v2504_v54 }
 0x315   : > { %10090 = vmatprep.subr.bf16.mxu0 %v3652_v40 }
 0x317   : > { %2808 = vrot.lane.b32.xlu0 %v14607_v58, %s12675_s26 }
 0x318   : > { %3919 = vrot.lane.b32.xlu1 %v14498_v53, %s12676_s30  ;;  %10091 = vmatpush3.bf16.msra.mxu0 %v3644_v32  ;;  %v2680_v53 = vadd.f32 %v14592_v6, %v14616_v56  ;;  %v2560_v56 = vadd.f32 %v14678_v24, %v14587_v4  ;;  %v14828_v24 = vpack.c.bf16 %v2555_v28, %v2552_v62  ;;  %v20913_v4 = vld [vmem:[#allocation70_spill] sm:$0xff]  ;;  %v20937_v62 = vld [vmem:[#allocation60_spill] sm:$0xff] }
 0x319   : > { %10092 = vmatprep.subr.bf16.mxu0 %v3651_v18 }
 0x31a   : > { %v3642_v41 = vpack.c.bf16 %v2683_v25, %v2680_v53  ;;  %v14811_v47 = vpack.c.bf16 %v2563_v17, %v2560_v56 }
 0x31b   : > { %2814 = vrot.lane.b32.xlu0 %v14780_v30, %s12675_s26 }
 0x31c   : > { %3921 = vrot.lane.b32.xlu1 %v14515_v61, %s12676_s30  ;;  %10093 = vmatpush3.bf16.msra.mxu0 %v20909_v48  ;;  %v2728_v61 = vadd.f32 %v14592_v6, %v14672_v12  ;;  %v20910_v12 = vld [vmem:[#allocation61_spill] sm:$0xff] }
 0x31d   : > { %10094 = vmatprep.subr.bf16.mxu0 %v3650_v14  ;;  %v20911_v51 = vpack.c.bf16 %v14602_v39, %v20910_v12  ;;  %v20917_v39 = vld [vmem:[#allocation26_spill] sm:$0xff]  ;;  %v20939_v12 = vld [vmem:[#allocation15_spill] sm:$0xff] }
 0x31e   : > { %v3648_v33 = vpack.c.bf16 %v2731_v21, %v2728_v61 }
 0x31f   : > { %2812 = vrot.lane.b32.xlu0 %v14630_v38, %s12675_s26 }
 0x320   : > { %3923 = vrot.lane.b32.xlu1 %v14532_v59, %s12676_s30  ;;  %10095 = vmatpush3.bf16.msra.mxu0 %v3642_v41  ;;  %v2664_v59 = vadd.f32 %v14592_v6, %v14594_v23  ;;  %v20915_v6 = vld [vmem:[#allocation16_spill] sm:$0xff]  ;;  %v20916_v23 = vld [vmem:[#allocation21_spill] sm:$0xff] }
 0x321   : > { %10096 = vmatprep.subr.bf16.mxu0 %v3649_v8 }
 0x322   : > { %v3640_v16 = vpack.c.bf16 %v2667_v46, %v2664_v59  ;;  %v20938_v59 = vld [vmem:[#allocation63_spill] sm:$0xff] }
 0x323   : > { %2828 = vrot.lane.b32.xlu0 %v14811_v47, %s12675_s26 }
 0x324   : > { %3925 = vrot.lane.b32.xlu1 %v14549_v2, %s12676_s30  ;;  %10097 = vmatpush3.bf16.msra.mxu0 %v20911_v51  ;;  %v20914_v2 = vld [vmem:[#allocation48_spill] sm:$0xff]  ;;  %v20940_v51 = vld [vmem:[#allocation59_spill] sm:$0xff] }
 0x325   : > { %10098 = vmatprep.subr.bf16.mxu0 %v3648_v33 }
 0x327   : > { %2826 = vrot.lane.b32.xlu0 %v14828_v24, %s12675_s26  ;;  %s12683_s26 = smov [#allocation5]  }
 0x328   : > { %3927 = vrot.lane.b32.xlu1 %v20912_v5, %s12676_s30  ;;  %10099 = vmatpush3.bf16.msra.mxu0 %v3640_v16  ;;  %v20941_v16 = vld [vmem:[#allocation18_spill] sm:$0xff]  ;;  %v20942_v5 = vld [vmem:[#allocation56_spill] sm:$0xff] }
 0x32b   : > { %3915 = vrot.lane.b32.xlu0 %v20913_v4, %s12676_s30  ;;  %v20943_v4 = vld [vmem:[#allocation51_spill] sm:$0xff] }
 0x32c   : > { %3929 = vrot.lane.b32.xlu1 %v20914_v2, %s12676_s30  ;;  %v20944_v2 = vld [vmem:[#allocation20_spill] sm:$0xff] }
 0x32f   : > { %3901 = vrot.lane.b32.xlu0 %v20915_v6, %s12676_s30  ;;  %v20945_v6 = vld [vmem:[#allocation62_spill] sm:$0xff] }
 0x333   : > { %3903 = vrot.lane.b32.xlu0 %v20916_v23, %s12676_s30  ;;  %v20947_v23 = vld [vmem:[#allocation17_spill] sm:$0xff] }
 0x337   : > { %3905 = vrot.lane.b32.xlu0 %v20917_v39, %s12676_s30  ;;  %v20948_v39 = vld [vmem:[#allocation22_spill] sm:$0xff] }
 0x33b   : > { %3907 = vrot.lane.b32.xlu0 %v20918_v60, %s12676_s30  ;;  %v20949_v60 = vld [vmem:[#allocation25_spill] sm:$0xff] }
 0x33f   : > { %3909 = vrot.lane.b32.xlu0 %v20919_v55, %s12676_s30  ;;  %v20950_v55 = vld [vmem:[#allocation67_spill] sm:$0xff] }
 0x343   : > { %3911 = vrot.lane.b32.xlu0 %v20920_v57, %s12676_s30  ;;  %v20951_v57 = vld [vmem:[#allocation19_spill] sm:$0xff] }
 0x346   : > { %v2821_v7 = vpop.permute.xlu1 %2820 }
 0x347   : > { %3913 = vrot.lane.b32.xlu0 %v20921_v3, %s12676_s30  ;;  %v2909_v52 = vsel %vm2838_vm7, %v2821_v7, 0  ;;  %v20952_v3 = vld [vmem:[#allocation30_spill] sm:$0xff] }
 0x348   : > { %v20953_v7 = vld [vmem:[#allocation66_spill] sm:$0xff] }
 0x34a   : > { %v2819_v50 = vpop.permute.xlu1 %2818 }
 0x34b   : > { %v2906_v10 = vsel %vm2838_vm7, %v2819_v50, 0  ;;  %v20955_v50 = vld [vmem:[#allocation29_spill] sm:$0xff] }
 0x34e   : > { %v2807_v0 = vpop.permute.xlu1 %2806 }
 0x34f   : > { %v2888_v28 = vsel %vm2838_vm7, %v2807_v0, 0  ;;  %v20956_v0 = vld [vmem:[#allocation35_spill] sm:$0xff] }
 0x36d   : > { %v2833_v42 = vpop.permute.xlu1 %2832 }
 0x371   : > { %v2811_v22 = vpop.permute.xlu1 %2810 }
 0x372   : > { %v2894_v48 = vsel %vm2838_vm7, %v2811_v22, 0  ;;  %v20958_v22 = vld [vmem:[#allocation27_spill] sm:$0xff] }
 0x375   : > { %v2831_v19 = vpop.permute.xlu1 %2830 }
 0x379   : > { %v2823_v15 = vpop.permute.xlu1 %2822 }
 0x37d   : > { %v2837_v45 = vpop.permute.xlu0 %2836 }
 0x37e   : > { %v2825_v13 = vpop.permute.xlu1 %2824  ;;  %10393 = vmatprep.subr.msk.bf16.mxu1 %vm2838_vm7, %v2837_v45  ;;  %v20962_v45 = vld [vmem:[#allocation68_spill] sm:$0xff] }
 0x37f   : > { %10037 = vmatpush3.bf16.xpose.msra.mxu1 %v2909_v52  ;;  %v20963_v52 = vld [vmem:[#allocation53_spill] sm:$0xff] }
 0x381   : > { %v2835_v43 = vpop.permute.xlu0 %2834 }
 0x382   : > { %v14854_v36 = vpop.permute.xlu1 %3899  ;;  %10394 = vmatprep.subr.msk.bf16.mxu1 %vm2838_vm7, %v2835_v43  ;;  %v20966_v43 = vld [vmem:[#allocation41_spill] sm:$0xff] }
 0x383   : > { %3947 = vxpose.xlu0.c.b16.start [1/8] (narrow) %v14854_v36, 16 }
 0x385   : > { %v2817_v49 = vpop.permute.xlu0 %2816 }
 0x386   : > { %v2903_v40 = vsel %vm2838_vm7, %v2817_v49, 0  ;;  %v14862_v11 = vpop.permute.xlu1 %3917  ;;  %v20967_v49 = vld [vmem:[#allocation37_spill] sm:$0xff] }
 0x387   : > { %10039 = vmatpush3.bf16.xpose.msra.mxu1 %v2906_v10  ;;  %20922 = vst [vmem:[#allocation44_spill] sm:$0xff] %v14862_v11  ;;  %v20968_v10 = vld [vmem:[#allocation54_spill] sm:$0xff] }
 0x388   : > { %10395 = vmatprep.subr.msk.bf16.mxu1 %vm2838_vm7, %v2833_v42  ;;  %v20957_v42 = vld [vmem:[#allocation34_spill] sm:$0xff] }
 0x389   : > { %v2809_v44 = vpop.permute.xlu0 %2808 }
 0x38a   : > { %v14866_v54 = vpop.permute.xlu1 %3919  ;;  %v2891_v8 = vsel %vm2838_vm7, %v2809_v44, 0  ;;  %v20969_v44 = vld [vmem:[#allocation43_spill] sm:$0xff] }
 0x38b   : > { %20923 = vst [vmem:[#allocation45_spill] sm:$0xff] %v14866_v54 }
 0x38d   : > { %v2815_v31 = vpop.permute.xlu0 %2814 }
 0x38e   : > { %v2900_v32 = vsel %vm2838_vm7, %v2815_v31, 0  ;;  %v14872_v25 = vpop.permute.xlu1 %3921  ;;  %v20970_v31 = vld [vmem:[#allocation65_spill] sm:$0xff] }
 0x38f   : > { %10041 = vmatpush3.bf16.xpose.msra.mxu1 %v2903_v40  ;;  %20925 = vst [vmem:[#allocation57_spill] sm:$0xff] %v14872_v25  ;;  %v20971_v40 = vld [vmem:[#allocation58_spill] sm:$0xff] }
 0x390   : > { %10396 = vmatprep.subr.msk.bf16.mxu1 %vm2838_vm7, %v2831_v19  ;;  %v20960_v19 = vld [vmem:[#allocation42_spill] sm:$0xff] }
 0x391   : > { %v2813_v27 = vpop.permute.xlu0 %2812 }
 0x392   : > { %v2897_v26 = vsel %vm2838_vm7, %v2813_v27, 0  ;;  %v14879_v14 = vpop.permute.xlu1 %3923  ;;  %v20972_v27 = vld [vmem:[#allocation64_spill] sm:$0xff] }
 0x393   : > { %20927 = vst [vmem:[#allocation38_spill] sm:$0xff] %v14879_v14 }
 0x395   : > { %v2829_v63 = vpop.permute.xlu0 %2828 }
 0x396   : > { %v14891_v17 = vpop.permute.xlu1 %3925 }
 0x397   : > { %10043 = vmatpush3.bf16.xpose.msra.mxu1 %v2900_v32  ;;  %20930 = vst [vmem:[#allocation16_spill] sm:$0xff] %v14891_v17 }
 0x398   : > { %10397 = vmatprep.subr.msk.bf16.mxu1 %vm2838_vm7, %v2829_v63  ;;  %v20973_v63 = vld [vmem:[#allocation52_spill] sm:$0xff] }
 0x399   : > { %v2827_v18 = vpop.permute.xlu0 %2826 }
 0x39a   : > { %v14899_v21 = vpop.permute.xlu1 %3927 }
 0x39b   : > { %20932 = vst [vmem:[#allocation26_spill] sm:$0xff] %v14899_v21 }
 0x39d   : > { %v14868_v29 = vpop.permute.xlu0 %3915 }
 0x39e   : > { %20924 = vst [vmem:[#allocation55_spill] sm:$0xff] %v14868_v29  ;;  %3963 = vxpose.xlu1.c.b16.start [1/8] (narrow) %v14868_v29, 16  ;;  %v14910_v46 = vpop.permute.xlu1 %3929 }
 0x39f   : > { %10045 = vmatpush3.bf16.xpose.msra.mxu1 %v2897_v26  ;;  %20935 = vst [vmem:[#allocation31_spill] sm:$0xff] %v14910_v46 }
 0x3a0   : > { %10398 = vmatprep.subr.msk.bf16.mxu1 %vm2838_vm7, %v2827_v18 }
 0x3a1   : > { %v14875_v37 = vpop.permute.xlu0 %3901 }
 0x3a2   : > { %20926 = vst [vmem:[#allocation61_spill] sm:$0xff] %v14875_v37  ;;  %3948 = vxpose.xlu0.c.b16.cont [2/8] (narrow) %v14875_v37, 16  ;;  %3964 = vxpose.xlu1.c.b16.cont [2/8] (narrow) %v14862_v11, 16 }
 0x3a5   : > { %v14881_v53 = vpop.permute.xlu0 %3903 }
 0x3a6   : > { %20928 = vst [vmem:[#allocation70_spill] sm:$0xff] %v14881_v53  ;;  %3949 = vxpose.xlu0.c.b16.cont [3/8] (narrow) %v14881_v53, 16  ;;  %3965 = vxpose.xlu1.c.b16.cont [3/8] (narrow) %v14866_v54, 16 }
 0x3a7   : > { %10047 = vmatpush3.bf16.xpose.msra.mxu1 %v2894_v48 }
 0x3a8   : > { %10399 = vmatprep.subr.msk.bf16.mxu1 %vm2838_vm7, %v2825_v13  ;;  %v20965_v13 = vld [vmem:[#allocation40_spill] sm:$0xff] }
 0x3a9   : > { %v14887_v20 = vpop.permute.xlu0 %3905 }
 0x3aa   : > { %20929 = vst [vmem:[#allocation48_spill] sm:$0xff] %v14887_v20  ;;  %3950 = vxpose.xlu0.c.b16.cont [4/8] (narrow) %v14887_v20, 16  ;;  %3966 = vxpose.xlu1.c.b16.cont [4/8] (narrow) %v14872_v25, 16 }
 0x3ad   : > { %v14893_v41 = vpop.permute.xlu0 %3907 }
 0x3ae   : > { %20931 = vst [vmem:[#allocation21_spill] sm:$0xff] %v14893_v41  ;;  %3951 = vxpose.xlu0.c.b16.cont [5/8] (narrow) %v14893_v41, 16  ;;  %3967 = vxpose.xlu1.c.b16.cont [5/8] (narrow) %v14879_v14, 16 }
 0x3af   : > { %10049 = vmatpush3.bf16.xpose.msra.mxu1 %v2891_v8 }
 0x3b0   : > { %10400 = vmatprep.subr.msk.bf16.mxu1 %vm2838_vm7, %v2823_v15  ;;  %v20961_v15 = vld [vmem:[#allocation49_spill] sm:$0xff] }
 0x3b1   : > { %v14901_v56 = vpop.permute.xlu0 %3909 }
 0x3b2   : > { %20933 = vst [vmem:[#allocation23_spill] sm:$0xff] %v14901_v56  ;;  %3952 = vxpose.xlu0.c.b16.cont [6/8] (narrow) %v14901_v56, 16  ;;  %3968 = vxpose.xlu1.c.b16.cont [6/8] (narrow) %v14891_v17, 16 }
 0x3b5   : > { %v14905_v61 = vpop.permute.xlu0 %3911 }
 0x3b6   : > { %20934 = vst [vmem:[#allocation28_spill] sm:$0xff] %v14905_v61  ;;  %3953 = vxpose.xlu0.c.b16.cont [7/8] (narrow) %v14905_v61, 16  ;;  %3969 = vxpose.xlu1.c.b16.cont [7/8] (narrow) %v14899_v21, 16 }
 0x3b7   : > { %10051 = vmatpush3.bf16.xpose.msra.mxu1 %v2888_v28 }
 0x3b8   : > { %10196 = vmatprep.subr.bf16.mxu1 %v14910_v46 }
 0x3b9   : > { %v14913_v33 = vpop.permute.xlu0 %3913 }
 0x3ba   : > { %20936 = vst [vmem:[#allocation33_spill] sm:$0xff] %v14913_v33  ;;  %3954 = vxpose.xlu0.c.b16.end [8/8] (narrow) %v14913_v33, 16  ;;  %3970 = vxpose.xlu1.c.b16.end [8/8] (narrow) %v14910_v46, 16 }
 0x3be   : > { %4331 = vrot.lane.b32.xlu1 %v20937_v62, %s12676_s30  ;;  %10053 = vmatmul.mubr.msk.bf16.vlgmr.msra.gmra.mxu1 %vm2838_vm7, %v20938_v59 }
 0x3bf   : > { %10054 = vmatprep.mubr.msk.bf16.mxu1 %vm2838_vm7, %v14607_v58  ;;  %10197 = vmatpush3.bf16.msra.mxu1 %v14913_v33 }
 0x3c0   : > { %10198 = vmatprep.subr.bf16.mxu1 %v14899_v21 }
 0x3c2   : > { %4333 = vrot.lane.b32.xlu1 %v20939_v12, %s12676_s30 }
 0x3c3   : > { %4329 = vrot.lane.b32.xlu0 %v20940_v51, %s12676_s30  ;;  %10199 = vmatpush3.bf16.msra.mxu1 %v14905_v61 }
 0x3c4   : > { %10200 = vmatprep.subr.bf16.mxu1 %v14891_v17 }
 0x3c6   : > { %4337 = vrot.lane.b32.xlu1 %v20941_v16, %s12676_s30  ;;  %10055 = vmatmul.mubr.msk.bf16.gmra.mxu1 %vm2838_vm7, %v14607_v58  ;;  %v20946_v58 = vld [vmem:[#allocation24_spill] sm:$0xff] }
 0x3c7   : > { %4335 = vrot.lane.b32.xlu0 %v20942_v5, %s12676_s30  ;;  %10056 = vmatprep.mubr.msk.bf16.mxu1 %vm2838_vm7, %v20943_v4 }
 0x3c8   : > { %10201 = vmatpush3.bf16.msra.mxu1 %v14901_v56 }
 0x3c9   : > { %10202 = vmatprep.subr.bf16.mxu1 %v14879_v14 }
 0x3ca   : > { %4341 = vrot.lane.b32.xlu1 %v20944_v2, %s12676_s30 }
 0x3cb   : > { %4339 = vrot.lane.b32.xlu0 %v20945_v6, %s12676_s30 }
 0x3cc   : > { %10203 = vmatpush3.bf16.msra.mxu1 %v14893_v41 }
 0x3cd   : > { %10204 = vmatprep.subr.bf16.mxu1 %v14872_v25 }
 0x3ce   : > { %4345 = vrot.lane.b32.xlu1 %v20946_v58, %s12676_s30  ;;  %10057 = vmatmul.mubr.msk.bf16.gmra.mxu1 %vm2838_vm7, %v20943_v4 }
 0x3cf   : > { %4343 = vrot.lane.b32.xlu0 %v20947_v23, %s12676_s30  ;;  %10058 = vmatprep.mubr.msk.bf16.mxu1 %vm2838_vm7, %v14630_v38 }
 0x3d0   : > { %10205 = vmatpush3.bf16.msra.mxu1 %v14887_v20 }
 0x3d1   : > { %10206 = vmatprep.subr.bf16.mxu1 %v14866_v54 }
 0x3d2   : > { %4349 = vrot.lane.b32.xlu1 %v20948_v39, %s12676_s30 }
 0x3d3   : > { %4347 = vrot.lane.b32.xlu0 %v20949_v60, %s12676_s30 }
 0x3d4   : > { %10207 = vmatpush3.bf16.msra.mxu1 %v14881_v53 }
 0x3d5   : > { %10208 = vmatprep.subr.bf16.mxu1 %v14862_v11 }
 0x3d6   : > { %4353 = vrot.lane.b32.xlu1 %v20950_v55, %s12676_s30  ;;  %10059 = vmatmul.mubr.msk.bf16.gmra.mxu1 %vm2838_vm7, %v14630_v38  ;;  %v20954_v38 = vld [vmem:[#allocation32_spill] sm:$0xff] }
 0x3d7   : > { %4351 = vrot.lane.b32.xlu0 %v20951_v57, %s12676_s30  ;;  %10060 = vmatprep.mubr.msk.bf16.mxu1 %vm2838_vm7, %v14780_v30 }
 0x3d8   : > { %10209 = vmatpush3.bf16.msra.mxu1 %v14875_v37 }
 0x3d9   : > { %10210 = vmatprep.subr.bf16.mxu1 %v14868_v29 }
 0x3da   : > { %4357 = vrot.lane.b32.xlu1 %v20952_v3, %s12676_s30 }
 0x3db   : > { %4355 = vrot.lane.b32.xlu0 %v20953_v7, %s12676_s30 }
 0x3dc   : > { %10211 = vmatpush3.bf16.msra.mxu1 %v14854_v36 }
 0x3de   : > { %4361 = vrot.lane.b32.xlu1 %v20954_v38, %s12676_s30  ;;  %10061 = vmatmul.mubr.msk.bf16.gmra.mxu1 %vm2838_vm7, %v14780_v30  ;;  %v20959_v30 = vld [vmem:[#allocation71_spill] sm:$0xff] }
 0x3df   : > { %4359 = vrot.lane.b32.xlu0 %v20955_v50, %s12676_s30  ;;  %10062 = vmatprep.mubr.msk.bf16.mxu1 %vm2838_vm7, %v14648_v35 }
 0x3e2   : > { %4365 = vrot.lane.b32.xlu1 %v20956_v0, %s12676_s30 }
 0x3e3   : > { %4363 = vrot.lane.b32.xlu0 %v20957_v42, %s12676_s30 }
 0x3e6   : > { %4369 = vrot.lane.b32.xlu1 %v20958_v22, %s12676_s30  ;;  %10063 = vmatmul.mubr.msk.bf16.gmra.mxu1 %vm2838_vm7, %v14648_v35  ;;  %v20964_v35 = vld [vmem:[#allocation50_spill] sm:$0xff] }
 0x3e7   : > { %4367 = vrot.lane.b32.xlu0 %v20959_v30, %s12676_s30  ;;  %10064 = vmatprep.mubr.msk.bf16.mxu1 %vm2838_vm7, %v20960_v19 }
 0x3ea   : > { %4373 = vrot.lane.b32.xlu1 %v20961_v15, %s12676_s30 }
 0x3eb   : > { %4371 = vrot.lane.b32.xlu0 %v20962_v45, %s12676_s30 }
 0x3ee   : > { %4377 = vrot.lane.b32.xlu1 %v20963_v52, %s12676_s30  ;;  %10065 = vmatmul.mubr.msk.bf16.gmra.mxu1 %vm2838_vm7, %v20960_v19 }
 0x3ef   : > { %4375 = vrot.lane.b32.xlu0 %v20964_v35, %s12676_s30  ;;  %10066 = vmatprep.mubr.msk.bf16.mxu1 %vm2838_vm7, %v20965_v13 }
 0x3f2   : > { %4381 = vrot.lane.b32.xlu1 %v20966_v43, %s12676_s30 }
 0x3f3   : > { %4379 = vrot.lane.b32.xlu0 %v20967_v49, %s12676_s30 }
 0x3f6   : > { %4385 = vrot.lane.b32.xlu1 %v20968_v10, %s12676_s30  ;;  %10067 = vmatmul.mubr.msk.bf16.gmra.mxu1 %vm2838_vm7, %v20965_v13 }
 0x3f7   : > { %4383 = vrot.lane.b32.xlu0 %v20969_v44, %s12676_s30  ;;  %10068 = vmatprep.mubr.msk.bf16.mxu1 %vm2838_vm7, %v20970_v31 }
 0x3fb   : > { %4387 = vrot.lane.b32.xlu0 %v20971_v40, %s12676_s30 }
 0x3fe   : > { %10069 = vmatmul.mubr.msk.bf16.gmra.mxu1 %vm2838_vm7, %v20970_v31 }
 0x3ff   : > { %10070 = vmatprep.mubr.msk.bf16.mxu1 %vm2838_vm7, %v14735_v1 }
 0x406   : > { %10071 = vmatmul.mubr.msk.bf16.gmra.mxu1 %vm2838_vm7, %v14735_v1  ;;  %v3971_v1 = vpop.trf.xlu1 }
 0x407   : > { %10072 = vmatprep.mubr.msk.bf16.mxu1 %vm2838_vm7, %v14828_v24 }
 0x40e   : > { %10073 = vmatmul.mubr.msk.bf16.gmra.mxu1 %vm2838_vm7, %v14828_v24 }
 0x40f   : > { %10074 = vmatprep.mubr.msk.bf16.mxu1 %vm2838_vm7, %v14811_v47 }
 0x416   : > { %10075 = vmatmul.mubr.msk.bf16.gmra.mxu1 %vm2838_vm7, %v14811_v47  ;;  %v3955_v47 = vpop.trf.xlu0 }
 0x417   : > { %10076 = vmatprep.mubr.msk.bf16.mxu1 %vm2838_vm7, %v20972_v27 }
 0x41e   : > { %10077 = vmatmul.mubr.msk.bf16.gmra.mxu1 %vm2838_vm7, %v20972_v27 }
 0x41f   : > { %10078 = vmatprep.mubr.msk.bf16.mxu1 %vm2838_vm7, %v20973_v63 }
 0x426   : > { %10079 = vmatmul.mubr.msk.bf16.gmra.mxu1 %vm2838_vm7, %v20973_v63 }
 0x427   : > { %10080 = vmatprep.mubr.msk.bf16.mxu1 %vm2838_vm7, %v14746_v9 }
 0x42e   : > { %10081 = vmatmul.mubr.msk.bf16.gmra.mxu1 %vm2838_vm7, %v14746_v9 }
 0x42f   : > { %10082 = vmatprep.mubr.msk.bf16.mxu1 %vm2838_vm7, %v14729_v34 }
 0x430   : > { %v15136_v33 = vpop.permute.xlu1 %4331 }
 0x431   : > { %20974 = vst [vmem:[#allocation63_spill] sm:$0xff] %v15136_v33 }
 0x434   : > { %v15150_v56 = vpop.permute.xlu1 %4333 }
 0x435   : > { %v15144_v52 = vpop.permute.xlu0 %4329  ;;  %20976 = vst [vmem:[#allocation42_spill] sm:$0xff] %v15150_v56 }
 0x436   : > { %10083 = vmatmul.mubr.msk.bf16.gmra.mxu1 %vm2838_vm7, %v14729_v34  ;;  %20975 = vst [vmem:[#allocation51_spill] sm:$0xff] %v15144_v52 }
 0x437   : > { %4011 = vmatprep.mubr.bf16.mxu1 %v3971_v1 }
 0x438   : > { %v15162_v52 = vpop.permute.xlu1 %4337 }
 0x439   : > { %v15158_v41 = vpop.permute.xlu0 %4335  ;;  %20978 = vst [vmem:[#allocation65_spill] sm:$0xff] %v15162_v52 }
 0x43a   : > { %20977 = vst [vmem:[#allocation40_spill] sm:$0xff] %v15158_v41 }
 0x43c   : > { %v15176_v53 = vpop.permute.xlu1 %4341 }
 0x43d   : > { %20980 = vst [vmem:[#allocation52_spill] sm:$0xff] %v15176_v53 }
 0x43e   : > { %4012 = vmatmul.mubr.bf16.vlgmr.msra.gmra.mxu1 %v3955_v47 }
 0x43f   : > { %10345 = vmatprep.mubr.msk.bf16.mxu1 %vm2388_vm6, %v14854_v36 }
 0x47e   : > { %v15056_v24 = vpop.f32.mrf.mxu1 }
 0x480   : > { %v15058_v32 = vpop.f32.mrf.mxu1 }
 0x481   : > { %v3128_v9 = vmax.f32 %v15056_v24, %v15058_v32 }
 0x482   : > { %v15062_v18 = vpop.f32.mrf.mxu1 }
 0x483   : > { %3129 = vmax.xlane.f32.xlu1 %v3128_v9 }
 0x484   : > { %v15064_v26 = vpop.f32.mrf.mxu1 }
 0x485   : > { %v3131_v34 = vmax.f32 %v15062_v18, %v15064_v26 }
 0x486   : > { %v15068_v48 = vpop.f32.mrf.mxu1 }
 0x487   : > { %3132 = vmax.xlane.f32.xlu0 %v3131_v34 }
 0x488   : > { %v15070_v8 = vpop.f32.mrf.mxu1 }
 0x489   : > { %v3134_v36 = vmax.f32 %v15068_v48, %v15070_v8 }
 0x48a   : > { %v15074_v28 = vpop.f32.mrf.mxu1 }
 0x48b   : > { %3135 = vmax.xlane.f32.xlu0 %v3134_v36 }
 0x48c   : > { %v15076_v59 = vpop.f32.mrf.mxu1 }
 0x48d   : > { %v3137_v4 = vmax.f32 %v15074_v28, %v15076_v59 }
 0x48e   : > { %v15080_v19 = vpop.f32.mrf.mxu1 }
 0x48f   : > { %3138 = vmax.xlane.f32.xlu1 %v3137_v4 }
 0x490   : > { %v15082_v13 = vpop.f32.mrf.mxu1 }
 0x491   : > { %v3140_v31 = vmax.f32 %v15080_v19, %v15082_v13 }
 0x492   : > { %v15086_v27 = vpop.f32.mrf.mxu1 }
 0x493   : > { %3141 = vmax.xlane.f32.xlu0 %v3140_v31 }
 0x494   : > { %v15088_v63 = vpop.f32.mrf.mxu1 }
 0x495   : > { %v3143_v1 = vmax.f32 %v15086_v27, %v15088_v63 }
 0x496   : > { %v15092_v47 = vpop.f32.mrf.mxu1 }
 0x497   : > { %3144 = vmax.xlane.f32.xlu1 %v3143_v1 }
 0x498   : > { %v15094_v9 = vpop.f32.mrf.mxu1 }
 0x499   : > { %v3146_v34 = vmax.f32 %v15092_v47, %v15094_v9 }
 0x49a   : > { %v15098_v36 = vpop.f32.mrf.mxu1 }
 0x49b   : > { %3147 = vmax.xlane.f32.xlu0 %v3146_v34 }
 0x49c   : > { %v15100_v4 = vpop.f32.mrf.mxu1 }
 0x49d   : > { %v3149_v31 = vmax.f32 %v15098_v36, %v15100_v4 }
 0x49e   : > { %v15104_v40 = vpop.f32.mrf.mxu1 }
 0x49f   : > { %3150 = vmax.xlane.f32.xlu1 %v3149_v31 }
 0x4a0   : > { %v15106_v10 = vpop.f32.mrf.mxu1 }
 0x4a1   : > { %v3152_v1 = vmax.f32 %v15104_v40, %v15106_v10 }
 0x4a2   : > { %v15110_v46 = vpop.f32.mrf.mxu1 }
 0x4a3   : > { %3153 = vmax.xlane.f32.xlu0 %v3152_v1 }
 0x4a4   : > { %v15112_v21 = vpop.f32.mrf.mxu1 }
 0x4a5   : > { %v3155_v34 = vmax.f32 %v15110_v46, %v15112_v21 }
 0x4a6   : > { %v15116_v17 = vpop.f32.mrf.mxu1 }
 0x4a7   : > { %3156 = vmax.xlane.f32.xlu1 %v3155_v34 }
 0x4a8   : > { %v15118_v14 = vpop.f32.mrf.mxu1 }
 0x4a9   : > { %v3158_v31 = vmax.f32 %v15116_v17, %v15118_v14 }
 0x4aa   : > { %v15122_v25 = vpop.f32.mrf.mxu1 }
 0x4ab   : > { %3159 = vmax.xlane.f32.xlu0 %v3158_v31 }
 0x4ac   : > { %v15124_v54 = vpop.f32.mrf.mxu1 }
 0x4ad   : > { %v3161_v1 = vmax.f32 %v15122_v25, %v15124_v54 }
 0x4ae   : > { %v15128_v11 = vpop.f32.mrf.mxu1 }
 0x4af   : > { %3162 = vmax.xlane.f32.xlu1 %v3161_v1 }
 0x4b0   : > { %v15130_v44 = vpop.f32.mrf.mxu1 }
 0x4b1   : > { %v3164_v34 = vmax.f32 %v15128_v11, %v15130_v44 }
 0x4b2   : > { %v15134_v29 = vpop.f32.mrf.mxu1 }
 0x4b3   : > { %3165 = vmax.xlane.f32.xlu0 %v3164_v34 }
 0x4b4   : > { %v15138_v43 = vpop.f32.mrf.mxu1 }
 0x4b5   : > { %v3167_v31 = vmax.f32 %v15134_v29, %v15138_v43 }
 0x4b6   : > { %v15142_v49 = vpop.f32.mrf.mxu1 }
 0x4b7   : > { %3168 = vmax.xlane.f32.xlu1 %v3167_v31 }
 0x4b8   : > { %v15146_v1 = vpop.f32.mrf.mxu1 }
 0x4b9   : > { %v3170_v61 = vmax.f32 %v15142_v49, %v15146_v1 }
 0x4ba   : > { %v15152_v34 = vpop.f32.mrf.mxu1 }
 0x4bb   : > { %3171 = vmax.xlane.f32.xlu0 %v3170_v61  ;;  %v15170_v61 = vpop.permute.xlu0 %4339 }
 0x4bc   : > { %v15154_v33 = vpop.f32.mrf.mxu1  ;;  %20979 = vst [vmem:[#allocation64_spill] sm:$0xff] %v15170_v61  ;;  %v15188_v61 = vpop.permute.xlu1 %4345 }
 0x4bd   : > { %v3173_v35 = vmax.f32 %v15152_v34, %v15154_v33  ;;  %20982 = vst [vmem:[#allocation73_spill] sm:$0xff] %v15188_v61 }
 0x4be   : > { %v15160_v31 = vpop.f32.mrf.mxu1 }
 0x4bf   : > { %3174 = vmax.xlane.f32.xlu1 %v3173_v35  ;;  %v15184_v37 = vpop.permute.xlu0 %4343 }
 0x4c0   : > { %v15164_v20 = vpop.f32.mrf.mxu1  ;;  %20981 = vst [vmem:[#allocation72_spill] sm:$0xff] %v15184_v37  ;;  %v15202_v38 = vpop.permute.xlu1 %4349 }
 0x4c1   : > { %v3176_v56 = vmax.f32 %v15160_v31, %v15164_v20  ;;  %20984 = vst [vmem:[#allocation75_spill] sm:$0xff] %v15202_v38 }
 0x4c2   : > { %v15168_v15 = vpop.f32.mrf.mxu1 }
 0x4c3   : > { %3177 = vmax.xlane.f32.xlu0 %v3176_v56 }
 0x4c4   : > { %v15172_v45 = vpop.f32.mrf.mxu1 }
 0x4c5   : > { %v3179_v41 = vmax.f32 %v15168_v15, %v15172_v45 }
 0x4c6   : > { %v15178_v35 = vpop.f32.mrf.mxu1 }
 0x4c7   : > { %3180 = vmax.xlane.f32.xlu1 %v3179_v41  ;;  %v15196_v41 = vpop.permute.xlu0 %4347 }
 0x4c8   : > { %v15180_v52 = vpop.f32.mrf.mxu1  ;;  %20983 = vst [vmem:[#allocation74_spill] sm:$0xff] %v15196_v41  ;;  %v15214_v41 = vpop.permute.xlu1 %4353 }
 0x4c9   : > { %v3182_v22 = vmax.f32 %v15178_v35, %v15180_v52  ;;  %20986 = vst [vmem:[#allocation77_spill] sm:$0xff] %v15214_v41 }
 0x4ca   : > { %v15186_v56 = vpop.f32.mrf.mxu1 }
 0x4cb   : > { %3183 = vmax.xlane.f32.xlu0 %v3182_v22  ;;  %v15210_v3 = vpop.permute.xlu0 %4351 }
 0x4cc   : > { %v15190_v30 = vpop.f32.mrf.mxu1  ;;  %20985 = vst [vmem:[#allocation76_spill] sm:$0xff] %v15210_v3  ;;  %v15228_v39 = vpop.permute.xlu1 %4357 }
 0x4cd   : > { %v3185_v53 = vmax.f32 %v15186_v56, %v15190_v30  ;;  %20988 = vst [vmem:[#allocation79_spill] sm:$0xff] %v15228_v39 }
 0x4ce   : > { %v15194_v0 = vpop.f32.mrf.mxu1 }
 0x4cf   : > { %3186 = vmax.xlane.f32.xlu1 %v3185_v53 }
 0x4d0   : > { %v15198_v42 = vpop.f32.mrf.mxu1 }
 0x4d1   : > { %v3188_v37 = vmax.f32 %v15194_v0, %v15198_v42 }
 0x4d2   : > { %v15204_v22 = vpop.f32.mrf.mxu1 }
 0x4d3   : > { %3189 = vmax.xlane.f32.xlu0 %v3188_v37  ;;  %v15222_v37 = vpop.permute.xlu0 %4355 }
 0x4d4   : > { %v15206_v61 = vpop.f32.mrf.mxu1  ;;  %20987 = vst [vmem:[#allocation78_spill] sm:$0xff] %v15222_v37  ;;  %v15240_v37 = vpop.permute.xlu1 %4361 }
 0x4d5   : > { %v3191_v50 = vmax.f32 %v15204_v22, %v15206_v61  ;;  %20990 = vst [vmem:[#allocation81_spill] sm:$0xff] %v15240_v37 }
 0x4d6   : > { %v15212_v53 = vpop.f32.mrf.mxu1 }
 0x4d7   : > { %3192 = vmax.xlane.f32.xlu1 %v3191_v50  ;;  %v15236_v60 = vpop.permute.xlu0 %4359 }
 0x4d8   : > { %v15216_v7 = vpop.f32.mrf.mxu1  ;;  %20989 = vst [vmem:[#allocation80_spill] sm:$0xff] %v15236_v60  ;;  %v15254_v16 = vpop.permute.xlu1 %4365 }
 0x4d9   : > { %v3194_v38 = vmax.f32 %v15212_v53, %v15216_v7  ;;  %20995 = vst [vmem:[#allocation86_spill] sm:$0xff] %v15254_v16 }
 0x4da   : > { %v15220_v55 = vpop.f32.mrf.mxu1 }
 0x4db   : > { %3195 = vmax.xlane.f32.xlu0 %v3194_v38 }
 0x4dc   : > { %v15224_v57 = vpop.f32.mrf.mxu1 }
 0x4dd   : > { %v3197_v3 = vmax.f32 %v15220_v55, %v15224_v57 }
 0x4de   : > { %v15230_v50 = vpop.f32.mrf.mxu1 }
 0x4df   : > { %3198 = vmax.xlane.f32.xlu1 %v3197_v3  ;;  %v15248_v3 = vpop.permute.xlu0 %4363 }
 0x4e0   : > { %v15232_v41 = vpop.f32.mrf.mxu1  ;;  %20993 = vst [vmem:[#allocation84_spill] sm:$0xff] %v15248_v3  ;;  %v15266_v3 = vpop.permute.xlu1 %4369 }
 0x4e1   : > { %v3200_v58 = vmax.f32 %v15230_v50, %v15232_v41  ;;  %21000 = vst [vmem:[#allocation91_spill] sm:$0xff] %v15266_v3 }
 0x4e2   : > { %v15238_v38 = vpop.f32.mrf.mxu1 }
 0x4e3   : > { %3201 = vmax.xlane.f32.xlu0 %v3200_v58  ;;  %v15262_v12 = vpop.permute.xlu0 %4367 }
 0x4e4   : > { %v15242_v23 = vpop.f32.mrf.mxu1  ;;  %20998 = vst [vmem:[#allocation89_spill] sm:$0xff] %v15262_v12 }
 0x4e5   : > { %20991 = vst [vmem:[#allocation82_spill] sm:$0xff] %v15242_v23  ;;  %v3203_v39 = vmax.f32 %v15238_v38, %v15242_v23 }
 0x4e6   : > { %v15246_v2 = vpop.f32.mrf.mxu1 }
 0x4e7   : > { %20992 = vst [vmem:[#allocation83_spill] sm:$0xff] %v15246_v2  ;;  %3204 = vmax.xlane.f32.xlu1 %v3203_v39 }
 0x4e8   : > { %v15250_v6 = vpop.f32.mrf.mxu1 }
 0x4e9   : > { %20994 = vst [vmem:[#allocation85_spill] sm:$0xff] %v15250_v6  ;;  %v3206_v60 = vmax.f32 %v15246_v2, %v15250_v6 }
 0x4ea   : > { %v15256_v58 = vpop.f32.mrf.mxu1 }
 0x4eb   : > { %20996 = vst [vmem:[#allocation87_spill] sm:$0xff] %v15256_v58  ;;  %3207 = vmax.xlane.f32.xlu0 %v3206_v60  ;;  %v15274_v60 = vpop.permute.xlu0 %4371 }
 0x4ec   : > { %v15258_v37 = vpop.f32.mrf.mxu1  ;;  %21003 = vst [vmem:[#allocation94_spill] sm:$0xff] %v15274_v60 }
 0x4ed   : > { %20997 = vst [vmem:[#allocation88_spill] sm:$0xff] %v15258_v37  ;;  %v3209_v5 = vmax.f32 %v15256_v58, %v15258_v37  ;;  %v15280_v37 = vpop.permute.xlu1 %4373 }
 0x4ee   : > { %v15264_v39 = vpop.f32.mrf.mxu1  ;;  %21005 = vst [vmem:[#allocation96_spill] sm:$0xff] %v15280_v37 }
 0x4ef   : > { %20999 = vst [vmem:[#allocation90_spill] sm:$0xff] %v15264_v39  ;;  %3210 = vmax.xlane.f32.xlu1 %v3209_v5 }
 0x4f0   : > { %v15268_v62 = vpop.f32.mrf.mxu1 }
 0x4f1   : > { %21001 = vst [vmem:[#allocation92_spill] sm:$0xff] %v15268_v62  ;;  %v3212_v16 = vmax.f32 %v15264_v39, %v15268_v62  ;;  %v15288_v39 = vpop.permute.xlu0 %4375  ;;  %v15292_v60 = vpop.permute.xlu1 %4377 }
 0x4f2   : > { %v15272_v51 = vpop.f32.mrf.mxu1  ;;  %21008 = vst [vmem:[#allocation99_spill] sm:$0xff] %v15288_v39  ;;  %21010 = vst [vmem:[#allocation101_spill] sm:$0xff] %v15292_v60 }
 0x4f3   : > { %21002 = vst [vmem:[#allocation93_spill] sm:$0xff] %v15272_v51  ;;  %3213 = vmax.xlane.f32.xlu0 %v3212_v16 }
 0x4f4   : > { %v15276_v6 = vpop.f32.mrf.mxu1 }
 0x4f5   : > { %21004 = vst [vmem:[#allocation95_spill] sm:$0xff] %v15276_v6  ;;  %v3215_v12 = vmax.f32 %v15272_v51, %v15276_v6 }
 0x4f6   : > { %v15282_v5 = vpop.f32.mrf.mxu1 }
 0x4f7   : > { %21006 = vst [vmem:[#allocation97_spill] sm:$0xff] %v15282_v5  ;;  %3216 = vmax.xlane.f32.xlu1 %v3215_v12  ;;  %v15298_v12 = vpop.permute.xlu0 %4379 }
 0x4f8   : > { %v15284_v3 = vpop.f32.mrf.mxu1  ;;  %21012 = vst [vmem:[#allocation103_spill] sm:$0xff] %v15298_v12 }
 0x4f9   : > { %21007 = vst [vmem:[#allocation98_spill] sm:$0xff] %v15284_v3  ;;  %v3218_v62 = vmax.f32 %v15282_v5, %v15284_v3  ;;  %v15302_v3 = vpop.permute.xlu1 %4381 }
 0x4fa   : > { %v15290_v16 = vpop.f32.mrf.mxu1  ;;  %21014 = vst [vmem:[#allocation105_spill] sm:$0xff] %v15302_v3 }
 0x4fb   : > { %21009 = vst [vmem:[#allocation100_spill] sm:$0xff] %v15290_v16  ;;  %3219 = vmax.xlane.f32.xlu0 %v3218_v62  ;;  %v15308_v23 = vpop.permute.xlu0 %4383 }
 0x4fc   : > { %v15294_v58 = vpop.f32.mrf.mxu1  ;;  %21016 = vst [vmem:[#allocation107_spill] sm:$0xff] %v15308_v23 }
 0x4fd   : > { %21011 = vst [vmem:[#allocation102_spill] sm:$0xff] %v15294_v58  ;;  %v3221_v37 = vmax.f32 %v15290_v16, %v15294_v58  ;;  %v15312_v58 = vpop.permute.xlu1 %4385 }
 0x4fe   : > { %v10212_v6 = vpop.f32.mrf.mxu1  ;;  %21017 = vst [vmem:[#allocation108_spill] sm:$0xff] %v15312_v58 }
 0x4ff   : > { %3222 = vmax.xlane.f32.xlu1 %v3221_v37 }
 0x500   : > { %v10213_v51 = vpop.f32.mrf.mxu1 }
 0x501   : > { %v15300_v2 = vadd.f32 %v10213_v51, %v10212_v6  ;;  %v15314_v51 = vpop.permute.xlu0 %4387 }
 0x502   : > { %v10215_v39 = vpop.f32.mrf.mxu1  ;;  %21018 = vst [vmem:[#allocation109_spill] sm:$0xff] %v15314_v51 }
 0x503   : > { %21013 = vst [vmem:[#allocation104_spill] sm:$0xff] %v15300_v2  ;;  %v4020_v62 = vsel %vm2388_vm6, %v15300_v2, -inf }
 0x504   : > { %v10216_v5 = vpop.f32.mrf.mxu1  ;;  %4021 = vmax.xlane.f32.xlu0 %v4020_v62 }
 0x505   : > { %v15306_v60 = vadd.f32 %v10216_v5, %v10215_v39 }
 0x507   : > { %21015 = vst [vmem:[#allocation106_spill] sm:$0xff] %v15306_v60  ;;  %v4023_v37 = vsel %vm2388_vm6, %v15306_v60, -inf }
 0x508   : > { %4024 = vmax.xlane.f32.xlu1 %v4023_v37 }
 0x50c   : > { %v3130_v6 = vpop.xlane.xlu1 %3129 }
 0x50d   : > { %v3224_v12 = vsub.f32 %v15056_v24, %v3130_v6  ;;  %v3225_v3 = vsub.f32 %v15058_v32, %v3130_v6 }
 0x50f   : > { %v3288_v16 = vmul.f32 1.442695, %v3224_v12  ;;  %v3290_v2 = vmul.f32 1.442695, %v3225_v3 }
 0x510   : > { %v3133_v62 = vpop.xlane.xlu0 %3132 }
 0x511   : > { %12387 = vpow2.f32 %v3288_v16  ;;  %v3226_v39 = vsub.f32 %v15062_v18, %v3133_v62  ;;  %v3227_v5 = vsub.f32 %v15064_v26, %v3133_v62 }
 0x512   : > { %12389 = vpow2.f32 %v3290_v2 }
 0x513   : > { %v3292_v23 = vmul.f32 1.442695, %v3226_v39  ;;  %v3294_v60 = vmul.f32 1.442695, %v3227_v5 }
 0x514   : > { %v3136_v58 = vpop.xlane.xlu0 %3135 }
 0x515   : > { %12391 = vpow2.f32 %v3292_v23  ;;  %v3228_v37 = vsub.f32 %v15068_v48, %v3136_v58  ;;  %v3229_v51 = vsub.f32 %v15070_v8, %v3136_v58 }
 0x516   : > { %12393 = vpow2.f32 %v3294_v60 }
 0x517   : > { %v3296_v24 = vmul.f32 1.442695, %v3228_v37  ;;  %v3298_v32 = vmul.f32 1.442695, %v3229_v51 }
 0x518   : > { %v3139_v12 = vpop.xlane.xlu1 %3138 }
 0x519   : > { %12395 = vpow2.f32 %v3296_v24  ;;  %v3230_v3 = vsub.f32 %v15074_v28, %v3139_v12  ;;  %v3231_v18 = vsub.f32 %v15076_v59, %v3139_v12 }
 0x51a   : > { %12397 = vpow2.f32 %v3298_v32 }
 0x51b   : > { %v3300_v26 = vmul.f32 1.442695, %v3230_v3  ;;  %v3302_v2 = vmul.f32 1.442695, %v3231_v18 }
 0x51c   : > { %v3142_v16 = vpop.xlane.xlu0 %3141 }
 0x51d   : > { %12399 = vpow2.f32 %v3300_v26  ;;  %v3232_v23 = vsub.f32 %v15080_v19, %v3142_v16  ;;  %v3233_v48 = vsub.f32 %v15082_v13, %v3142_v16 }
 0x51e   : > { %v15326_v6 = vpop.eup %12387  ;;  %12401 = vpow2.f32 %v3302_v2 }
 0x51f   : > { %v15328_v8 = vpop.eup %12389  ;;  %v3304_v58 = vmul.f32 1.442695, %v3232_v23  ;;  %v3306_v60 = vmul.f32 1.442695, %v3233_v48 }
 0x520   : > { %v3145_v51 = vpop.xlane.xlu1 %3144  ;;  %v3416_v28 = vadd.f32 %v15328_v8, %v15326_v6 }
 0x521   : > { %12403 = vpow2.f32 %v3304_v58  ;;  %v3234_v59 = vsub.f32 %v15086_v27, %v3145_v51  ;;  %v3235_v62 = vsub.f32 %v15088_v63, %v3145_v51 }
 0x522   : > { %v15334_v39 = vpop.eup %12391  ;;  %12405 = vpow2.f32 %v3306_v60  ;;  %3417 = vadd.xlane.f32.xlu0 %v3416_v28 }
 0x523   : > { %v15336_v19 = vpop.eup %12393  ;;  %v3308_v13 = vmul.f32 1.442695, %v3234_v59  ;;  %v3310_v5 = vmul.f32 1.442695, %v3235_v62 }
 0x524   : > { %v3148_v37 = vpop.xlane.xlu0 %3147  ;;  %v3419_v24 = vadd.f32 %v15336_v19, %v15334_v39 }
 0x525   : > { %12407 = vpow2.f32 %v3308_v13  ;;  %v3236_v32 = vsub.f32 %v15092_v47, %v3148_v37  ;;  %v3237_v12 = vsub.f32 %v15094_v9, %v3148_v37 }
 0x526   : > { %v15342_v27 = vpop.eup %12395  ;;  %12409 = vpow2.f32 %v3310_v5  ;;  %3420 = vadd.xlane.f32.xlu1 %v3419_v24 }
 0x527   : > { %v15344_v63 = vpop.eup %12397  ;;  %v3312_v3 = vmul.f32 1.442695, %v3236_v32  ;;  %v3314_v18 = vmul.f32 1.442695, %v3237_v12 }
 0x528   : > { %v3151_v26 = vpop.xlane.xlu1 %3150  ;;  %v3422_v2 = vadd.f32 %v15344_v63, %v15342_v27 }
 0x529   : > { %12411 = vpow2.f32 %v3312_v3  ;;  %v3238_v16 = vsub.f32 %v15098_v36, %v3151_v26  ;;  %v3239_v23 = vsub.f32 %v15100_v4, %v3151_v26 }
 0x52a   : > { %v15350_v47 = vpop.eup %12399  ;;  %12413 = vpow2.f32 %v3314_v18  ;;  %3423 = vadd.xlane.f32.xlu0 %v3422_v2 }
 0x52b   : > { %v15352_v9 = vpop.eup %12401  ;;  %v3316_v48 = vmul.f32 1.442695, %v3238_v16  ;;  %v3318_v58 = vmul.f32 1.442695, %v3239_v23 }
 0x52c   : > { %v3154_v60 = vpop.xlane.xlu0 %3153  ;;  %v3425_v51 = vadd.f32 %v15352_v9, %v15350_v47 }
 0x52d   : > { %12415 = vpow2.f32 %v3316_v48  ;;  %v3240_v28 = vsub.f32 %v15104_v40, %v3154_v60  ;;  %v3241_v59 = vsub.f32 %v15106_v10, %v3154_v60 }
 0x52e   : > { %v15358_v36 = vpop.eup %12403  ;;  %12417 = vpow2.f32 %v3318_v58  ;;  %3426 = vadd.xlane.f32.xlu1 %v3425_v51 }
 0x52f   : > { %v15360_v4 = vpop.eup %12405  ;;  %v3320_v62 = vmul.f32 1.442695, %v3240_v28  ;;  %v3322_v13 = vmul.f32 1.442695, %v3241_v59 }
 0x530   : > { %v3157_v5 = vpop.xlane.xlu1 %3156  ;;  %v3428_v37 = vadd.f32 %v15360_v4, %v15358_v36 }
 0x531   : > { %12419 = vpow2.f32 %v3320_v62  ;;  %v3242_v24 = vsub.f32 %v15110_v46, %v3157_v5  ;;  %v3243_v32 = vsub.f32 %v15112_v21, %v3157_v5 }
 0x532   : > { %v15366_v40 = vpop.eup %12407  ;;  %12421 = vpow2.f32 %v3322_v13  ;;  %3429 = vadd.xlane.f32.xlu0 %v3428_v37 }
 0x533   : > { %v15368_v10 = vpop.eup %12409  ;;  %v3324_v12 = vmul.f32 1.442695, %v3242_v24  ;;  %v3326_v3 = vmul.f32 1.442695, %v3243_v32 }
 0x534   : > { %v3160_v18 = vpop.xlane.xlu0 %3159  ;;  %v3431_v26 = vadd.f32 %v15368_v10, %v15366_v40 }
 0x535   : > { %12423 = vpow2.f32 %v3324_v12  ;;  %v3244_v2 = vsub.f32 %v15116_v17, %v3160_v18  ;;  %v3245_v16 = vsub.f32 %v15118_v14, %v3160_v18 }
 0x536   : > { %v15374_v46 = vpop.eup %12411  ;;  %12425 = vpow2.f32 %v3326_v3  ;;  %3432 = vadd.xlane.f32.xlu1 %v3431_v26 }
 0x537   : > { %v15376_v21 = vpop.eup %12413  ;;  %v3328_v23 = vmul.f32 1.442695, %v3244_v2  ;;  %v3330_v48 = vmul.f32 1.442695, %v3245_v16 }
 0x538   : > { %v3163_v58 = vpop.xlane.xlu1 %3162  ;;  %v3434_v60 = vadd.f32 %v15376_v21, %v15374_v46 }
 0x539   : > { %12427 = vpow2.f32 %v3328_v23  ;;  %v3246_v51 = vsub.f32 %v15122_v25, %v3163_v58  ;;  %v3247_v28 = vsub.f32 %v15124_v54, %v3163_v58 }
 0x53a   : > { %v15382_v17 = vpop.eup %12415  ;;  %12429 = vpow2.f32 %v3330_v48  ;;  %3435 = vadd.xlane.f32.xlu0 %v3434_v60 }
 0x53b   : > { %v15384_v14 = vpop.eup %12417  ;;  %v3332_v59 = vmul.f32 1.442695, %v3246_v51  ;;  %v3334_v62 = vmul.f32 1.442695, %v3247_v28 }
 0x53c   : > { %v3166_v13 = vpop.xlane.xlu0 %3165  ;;  %v3437_v5 = vadd.f32 %v15384_v14, %v15382_v17 }
 0x53d   : > { %12431 = vpow2.f32 %v3332_v59  ;;  %v3248_v37 = vsub.f32 %v15128_v11, %v3166_v13  ;;  %v3249_v24 = vsub.f32 %v15130_v44, %v3166_v13 }
 0x53e   : > { %v15390_v25 = vpop.eup %12419  ;;  %12433 = vpow2.f32 %v3334_v62  ;;  %3438 = vadd.xlane.f32.xlu1 %v3437_v5 }
 0x53f   : > { %v15392_v54 = vpop.eup %12421  ;;  %v3336_v32 = vmul.f32 1.442695, %v3248_v37  ;;  %v3338_v12 = vmul.f32 1.442695, %v3249_v24 }
 0x540   : > { %v3169_v3 = vpop.xlane.xlu1 %3168  ;;  %v3440_v18 = vadd.f32 %v15392_v54, %v15390_v25 }
 0x541   : > { %12435 = vpow2.f32 %v3336_v32  ;;  %v3250_v26 = vsub.f32 %v15134_v29, %v3169_v3  ;;  %v3251_v2 = vsub.f32 %v15138_v43, %v3169_v3 }
 0x542   : > { %v15398_v11 = vpop.eup %12423  ;;  %12437 = vpow2.f32 %v3338_v12  ;;  %3441 = vadd.xlane.f32.xlu0 %v3440_v18 }
 0x543   : > { %v15400_v44 = vpop.eup %12425  ;;  %v3340_v16 = vmul.f32 1.442695, %v3250_v26  ;;  %v3342_v23 = vmul.f32 1.442695, %v3251_v2 }
 0x544   : > { %v3172_v48 = vpop.xlane.xlu0 %3171  ;;  %v3443_v58 = vadd.f32 %v15400_v44, %v15398_v11 }
 0x545   : > { %12439 = vpow2.f32 %v3340_v16  ;;  %v3252_v60 = vsub.f32 %v15142_v49, %v3172_v48  ;;  %v3253_v51 = vsub.f32 %v15146_v1, %v3172_v48 }
 0x546   : > { %v15406_v29 = vpop.eup %12427  ;;  %12441 = vpow2.f32 %v3342_v23  ;;  %3444 = vadd.xlane.f32.xlu1 %v3443_v58 }
 0x547   : > { %v15408_v43 = vpop.eup %12429  ;;  %v3344_v28 = vmul.f32 1.442695, %v3252_v60  ;;  %v3346_v59 = vmul.f32 1.442695, %v3253_v51 }
 0x548   : > { %v3175_v62 = vpop.xlane.xlu1 %3174  ;;  %v3446_v13 = vadd.f32 %v15408_v43, %v15406_v29 }
 0x549   : > { %12443 = vpow2.f32 %v3344_v28  ;;  %v3254_v5 = vsub.f32 %v15152_v34, %v3175_v62  ;;  %v3255_v37 = vsub.f32 %v15154_v33, %v3175_v62 }
 0x54a   : > { %v15414_v49 = vpop.eup %12431  ;;  %12445 = vpow2.f32 %v3346_v59  ;;  %3447 = vadd.xlane.f32.xlu0 %v3446_v13 }
 0x54b   : > { %v15416_v1 = vpop.eup %12433  ;;  %v3348_v24 = vmul.f32 1.442695, %v3254_v5  ;;  %v3350_v32 = vmul.f32 1.442695, %v3255_v37 }
 0x54c   : > { %v3178_v12 = vpop.xlane.xlu0 %3177  ;;  %v3449_v3 = vadd.f32 %v15416_v1, %v15414_v49 }
 0x54d   : > { %12447 = vpow2.f32 %v3348_v24  ;;  %v3256_v18 = vsub.f32 %v15160_v31, %v3178_v12  ;;  %v3257_v26 = vsub.f32 %v15164_v20, %v3178_v12 }
 0x54e   : > { %v15422_v34 = vpop.eup %12435  ;;  %12449 = vpow2.f32 %v3350_v32  ;;  %3450 = vadd.xlane.f32.xlu1 %v3449_v3 }
 0x54f   : > { %v15424_v33 = vpop.eup %12437  ;;  %v3352_v2 = vmul.f32 1.442695, %v3256_v18  ;;  %v3354_v16 = vmul.f32 1.442695, %v3257_v26 }
 0x550   : > { %v3181_v23 = vpop.xlane.xlu1 %3180  ;;  %v3452_v48 = vadd.f32 %v15424_v33, %v15422_v34 }
 0x551   : > { %12451 = vpow2.f32 %v3352_v2  ;;  %v3258_v58 = vsub.f32 %v15168_v15, %v3181_v23  ;;  %v3259_v60 = vsub.f32 %v15172_v45, %v3181_v23 }
 0x552   : > { %v15430_v31 = vpop.eup %12439  ;;  %12453 = vpow2.f32 %v3354_v16  ;;  %3453 = vadd.xlane.f32.xlu1 %v3452_v48 }
 0x553   : > { %v15432_v20 = vpop.eup %12441  ;;  %v3356_v51 = vmul.f32 1.442695, %v3258_v58  ;;  %v3358_v28 = vmul.f32 1.442695, %v3259_v60 }
 0x554   : > { %v3184_v59 = vpop.xlane.xlu0 %3183  ;;  %v3455_v62 = vadd.f32 %v15432_v20, %v15430_v31 }
 0x555   : > { %12455 = vpow2.f32 %v3356_v51  ;;  %v3260_v13 = vsub.f32 %v15178_v35, %v3184_v59  ;;  %v3261_v5 = vsub.f32 %v15180_v52, %v3184_v59 }
 0x556   : > { %v15438_v15 = vpop.eup %12443  ;;  %12457 = vpow2.f32 %v3358_v28  ;;  %3456 = vadd.xlane.f32.xlu0 %v3455_v62 }
 0x557   : > { %v15440_v45 = vpop.eup %12445  ;;  %v3360_v37 = vmul.f32 1.442695, %v3260_v13  ;;  %v3362_v24 = vmul.f32 1.442695, %v3261_v5 }
 0x558   : > { %v3187_v32 = vpop.xlane.xlu1 %3186  ;;  %v3458_v12 = vadd.f32 %v15440_v45, %v15438_v15 }
 0x559   : > { %12459 = vpow2.f32 %v3360_v37  ;;  %v3262_v3 = vsub.f32 %v15186_v56, %v3187_v32  ;;  %v3263_v18 = vsub.f32 %v15190_v30, %v3187_v32 }
 0x55a   : > { %v15446_v35 = vpop.eup %12447  ;;  %12461 = vpow2.f32 %v3362_v24  ;;  %3459 = vadd.xlane.f32.xlu0 %v3458_v12 }
 0x55b   : > { %v15448_v52 = vpop.eup %12449  ;;  %v3364_v26 = vmul.f32 1.442695, %v3262_v3  ;;  %v3366_v2 = vmul.f32 1.442695, %v3263_v18 }
 0x55c   : > { %v3190_v16 = vpop.xlane.xlu0 %3189  ;;  %v3461_v23 = vadd.f32 %v15448_v52, %v15446_v35 }
 0x55d   : > { %12463 = vpow2.f32 %v3364_v26  ;;  %v3264_v48 = vsub.f32 %v15194_v0, %v3190_v16  ;;  %v3265_v58 = vsub.f32 %v15198_v42, %v3190_v16 }
 0x55e   : > { %v15454_v56 = vpop.eup %12451  ;;  %12465 = vpow2.f32 %v3366_v2  ;;  %3462 = vadd.xlane.f32.xlu1 %v3461_v23 }
 0x55f   : > { %v15456_v30 = vpop.eup %12453  ;;  %v3368_v60 = vmul.f32 1.442695, %v3264_v48  ;;  %v3370_v51 = vmul.f32 1.442695, %v3265_v58 }
 0x560   : > { %v3193_v28 = vpop.xlane.xlu1 %3192  ;;  %v3464_v59 = vadd.f32 %v15456_v30, %v15454_v56 }
 0x561   : > { %12467 = vpow2.f32 %v3368_v60  ;;  %v3266_v62 = vsub.f32 %v15204_v22, %v3193_v28  ;;  %v3267_v13 = vsub.f32 %v15206_v61, %v3193_v28 }
 0x562   : > { %v15462_v0 = vpop.eup %12455  ;;  %12469 = vpow2.f32 %v3370_v51  ;;  %3465 = vadd.xlane.f32.xlu0 %v3464_v59 }
 0x563   : > { %v15464_v42 = vpop.eup %12457  ;;  %v3372_v5 = vmul.f32 1.442695, %v3266_v62  ;;  %v3374_v37 = vmul.f32 1.442695, %v3267_v13 }
 0x564   : > { %v3196_v24 = vpop.xlane.xlu0 %3195  ;;  %v3467_v32 = vadd.f32 %v15464_v42, %v15462_v0 }
 0x565   : > { %12471 = vpow2.f32 %v3372_v5  ;;  %v3268_v12 = vsub.f32 %v15212_v53, %v3196_v24  ;;  %v3269_v3 = vsub.f32 %v15216_v7, %v3196_v24 }
 0x566   : > { %v15470_v22 = vpop.eup %12459  ;;  %12473 = vpow2.f32 %v3374_v37  ;;  %3468 = vadd.xlane.f32.xlu1 %v3467_v32 }
 0x567   : > { %v15472_v61 = vpop.eup %12461  ;;  %v3376_v18 = vmul.f32 1.442695, %v3268_v12  ;;  %v3378_v26 = vmul.f32 1.442695, %v3269_v3  ;;  %v21019_v12 = vld [vmem:[#allocation82_spill] sm:$0xff] }
 0x568   : > { %v3199_v2 = vpop.xlane.xlu1 %3198  ;;  %v3470_v16 = vadd.f32 %v15472_v61, %v15470_v22 }
 0x569   : > { %12475 = vpow2.f32 %v3376_v18  ;;  %v3270_v23 = vsub.f32 %v15220_v55, %v3199_v2  ;;  %v3271_v48 = vsub.f32 %v15224_v57, %v3199_v2 }
 0x56a   : > { %v15478_v53 = vpop.eup %12463  ;;  %12477 = vpow2.f32 %v3378_v26  ;;  %3471 = vadd.xlane.f32.xlu0 %v3470_v16 }
 0x56b   : > { %v15480_v7 = vpop.eup %12465  ;;  %v3380_v58 = vmul.f32 1.442695, %v3270_v23  ;;  %v3382_v60 = vmul.f32 1.442695, %v3271_v48  ;;  %v21020_v23 = vld [vmem:[#allocation83_spill] sm:$0xff] }
 0x56c   : > { %v3202_v51 = vpop.xlane.xlu0 %3201  ;;  %v3473_v28 = vadd.f32 %v15480_v7, %v15478_v53 }
 0x56d   : > { %12479 = vpow2.f32 %v3380_v58  ;;  %v3272_v59 = vsub.f32 %v15230_v50, %v3202_v51  ;;  %v3273_v62 = vsub.f32 %v15232_v41, %v3202_v51  ;;  %v21021_v58 = vld [vmem:[#allocation85_spill] sm:$0xff] }
 0x56e   : > { %v15486_v55 = vpop.eup %12467  ;;  %12481 = vpow2.f32 %v3382_v60  ;;  %3474 = vadd.xlane.f32.xlu1 %v3473_v28 }
 0x56f   : > { %v15488_v57 = vpop.eup %12469  ;;  %v3384_v13 = vmul.f32 1.442695, %v3272_v59  ;;  %v3386_v5 = vmul.f32 1.442695, %v3273_v62 }
 0x570   : > { %v3205_v37 = vpop.xlane.xlu1 %3204  ;;  %v3476_v24 = vadd.f32 %v15488_v57, %v15486_v55 }
 0x571   : > { %12483 = vpow2.f32 %v3384_v13  ;;  %v3274_v32 = vsub.f32 %v15238_v38, %v3205_v37  ;;  %v3275_v3 = vsub.f32 %v21019_v12, %v3205_v37 }
 0x572   : > { %v15494_v50 = vpop.eup %12471  ;;  %12485 = vpow2.f32 %v3386_v5  ;;  %3477 = vadd.xlane.f32.xlu0 %v3476_v24  ;;  %v21023_v5 = vld [vmem:[#allocation87_spill] sm:$0xff]  ;;  %v21024_v24 = vld [vmem:[#allocation88_spill] sm:$0xff] }
 0x573   : > { %v15496_v41 = vpop.eup %12473  ;;  %v3388_v18 = vmul.f32 1.442695, %v3274_v32  ;;  %v3390_v26 = vmul.f32 1.442695, %v3275_v3 }
 0x574   : > { %v3208_v2 = vpop.xlane.xlu0 %3207  ;;  %v3479_v16 = vadd.f32 %v15496_v41, %v15494_v50 }
 0x575   : > { %12487 = vpow2.f32 %v3388_v18  ;;  %v3276_v48 = vsub.f32 %v21020_v23, %v3208_v2  ;;  %v3277_v60 = vsub.f32 %v21021_v58, %v3208_v2  ;;  %v21026_v23 = vld [vmem:[#allocation90_spill] sm:$0xff]  ;;  %v21027_v58 = vld [vmem:[#allocation92_spill] sm:$0xff] }
 0x576   : > { %v15502_v38 = vpop.eup %12475  ;;  %12489 = vpow2.f32 %v3390_v26  ;;  %3480 = vadd.xlane.f32.xlu1 %v3479_v16 }
 0x577   : > { %21022 = vst [vmem:[#allocation82_spill] sm:$0xff] %v15502_v38  ;;  %v15504_v51 = vpop.eup %12477  ;;  %v3392_v28 = vmul.f32 1.442695, %v3276_v48  ;;  %v3394_v59 = vmul.f32 1.442695, %v3277_v60 }
 0x578   : > { %v3211_v62 = vpop.xlane.xlu1 %3210  ;;  %v3482_v13 = vadd.f32 %v15504_v51, %v15502_v38 }
 0x579   : > { %12491 = vpow2.f32 %v3392_v28  ;;  %v3278_v37 = vsub.f32 %v21023_v5, %v3211_v62  ;;  %v3279_v32 = vsub.f32 %v21024_v24, %v3211_v62  ;;  %v21030_v24 = vld [vmem:[#allocation93_spill] sm:$0xff] }
 0x57a   : > { %v15510_v12 = vpop.eup %12479  ;;  %12493 = vpow2.f32 %v3394_v59  ;;  %3483 = vadd.xlane.f32.xlu0 %v3482_v13 }
 0x57b   : > { %21025 = vst [vmem:[#allocation83_spill] sm:$0xff] %v15510_v12  ;;  %v15512_v3 = vpop.eup %12481  ;;  %v3396_v18 = vmul.f32 1.442695, %v3278_v37  ;;  %v3398_v26 = vmul.f32 1.442695, %v3279_v32 }
 0x57c   : > { %v3214_v2 = vpop.xlane.xlu0 %3213  ;;  %v3485_v16 = vadd.f32 %v15512_v3, %v15510_v12 }
 0x57d   : > { %12495 = vpow2.f32 %v3396_v18  ;;  %v3280_v48 = vsub.f32 %v21026_v23, %v3214_v2  ;;  %v3281_v60 = vsub.f32 %v21027_v58, %v3214_v2  ;;  %v21031_v18 = vld [vmem:[#allocation95_spill] sm:$0xff] }
 0x57e   : > { %v15518_v28 = vpop.eup %12483  ;;  %12497 = vpow2.f32 %v3398_v26  ;;  %3486 = vadd.xlane.f32.xlu1 %v3485_v16 }
 0x57f   : > { %21028 = vst [vmem:[#allocation85_spill] sm:$0xff] %v15518_v28  ;;  %v15520_v62 = vpop.eup %12485  ;;  %v3400_v59 = vmul.f32 1.442695, %v3280_v48  ;;  %v3402_v13 = vmul.f32 1.442695, %v3281_v60 }
 0x580   : > { %21029 = vst [vmem:[#allocation87_spill] sm:$0xff] %v15520_v62  ;;  %v3217_v5 = vpop.xlane.xlu1 %3216  ;;  %v3488_v37 = vadd.f32 %v15520_v62, %v15518_v28 }
 0x581   : > { %12499 = vpow2.f32 %v3400_v59  ;;  %v3282_v32 = vsub.f32 %v21030_v24, %v3217_v5  ;;  %v3283_v12 = vsub.f32 %v21031_v18, %v3217_v5 }
 0x582   : > { %v15526_v23 = vpop.eup %12487  ;;  %12501 = vpow2.f32 %v3402_v13  ;;  %3489 = vadd.xlane.f32.xlu0 %v3488_v37 }
 0x583   : > { %21032 = vst [vmem:[#allocation88_spill] sm:$0xff] %v15526_v23  ;;  %v15528_v2 = vpop.eup %12489  ;;  %v3404_v26 = vmul.f32 1.442695, %v3282_v32  ;;  %v3406_v16 = vmul.f32 1.442695, %v3283_v12 }
 0x584   : > { %21033 = vst [vmem:[#allocation90_spill] sm:$0xff] %v15528_v2  ;;  %v3491_v48 = vadd.f32 %v15528_v2, %v15526_v23  ;;  %v3220_v13 = vpop.xlane.xlu0 %3219 }
 0x585   : > { %12503 = vpow2.f32 %v3404_v26 }
 0x586   : > { %v15532_v58 = vpop.eup %12491  ;;  %12505 = vpow2.f32 %v3406_v16  ;;  %3492 = vadd.xlane.f32.xlu1 %v3491_v48  ;;  %v21040_v48 = vld [vmem:[#allocation104_spill] sm:$0xff] }
 0x587   : > { %21034 = vst [vmem:[#allocation92_spill] sm:$0xff] %v15532_v58  ;;  %v15534_v60 = vpop.eup %12493 }
 0x588   : > { %21035 = vst [vmem:[#allocation93_spill] sm:$0xff] %v15534_v60  ;;  %v3494_v59 = vadd.f32 %v15534_v60, %v15532_v58  ;;  %v3223_v32 = vpop.xlane.xlu1 %3222 }
 0x58a   : > { %v15538_v5 = vpop.eup %12495  ;;  %3495 = vadd.xlane.f32.xlu0 %v3494_v59 }
 0x58b   : > { %21036 = vst [vmem:[#allocation95_spill] sm:$0xff] %v15538_v5  ;;  %v15540_v37 = vpop.eup %12497 }
 0x58c   : > { %21037 = vst [vmem:[#allocation110_spill] sm:$0xff] %v15540_v37  ;;  %v3497_v12 = vadd.f32 %v15540_v37, %v15538_v5  ;;  %v21044_v37 = vld [vmem:[#allocation106_spill] sm:$0xff] }
 0x58d   : > { %v4022_v18 = vpop.xlane.xlu0 %4021 }
 0x58e   : > { %v15544_v24 = vpop.eup %12499  ;;  %3498 = vadd.xlane.f32.xlu1 %v3497_v12  ;;  %v15551_v58 = vsub.f32 %v4022_v18, %v21040_v48 }
 0x58f   : > { %21038 = vst [vmem:[#allocation111_spill] sm:$0xff] %v15544_v24  ;;  %v15546_v26 = vpop.eup %12501 }
 0x590   : > { %21039 = vst [vmem:[#allocation112_spill] sm:$0xff] %v15546_v26  ;;  %v3500_v16 = vadd.f32 %v15546_v26, %v15544_v24  ;;  %21041 = vst [vmem:[#allocation104_spill] sm:$0xff] %v15551_v58  ;;  %v4028_v12 = vsel %vm2388_vm6, %v15551_v58, -inf  ;;  %v21047_v24 = vld [vmem:[#allocation47_spill] sm:$0xff]  ;;  %v21050_v58 = vld [vmem:[#allocation100_spill] sm:$0xff] }
 0x591   : > { %v4025_v59 = vpop.xlane.xlu1 %4024  ;;  %v3286_v2 = vsub.f32 %v21050_v58, %v3223_v32 }
 0x592   : > { %v15553_v60 = vpop.eup %12503  ;;  %3501 = vadd.xlane.f32.xlu0 %v3500_v16  ;;  %v15560_v28 = vsub.f32 %v4025_v59, %v21044_v37  ;;  %v21046_v16 = vld [vmem:[#allocation39_spill] sm:$0xff] }
 0x593   : > { %21042 = vst [vmem:[#allocation113_spill] sm:$0xff] %v15553_v60  ;;  %v15555_v23 = vpop.eup %12505  ;;  %v3412_v38 = vmul.f32 1.442695, %v3286_v2 }
 0x594   : > { %21043 = vst [vmem:[#allocation114_spill] sm:$0xff] %v15555_v23  ;;  %v3503_v5 = vadd.f32 %v15555_v23, %v15553_v60  ;;  %21045 = vst [vmem:[#allocation106_spill] sm:$0xff] %v15560_v28  ;;  %v4031_v18 = vsel %vm2388_vm6, %v15560_v28, -inf  ;;  %v21048_v60 = vld [vmem:[#allocation97_spill] sm:$0xff]  ;;  %v21049_v23 = vld [vmem:[#allocation98_spill] sm:$0xff] }
 0x595   : > { %v3284_v37 = vsub.f32 %v21048_v60, %v3220_v13  ;;  %v3285_v26 = vsub.f32 %v21049_v23, %v3220_v13 }
 0x596   : > { %4029 = vmax.xlane.f32.xlu0 %v4028_v12  ;;  %3504 = vadd.xlane.f32.xlu1 %v3503_v5 }
 0x597   : > { %v3408_v12 = vmul.f32 1.442695, %v3284_v37  ;;  %v3410_v28 = vmul.f32 1.442695, %v3285_v26 }
 0x59a   : > { %4032 = vmax.xlane.f32.xlu1 %v4031_v18  ;;  %v21051_v18 = vld [vmem:[#allocation102_spill] sm:$0xff] }
 0x59b   : > { %v3287_v62 = vsub.f32 %v21051_v18, %v3223_v32 }
 0x5ab   : > { %v3418_v48 = vpop.xlane.xlu0 %3417  ;;  %4389 = vrot.lane.b32.xlu1 %v21046_v16, %s12676_s30 }
 0x5ac   : > { %4391 = vrot.lane.b32.xlu0 %v21047_v24, %s12676_s30  ;;  %12507 = vrcp.f32 %v3418_v48  ;;  %v3414_v48 = vmul.f32 1.442695, %v3287_v62 }
 0x5af   : > { %v3421_v59 = vpop.xlane.xlu1 %3420 }
 0x5b0   : > { %12509 = vrcp.f32 %v3421_v59 }
 0x5b3   : > { %v3424_v5 = vpop.xlane.xlu0 %3423 }
 0x5b4   : > { %12511 = vrcp.f32 %v3424_v5 }
 0x5b5   : > { %12513 = vpow2.f32 %v3408_v12 }
 0x5b7   : > { %v3427_v16 = vpop.xlane.xlu1 %3426 }
 0x5b8   : > { %12515 = vrcp.f32 %v3427_v16 }
 0x5b9   : > { %12517 = vpow2.f32 %v3410_v28  ;;  %v12508_v24 = vpop.eup %12507 }
 0x5ba   : > { %12519 = vpow2.f32 %v3412_v38  ;;  %v3545_v23 = vmul.f32 %v12508_v24, %v15328_v8  ;;  %v3544_v13 = vmul.f32 %v12508_v24, %v15326_v6 }
 0x5bb   : > { %v3430_v60 = vpop.xlane.xlu0 %3429  ;;  %12521 = vpow2.f32 %v3414_v48 }
 0x5bc   : > { %12523 = vrcp.f32 %v3430_v60 }
 0x5bd   : > { %v12510_v59 = vpop.eup %12509 }
 0x5be   : > { %v3547_v58 = vmul.f32 %v12510_v59, %v15336_v19  ;;  %v3546_v32 = vmul.f32 %v12510_v59, %v15334_v39 }
 0x5bf   : > { %v3433_v26 = vpop.xlane.xlu1 %3432 }
 0x5c0   : > { %12525 = vrcp.f32 %v3433_v26  ;;  %v3609_v2 = vpack.c.bf16 %v3547_v58, %v3545_v23  ;;  %v3608_v16 = vpack.c.bf16 %v3546_v32, %v3544_v13 }
 0x5c1   : > { %v12512_v28 = vpop.eup %12511 }
 0x5c2   : > { %3688 = vmatprep.mubr.bf16.mxu0 %v3609_v2  ;;  %v15578_v38 = vpop.eup %12513  ;;  %v3549_v8 = vmul.f32 %v12512_v28, %v15344_v63  ;;  %v3548_v39 = vmul.f32 %v12512_v28, %v15342_v27 }
 0x5c3   : > { %v3436_v62 = vpop.xlane.xlu0 %3435  ;;  %3689 = vmatmul.mubr.bf16.vlgmr.msra.gmra.mxu0 %v3608_v16 }
 0x5c4   : > { %12527 = vrcp.f32 %v3436_v62 }
 0x5c5   : > { %v12516_v37 = vpop.eup %12515 }
 0x5c6   : > { %v15581_v12 = vpop.eup %12517  ;;  %v3551_v6 = vmul.f32 %v12516_v37, %v15352_v9  ;;  %v3550_v19 = vmul.f32 %v12516_v37, %v15350_v47 }
 0x5c7   : > { %v3439_v24 = vpop.xlane.xlu1 %3438  ;;  %v15586_v48 = vpop.eup %12519  ;;  %v3506_v60 = vadd.f32 %v15581_v12, %v15578_v38 }
 0x5c8   : > { %12529 = vrcp.f32 %v3439_v24  ;;  %v3611_v5 = vpack.c.bf16 %v3551_v6, %v3549_v8  ;;  %v3610_v18 = vpack.c.bf16 %v3550_v19, %v3548_v39  ;;  %v15590_v59 = vpop.eup %12521 }
 0x5c9   : > { %v12524_v63 = vpop.eup %12523  ;;  %v3509_v27 = vadd.f32 %v15590_v59, %v15586_v48 }
 0x5ca   : > { %3696 = vmatprep.mubr.bf16.mxu0 %v3611_v5  ;;  %v3553_v47 = vmul.f32 %v12524_v63, %v15360_v4  ;;  %v3552_v13 = vmul.f32 %v12524_v63, %v15358_v36 }
 0x5cb   : > { %3507 = vadd.xlane.f32.xlu0 %v3506_v60  ;;  %v3442_v23 = vpop.xlane.xlu0 %3441  ;;  %3697 = vmatmul.mubr.bf16.gmra.mxu0 %v3610_v18 }
 0x5cc   : > { %12531 = vrcp.f32 %v3442_v23 }
 0x5cd   : > { %v12526_v9 = vpop.eup %12525 }
 0x5ce   : > { %v3555_v58 = vmul.f32 %v12526_v9, %v15368_v10  ;;  %v3554_v32 = vmul.f32 %v12526_v9, %v15366_v40 }
 0x5cf   : > { %3510 = vadd.xlane.f32.xlu1 %v3509_v27  ;;  %v3445_v26 = vpop.xlane.xlu1 %3444 }
 0x5d0   : > { %12533 = vrcp.f32 %v3445_v26  ;;  %v3613_v2 = vpack.c.bf16 %v3555_v58, %v3553_v47  ;;  %v3612_v16 = vpack.c.bf16 %v3554_v32, %v3552_v13 }
 0x5d1   : > { %v12528_v28 = vpop.eup %12527 }
 0x5d2   : > { %3704 = vmatprep.mubr.bf16.mxu0 %v3613_v2  ;;  %v3557_v8 = vmul.f32 %v12528_v28, %v15376_v21  ;;  %v3556_v10 = vmul.f32 %v12528_v28, %v15374_v46 }
 0x5d3   : > { %v3448_v62 = vpop.xlane.xlu0 %3447  ;;  %3705 = vmatmul.mubr.bf16.gmra.mxu0 %v3612_v16 }
 0x5d4   : > { %12535 = vrcp.f32 %v3448_v62 }
 0x5d5   : > { %v12530_v37 = vpop.eup %12529 }
 0x5d6   : > { %v3559_v4 = vmul.f32 %v12530_v37, %v15384_v14  ;;  %v3558_v36 = vmul.f32 %v12530_v37, %v15382_v17 }
 0x5d7   : > { %v3451_v40 = vpop.xlane.xlu1 %3450 }
 0x5d8   : > { %12537 = vrcp.f32 %v3451_v40  ;;  %v3615_v6 = vpack.c.bf16 %v3559_v4, %v3557_v8  ;;  %v3614_v39 = vpack.c.bf16 %v3558_v36, %v3556_v10 }
 0x5d9   : > { %v12532_v19 = vpop.eup %12531 }
 0x5da   : > { %3712 = vmatprep.mubr.bf16.mxu0 %v3615_v6  ;;  %v3561_v18 = vmul.f32 %v12532_v19, %v15392_v54  ;;  %v3560_v14 = vmul.f32 %v12532_v19, %v15390_v25 }
 0x5db   : > { %3713 = vmatmul.mubr.bf16.gmra.mxu0 %v3614_v39  ;;  %v3454_v24 = vpop.xlane.xlu1 %3453 }
 0x5dc   : > { %12539 = vrcp.f32 %v3454_v24 }
 0x5dd   : > { %v12534_v5 = vpop.eup %12533 }
 0x5de   : > { %v3563_v21 = vmul.f32 %v12534_v5, %v15400_v44  ;;  %v3562_v46 = vmul.f32 %v12534_v5, %v15398_v11 }
 0x5df   : > { %v3457_v60 = vpop.xlane.xlu0 %3456 }
 0x5e0   : > { %12541 = vrcp.f32 %v3457_v60  ;;  %v3617_v17 = vpack.c.bf16 %v3563_v21, %v3561_v18  ;;  %v3616_v63 = vpack.c.bf16 %v3562_v46, %v3560_v14 }
 0x5e1   : > { %v12536_v23 = vpop.eup %12535 }
 0x5e2   : > { %3720 = vmatprep.mubr.bf16.mxu0 %v3617_v17  ;;  %v3565_v47 = vmul.f32 %v12536_v23, %v15408_v43  ;;  %v3564_v44 = vmul.f32 %v12536_v23, %v15406_v29 }
 0x5e3   : > { %v3460_v9 = vpop.xlane.xlu0 %3459  ;;  %3721 = vmatmul.mubr.bf16.gmra.mxu0 %v3616_v63 }
 0x5e4   : > { %12543 = vrcp.f32 %v3460_v9 }
 0x5e5   : > { %v12538_v27 = vpop.eup %12537 }
 0x5e6   : > { %v3567_v54 = vmul.f32 %v12538_v27, %v15416_v1  ;;  %v3566_v25 = vmul.f32 %v12538_v27, %v15414_v49 }
 0x5e7   : > { %v3463_v58 = vpop.xlane.xlu1 %3462 }
 0x5e8   : > { %12545 = vrcp.f32 %v3463_v58  ;;  %v3619_v11 = vpack.c.bf16 %v3567_v54, %v3565_v47  ;;  %v3618_v13 = vpack.c.bf16 %v3566_v25, %v3564_v44 }
 0x5e9   : > { %v12540_v32 = vpop.eup %12539 }
 0x5ea   : > { %3728 = vmatprep.mubr.bf16.mxu0 %v3619_v11  ;;  %v3569_v16 = vmul.f32 %v12540_v32, %v15424_v33  ;;  %v3568_v1 = vmul.f32 %v12540_v32, %v15422_v34  ;;  %v21052_v32 = vld [vmem:[#allocation82_spill] sm:$0xff] }
 0x5eb   : > { %v3466_v26 = vpop.xlane.xlu0 %3465  ;;  %3729 = vmatmul.mubr.bf16.gmra.mxu0 %v3618_v13 }
 0x5ec   : > { %12547 = vrcp.f32 %v3466_v26  ;;  %v21053_v26 = vld [vmem:[#allocation83_spill] sm:$0xff] }
 0x5ed   : > { %v12542_v2 = vpop.eup %12541 }
 0x5ee   : > { %v3571_v43 = vmul.f32 %v12542_v2, %v15432_v20  ;;  %v3570_v29 = vmul.f32 %v12542_v2, %v15430_v31 }
 0x5ef   : > { %v3469_v28 = vpop.xlane.xlu1 %3468 }
 0x5f0   : > { %12549 = vrcp.f32 %v3469_v28  ;;  %v3621_v49 = vpack.c.bf16 %v3571_v43, %v3569_v16  ;;  %v3620_v62 = vpack.c.bf16 %v3570_v29, %v3568_v1  ;;  %v21054_v28 = vld [vmem:[#allocation87_spill] sm:$0xff] }
 0x5f1   : > { %v12544_v37 = vpop.eup %12543 }
 0x5f2   : > { %3736 = vmatprep.mubr.bf16.mxu0 %v3621_v49  ;;  %v3573_v10 = vmul.f32 %v12544_v37, %v15440_v45  ;;  %v3572_v20 = vmul.f32 %v12544_v37, %v15438_v15  ;;  %v21056_v37 = vld [vmem:[#allocation85_spill] sm:$0xff] }
 0x5f3   : > { %v3472_v8 = vpop.xlane.xlu0 %3471  ;;  %3737 = vmatmul.mubr.bf16.gmra.mxu0 %v3620_v62  ;;  %v21055_v62 = vld [vmem:[#allocation90_spill] sm:$0xff] }
 0x5f4   : > { %12551 = vrcp.f32 %v3472_v8  ;;  %v21057_v8 = vld [vmem:[#allocation88_spill] sm:$0xff] }
 0x5f5   : > { %v12546_v4 = vpop.eup %12545 }
 0x5f6   : > { %v3575_v33 = vmul.f32 %v12546_v4, %v15448_v52  ;;  %v3574_v34 = vmul.f32 %v12546_v4, %v15446_v35 }
 0x5f7   : > { %v3475_v36 = vpop.xlane.xlu1 %3474 }
 0x5f8   : > { %12553 = vrcp.f32 %v3475_v36  ;;  %v3623_v31 = vpack.c.bf16 %v3575_v33, %v3573_v10  ;;  %v3622_v40 = vpack.c.bf16 %v3574_v34, %v3572_v20  ;;  %v21058_v20 = vld [vmem:[#allocation104_spill] sm:$0xff] }
 0x5f9   : > { %v12548_v6 = vpop.eup %12547 }
 0x5fa   : > { %3744 = vmatprep.mubr.bf16.mxu0 %v3623_v31  ;;  %v3577_v24 = vmul.f32 %v12548_v6, %v15456_v30  ;;  %v3576_v52 = vmul.f32 %v12548_v6, %v15454_v56 }
 0x5fb   : > { %v3478_v39 = vpop.xlane.xlu0 %3477  ;;  %3745 = vmatmul.mubr.bf16.gmra.mxu0 %v3622_v40 }
 0x5fc   : > { %12555 = vrcp.f32 %v3478_v39 }
 0x5fd   : > { %v12550_v19 = vpop.eup %12549 }
 0x5fe   : > { %v3579_v45 = vmul.f32 %v12550_v19, %v15464_v42  ;;  %v3578_v15 = vmul.f32 %v12550_v19, %v15462_v0  ;;  %v21059_v19 = vld [vmem:[#allocation106_spill] sm:$0xff] }
 0x5ff   : > { %v3481_v5 = vpop.xlane.xlu1 %3480 }
 0x600   : > { %12557 = vrcp.f32 %v3481_v5  ;;  %v3625_v35 = vpack.c.bf16 %v3579_v45, %v3577_v24  ;;  %v3624_v18 = vpack.c.bf16 %v3578_v15, %v3576_v52  ;;  %v21060_v52 = vld [vmem:[#allocation93_spill] sm:$0xff] }
 0x601   : > { %v12552_v21 = vpop.eup %12551 }
 0x602   : > { %3752 = vmatprep.mubr.bf16.mxu0 %v3625_v35  ;;  %v3581_v60 = vmul.f32 %v12552_v21, %v15472_v61  ;;  %v3580_v42 = vmul.f32 %v12552_v21, %v15470_v22  ;;  %v21061_v35 = vld [vmem:[#allocation110_spill] sm:$0xff]  ;;  %v21062_v21 = vld [vmem:[#allocation92_spill] sm:$0xff] }
 0x603   : > { %v3484_v14 = vpop.xlane.xlu0 %3483  ;;  %3753 = vmatmul.mubr.bf16.gmra.mxu0 %v3624_v18 }
 0x604   : > { %12559 = vrcp.f32 %v3484_v14 }
 0x605   : > { %v12554_v46 = vpop.eup %12553 }
 0x606   : > { %v3583_v30 = vmul.f32 %v12554_v46, %v15480_v7  ;;  %v3582_v56 = vmul.f32 %v12554_v46, %v15478_v53  ;;  %v21063_v46 = vld [vmem:[#allocation95_spill] sm:$0xff] }
 0x607   : > { %v3487_v17 = vpop.xlane.xlu1 %3486 }
 0x608   : > { %12561 = vrcp.f32 %v3487_v17  ;;  %v3627_v0 = vpack.c.bf16 %v3583_v30, %v3581_v60  ;;  %v3626_v63 = vpack.c.bf16 %v3582_v56, %v3580_v42 }
 0x609   : > { %v12556_v23 = vpop.eup %12555 }
 0x60a   : > { %3760 = vmatprep.mubr.bf16.mxu0 %v3627_v0  ;;  %v3585_v47 = vmul.f32 %v12556_v23, %v15488_v57  ;;  %v3584_v7 = vmul.f32 %v12556_v23, %v15486_v55  ;;  %v21064_v0 = vld [vmem:[#allocation112_spill] sm:$0xff]  ;;  %v21065_v23 = vld [vmem:[#allocation114_spill] sm:$0xff] }
 0x60b   : > { %v3490_v9 = vpop.xlane.xlu0 %3489  ;;  %3761 = vmatmul.mubr.bf16.gmra.mxu0 %v3626_v63 }
 0x60c   : > { %12563 = vrcp.f32 %v3490_v9 }
 0x60d   : > { %v12558_v27 = vpop.eup %12557 }
 0x60e   : > { %v3587_v61 = vmul.f32 %v12558_v27, %v15496_v41  ;;  %v3586_v22 = vmul.f32 %v12558_v27, %v15494_v50  ;;  %v21066_v27 = vld [vmem:[#allocation111_spill] sm:$0xff] }
 0x60f   : > { %v3493_v54 = vpop.xlane.xlu1 %3492 }
 0x610   : > { %12565 = vrcp.f32 %v3493_v54  ;;  %v3629_v53 = vpack.c.bf16 %v3587_v61, %v3585_v47  ;;  %v3628_v44 = vpack.c.bf16 %v3586_v22, %v3584_v7  ;;  %v21067_v61 = vld [vmem:[#allocation113_spill] sm:$0xff] }
 0x611   : > { %v12560_v25 = vpop.eup %12559 }
 0x612   : > { %3768 = vmatprep.mubr.bf16.mxu0 %v3629_v53  ;;  %v3589_v13 = vmul.f32 %v12560_v25, %v15504_v51  ;;  %v3588_v41 = vmul.f32 %v12560_v25, %v21052_v32 }
 0x613   : > { %v3496_v58 = vpop.xlane.xlu0 %3495  ;;  %3769 = vmatmul.mubr.bf16.gmra.mxu0 %v3628_v44 }
 0x614   : > { %12567 = vrcp.f32 %v3496_v58 }
 0x615   : > { %v12562_v11 = vpop.eup %12561 }
 0x616   : > { %v3591_v57 = vmul.f32 %v12562_v11, %v15512_v3  ;;  %v3590_v55 = vmul.f32 %v12562_v11, %v21053_v26 }
 0x617   : > { %v3499_v2 = vpop.xlane.xlu1 %3498 }
 0x618   : > { %12569 = vrcp.f32 %v3499_v2  ;;  %v3631_v50 = vpack.c.bf16 %v3591_v57, %v3589_v13  ;;  %v3630_v16 = vpack.c.bf16 %v3590_v55, %v3588_v41 }
 0x619   : > { %v12564_v43 = vpop.eup %12563 }
 0x61a   : > { %3776 = vmatprep.mubr.bf16.mxu0 %v3631_v50  ;;  %v3593_v49 = vmul.f32 %v12564_v43, %v21054_v28  ;;  %v3592_v3 = vmul.f32 %v12564_v43, %v21056_v37  ;;  %v12360_v28 = vld [vmem:[%s20307_s8 + $0x38] sm:$0xff]  }
 0x61b   : > { %v3502_v1 = vpop.xlane.xlu0 %3501  ;;  %3777 = vmatmul.mubr.bf16.gmra.mxu0 %v3630_v16 }
 0x61c   : > { %12571 = vrcp.f32 %v3502_v1 }
 0x61d   : > { %v12566_v29 = vpop.eup %12565 }
 0x61e   : > { %v3595_v51 = vmul.f32 %v12566_v29, %v21055_v62  ;;  %v3594_v4 = vmul.f32 %v12566_v29, %v21057_v8  ;;  %v15668_v62 = vstv %s3817_s18 }
 0x61f   : > { %v4030_v10 = vpop.xlane.xlu0 %4029  ;;  %v3505_v33 = vpop.xlane.xlu1 %3504 }
 0x620   : > { %v4034_v34 = vsub.f32 %v21058_v20, %v4030_v10  ;;  %12573 = vrcp.f32 %v3505_v33  ;;  %v3633_v36 = vpack.c.bf16 %v3595_v51, %v3593_v49  ;;  %v3632_v31 = vpack.c.bf16 %v3594_v4, %v3592_v3  ;;  %v21070_v3 = vld [vmem:[#allocation59_spill] sm:$0xff] }
 0x621   : > { %v12568_v40 = vpop.eup %12567  ;;  %v20540_v49 = vmov 0   ;;  %v12362_v10 = vld [vmem:[%s20307_s8 + $0x28] sm:$0xff]  }
 0x622   : > { %v4036_v6 = vmul.f32 1.442695, %v4034_v34  ;;  %3784 = vmatprep.mubr.bf16.mxu0 %v3633_v36  ;;  %v3597_v15 = vmul.f32 %v12568_v40, %v21060_v52  ;;  %v3596_v14 = vmul.f32 %v12568_v40, %v21062_v21  ;;  %5882 = vmatprep.subr.bf16.mxu0 %v20540_v49 }
 0x623   : > { %3785 = vmatmul.mubr.bf16.gmra.mxu0 %v3632_v31  ;;  %v4033_v39 = vpop.xlane.xlu1 %4032  ;;  %v15656_v11 = vpop.permute.xlu0 %4391  ;;  %v21071_v31 = vld [vmem:[#allocation60_spill] sm:$0xff] }
 0x624   : > { %12575 = vpow2.f32 %v4036_v6  ;;  %v4035_v24 = vsub.f32 %v21059_v19, %v4033_v39  ;;  %21068 = vst [vmem:[#allocation97_spill] sm:$0xff] %v15656_v11  ;;  %5883 = vmatpush1.bf16.msra.mxu0 %v12360_v28  ;;  %v12363_v39 = vld [vmem:[%s20307_s8 + $0x20] sm:$0xff]  }
 0x625   : > { %v12570_v45 = vpop.eup %12569  ;;  %5884 = vmatprep.subr.bf16.mxu0 %v20540_v49 }
 0x626   : > { %v4038_v5 = vmul.f32 1.442695, %v4035_v24  ;;  %v3599_v18 = vmul.f32 %v12570_v45, %v21061_v35  ;;  %v3598_v60 = vmul.f32 %v12570_v45, %v21063_v46  ;;  %v21072_v35 = vld [vmem:[#allocation15_spill] sm:$0xff] }
 0x627   : > { %v15658_v13 = vpop.permute.xlu1 %4389 }
 0x628   : > { %12577 = vpow2.f32 %v4038_v5  ;;  %v3635_v30 = vpack.c.bf16 %v3599_v18, %v3597_v15  ;;  %v3634_v42 = vpack.c.bf16 %v3598_v60, %v3596_v14  ;;  %21069 = vst [vmem:[#allocation98_spill] sm:$0xff] %v15658_v13  ;;  %v12364_v14 = vld [vmem:[%s20307_s8 + $0x18] sm:$0xff]  }
 0x629   : > { %v12572_v56 = vpop.eup %12571 }
 0x62a   : > { %3792 = vmatprep.mubr.bf16.mxu0 %v3635_v30  ;;  %v3601_v63 = vmul.f32 %v12572_v56, %v21064_v0  ;;  %v3600_v47 = vmul.f32 %v12572_v56, %v21066_v27 }
 0x62b   : > { %3793 = vmatmul.mubr.bf16.gmra.mxu0 %v3634_v42 }
 0x62d   : > { %v12574_v17 = vpop.eup %12573 }
 0x62e   : > { %v3603_v9 = vmul.f32 %v12574_v17, %v21065_v23  ;;  %v3602_v7 = vmul.f32 %v12574_v17, %v21067_v61 }
 0x630   : > { %v3637_v22 = vpack.c.bf16 %v3603_v9, %v3601_v63  ;;  %v3636_v54 = vpack.c.bf16 %v3602_v7, %v3600_v47  ;;  %v21073_v47 = vld [vmem:[#allocation56_spill] sm:$0xff] }
 0x631   : > { %v15648_v53 = vpop.eup %12575 }
 0x632   : > { %3800 = vmatprep.mubr.bf16.mxu0 %v3637_v22  ;;  %v4040_v44 = vsel %vm2388_vm6, %v15648_v53, 0.0  ;;  %v21074_v22 = vld [vmem:[#allocation14_spill] sm:$0xff] }
 0x633   : > { %4041 = vadd.xlane.f32.xlu0 %v4040_v44  ;;  %3801 = vmatmul.mubr.bf16.gmra.mxu0 %v3636_v54 }
 0x635   : > { %v15652_v25 = vpop.eup %12577 }
 0x636   : > { %v4043_v58 = vsel %vm2388_vm6, %v15652_v25, 0.0 }
 0x637   : > { %4044 = vadd.xlane.f32.xlu1 %v4043_v58 }
 0x654   : > { %v3508_v57 = vpop.xlane.xlu0 %3507 }
 0x655   : > { %12579 = vrcp.f32 %v3508_v57  ;;  %v12365_v57 = vld [vmem:[%s20307_s8 + $0x10] sm:$0xff]  }
 0x658   : > { %v3511_v32 = vpop.xlane.xlu1 %3510 }
 0x659   : > { %12581 = vrcp.f32 %v3511_v32 }
 0x662   : > { %v12580_v41 = vpop.eup %12579 }
 0x663   : > { %v3605_v55 = vmul.f32 %v12580_v41, %v15581_v12  ;;  %v3604_v50 = vmul.f32 %v12580_v41, %v15578_v38 }
 0x666   : > { %v12582_v26 = vpop.eup %12581 }
 0x667   : > { %v3607_v2 = vmul.f32 %v12582_v26, %v15590_v59  ;;  %v3606_v16 = vmul.f32 %v12582_v26, %v15586_v48  ;;  %v12361_v48 = vld [vmem:[%s20307_s8 + $0x30] sm:$0xff]  }
 0x668   : > { %5885 = vmatpush1.bf16.msra.mxu0 %v12361_v48  ;;  %v21075_v48 = vld [vmem:[#allocation69_spill] sm:$0xff] }
 0x669   : > { %v3639_v43 = vpack.c.bf16 %v3607_v2, %v3605_v55  ;;  %v3638_v1 = vpack.c.bf16 %v3606_v16, %v3604_v50  ;;  %5886 = vmatprep.subr.bf16.mxu0 %v20540_v49 }
 0x66b   : > { %3808 = vmatprep.mubr.bf16.mxu0 %v3639_v43 }
 0x66c   : > { %3809 = vmatmul.mubr.bf16.gmra.mxu0 %v3638_v1 }
 0x66d   : > { %5887 = vmatpush1.bf16.msra.mxu0 %v12362_v10 }
 0x66e   : > { %5888 = vmatprep.subr.bf16.mxu0 %v20540_v49 }
 0x671   : > { %5889 = vmatpush1.bf16.msra.mxu0 %v12363_v39 }
 0x672   : > { %5890 = vmatprep.subr.bf16.mxu0 %v20540_v49 }
 0x675   : > { %5891 = vmatpush1.bf16.msra.mxu0 %v12364_v14 }
 0x676   : > { %5892 = vmatprep.subr.bf16.mxu0 %v20540_v49 }
 0x679   : > { %5893 = vmatpush1.bf16.msra.mxu0 %v12365_v57 }
 0x67a   : > { %5894 = vmatprep.subr.bf16.mxu0 %v20540_v49 }
 0x683   : > { %v10100_v29 = vpop.f32.mrf.mxu0 }
 0x685   : > { %v10101_v12 = vpop.f32.mrf.mxu0 }
 0x686   : > { %v10102_v38 = vadd.f32 %v10101_v12, %v10100_v29 }
 0x687   : > { %v10103_v59 = vpop.f32.mrf.mxu0 }
 0x688   : > { %v3819_v51 = vmul.f32 %v10102_v38, %v15668_v62 }
 0x689   : > { %v10104_v37 = vpop.f32.mrf.mxu0 }
 0x68a   : > { %v3851_v8 = vadd.f32 %v3819_v51, %v21070_v3  ;;  %v10105_v4 = vadd.f32 %v10104_v37, %v10103_v59  ;;  %v12366_v37 = vld [vmem:[%s20307_s8 + $0x8] sm:$0xff]  }
 0x68b   : > { %v10106_v33 = vpop.f32.mrf.mxu0  ;;  %v21076_v3 = vld [vmem:[#allocation18_spill] sm:$0xff]  ;;  %5895 = vmatpush1.bf16.msra.mxu0 %v12366_v37 }
 0x68c   : > { %v4489_v20 = vrot.slane %v3851_v8, 7  ;;  %v3820_v34 = vmul.f32 %v10105_v4, %v15668_v62  ;;  %5896 = vmatprep.subr.bf16.mxu0 %v20540_v49 }
 0x68d   : > { %v10107_v36 = vpop.f32.mrf.mxu0 }
 0x68e   : > { %v3852_v40 = vadd.f32 %v3820_v34, %v21071_v31  ;;  %v10108_v6 = vadd.f32 %v10107_v36, %v10106_v33  ;;  %v15687_v24 = vsel %vm652_vm0, 0.0, %v4489_v20 }
 0x68f   : > { %v10109_v19 = vpop.f32.mrf.mxu0  ;;  %v4646_v46 = vrot.slane %v15687_v24, 1  ;;  %v4721_v27 = vrot.slane %v15687_v24, 2 }
 0x690   : > { %v4490_v45 = vrot.slane %v3852_v40, 7  ;;  %v3821_v52 = vmul.f32 %v10108_v6, %v15668_v62  ;;  %v21077_v40 = vld [vmem:[#allocation62_spill] sm:$0xff] }
 0x691   : > { %v10110_v15 = vpop.f32.mrf.mxu0 }
 0x692   : > { %v15691_v5 = vsel %vm652_vm0, %v4489_v20, %v4490_v45  ;;  %v3853_v18 = vadd.f32 %v3821_v52, %v21072_v35  ;;  %v10111_v21 = vadd.f32 %v10110_v15, %v10109_v19  ;;  %v4600_v63 = vsel %vm652_vm0, %v4490_v45, 0.0 }
 0x693   : > { %v10112_v60 = vpop.f32.mrf.mxu0  ;;  %v10702_v30 = vpack.i.bf16 %v15691_v5, %v15687_v24  ;;  %v4647_v42 = vrot.slane %v15691_v5, 1  ;;  %v4722_v0 = vrot.slane %v15691_v5, 2  ;;  %v4649_v32 = vrot.slane %v4600_v63, 1 }
 0x694   : > { %v4492_v56 = vrot.slane %v3853_v18, 7  ;;  %v3822_v17 = vmul.f32 %v10111_v21, %v15668_v62  ;;  %v4724_v2 = vrot.slane %v4600_v63, 2  ;;  %v12367_v18 = vld [vmem:[%s20307_s8] sm:$0xff]  }
 0x695   : > { %v10113_v23 = vpop.f32.mrf.mxu0  ;;  %10703 = vrot.lane.b32.xlu1 %v10702_v30, %s12678_s1  ;;  %v4648_v9 = vsel %vm812_vm2, %v4646_v46, %v4647_v42  ;;  %v4723_v55 = vsel %vm890_vm3, %v4721_v27, %v4722_v0  ;;  %v4650_v10 = vsel %vm812_vm2, %v4647_v42, %v4649_v32  ;;  %5897 = vmatpush1.bf16.msra.mxu0 %v12367_v18 }
 0x696   : > { %v3854_v61 = vadd.f32 %v3822_v17, %v21073_v47  ;;  %v10114_v7 = vadd.f32 %v10113_v23, %v10112_v60  ;;  %v10707_v54 = vpack.i.bf16 %v4648_v9, %v21074_v22  ;;  %v15712_v44 = vsel %vm652_vm0, 0.0, %v4492_v56  ;;  %v21078_v17 = vld [vmem:[#allocation20_spill] sm:$0xff]  ;;  %5912 = vmatprep.subr.bf16.mxu0 %v20540_v49  ;;  %v12368_v47 = vld [vmem:[%s20307_s8 + $0x40] sm:$0xff]  }
 0x697   : > { %v10115_v58 = vpop.f32.mrf.mxu0  ;;  %v4726_v16 = vrot.slane %v15712_v44, 2  ;;  %v10712_v59 = vpack.i.bf16 %v4723_v55, %v21075_v48  ;;  %v4651_v20 = vrot.slane %v15712_v44, 1  ;;  %v10717_v15 = vpack.i.bf16 %v4650_v10, %v4648_v9 }
 0x698   : > { %v4493_v41 = vrot.slane %v3854_v61, 7  ;;  %v3823_v26 = vmul.f32 %v10114_v7, %v15668_v62  ;;  %v4725_v35 = vsel %vm890_vm3, %v4722_v0, %v4724_v2 }
 0x699   : > { %v10116_v50 = vpop.f32.mrf.mxu0  ;;  %10708 = vrot.lane.b32.xlu1 %v10707_v54, %s12679_s19  ;;  %v10722_v27 = vpack.i.bf16 %v4725_v35, %v4723_v55  ;;  %v21079_v55 = vld [vmem:[#allocation17_spill] sm:$0xff]  ;;  %5913 = vmatpush2.bf16.msra.mxu0 %v12368_v47 }
 0x69a   : > { %v15722_v43 = vsel %vm652_vm0, %v4492_v56, %v4493_v41  ;;  %v4601_v1 = vsel %vm652_vm0, %v4493_v41, 0.0  ;;  %v10117_v29 = vadd.f32 %v10116_v50, %v10115_v58  ;;  %v3855_v8 = vadd.f32 %v3823_v26, %v21076_v3  ;;  %9108 = vmatprep.subr.bf16.mxu0 %v20540_v49 }
 0x69b   : > { %v4729_v28 = vrot.slane %v4601_v1, 2  ;;  %v10118_v12 = vpop.f32.mrf.mxu0  ;;  %v15728_v38 = vpack.i.bf16 %v15722_v43, %v15712_v44  ;;  %v4727_v51 = vrot.slane %v15722_v43, 2  ;;  %v4652_v33 = vrot.slane %v15722_v43, 1 }
 0x69c   : > { %v3824_v4 = vmul.f32 %v10117_v29, %v15668_v62  ;;  %v4495_v21 = vrot.slane %v3855_v8, 7  ;;  %v4654_v30 = vrot.slane %v4601_v1, 1 }
 0x69d   : > { %10728 = vrot.lane.b32.xlu0 %v15728_v38, %s12678_s1  ;;  %v10119_v34 = vpop.f32.mrf.mxu0  ;;  %10713 = vrot.lane.b32.xlu1 %v10712_v59, %s12680_s20  ;;  %v15744_v36 = vsel %vm890_vm3, %v4726_v16, %v4727_v51  ;;  %v15747_v31 = vsel %vm890_vm3, %v4727_v51, %v4729_v28  ;;  %v4653_v52 = vsel %vm812_vm2, %v4651_v20, %v4652_v33 }
 0x69e   : > { %v3856_v6 = vadd.f32 %v3824_v4, %v21077_v40  ;;  %v10120_v39 = vadd.f32 %v10119_v34, %v10118_v12  ;;  %v5726_v19 = vpack.c.bf16 %v15747_v31, %v15744_v36  ;;  %v10737_v60 = vpack.i.bf16 %v4653_v52, %v4650_v10 }
 0x69f   : > { %v10121_v45 = vpop.f32.mrf.mxu0  ;;  %v15772_v61 = vsel %vm652_vm0, 0.0, %v4495_v21  ;;  %v10742_v54 = vpack.i.bf16 %v15744_v36, %v4725_v35  ;;  %v4655_v32 = vsel %vm812_vm2, %v4652_v33, %v4654_v30  ;;  %v10752_v10 = vpack.i.bf16 %v15747_v31, %v15744_v36 }
 0x6a0   : > { %v4496_v14 = vrot.slane %v3856_v6, 7  ;;  %v3825_v46 = vmul.f32 %v10120_v39, %v15668_v62  ;;  %9686 = vmatprep.mubr.msk.bf16.mxu0 %vm2388_vm6, %v5726_v19  ;;  %v4731_v50 = vrot.slane %v15772_v61, 2  ;;  %v10747_v28 = vpack.i.bf16 %v4655_v32, %v4653_v52  ;;  %v21082_v52 = vld [vmem:[#allocation25_spill] sm:$0xff] }
 0x6a1   : > { %v10122_v42 = vpop.f32.mrf.mxu0  ;;  %10718 = vrot.lane.b32.xlu1 %v10717_v15, %s12674_s27  ;;  %10738 = vrot.lane.b32.xlu0 %v10737_v60, %s12679_s19  ;;  %v4656_v36 = vrot.slane %v15772_v61, 1 }
 0x6a2   : > { %v15762_v56 = vsel %vm652_vm0, %v4495_v21, %v4496_v14  ;;  %v3857_v0 = vadd.f32 %v3825_v46, %v21078_v17  ;;  %v10123_v63 = vadd.f32 %v10122_v42, %v10121_v45  ;;  %v4602_v23 = vsel %vm652_vm0, %v4496_v14, 0.0  ;;  %v21083_v46 = vld [vmem:[#allocation24_spill] sm:$0xff] }
 0x6a3   : > { %v10124_v9 = vpop.f32.mrf.mxu0  ;;  %v4732_v41 = vrot.slane %v15762_v56, 2  ;;  %v4734_v26 = vrot.slane %v4602_v23, 2  ;;  %v4659_v6 = vrot.slane %v4602_v23, 1  ;;  %v10762_v21 = vpack.i.bf16 %v15762_v56, %v15772_v61 }
 0x6a4   : > { %v3826_v7 = vmul.f32 %v10123_v63, %v15668_v62  ;;  %v4498_v58 = vrot.slane %v3857_v0, 7 }
 0x6a5   : > { %v10125_v57 = vpop.f32.mrf.mxu0  ;;  %10723 = vrot.lane.b32.xlu1 %v10722_v27, %s12681_s25  ;;  %10743 = vrot.lane.b32.xlu0 %v10742_v54, %s12680_s20  ;;  %v15789_v59 = vsel %vm890_vm3, %v4731_v50, %v4732_v41  ;;  %v15799_v8 = vsel %vm890_vm3, %v4732_v41, %v4734_v26 }
 0x6a6   : > { %v3858_v2 = vadd.f32 %v3826_v7, %v21079_v55  ;;  %v10126_v29 = vadd.f32 %v10125_v57, %v10124_v9  ;;  %v15784_v12 = vsel %vm652_vm0, 0.0, %v4498_v58  ;;  %v21084_v55 = vld [vmem:[#allocation22_spill] sm:$0xff] }
 0x6a7   : > { %v10127_v16 = vpop.f32.mrf.mxu0  ;;  %21080 = vst [vmem:[#allocation100_spill] sm:$0xff] %v15784_v12  ;;  %v4736_v39 = vrot.slane %v15784_v12, 2  ;;  %v4661_v26 = vrot.slane %v15784_v12, 1 }
 0x6a8   : > { %v4499_v1 = vrot.slane %v3858_v2, 7  ;;  %v3827_v20 = vmul.f32 %v10126_v29, %v15668_v62 }
 0x6a9   : > { %v10128_v48 = vpop.f32.mrf.mxu0  ;;  %10733 = vrot.lane.b32.xlu1 %v15728_v38, %s12682_s22  ;;  %10748 = vrot.lane.b32.xlu0 %v10747_v28, %s12674_s27  ;;  %v4657_v38 = vrot.slane %v15762_v56, 1 }
 0x6aa   : > { %v15792_v51 = vsel %vm652_vm0, %v4498_v58, %v4499_v1  ;;  %v15795_v37 = vsel %vm652_vm0, %v4499_v1, 0.0  ;;  %v10129_v3 = vadd.f32 %v10128_v48, %v10127_v16  ;;  %v3859_v60 = vadd.f32 %v3827_v20, %v21083_v46 }
 0x6ab   : > { %21081 = vst [vmem:[#allocation102_spill] sm:$0xff] %v15792_v51  ;;  %v10130_v4 = vpop.f32.mrf.mxu0  ;;  %v4739_v33 = vrot.slane %v15795_v37, 2  ;;  %v4737_v40 = vrot.slane %v15792_v51, 2  ;;  %v4658_v30 = vsel %vm812_vm2, %v4656_v36, %v4657_v38  ;;  %v4660_v63 = vsel %vm812_vm2, %v4657_v38, %v4659_v6 }
 0x6ac   : > { %v3828_v34 = vmul.f32 %v10129_v3, %v15668_v62  ;;  %v10772_v7 = vpack.i.bf16 %v4658_v30, %v4655_v32  ;;  %v4501_v54 = vrot.slane %v3859_v60, 7  ;;  %v10792_v57 = vpack.i.bf16 %v4660_v63, %v4658_v30  ;;  %v21086_v32 = vld [vmem:[#allocation19_spill] sm:$0xff] }
 0x6ad   : > { %v10131_v19 = vpop.f32.mrf.mxu0  ;;  %10758 = vrot.lane.b32.xlu1 %v10747_v28, %s12676_s30  ;;  %10753 = vrot.lane.b32.xlu0 %v10752_v10, %s12681_s25  ;;  %v15818_v14 = vsel %vm890_vm3, %v4736_v39, %v4737_v40  ;;  %v15823_v42 = vsel %vm890_vm3, %v4737_v40, %v4739_v33  ;;  %v4662_v41 = vrot.slane %v15792_v51, 1  ;;  %v10777_v3 = vpack.i.bf16 %v15789_v59, %v15747_v31  ;;  %v21090_v30 = vld [vmem:[#allocation67_spill] sm:$0xff] }
 0x6ae   : > { %v3860_v15 = vadd.f32 %v3828_v34, %v21082_v52  ;;  %v10132_v35 = vadd.f32 %v10131_v19, %v10130_v4  ;;  %v15847_v4 = vsel %vm652_vm0, 0.0, %v4501_v54  ;;  %v10797_v38 = vpack.i.bf16 %v15792_v51, %v15784_v12 }
 0x6af   : > { %v10133_v18 = vpop.f32.mrf.mxu0  ;;  %21087 = vst [vmem:[#allocation83_spill] sm:$0xff] %v15847_v4  ;;  %v4663_v33 = vsel %vm812_vm2, %v4661_v26, %v4662_v41  ;;  %v4741_v19 = vrot.slane %v15847_v4, 2 }
 0x6b0   : > { %v3829_v17 = vmul.f32 %v10132_v35, %v15668_v62  ;;  %v4502_v9 = vrot.slane %v3860_v15, 7  ;;  %v4664_v35 = vrot.slane %v15795_v37, 1  ;;  %v10807_v46 = vpack.i.bf16 %v4663_v33, %v4660_v63 }
 0x6b1   : > { %v10134_v0 = vpop.f32.mrf.mxu0  ;;  %10763 = vrot.lane.b32.xlu1 %v10762_v21, %s12678_s1  ;;  %10768 = vrot.lane.b32.xlu0 %v10762_v21, %s12682_s22 }
 0x6b2   : > { %v10135_v27 = vadd.f32 %v10134_v0, %v10133_v18  ;;  %v3861_v2 = vadd.f32 %v3829_v17, %v21084_v55  ;;  %v15837_v16 = vsel %vm652_vm0, %v4501_v54, %v4502_v9  ;;  %v15840_v1 = vsel %vm652_vm0, %v4502_v9, 0.0 }
 0x6b3   : > { %v10136_v47 = vpop.f32.mrf.mxu0  ;;  %21085 = vst [vmem:[#allocation82_spill] sm:$0xff] %v15837_v16  ;;  %v4744_v20 = vrot.slane %v15840_v1, 2  ;;  %v4742_v39 = vrot.slane %v15837_v16, 2 }
 0x6b4   : > { %v3830_v58 = vmul.f32 %v10135_v27, %v15668_v62  ;;  %v4504_v34 = vrot.slane %v3861_v2, 7 }
 0x6b5   : > { %v10137_v50 = vpop.f32.mrf.mxu0  ;;  %10773 = vrot.lane.b32.xlu1 %v10772_v7, %s12679_s19  ;;  %10793 = vrot.lane.b32.xlu0 %v10792_v57, %s12676_s30  ;;  %v15872_v9 = vsel %vm890_vm3, %v4741_v19, %v4742_v39  ;;  %v15875_v27 = vsel %vm890_vm3, %v4742_v39, %v4744_v20 }
 0x6b6   : > { %v3862_v29 = vadd.f32 %v3830_v58, %v21086_v32  ;;  %v10138_v28 = vadd.f32 %v10137_v50, %v10136_v47  ;;  %v15867_v60 = vsel %vm652_vm0, 0.0, %v4504_v34  ;;  %v21091_v47 = vld [vmem:[#allocation66_spill] sm:$0xff]  ;;  %v10812_v50 = vpack.i.bf16 %v15818_v14, %v15799_v8 }
 0x6b7   : > { %v10139_v48 = vpop.f32.mrf.mxu0  ;;  %21089 = vst [vmem:[#allocation90_spill] sm:$0xff] %v15867_v60  ;;  %v4746_v26 = vrot.slane %v15867_v60, 2  ;;  %v15887_v32 = vsel %vm812_vm2, %v4662_v41, %v4664_v35 }
 0x6b8   : > { %v4505_v10 = vrot.slane %v3862_v29, 7  ;;  %v3831_v40 = vmul.f32 %v10138_v28, %v15668_v62 }
 0x6b9   : > { %v10140_v6 = vpop.f32.mrf.mxu0  ;;  %10778 = vrot.lane.b32.xlu1 %v10777_v3, %s12680_s20  ;;  %10798 = vrot.lane.b32.xlu0 %v10797_v38, %s12678_s1 }
 0x6ba   : > { %v10141_v31 = vadd.f32 %v10140_v6, %v10139_v48  ;;  %v15859_v36 = vsel %vm652_vm0, %v4504_v34, %v4505_v10  ;;  %v15862_v52 = vsel %vm652_vm0, %v4505_v10, 0.0  ;;  %v3863_v17 = vadd.f32 %v3831_v40, %v21090_v30  ;;  %v21095_v30 = vld [vmem:[#allocation29_spill] sm:$0xff] }
 0x6bb   : > { %21088 = vst [vmem:[#allocation87_spill] sm:$0xff] %v15859_v36  ;;  %v10142_v15 = vpop.f32.mrf.mxu0  ;;  %v4749_v37 = vrot.slane %v15862_v52, 2  ;;  %v4747_v54 = vrot.slane %v15859_v36, 2 }
 0x6bc   : > { %v3832_v18 = vmul.f32 %v10141_v31, %v15668_v62  ;;  %v4042_v21 = vpop.xlane.xlu0 %4041  ;;  %v4507_v29 = vrot.slane %v3863_v17, 7  ;;  %v10817_v31 = vpack.i.bf16 %v15887_v32, %v4663_v33 }
 0x6bd   : > { %v10143_v0 = vpop.f32.mrf.mxu0  ;;  %10783 = vrot.lane.b32.xlu1 %v10792_v57, %s12674_s27  ;;  %10808 = vrot.lane.b32.xlu0 %v10807_v46, %s12679_s19  ;;  %12583 = vrcp.f32 %v4042_v21  ;;  %v10787_v57 = vpack.i.bf16 %v15799_v8, %v15789_v59  ;;  %v15895_v20 = vsel %vm890_vm3, %v4746_v26, %v4747_v54  ;;  %v15898_v34 = vsel %vm890_vm3, %v4747_v54, %v4749_v37 }
 0x6be   : > { %v3864_v7 = vadd.f32 %v3832_v18, %v21091_v47  ;;  %v10144_v63 = vadd.f32 %v10143_v0, %v10142_v15  ;;  %v15909_v19 = vsel %vm652_vm0, 0.0, %v4507_v29  ;;  %v21094_v15 = vld [vmem:[#allocation30_spill] sm:$0xff]  ;;  %v10822_v47 = vpack.i.bf16 %v15823_v42, %v15818_v14 }
 0x6bf   : > { %v10145_v58 = vpop.f32.mrf.mxu0  ;;  %21093 = vst [vmem:[#allocation88_spill] sm:$0xff] %v15909_v19  ;;  %v4667_v54 = vrot.slane %v15837_v16, 1 }
 0x6c0   : > { %v4508_v55 = vrot.slane %v3864_v7, 7  ;;  %v4045_v2 = vpop.xlane.xlu1 %4044  ;;  %v3833_v28 = vmul.f32 %v10144_v63, %v15668_v62  ;;  %v4669_v7 = vrot.slane %v15840_v1, 1 }
 0x6c1   : > { %12585 = vrcp.f32 %v4045_v2  ;;  %v10146_v48 = vpop.f32.mrf.mxu0  ;;  %10788 = vrot.lane.b32.xlu1 %v10787_v57, %s12681_s25  ;;  %10813 = vrot.lane.b32.xlu0 %v10812_v50, %s12680_s20 }
 0x6c2   : > { %v10147_v10 = vadd.f32 %v10146_v48, %v10145_v58  ;;  %v15901_v41 = vsel %vm652_vm0, %v4507_v29, %v4508_v55  ;;  %v15904_v40 = vsel %vm652_vm0, %v4508_v55, 0.0  ;;  %v3865_v35 = vadd.f32 %v3833_v28, %v21094_v15 }
 0x6c3   : > { %21092 = vst [vmem:[#allocation85_spill] sm:$0xff] %v15901_v41  ;;  %v10148_v6 = vpop.f32.mrf.mxu0  ;;  %v4754_v46 = vrot.slane %v15904_v40, 2  ;;  %v4752_v33 = vrot.slane %v15901_v41, 2  ;;  %v4666_v55 = vrot.slane %v15847_v4, 1  ;;  %v4670_v15 = vsel %vm812_vm2, %v4667_v54, %v4669_v7 }
 0x6c4   : > { %v3834_v39 = vmul.f32 %v10147_v10, %v15668_v62  ;;  %v4510_v58 = vrot.slane %v3865_v35, 7  ;;  %v10832_v10 = vpack.i.bf16 %v15837_v16, %v15847_v4 }
 0x6c5   : > { %v10149_v18 = vpop.f32.mrf.mxu0  ;;  %10803 = vrot.lane.b32.xlu1 %v10797_v38, %s12682_s22  ;;  %10818 = vrot.lane.b32.xlu0 %v10817_v31, %s12674_s27  ;;  %v4751_v38 = vrot.slane %v15909_v19, 2  ;;  %v15932_v1 = vsel %vm890_vm3, %v4752_v33, %v4754_v46 }
 0x6c6   : > { %v3866_v17 = vadd.f32 %v3834_v39, %v21095_v30  ;;  %v10150_v0 = vadd.f32 %v10149_v18, %v10148_v6  ;;  %21097 = vst [vmem:[#allocation106_spill] sm:$0xff] %v15932_v1  ;;  %v15946_v35 = vsel %vm652_vm0, 0.0, %v4510_v58  ;;  %v21100_v18 = vld [vmem:[#allocation32_spill] sm:$0xff] }
 0x6c7   : > { %v10151_v37 = vpop.f32.mrf.mxu0  ;;  %v15929_v50 = vsel %vm890_vm3, %v4751_v38, %v4752_v33  ;;  %21099 = vst [vmem:[#allocation110_spill] sm:$0xff] %v15946_v35 }
 0x6c8   : > { %v4511_v63 = vrot.slane %v3866_v17, 7  ;;  %v3835_v57 = vmul.f32 %v10150_v0, %v15668_v62  ;;  %21096 = vst [vmem:[#allocation104_spill] sm:$0xff] %v15929_v50 }
 0x6c9   : > { %v10152_v26 = vpop.f32.mrf.mxu0  ;;  %10828 = vrot.lane.b32.xlu1 %v10817_v31, %s12676_s30  ;;  %10823 = vrot.lane.b32.xlu0 %v10822_v47, %s12681_s25  ;;  %v4668_v31 = vsel %vm812_vm2, %v4666_v55, %v4667_v54  ;;  %v4756_v55 = vrot.slane %v15946_v35, 2 }
 0x6ca   : > { %v10153_v2 = vadd.f32 %v10152_v26, %v10151_v37  ;;  %v15935_v29 = vsel %vm652_vm0, %v4510_v58, %v4511_v63  ;;  %v15938_v28 = vsel %vm652_vm0, %v4511_v63, 0.0  ;;  %v12584_v6 = vpop.eup %12583  ;;  %v3867_v46 = vadd.f32 %v3835_v57, %v21100_v18  ;;  %v21101_v37 = vld [vmem:[#allocation34_spill] sm:$0xff] }
 0x6cb   : > { %21098 = vst [vmem:[#allocation93_spill] sm:$0xff] %v15935_v29  ;;  %v10154_v48 = vpop.f32.mrf.mxu0  ;;  %v4759_v33 = vrot.slane %v15938_v28, 2  ;;  %v4757_v7 = vrot.slane %v15935_v29, 2  ;;  %v10862_v54 = vpack.i.bf16 %v4670_v15, %v4668_v31  ;;  %v10842_v58 = vpack.i.bf16 %v4668_v31, %v15887_v32 }
 0x6cc   : > { %v3836_v39 = vmul.f32 %v10153_v2, %v15668_v62  ;;  %v4048_v57 = vmul.f32 %v12584_v6, %v15648_v53 }
 0x6cd   : > { %v10155_v30 = vpop.f32.mrf.mxu0  ;;  %10833 = vrot.lane.b32.xlu1 %v10832_v10, %s12678_s1  ;;  %10838 = vrot.lane.b32.xlu0 %v10832_v10, %s12682_s22  ;;  %v15966_v53 = vsel %vm890_vm3, %v4756_v55, %v4757_v7  ;;  %v4674_v55 = vrot.slane %v15862_v52, 1  ;;  %v21111_v52 = vld [vmem:[#allocation61_spill] sm:$0xff] }
 0x6ce   : > { %v12586_v0 = vpop.eup %12585  ;;  %v3868_v47 = vadd.f32 %v3836_v39, %v21101_v37  ;;  %v10156_v38 = vadd.f32 %v10155_v30, %v10154_v48  ;;  %v4672_v39 = vrot.slane %v15859_v36, 1  ;;  %v4513_v37 = vrot.slane %v3867_v46, 7  ;;  %21102 = vst [vmem:[#allocation92_spill] sm:$0xff] %v15966_v53 }
 0x6cf   : > { %v10157_v63 = vpop.f32.mrf.mxu0  ;;  %v4049_v26 = vmul.f32 %v12586_v0, %v15652_v25  ;;  %v4671_v30 = vrot.slane %v15867_v60, 1  ;;  %v15969_v25 = vsel %vm890_vm3, %v4757_v7, %v4759_v33  ;;  %v10867_v33 = vpack.i.bf16 %v15859_v36, %v15867_v60 }
 0x6d0   : > { %v4514_v2 = vrot.slane %v3868_v47, 7  ;;  %v3837_v18 = vmul.f32 %v10156_v38, %v15668_v62  ;;  %21103 = vst [vmem:[#allocation95_spill] sm:$0xff] %v15969_v25  ;;  %v10847_v47 = vpack.i.bf16 %v15872_v9, %v15823_v42  ;;  %v21105_v38 = vld [vmem:[#allocation35_spill] sm:$0xff]  ;;  %v10917_v36 = vpack.i.bf16 %v15929_v50, %v15898_v34 }
 0x6d1   : > { %v10158_v10 = vpop.f32.mrf.mxu0  ;;  %10843 = vrot.lane.b32.xlu1 %v10842_v58, %s12679_s19  ;;  %v4050_v48 = vpack.c.bf16 %v4049_v26, %v4048_v57  ;;  %10863 = vrot.lane.b32.xlu0 %v10862_v54, %s12676_s30  ;;  %v4673_v7 = vsel %vm812_vm2, %v4671_v30, %v4672_v39  ;;  %v15987_v57 = vsel %vm652_vm0, 0.0, %v4513_v37 }
 0x6d2   : > { %v10159_v32 = vadd.f32 %v10158_v10, %v10157_v63  ;;  %v15972_v6 = vsel %vm652_vm0, %v4513_v37, %v4514_v2  ;;  %v15975_v31 = vsel %vm652_vm0, %v4514_v2, 0.0  ;;  %v3869_v63 = vadd.f32 %v3837_v18, %v21105_v38  ;;  %21106 = vst [vmem:[#allocation114_spill] sm:$0xff] %v15987_v57  ;;  %v21107_v18 = vld [vmem:[#allocation71_spill] sm:$0xff] }
 0x6d3   : > { %21104 = vst [vmem:[#allocation112_spill] sm:$0xff] %v15972_v6  ;;  %v10160_v46 = vpop.f32.mrf.mxu0  ;;  %10401 = vmatprep.subr.msk.bf16.mxu1 %vm2388_vm6, %v4050_v48  ;;  %v4100_v0 = vsel %vm2388_vm6, %v4050_v48, 0  ;;  %v4764_v2 = vrot.slane %v15975_v31, 2  ;;  %v4762_v30 = vrot.slane %v15972_v6, 2  ;;  %v10877_v37 = vpack.i.bf16 %v4673_v7, %v4670_v15 }
 0x6d4   : > { %v3838_v58 = vmul.f32 %v10159_v32, %v15668_v62  ;;  %10344 = vmatpush3.bf16.xpose.msra.mxu1 %v4100_v0  ;;  %v4761_v0 = vrot.slane %v15987_v57, 2  ;;  %v4516_v38 = vrot.slane %v3869_v63, 7 }
 0x6d5   : > { %v10161_v26 = vpop.f32.mrf.mxu0  ;;  %10848 = vrot.lane.b32.xlu1 %v10847_v47, %s12680_s20  ;;  %7479 = vmatprep.subr.bf16.mxu1 %v20540_v49  ;;  %v16009_v15 = vsel %vm890_vm3, %v4762_v30, %v4764_v2  ;;  %v10882_v2 = vpack.i.bf16 %v15895_v20, %v15875_v27 }
 0x6d6   : > { %v3870_v10 = vadd.f32 %v3838_v58, %v21107_v18  ;;  %10868 = vrot.lane.b32.xlu0 %v10867_v33, %s12678_s1  ;;  %v10162_v48 = vadd.f32 %v10161_v26, %v10160_v46  ;;  %v16006_v26 = vsel %vm890_vm3, %v4761_v0, %v4762_v30  ;;  %21110 = vst [vmem:[#allocation59_spill] sm:$0xff] %v16009_v15 }
 0x6d7   : > { %v10163_v32 = vpop.f32.mrf.mxu0  ;;  %21109 = vst [vmem:[#allocation113_spill] sm:$0xff] %v16006_v26  ;;  %v16029_v0 = vsel %vm812_vm2, %v4672_v39, %v4674_v55 }
 0x6d8   : > { %v4517_v47 = vrot.slane %v3870_v10, 7  ;;  %v3839_v17 = vmul.f32 %v10162_v48, %v15668_v62  ;;  %v16019_v10 = vsel %vm652_vm0, 0.0, %v4516_v38  ;;  %v10887_v55 = vpack.i.bf16 %v16029_v0, %v4673_v7 }
 0x6d9   : > { %v10164_v49 = vpop.f32.mrf.mxu0  ;;  %10853 = vrot.lane.b32.xlu1 %v10862_v54, %s12674_s27  ;;  %v10857_v54 = vpack.i.bf16 %v15875_v27, %v15872_v9  ;;  %21112 = vst [vmem:[#allocation60_spill] sm:$0xff] %v16019_v10 }
 0x6da   : > { %v16002_v58 = vsel %vm652_vm0, %v4516_v38, %v4517_v47  ;;  %10878 = vrot.lane.b32.xlu0 %v10877_v37, %s12679_s19  ;;  %v10165_v46 = vadd.f32 %v10164_v49, %v10163_v32  ;;  %v16012_v63 = vsel %vm652_vm0, %v4517_v47, 0.0  ;;  %v21113_v49 = vld [vmem:[#allocation27_spill] sm:$0xff]  ;;  %v21114_v37 = vld [vmem:[#allocation70_spill] sm:$0xff] }
 0x6db   : > { %21108 = vst [vmem:[#allocation111_spill] sm:$0xff] %v16002_v58  ;;  %v10166_v18 = vpop.f32.mrf.mxu0  ;;  %10346 = vmatmul.mubr.msk.bf16.vlgmr.msra.gmra.mxu1 %vm2388_vm6, %v21111_v52  ;;  %v3871_v48 = vadd.f32 %v3839_v17, %v21113_v49  ;;  %v4767_v47 = vrot.slane %v16002_v58, 2  ;;  %v4769_v17 = vrot.slane %v16012_v63, 2 }
 0x6dc   : > { %v3840_v32 = vmul.f32 %v10165_v46, %v15668_v62  ;;  %10349 = vmatprep.mubr.msk.bf16.mxu1 %vm2388_vm6, %v21114_v37  ;;  %v21115_v46 = vld [vmem:[#allocation68_spill] sm:$0xff]  ;;  %v4766_v37 = vrot.slane %v16019_v10, 2 }
 0x6dd   : > { %v10167_v30 = vpop.f32.mrf.mxu0  ;;  %10858 = vrot.lane.b32.xlu1 %v10857_v54, %s12681_s25  ;;  %v4519_v3 = vrot.slane %v3871_v48, 7  ;;  %v16050_v48 = vsel %vm890_vm3, %v4767_v47, %v4769_v17 }
 0x6de   : > { %v3872_v52 = vadd.f32 %v3840_v32, %v21115_v46  ;;  %10883 = vrot.lane.b32.xlu0 %v10882_v2, %s12680_s20  ;;  %v10168_v49 = vadd.f32 %v10167_v30, %v10166_v18  ;;  %v16042_v38 = vsel %vm890_vm3, %v4766_v37, %v4767_v47  ;;  %v21118_v2 = vld [vmem:[#allocation49_spill] sm:$0xff]  ;;  %v4679_v47 = vrot.slane %v15904_v40, 1 }
 0x6df   : > { %v10169_v21 = vpop.f32.mrf.mxu0  ;;  %21116 = vst [vmem:[#allocation15_spill] sm:$0xff] %v16042_v38  ;;  %v21121_v37 = vld [vmem:[#allocation21_spill] sm:$0xff] }
 0x6e0   : > { %v4520_v54 = vrot.slane %v3872_v52, 7  ;;  %v3841_v39 = vmul.f32 %v10168_v49, %v15668_v62  ;;  %v21119_v52 = vld [vmem:[#allocation48_spill] sm:$0xff] }
 0x6e1   : > { %v10170_v23 = vpop.f32.mrf.mxu0  ;;  %10873 = vrot.lane.b32.xlu1 %v10867_v33, %s12682_s22  ;;  %v16058_v33 = vsel %vm652_vm0, 0.0, %v4519_v3 }
 0x6e2   : > { %v16045_v32 = vsel %vm652_vm0, %v4519_v3, %v4520_v54  ;;  %v3873_v18 = vadd.f32 %v3841_v39, %v21118_v2  ;;  %10888 = vrot.lane.b32.xlu0 %v10887_v55, %s12674_s27  ;;  %v10171_v30 = vadd.f32 %v10170_v23, %v10169_v21  ;;  %v16053_v46 = vsel %vm652_vm0, %v4520_v54, 0.0  ;;  %21120 = vst [vmem:[#allocation69_spill] sm:$0xff] %v16058_v33 }
 0x6e3   : > { %21117 = vst [vmem:[#allocation56_spill] sm:$0xff] %v16045_v32  ;;  %v10172_v7 = vpop.f32.mrf.mxu0  ;;  %10350 = vmatmul.mubr.msk.bf16.gmra.mxu1 %vm2388_vm6, %v21119_v52  ;;  %v10892_v23 = vpack.i.bf16 %v15898_v34, %v15895_v20  ;;  %v4677_v21 = vrot.slane %v15901_v41, 1  ;;  %v4772_v39 = vrot.slane %v16045_v32, 2  ;;  %v4676_v2 = vrot.slane %v15909_v19, 1  ;;  %v21122_v52 = vld [vmem:[#allocation50_spill] sm:$0xff] }
 0x6e4   : > { %v3842_v49 = vmul.f32 %v10171_v30, %v15668_v62  ;;  %10353 = vmatprep.mubr.msk.bf16.mxu1 %vm2388_vm6, %v21121_v37  ;;  %v4522_v17 = vrot.slane %v3873_v18, 7  ;;  %v4774_v30 = vrot.slane %v16053_v46, 2  ;;  %v4771_v40 = vrot.slane %v16058_v33, 2 }
 0x6e5   : > { %v10173_v54 = vpop.f32.mrf.mxu0  ;;  %10898 = vrot.lane.b32.xlu1 %v10887_v55, %s12676_s30  ;;  %v10902_v55 = vpack.i.bf16 %v15901_v41, %v15909_v19  ;;  %v4678_v11 = vsel %vm812_vm2, %v4676_v2, %v4677_v21  ;;  %v21126_v41 = vld [vmem:[#allocation37_spill] sm:$0xff] }
 0x6e6   : > { %v3874_v37 = vadd.f32 %v3842_v49, %v21122_v52  ;;  %10893 = vrot.lane.b32.xlu0 %v10892_v23, %s12681_s25  ;;  %v10174_v45 = vadd.f32 %v10173_v54, %v10172_v7  ;;  %v16080_v3 = vsel %vm652_vm0, 0.0, %v4522_v17  ;;  %v4680_v49 = vsel %vm812_vm2, %v4677_v21, %v4679_v47 }
 0x6e7   : > { %v10175_v18 = vpop.f32.mrf.mxu0  ;;  %v16086_v7 = vsel %vm890_vm3, %v4771_v40, %v4772_v39  ;;  %v16096_v52 = vsel %vm890_vm3, %v4772_v39, %v4774_v30  ;;  %v10912_v21 = vpack.i.bf16 %v4678_v11, %v16029_v0  ;;  %v21124_v40 = vld [vmem:[#allocation28_spill] sm:$0xff]  ;;  %v21125_v39 = vld [vmem:[#allocation53_spill] sm:$0xff]  ;;  %v10937_v0 = vpack.i.bf16 %v15935_v29, %v15946_v35 }
 0x6e8   : > { %v4523_v13 = vrot.slane %v3874_v37, 7  ;;  %v3843_v22 = vmul.f32 %v10174_v45, %v15668_v62  ;;  %v21123_v37 = vld [vmem:[#allocation23_spill] sm:$0xff] }
 0x6e9   : > { %v10176_v60 = vpop.f32.mrf.mxu0  ;;  %10903 = vrot.lane.b32.xlu1 %v10902_v55, %s12678_s1 }
 0x6ea   : > { %v16089_v23 = vsel %vm652_vm0, %v4522_v17, %v4523_v13  ;;  %v16092_v54 = vsel %vm652_vm0, %v4523_v13, 0.0  ;;  %10908 = vrot.lane.b32.xlu0 %v10902_v55, %s12682_s22  ;;  %v10177_v2 = vadd.f32 %v10176_v60, %v10175_v18  ;;  %v10932_v13 = vpack.i.bf16 %v4680_v49, %v4678_v11 }
 0x6eb   : > { %v10178_v45 = vpop.f32.mrf.mxu0  ;;  %10354 = vmatmul.mubr.msk.bf16.gmra.mxu1 %vm2388_vm6, %v21123_v37  ;;  %v4779_v47 = vrot.slane %v16092_v54, 2  ;;  %v4777_v55 = vrot.slane %v16089_v23, 2  ;;  %v4776_v60 = vrot.slane %v16080_v3, 2  ;;  %v3875_v30 = vadd.f32 %v3843_v22, %v21125_v39 }
 0x6ec   : > { %v3844_v17 = vmul.f32 %v10177_v2, %v15668_v62  ;;  %10357 = vmatprep.mubr.msk.bf16.mxu1 %vm2388_vm6, %v21124_v40  ;;  %v4682_v37 = vrot.slane %v15935_v29, 1  ;;  %v4681_v11 = vrot.slane %v15946_v35, 1  ;;  %v21135_v35 = vld [vmem:[#allocation38_spill] sm:$0xff]  ;;  %v11032_v29 = vpack.i.bf16 %v16050_v48, %v16042_v38 }
 0x6ed   : > { %v10179_v18 = vpop.f32.mrf.mxu0  ;;  %10913 = vrot.lane.b32.xlu1 %v10912_v21, %s12679_s19  ;;  %v16118_v22 = vsel %vm890_vm3, %v4776_v60, %v4777_v55  ;;  %v21127_v60 = vld [vmem:[#allocation41_spill] sm:$0xff] }
 0x6ee   : > { %v3876_v2 = vadd.f32 %v3844_v17, %v21126_v41  ;;  %10933 = vrot.lane.b32.xlu0 %v10932_v13, %s12676_s30  ;;  %v10180_v40 = vadd.f32 %v10179_v18, %v10178_v45  ;;  %v16124_v41 = vsel %vm890_vm3, %v4777_v55, %v4779_v47  ;;  %v4525_v17 = vrot.slane %v3875_v30, 7  ;;  %v21128_v55 = vld [vmem:[#allocation33_spill] sm:$0xff]  ;;  %v21129_v30 = vld [vmem:[#allocation55_spill] sm:$0xff] }
 0x6ef   : > { %v10181_v19 = vpop.f32.mrf.mxu0  ;;  %v4683_v18 = vsel %vm812_vm2, %v4681_v11, %v4682_v37 }
 0x6f0   : > { %v4526_v21 = vrot.slane %v3876_v2, 7  ;;  %v3845_v39 = vmul.f32 %v10180_v40, %v15668_v62  ;;  %v10947_v11 = vpack.i.bf16 %v4683_v18, %v4680_v49 }
 0x6f1   : > { %v10182_v45 = vpop.f32.mrf.mxu0  ;;  %10918 = vrot.lane.b32.xlu1 %v10917_v36, %s12680_s20 }
 0x6f2   : > { %v3877_v4 = vadd.f32 %v3845_v39, %v21127_v60  ;;  %10938 = vrot.lane.b32.xlu0 %v10937_v0, %s12678_s1  ;;  %v10183_v2 = vadd.f32 %v10182_v45, %v10181_v19  ;;  %v16133_v40 = vsel %vm652_vm0, %v4525_v17, %v4526_v21  ;;  %v16136_v47 = vsel %vm652_vm0, %v4526_v21, 0.0  ;;  %v21130_v45 = vld [vmem:[#allocation43_spill] sm:$0xff] }
 0x6f3   : > { %10358 = vmatmul.mubr.msk.bf16.gmra.mxu1 %vm2388_vm6, %v21128_v55  ;;  %v4684_v39 = vrot.slane %v15938_v28, 1  ;;  %v16145_v60 = vsel %vm652_vm0, 0.0, %v4525_v17  ;;  %v4784_v21 = vrot.slane %v16136_v47, 2  ;;  %v10927_v55 = vpack.i.bf16 %v15932_v1, %v15929_v50 }
 0x6f4   : > { %v3846_v36 = vmul.f32 %v10183_v2, %v15668_v62  ;;  %10361 = vmatprep.mubr.msk.bf16.mxu1 %vm2388_vm6, %v21129_v30  ;;  %v4528_v19 = vrot.slane %v3877_v4, 7  ;;  %v4782_v2 = vrot.slane %v16133_v40, 2  ;;  %v4781_v49 = vrot.slane %v16145_v60, 2 }
 0x6f5   : > { %10923 = vrot.lane.b32.xlu1 %v10932_v13, %s12674_s27  ;;  %v10952_v17 = vpack.i.bf16 %v15966_v53, %v15932_v1  ;;  %v4685_v13 = vsel %vm812_vm2, %v4682_v37, %v4684_v39  ;;  %v21132_v39 = vld [vmem:[#allocation45_spill] sm:$0xff] }
 0x6f6   : > { %v3878_v16 = vadd.f32 %v3846_v36, %v21130_v45  ;;  %10948 = vrot.lane.b32.xlu0 %v10947_v11, %s12679_s19  ;;  %v16158_v4 = vsel %vm652_vm0, 0.0, %v4528_v19  ;;  %v16173_v11 = vsel %vm890_vm3, %v4782_v2, %v4784_v21  ;;  %v21131_v45 = vld [vmem:[#allocation44_spill] sm:$0xff] }
 0x6f8   : > { %v4529_v28 = vrot.slane %v3878_v16, 7  ;;  %v16170_v16 = vsel %vm890_vm3, %v4781_v49, %v4782_v2  ;;  %v10962_v2 = vpack.i.bf16 %v15969_v25, %v15966_v53  ;;  %v10972_v49 = vpack.i.bf16 %v15972_v6, %v15987_v57 }
 0x6f9   : > { %10928 = vrot.lane.b32.xlu1 %v10927_v55, %s12681_s25  ;;  %v4786_v55 = vrot.slane %v16158_v4, 2 }
 0x6fa   : > { %v16163_v36 = vsel %vm652_vm0, %v4528_v19, %v4529_v28  ;;  %v16166_v30 = vsel %vm652_vm0, %v4529_v28, 0.0  ;;  %10953 = vrot.lane.b32.xlu0 %v10952_v17, %s12680_s20  ;;  %v10957_v19 = vpack.i.bf16 %v4685_v13, %v4683_v18  ;;  %v4687_v17 = vrot.slane %v15972_v6, 1 }
 0x6fb   : > { %10362 = vmatmul.mubr.msk.bf16.gmra.mxu1 %vm2388_vm6, %v21131_v45  ;;  %v4789_v37 = vrot.slane %v16166_v30, 2  ;;  %v4787_v28 = vrot.slane %v16163_v36, 2  ;;  %v4689_v18 = vrot.slane %v15975_v31, 1  ;;  %v4694_v6 = vrot.slane %v16012_v63, 1 }
 0x6fc   : > { %10365 = vmatprep.mubr.msk.bf16.mxu1 %vm2388_vm6, %v21132_v39  ;;  %v4686_v39 = vrot.slane %v15987_v57, 1 }
 0x6fd   : > { %10943 = vrot.lane.b32.xlu1 %v10937_v0, %s12682_s22  ;;  %v16187_v21 = vsel %vm890_vm3, %v4786_v55, %v4787_v28  ;;  %v16193_v45 = vsel %vm890_vm3, %v4787_v28, %v4789_v37  ;;  %v21134_v55 = vld [vmem:[#allocation57_spill] sm:$0xff]  ;;  %v4690_v37 = vsel %vm812_vm2, %v4687_v17, %v4689_v18  ;;  %v21136_v0 = vld [vmem:[#allocation16_spill] sm:$0xff] }
 0x6fe   : > { %10958 = vrot.lane.b32.xlu0 %v10957_v19, %s12674_s27  ;;  %21133 = vst [vmem:[#allocation18_spill] sm:$0xff] %v16193_v45  ;;  %v4688_v31 = vsel %vm812_vm2, %v4686_v39, %v4687_v17  ;;  %v21137_v17 = vld [vmem:[#allocation26_spill] sm:$0xff] }
 0x6ff   : > { %v10982_v28 = vpack.i.bf16 %v4688_v31, %v4685_v13  ;;  %v11007_v13 = vpack.i.bf16 %v16002_v58, %v16019_v10 }
 0x701   : > { %10968 = vrot.lane.b32.xlu1 %v10957_v19, %s12676_s30 }
 0x702   : > { %10963 = vrot.lane.b32.xlu0 %v10962_v2, %s12681_s25  ;;  %v11002_v2 = vpack.i.bf16 %v4690_v37, %v4688_v31 }
 0x703   : > { %10366 = vmatmul.mubr.msk.bf16.gmra.mxu1 %vm2388_vm6, %v21134_v55  ;;  %v4692_v55 = vrot.slane %v16002_v58, 1 }
 0x704   : > { %10369 = vmatprep.mubr.msk.bf16.mxu1 %vm2388_vm6, %v21135_v35  ;;  %v4691_v35 = vrot.slane %v16019_v10, 1  ;;  %v11022_v10 = vpack.i.bf16 %v16042_v38, %v16009_v15 }
 0x705   : > { %10973 = vrot.lane.b32.xlu1 %v10972_v49, %s12678_s1  ;;  %v16247_v63 = vsel %vm812_vm2, %v4692_v55, %v4694_v6  ;;  %v4699_v6 = vrot.slane %v16053_v46, 1 }
 0x706   : > { %10978 = vrot.lane.b32.xlu0 %v10972_v49, %s12682_s22  ;;  %v10987_v49 = vpack.i.bf16 %v16006_v26, %v15969_v25  ;;  %v4693_v18 = vsel %vm812_vm2, %v4691_v35, %v4692_v55  ;;  %v10997_v35 = vpack.i.bf16 %v16009_v15, %v16006_v26 }
 0x707   : > { %v16211_v19 = vpop.permute.xlu1 %10703  ;;  %v11027_v57 = vpack.i.bf16 %v16247_v63, %v4693_v18 }
 0x708   : > { %v10705_v25 = vunpack.i.l.bf16 %v16211_v19 }
 0x709   : > { %10983 = vrot.lane.b32.xlu1 %v10982_v28, %s12679_s19  ;;  %v11017_v28 = vpack.i.bf16 %v4693_v18, %v4690_v37  ;;  %v11047_v18 = vpack.i.bf16 %v16045_v32, %v16058_v33 }
 0x70a   : > { %11003 = vrot.lane.b32.xlu0 %v11002_v2, %s12676_s30 }
 0x70b   : > { %10370 = vmatmul.mubr.msk.bf16.gmra.mxu1 %vm2388_vm6, %v21136_v0  ;;  %v16219_v39 = vpop.permute.xlu1 %10708 }
 0x70c   : > { %10373 = vmatprep.mubr.msk.bf16.mxu1 %vm2388_vm6, %v21137_v17  ;;  %v21138_v17 = vld [vmem:[#allocation31_spill] sm:$0xff]  ;;  %v10710_v37 = vunpack.i.l.bf16 %v16219_v39 }
 0x70d   : > { %10988 = vrot.lane.b32.xlu1 %v10987_v49, %s12680_s20 }
 0x70e   : > { %11008 = vrot.lane.b32.xlu0 %v11007_v13, %s12678_s1  ;;  %v5498_v55 = vsel %vm2388_vm6, 0.0, %v10710_v37 }
 0x70f   : > { %v16230_v31 = vpop.permute.xlu0 %10728  ;;  %v16232_v0 = vpop.permute.xlu1 %10713 }
 0x711   : > { %10993 = vrot.lane.b32.xlu1 %v11002_v2, %s12674_s27  ;;  %v10715_v2 = vunpack.i.l.bf16 %v16232_v0 }
 0x712   : > { %11018 = vrot.lane.b32.xlu0 %v11017_v28, %s12679_s19 }
 0x713   : > { %10374 = vmatmul.mubr.msk.bf16.gmra.mxu1 %vm2388_vm6, %v21138_v17  ;;  %v10719_v58 = vpop.permute.xlu1 %10718  ;;  %v16241_v49 = vpop.permute.xlu0 %10738  ;;  %v16266_v26 = vsel %vm5529_vm8, %v5498_v55, %v10715_v2  ;;  %v10716_v55 = vunpack.i.h.bf16 %v16232_v0 }
 0x714   : > { %21139 = vst [vmem:[#allocation62_spill] sm:$0xff] %v16266_v26  ;;  %v10721_v15 = vunpack.i.h.bf16 %v10719_v58  ;;  %v10720_v46 = vunpack.i.l.bf16 %v10719_v58  ;;  %v16275_v2 = vpop.f32.mrf.mxu0  ;;  %v10711_v58 = vunpack.i.h.bf16 %v16219_v39 }
 0x715   : > { %10998 = vrot.lane.b32.xlu1 %v10997_v35, %s12681_s25  ;;  %v4696_v35 = vrot.slane %v16058_v33, 1 }
 0x716   : > { %11023 = vrot.lane.b32.xlu0 %v11022_v10, %s12680_s20  ;;  %v4697_v10 = vrot.slane %v16045_v32, 1 }
 0x717   : > { %v10724_v28 = vpop.permute.xlu1 %10723  ;;  %v16252_v17 = vpop.permute.xlu0 %10743 }
 0x718   : > { %v10726_v50 = vunpack.i.h.bf16 %v10724_v28  ;;  %v10725_v37 = vunpack.i.l.bf16 %v10724_v28  ;;  %v4698_v38 = vsel %vm812_vm2, %v4696_v35, %v4697_v10  ;;  %v16273_v32 = vsel %vm812_vm2, %v4697_v10, %v4699_v6 }
 0x719   : > { %11013 = vrot.lane.b32.xlu1 %v11007_v13, %s12682_s22  ;;  %v10706_v13 = vunpack.i.h.bf16 %v16211_v19  ;;  %v5562_v19 = vsel %vm5561_vm9, %v16266_v26, %v10705_v25  ;;  %v10745_v6 = vunpack.i.l.bf16 %v16252_v17 }
 0x71a   : > { %11028 = vrot.lane.b32.xlu0 %v11027_v57, %s12674_s27 }
 0x71b   : > { %v10734_v53 = vpop.permute.xlu1 %10733  ;;  %v10749_v1 = vpop.permute.xlu0 %10748  ;;  %v5563_v28 = vsel %vm5561_vm9, %v16266_v26, %v10706_v13 }
 0x71c   : > { %v10736_v12 = vunpack.i.h.bf16 %v10734_v53  ;;  %v10735_v51 = vunpack.i.l.bf16 %v10734_v53  ;;  %v10740_v53 = vunpack.i.l.bf16 %v16241_v49  ;;  %v5595_v35 = vsel %vm1336_vm1, %v5563_v28, %v10721_v15 }
 0x71d   : > { %11038 = vrot.lane.b32.xlu1 %v11027_v57, %s12676_s30  ;;  %v5594_v57 = vsel %vm1336_vm1, %v5562_v19, %v10720_v46  ;;  %v5628_v0 = vsel %vm5626_vm10, %v5595_v35, %v10726_v50  ;;  %v11052_v46 = vpack.i.bf16 %v4698_v38, %v16247_v63  ;;  %v16294_v19 = vpop.f32.mrf.mxu0  ;;  %v11072_v50 = vpack.i.bf16 %v16273_v32, %v4698_v38 }
 0x71e   : > { %11033 = vrot.lane.b32.xlu0 %v11032_v29, %s12681_s25  ;;  %v5627_v39 = vsel %vm5626_vm10, %v5594_v57, %v10725_v37  ;;  %v5661_v29 = vsel %vm5659_vm11, %v5628_v0, %v10736_v12  ;;  %v4702_v37 = vrot.slane %v16089_v23, 1  ;;  %v10730_v12 = vunpack.i.l.bf16 %v16230_v31 }
 0x71f   : > { %v10759_v10 = vpop.permute.xlu1 %10758  ;;  %v10754_v33 = vpop.permute.xlu0 %10753  ;;  %v5660_v13 = vsel %vm5659_vm11, %v5627_v39, %v10735_v51  ;;  %v5499_v51 = vsel %vm2388_vm6, %v15687_v24, %v10711_v58  ;;  %v5500_v63 = vsel %vm2388_vm6, %v15691_v5, %v10740_v53  ;;  %v10750_v39 = vunpack.i.l.bf16 %v10749_v1 }
 0x720   : > { %v10761_v25 = vunpack.i.h.bf16 %v10759_v10  ;;  %v10760_v45 = vunpack.i.l.bf16 %v10759_v10  ;;  %v5532_v10 = vsel %vm5529_vm8, %v5500_v63, %v10745_v6  ;;  %v10731_v0 = vunpack.i.h.bf16 %v16230_v31  ;;  %v10187_v5 = vpop.f32.mrf.mxu0 }
 0x721   : > { %11043 = vrot.lane.b32.xlu1 %v11047_v18, %s12678_s1  ;;  %v4701_v24 = vrot.slane %v16080_v3, 1 }
 0x722   : > { %v5693_v15 = vsel %vm5692_vm12, %v5660_v13, %v10760_v45  ;;  %v5694_v28 = vsel %vm5692_vm12, %v5661_v29, %v10761_v25  ;;  %11048 = vrot.lane.b32.xlu0 %v11047_v18, %s12682_s22  ;;  %v5531_v45 = vsel %vm5529_vm8, %v5499_v51, %v10716_v55  ;;  %v10751_v18 = vunpack.i.h.bf16 %v10749_v1 }
 0x723   : > { %v5725_v57 = vpack.c.bf16 %v5694_v28, %v5693_v15  ;;  %v16306_v35 = vpop.permute.xlu1 %10763  ;;  %v10769_v38 = vpop.permute.xlu0 %10768  ;;  %v10756_v25 = vunpack.i.h.bf16 %v10754_v33  ;;  %v10755_v13 = vunpack.i.l.bf16 %v10754_v33  ;;  %v21140_v55 = vpack.c.bf16 %v15799_v8, %v15789_v59 }
 0x724   : > { %v10771_v58 = vunpack.i.h.bf16 %v10769_v38  ;;  %v10770_v53 = vunpack.i.l.bf16 %v10769_v38  ;;  %v4704_v1 = vrot.slane %v16092_v54, 1  ;;  %v5564_v31 = vsel %vm5561_vm9, %v5531_v45, %v10730_v12 }
 0x725   : > { %11053 = vrot.lane.b32.xlu1 %v11052_v46, %s12679_s19  ;;  %5915 = vmatmul.mubr.bf16.vlgmr.msra.gmra.mxu0 %v5725_v57  ;;  %v5565_v33 = vsel %vm5561_vm9, %v5532_v10, %v10731_v0  ;;  %v11057_v29 = vpack.i.bf16 %v16086_v7, %v16050_v48  ;;  %v5596_v46 = vsel %vm1336_vm1, %v5564_v31, %v10750_v39  ;;  %v10188_v57 = vpop.f32.mrf.mxu0  ;;  %v4706_v31 = vrot.slane %v16145_v60, 1 }
 0x726   : > { %11073 = vrot.lane.b32.xlu0 %v11072_v50, %s12676_s30  ;;  %9687 = vmatprep.mubr.msk.bf16.mxu0 %vm2388_vm6, %v21140_v55  ;;  %v5597_v15 = vsel %vm1336_vm1, %v5565_v33, %v10751_v18  ;;  %v11077_v59 = vpack.i.bf16 %v16089_v23, %v16080_v3  ;;  %v4703_v8 = vsel %vm812_vm2, %v4701_v24, %v4702_v37 }
 0x727   : > { %v16321_v6 = vpop.permute.xlu1 %10773  ;;  %v10794_v28 = vpop.permute.xlu0 %10793  ;;  %v5629_v54 = vsel %vm5626_vm10, %v5596_v46, %v10755_v13  ;;  %v5630_v51 = vsel %vm5626_vm10, %v5597_v15, %v10756_v25  ;;  %v11087_v13 = vpack.i.bf16 %v4703_v8, %v16273_v32  ;;  %v16344_v55 = vsel %vm812_vm2, %v4702_v37, %v4704_v1 }
 0x728   : > { %v10796_v12 = vunpack.i.h.bf16 %v10794_v28  ;;  %v10795_v63 = vunpack.i.l.bf16 %v10794_v28  ;;  %v5663_v45 = vsel %vm5659_vm11, %v5630_v51, %v10771_v58  ;;  %v5662_v10 = vsel %vm5659_vm11, %v5629_v54, %v10770_v53 }
 0x729   : > { %11058 = vrot.lane.b32.xlu1 %v11057_v29, %s12680_s20  ;;  %v4707_v58 = vrot.slane %v16133_v40, 1  ;;  %v4709_v53 = vrot.slane %v16136_v47, 1  ;;  %v11067_v29 = vpack.i.bf16 %v16096_v52, %v16086_v7  ;;  %v21141_v37 = vpack.c.bf16 %v15823_v42, %v15818_v14 }
 0x72a   : > { %11078 = vrot.lane.b32.xlu0 %v11077_v59, %s12678_s1  ;;  %v5696_v18 = vsel %vm5692_vm12, %v5663_v45, %v10796_v12  ;;  %v5695_v39 = vsel %vm5692_vm12, %v5662_v10, %v10795_v63  ;;  %v11092_v47 = vpack.i.bf16 %v16118_v22, %v16096_v52  ;;  %v10186_v46 = vadd.f32 %v16294_v19, %v16275_v2 }
 0x72b   : > { %v16338_v38 = vpop.permute.xlu1 %10778  ;;  %v16340_v0 = vpop.permute.xlu0 %10798  ;;  %v5727_v24 = vpack.c.bf16 %v5696_v18, %v5695_v39  ;;  %v11102_v54 = vpack.i.bf16 %v16124_v41, %v16118_v22  ;;  %v16367_v51 = vsel %vm812_vm2, %v4706_v31, %v4707_v58  ;;  %v10741_v14 = vunpack.i.h.bf16 %v16241_v49 }
 0x72c   : > { %v10190_v25 = vpop.f32.mrf.mxu0  ;;  %v16377_v2 = vsel %vm812_vm2, %v4707_v58, %v4709_v53  ;;  %v10189_v19 = vadd.f32 %v10188_v57, %v10187_v5  ;;  %v10746_v12 = vunpack.i.h.bf16 %v16252_v17  ;;  %v10775_v63 = vunpack.i.l.bf16 %v16321_v6  ;;  %v21142_v17 = vld [vmem:[#allocation39_spill] sm:$0xff] }
 0x72d   : > { %11063 = vrot.lane.b32.xlu1 %v11072_v50, %s12674_s27  ;;  %5923 = vmatmul.mubr.bf16.gmra.mxu0 %v5727_v24  ;;  %v11097_v50 = vpack.i.bf16 %v16344_v55, %v4703_v8  ;;  %v16374_v8 = vpack.i.bf16 %v16133_v40, %v16145_v60  ;;  %v4711_v49 = vrot.slane %v16158_v4, 1  ;;  %v10780_v10 = vunpack.i.l.bf16 %v16338_v38 }
 0x72e   : > { %11088 = vrot.lane.b32.xlu0 %v11087_v13, %s12679_s19  ;;  %v10191_v33 = vpop.f32.mrf.mxu0  ;;  %9688 = vmatprep.mubr.msk.bf16.mxu0 %vm2388_vm6, %v21141_v37  ;;  %v16387_v13 = vmul.f32 %v10186_v46, %v15668_v62  ;;  %v10765_v5 = vunpack.i.l.bf16 %v16306_v35  ;;  %v16395_v58 = vpack.i.bf16 %v16377_v2, %v16367_v51  ;;  %v5501_v53 = vsel %vm2388_vm6, %v15712_v44, %v10741_v14 }
 0x72f   : > { %v10192_v32 = vadd.f32 %v10191_v33, %v10190_v25  ;;  %v10784_v1 = vpop.permute.xlu1 %10783  ;;  %v16362_v15 = vpop.permute.xlu0 %10808  ;;  %v11122_v25 = vpack.i.bf16 %v16367_v51, %v16344_v55  ;;  %v10776_v31 = vunpack.i.h.bf16 %v16321_v6  ;;  %v5533_v37 = vsel %vm5529_vm8, %v5501_v53, %v10746_v12 }
 0x730   : > { %v10193_v28 = vpop.f32.mrf.mxu0  ;;  %v4712_v44 = vrot.slane %v16163_v36, 1  ;;  %v10786_v46 = vunpack.i.h.bf16 %v10784_v1 }
 0x731   : > { %v3849_v42 = vmul.f32 %v10192_v32, %v15668_v62  ;;  %11068 = vrot.lane.b32.xlu1 %v11067_v29, %s12681_s25  ;;  %v11127_v29 = vpack.i.bf16 %v16170_v16, %v16124_v41  ;;  %v16405_v32 = vmul.f32 %v10189_v19, %v15668_v62 }
 0x732   : > { %11093 = vrot.lane.b32.xlu0 %v11092_v47, %s12680_s20  ;;  %v10194_v45 = vpop.f32.mrf.mxu0  ;;  %v5502_v47 = vsel %vm2388_vm6, %v15722_v43, %v10775_v63  ;;  %v5503_v43 = vsel %vm2388_vm6, %v15772_v61, %v10776_v31 }
 0x733   : > { %v10195_v18 = vadd.f32 %v10194_v45, %v10193_v28  ;;  %v10789_v39 = vpop.permute.xlu1 %10788  ;;  %v3881_v57 = vadd.f32 %v3849_v42, %v21142_v17  ;;  %v16391_v24 = vpop.permute.xlu0 %10813  ;;  %v5534_v6 = vsel %vm5529_vm8, %v5502_v47, %v10780_v10  ;;  %v10785_v28 = vunpack.i.l.bf16 %v10784_v1 }
 0x734   : > { %v10766_v45 = vunpack.i.h.bf16 %v16306_v35  ;;  %v10791_v12 = vunpack.i.h.bf16 %v10789_v39  ;;  %v10790_v17 = vunpack.i.l.bf16 %v10789_v39  ;;  %v10781_v1 = vunpack.i.h.bf16 %v16338_v38 }
 0x735   : > { %v3850_v33 = vmul.f32 %v10195_v18, %v15668_v62  ;;  %11083 = vrot.lane.b32.xlu1 %v11077_v59, %s12682_s22  ;;  %v21143_v59 = vld [vmem:[#allocation47_spill] sm:$0xff]  ;;  %v5566_v62 = vsel %vm5561_vm9, %v5533_v37, %v10765_v5  ;;  %v4534_v19 = vrot.slane %v3881_v57, 7  ;;  %v10810_v10 = vunpack.i.l.bf16 %v16362_v15 }
 0x736   : > { %11098 = vrot.lane.b32.xlu0 %v11097_v50, %s12674_s27  ;;  %v5598_v5 = vsel %vm1336_vm1, %v5566_v62, %v10785_v28  ;;  %v10815_v31 = vunpack.i.l.bf16 %v16391_v24 }
 0x737   : > { %v3882_v14 = vadd.f32 %v3850_v33, %v21143_v59  ;;  %v10804_v42 = vpop.permute.xlu1 %10803  ;;  %v10819_v18 = vpop.permute.xlu0 %10818  ;;  %v5567_v33 = vsel %vm5561_vm9, %v5534_v6, %v10766_v45  ;;  %v16432_v38 = vsel %vm652_vm0, 0.0, %v4534_v19  ;;  %v10800_v6 = vunpack.i.l.bf16 %v16340_v0 }
 0x738   : > { %v10806_v53 = vunpack.i.h.bf16 %v10804_v42  ;;  %v10805_v35 = vunpack.i.l.bf16 %v10804_v42  ;;  %v5599_v57 = vsel %vm1336_vm1, %v5567_v33, %v10786_v46  ;;  %v5631_v46 = vsel %vm5626_vm10, %v5598_v5, %v10790_v17 }
 0x739   : > { %v4535_v63 = vrot.slane %v3882_v14, 7  ;;  %11108 = vrot.lane.b32.xlu1 %v11097_v50, %s12676_s30  ;;  %v5632_v37 = vsel %vm5626_vm10, %v5599_v57, %v10791_v12  ;;  %v4803_v12 = vrot.slane %v16432_v38, 2  ;;  %v10820_v5 = vunpack.i.l.bf16 %v10819_v18 }
 0x73a   : > { %11103 = vrot.lane.b32.xlu0 %v11102_v54, %s12681_s25  ;;  %v5665_v28 = vsel %vm5659_vm11, %v5632_v37, %v10806_v53  ;;  %v5664_v42 = vsel %vm5659_vm11, %v5631_v46, %v10805_v35  ;;  %v10821_v35 = vunpack.i.h.bf16 %v10819_v18  ;;  %v21145_v18 = vld [vmem:[#allocation58_spill] sm:$0xff]  ;;  %v11147_v46 = vpack.i.bf16 %v16163_v36, %v16158_v4 }
 0x73b   : > { %v16426_v61 = vsel %vm652_vm0, %v4534_v19, %v4535_v63  ;;  %v16429_v39 = vsel %vm652_vm0, %v4535_v63, 0.0  ;;  %v10829_v50 = vpop.permute.xlu1 %10828  ;;  %v10824_v47 = vpop.permute.xlu0 %10823  ;;  %v5535_v19 = vsel %vm5529_vm8, %v5503_v43, %v10781_v1  ;;  %v5504_v63 = vsel %vm2388_vm6, %v15762_v56, %v10810_v10  ;;  %v21144_v43 = vld [vmem:[#allocation54_spill] sm:$0xff] }
 0x73c   : > { %v10831_v54 = vunpack.i.h.bf16 %v10829_v50  ;;  %v10830_v59 = vunpack.i.l.bf16 %v10829_v50  ;;  %v4806_v14 = vrot.slane %v16429_v39, 2  ;;  %v4804_v62 = vrot.slane %v16426_v61, 2 }
 0x73d   : > { %11113 = vrot.lane.b32.xlu1 %v16374_v8, %s12678_s1  ;;  %v5536_v33 = vsel %vm5529_vm8, %v5504_v63, %v10815_v31  ;;  %v10826_v37 = vunpack.i.h.bf16 %v10824_v47  ;;  %v3879_v1 = vadd.f32 %v16387_v13, %v21144_v43  ;;  %v5568_v55 = vsel %vm5561_vm9, %v5535_v19, %v10800_v6 }
 0x73e   : > { %v5698_v45 = vsel %vm5692_vm12, %v5665_v28, %v10831_v54  ;;  %11118 = vrot.lane.b32.xlu0 %v16374_v8, %s12682_s22  ;;  %v5697_v17 = vsel %vm5692_vm12, %v5664_v42, %v10830_v59  ;;  %v10801_v8 = vunpack.i.h.bf16 %v16340_v0  ;;  %v10825_v54 = vunpack.i.l.bf16 %v10824_v47 }
 0x73f   : > { %v16452_v53 = vpop.permute.xlu1 %10833  ;;  %v10839_v57 = vpop.permute.xlu0 %10838  ;;  %v5729_v50 = vpack.c.bf16 %v5698_v45, %v5697_v17  ;;  %v16461_v56 = vsel %vm890_vm3, %v4803_v12, %v4804_v62  ;;  %v16468_v0 = vsel %vm890_vm3, %v4804_v62, %v4806_v14  ;;  %v3880_v47 = vadd.f32 %v16405_v32, %v21145_v18 }
 0x740   : > { %v10841_v10 = vunpack.i.h.bf16 %v10839_v57  ;;  %v10840_v31 = vunpack.i.l.bf16 %v10839_v57  ;;  %v5569_v51 = vsel %vm5561_vm9, %v5536_v33, %v10801_v8  ;;  %v5600_v28 = vsel %vm1336_vm1, %v5568_v55, %v10820_v5 }
 0x741   : > { %11123 = vrot.lane.b32.xlu1 %v11122_v25, %s12679_s19  ;;  %5931 = vmatmul.mubr.bf16.gmra.mxu0 %v5729_v50  ;;  %v21146_v25 = vpack.c.bf16 %v15875_v27, %v15872_v9  ;;  %v5601_v59 = vsel %vm1336_vm1, %v5569_v51, %v10821_v35  ;;  %v4713_v32 = vsel %vm812_vm2, %v4711_v49, %v4712_v44  ;;  %v4532_v49 = vrot.slane %v3880_v47, 7 }
 0x742   : > { %11143 = vrot.lane.b32.xlu0 %v16395_v58, %s12676_s30  ;;  %v5633_v27 = vsel %vm5626_vm10, %v5600_v28, %v10825_v54  ;;  %v5634_v6 = vsel %vm5626_vm10, %v5601_v59, %v10826_v37  ;;  %v4531_v33 = vrot.slane %v3879_v1, 7  ;;  %v11157_v5 = vpack.i.bf16 %v4713_v32, %v16377_v2  ;;  %v21148_v59 = vld [vmem:[#allocation18_spill] sm:$0xff] }
 0x743   : > { %9689 = vmatprep.mubr.msk.bf16.mxu0 %vm2388_vm6, %v21146_v25  ;;  %v16478_v13 = vpop.permute.xlu1 %10843  ;;  %v10864_v14 = vpop.permute.xlu0 %10863  ;;  %v5667_v62 = vsel %vm5659_vm11, %v5634_v6, %v10841_v10  ;;  %v5666_v19 = vsel %vm5659_vm11, %v5633_v27, %v10840_v31  ;;  %v21147_v8 = vpack.c.bf16 %v15898_v34, %v15895_v20  ;;  %v11137_v2 = vpack.i.bf16 %v16173_v11, %v16170_v16 }
 0x744   : > { %v10866_v42 = vunpack.i.h.bf16 %v10864_v14  ;;  %v10865_v45 = vunpack.i.l.bf16 %v10864_v14  ;;  %v16512_v50 = vsel %vm652_vm0, %v4531_v33, %v4532_v49  ;;  %v11162_v43 = vpack.i.bf16 %v16187_v21, %v16173_v11 }
 0x745   : > { %11128 = vrot.lane.b32.xlu1 %v11127_v29, %s12680_s20  ;;  %v4714_v29 = vrot.slane %v16166_v30, 1  ;;  %v16521_v30 = vsel %vm652_vm0, 0.0, %v4531_v33  ;;  %v10845_v34 = vunpack.i.l.bf16 %v16478_v13  ;;  %v4717_v1 = vrot.slane %v16512_v50, 1 }
 0x746   : > { %11148 = vrot.lane.b32.xlu0 %v11147_v46, %s12678_s1  ;;  %v5700_v12 = vsel %vm5692_vm12, %v5667_v62, %v10866_v42  ;;  %v5699_v63 = vsel %vm5692_vm12, %v5666_v19, %v10865_v45  ;;  %v4716_v10 = vrot.slane %v16521_v30, 1  ;;  %v4791_v55 = vrot.slane %v16521_v30, 2  ;;  %v21149_v45 = vld [vmem:[#allocation102_spill] sm:$0xff] }
 0x747   : > { %v16502_v17 = vpop.permute.xlu1 %10848  ;;  %v5731_v57 = vpack.c.bf16 %v5700_v12, %v5699_v63  ;;  %v16534_v20 = vsel %vm812_vm2, %v4712_v44, %v4714_v29  ;;  %v10811_v51 = vunpack.i.h.bf16 %v16362_v15  ;;  %v10816_v28 = vunpack.i.h.bf16 %v16391_v24  ;;  %v21150_v12 = vld [vmem:[#allocation100_spill] sm:$0xff] }
 0x748   : > { %v16504_v35 = vpop.permute.xlu0 %10868  ;;  %v10850_v18 = vunpack.i.l.bf16 %v16502_v17  ;;  %v11167_v44 = vpack.i.bf16 %v16534_v20, %v4713_v32  ;;  %v11172_v14 = vpack.i.bf16 %v21148_v59, %v16187_v21  ;;  %v11187_v27 = vpack.i.bf16 %v16512_v50, %v16521_v30 }
 0x749   : > { %11133 = vrot.lane.b32.xlu1 %v16395_v58, %s12674_s27  ;;  %5939 = vmatmul.mubr.bf16.gmra.mxu0 %v5731_v57  ;;  %v16524_v58 = vsel %vm652_vm0, %v4532_v49, 0.0  ;;  %v4792_v6 = vrot.slane %v16512_v50, 2  ;;  %v10835_v42 = vunpack.i.l.bf16 %v16452_v53  ;;  %v5506_v15 = vsel %vm2388_vm6, %v21149_v45, %v10845_v34 }
 0x74a   : > { %11158 = vrot.lane.b32.xlu0 %v11157_v5, %s12679_s19  ;;  %9690 = vmatprep.mubr.msk.bf16.mxu0 %vm2388_vm6, %v21147_v8  ;;  %v4719_v31 = vrot.slane %v16524_v58, 1  ;;  %v4718_v32 = vsel %vm812_vm2, %v4716_v10, %v4717_v1  ;;  %v5538_v24 = vsel %vm5529_vm8, %v5506_v15, %v10850_v18  ;;  %v5505_v63 = vsel %vm2388_vm6, %v21150_v12, %v10811_v51 }
 0x74b   : > { %v10854_v37 = vpop.permute.xlu1 %10853  ;;  %v10836_v33 = vunpack.i.h.bf16 %v16452_v53  ;;  %v5537_v8 = vsel %vm5529_vm8, %v5505_v63, %v10816_v28  ;;  %v10851_v53 = vunpack.i.h.bf16 %v16502_v17  ;;  %v4799_v12 = vrot.slane %v16426_v61, 1  ;;  %v21151_v63 = vld [vmem:[#allocation83_spill] sm:$0xff] }
 0x74c   : > { %v16526_v54 = vpop.permute.xlu0 %10878  ;;  %v10855_v62 = vunpack.i.l.bf16 %v10854_v37  ;;  %v16561_v49 = vsel %vm812_vm2, %v4717_v1, %v4719_v31  ;;  %v5570_v34 = vsel %vm5561_vm9, %v5537_v8, %v10835_v42  ;;  %v10846_v1 = vunpack.i.h.bf16 %v16478_v13 }
 0x74d   : > { %11138 = vrot.lane.b32.xlu1 %v11137_v2, %s12681_s25  ;;  %v5571_v10 = vsel %vm5561_vm9, %v5538_v24, %v10836_v33  ;;  %v10880_v31 = vunpack.i.l.bf16 %v16526_v54  ;;  %v11212_v15 = vpack.i.bf16 %v16561_v49, %v4718_v32  ;;  %v11192_v24 = vpack.i.bf16 %v4718_v32, %v16534_v20 }
 0x74e   : > { %11163 = vrot.lane.b32.xlu0 %v11162_v43, %s12680_s20  ;;  %v5602_v18 = vsel %vm1336_vm1, %v5570_v34, %v10855_v62  ;;  %v5507_v33 = vsel %vm2388_vm6, %v21151_v63, %v10846_v1  ;;  %v4794_v1 = vrot.slane %v16524_v58, 2  ;;  %v11217_v58 = vpack.i.bf16 %v16426_v61, %v16432_v38 }
 0x74f   : > { %v10859_v47 = vpop.permute.xlu1 %10858 }
 0x750   : > { %v16544_v25 = vpop.permute.xlu0 %10883  ;;  %v10861_v5 = vunpack.i.h.bf16 %v10859_v47  ;;  %v10860_v57 = vunpack.i.l.bf16 %v10859_v47 }
 0x751   : > { %11153 = vrot.lane.b32.xlu1 %v11147_v46, %s12682_s22  ;;  %v10856_v46 = vunpack.i.h.bf16 %v10854_v37  ;;  %v16571_v37 = vsel %vm890_vm3, %v4791_v55, %v4792_v6  ;;  %v10885_v51 = vunpack.i.l.bf16 %v16544_v25 }
 0x752   : > { %11168 = vrot.lane.b32.xlu0 %v11167_v44, %s12674_s27 }
 0x753   : > { %v10874_v19 = vpop.permute.xlu1 %10873  ;;  %v5603_v47 = vsel %vm1336_vm1, %v5571_v10, %v10856_v46  ;;  %v4801_v46 = vrot.slane %v16429_v39, 1  ;;  %v5539_v39 = vsel %vm5529_vm8, %v5507_v33, %v10851_v53  ;;  %v10871_v10 = vunpack.i.h.bf16 %v16504_v35  ;;  %v21153_v53 = vld [vmem:[#allocation106_spill] sm:$0xff] }
 0x754   : > { %v10889_v29 = vpop.permute.xlu0 %10888  ;;  %v10876_v2 = vunpack.i.h.bf16 %v10874_v19  ;;  %v10875_v43 = vunpack.i.l.bf16 %v10874_v19  ;;  %v5636_v28 = vsel %vm5626_vm10, %v5603_v47, %v10861_v5  ;;  %v10870_v5 = vunpack.i.l.bf16 %v16504_v35 }
 0x755   : > { %11178 = vrot.lane.b32.xlu1 %v11167_v44, %s12676_s30  ;;  %v5635_v44 = vsel %vm5626_vm10, %v5602_v18, %v10860_v57  ;;  %v21152_v57 = vld [vmem:[#allocation82_spill] sm:$0xff]  ;;  %v10890_v34 = vunpack.i.l.bf16 %v10889_v29 }
 0x756   : > { %11173 = vrot.lane.b32.xlu0 %v11172_v14, %s12681_s25  ;;  %v5668_v45 = vsel %vm5659_vm11, %v5635_v44, %v10875_v43  ;;  %v5669_v14 = vsel %vm5659_vm11, %v5636_v28, %v10876_v2  ;;  %v5508_v8 = vsel %vm2388_vm6, %v21152_v57, %v10880_v31  ;;  %v10891_v43 = vunpack.i.h.bf16 %v10889_v29 }
 0x757   : > { %v10899_v55 = vpop.permute.xlu1 %10898  ;;  %v5540_v32 = vsel %vm5529_vm8, %v5508_v8, %v10885_v51  ;;  %v4798_v31 = vrot.slane %v16432_v38, 1  ;;  %v21154_v51 = vld [vmem:[#allocation104_spill] sm:$0xff]  ;;  %v5572_v35 = vsel %vm5561_vm9, %v5539_v39, %v10870_v5 }
 0x758   : > { %v10894_v13 = vpop.permute.xlu0 %10893  ;;  %v10901_v42 = vunpack.i.h.bf16 %v10899_v55  ;;  %v10900_v17 = vunpack.i.l.bf16 %v10899_v55  ;;  %v21155_v28 = vpack.c.bf16 %v21153_v53, %v21154_v51  ;;  %v5573_v29 = vsel %vm5561_vm9, %v5540_v32, %v10871_v10 }
 0x759   : > { %11183 = vrot.lane.b32.xlu1 %v11187_v27, %s12678_s1  ;;  %v10896_v18 = vunpack.i.h.bf16 %v10894_v13  ;;  %v10895_v47 = vunpack.i.l.bf16 %v10894_v13  ;;  %v16637_v32 = vsel %vm890_vm3, %v4792_v6, %v4794_v1  ;;  %v11232_v6 = vpack.i.bf16 %v16468_v0, %v16461_v56 }
 0x75a   : > { %v5701_v62 = vsel %vm5692_vm12, %v5668_v45, %v10900_v17  ;;  %v5702_v19 = vsel %vm5692_vm12, %v5669_v14, %v10901_v42  ;;  %11188 = vrot.lane.b32.xlu0 %v11187_v27, %s12682_s22  ;;  %v11197_v42 = vpack.i.bf16 %v16571_v37, %v21148_v59  ;;  %v5604_v17 = vsel %vm1336_vm1, %v5572_v35, %v10890_v34  ;;  %v21157_v34 = vld [vmem:[#allocation92_spill] sm:$0xff] }
 0x75b   : > { %v16599_v2 = vpop.permute.xlu1 %10903  ;;  %v5733_v20 = vpack.c.bf16 %v5702_v19, %v5701_v62  ;;  %v5605_v45 = vsel %vm1336_vm1, %v5573_v29, %v10891_v43  ;;  %v4802_v62 = vsel %vm812_vm2, %v4799_v12, %v4801_v46  ;;  %v5637_v19 = vsel %vm5626_vm10, %v5604_v17, %v10895_v47  ;;  %v21156_v43 = vld [vmem:[#allocation95_spill] sm:$0xff] }
 0x75c   : > { %v10909_v27 = vpop.permute.xlu0 %10908  ;;  %v5638_v63 = vsel %vm5626_vm10, %v5605_v45, %v10896_v18  ;;  %v11207_v18 = vpack.i.bf16 %v16637_v32, %v16571_v37  ;;  %v10886_v53 = vunpack.i.h.bf16 %v16544_v25  ;;  %v10905_v51 = vunpack.i.l.bf16 %v16599_v2 }
 0x75d   : > { %11193 = vrot.lane.b32.xlu1 %v11192_v24, %s12679_s19  ;;  %5947 = vmatmul.mubr.bf16.gmra.mxu0 %v5733_v20  ;;  %v10911_v55 = vunpack.i.h.bf16 %v10909_v27  ;;  %v10910_v44 = vunpack.i.l.bf16 %v10909_v27  ;;  %v4800_v24 = vsel %vm812_vm2, %v4798_v31, %v4799_v12  ;;  %v21158_v27 = vpack.c.bf16 %v21156_v43, %v21157_v34 }
 0x75e   : > { %11213 = vrot.lane.b32.xlu0 %v11212_v15, %s12676_s30  ;;  %9691 = vmatprep.mubr.msk.bf16.mxu0 %vm2388_vm6, %v21155_v28  ;;  %v11227_v12 = vpack.i.bf16 %v4802_v62, %v4800_v24  ;;  %v21159_v28 = vld [vmem:[#allocation87_spill] sm:$0xff] }
 0x75f   : > { %v16614_v13 = vpop.permute.xlu1 %10913  ;;  %v5671_v61 = vsel %vm5659_vm11, %v5638_v63, %v10911_v55  ;;  %v5670_v38 = vsel %vm5659_vm11, %v5637_v19, %v10910_v44  ;;  %v10881_v55 = vunpack.i.h.bf16 %v16526_v54  ;;  %v10906_v54 = vunpack.i.h.bf16 %v16599_v2 }
 0x760   : > { %v10934_v14 = vpop.permute.xlu0 %10933 }
 0x761   : > { %v10936_v33 = vunpack.i.h.bf16 %v10934_v14  ;;  %v10935_v5 = vunpack.i.l.bf16 %v10934_v14  ;;  %11198 = vrot.lane.b32.xlu1 %v11197_v42, %s12680_s20  ;;  %v21160_v14 = vld [vmem:[#allocation90_spill] sm:$0xff] }
 0x762   : > { %11218 = vrot.lane.b32.xlu0 %v11217_v58, %s12678_s1  ;;  %v5509_v24 = vsel %vm2388_vm6, %v21160_v14, %v10881_v55 }
 0x763   : > { %v5704_v57 = vsel %vm5692_vm12, %v5671_v61, %v10936_v33  ;;  %v5703_v8 = vsel %vm5692_vm12, %v5670_v38, %v10935_v5  ;;  %v10919_v20 = vpop.permute.xlu1 %10918  ;;  %v10916_v61 = vunpack.i.h.bf16 %v16614_v13 }
 0x764   : > { %v16632_v46 = vpop.permute.xlu0 %10938  ;;  %v5735_v39 = vpack.c.bf16 %v5704_v57, %v5703_v8  ;;  %v10920_v1 = vunpack.i.l.bf16 %v10919_v20  ;;  %v10921_v38 = vunpack.i.h.bf16 %v10919_v20 }
 0x765   : > { %11203 = vrot.lane.b32.xlu1 %v11212_v15, %s12674_s27  ;;  %v10915_v15 = vunpack.i.l.bf16 %v16614_v13 }
 0x766   : > { %11228 = vrot.lane.b32.xlu0 %v11227_v12, %s12674_s27  ;;  %5955 = vmatmul.mubr.bf16.gmra.mxu0 %v5735_v39 }
 0x767   : > { %9692 = vmatprep.mubr.msk.bf16.mxu0 %vm2388_vm6, %v21158_v27  ;;  %v10924_v10 = vpop.permute.xlu1 %10923  ;;  %v5510_v35 = vsel %vm2388_vm6, %v21159_v28, %v10915_v15 }
 0x768   : > { %v16647_v47 = vpop.permute.xlu0 %10948  ;;  %v5542_v29 = vsel %vm5529_vm8, %v5510_v35, %v10920_v1  ;;  %v10926_v42 = vunpack.i.h.bf16 %v10924_v10  ;;  %v10925_v17 = vunpack.i.l.bf16 %v10924_v10 }
 0x769   : > { %11208 = vrot.lane.b32.xlu1 %v11207_v18, %s12681_s25  ;;  %v5575_v57 = vsel %vm5561_vm9, %v5542_v29, %v10906_v54  ;;  %v10950_v8 = vunpack.i.l.bf16 %v16647_v47  ;;  %v10941_v54 = vunpack.i.h.bf16 %v16632_v46 }
 0x76a   : > { %11233 = vrot.lane.b32.xlu0 %v11232_v6, %s12681_s25  ;;  %v5607_v39 = vsel %vm1336_vm1, %v5575_v57, %v10926_v42 }
 0x76b   : > { %v10929_v31 = vpop.permute.xlu1 %10928 }
 0x76c   : > { %v16655_v44 = vpop.permute.xlu0 %10953  ;;  %v10931_v62 = vunpack.i.h.bf16 %v10929_v31  ;;  %v10930_v19 = vunpack.i.l.bf16 %v10929_v31  ;;  %v21161_v31 = vld [vmem:[#allocation88_spill] sm:$0xff] }
 0x76d   : > { %11223 = vrot.lane.b32.xlu1 %v11217_v58, %s12682_s22  ;;  %v5541_v58 = vsel %vm5529_vm8, %v5509_v24, %v10886_v53  ;;  %v10955_v43 = vunpack.i.l.bf16 %v16655_v44  ;;  %v5511_v55 = vsel %vm2388_vm6, %v21161_v31, %v10916_v61  ;;  %v10940_v53 = vunpack.i.l.bf16 %v16632_v46 }
 0x76e   : > { %v5574_v5 = vsel %vm5561_vm9, %v5541_v58, %v10905_v51  ;;  %v21162_v51 = vld [vmem:[#allocation85_spill] sm:$0xff]  ;;  %v5543_v42 = vsel %vm5529_vm8, %v5511_v55, %v10921_v38 }
 0x76f   : > { %v10944_v45 = vpop.permute.xlu1 %10943  ;;  %v5606_v2 = vsel %vm1336_vm1, %v5574_v5, %v10925_v17  ;;  %v5512_v28 = vsel %vm2388_vm6, %v21162_v51, %v10950_v8  ;;  %v21164_v5 = vld [vmem:[#allocation113_spill] sm:$0xff]  ;;  %v5576_v57 = vsel %vm5561_vm9, %v5543_v42, %v10940_v53  ;;  %v10951_v42 = vunpack.i.h.bf16 %v16647_v47 }
 0x770   : > { %v10959_v25 = vpop.permute.xlu0 %10958  ;;  %v10946_v63 = vunpack.i.h.bf16 %v10944_v45  ;;  %v10945_v33 = vunpack.i.l.bf16 %v10944_v45  ;;  %v5639_v27 = vsel %vm5626_vm10, %v5606_v2, %v10930_v19  ;;  %v5544_v17 = vsel %vm5529_vm8, %v5512_v28, %v10955_v43 }
 0x771   : > { %11238 = vrot.lane.b32.xlu1 %v11227_v12, %s12676_s30  ;;  %v5640_v12 = vsel %vm5626_vm10, %v5607_v39, %v10931_v62  ;;  %v10961_v45 = vunpack.i.h.bf16 %v10959_v25  ;;  %v10960_v14 = vunpack.i.l.bf16 %v10959_v25  ;;  %v5577_v38 = vsel %vm5561_vm9, %v5544_v17, %v10941_v54 }
 0x772   : > { %v5672_v13 = vsel %vm5659_vm11, %v5639_v27, %v10945_v33  ;;  %v5673_v20 = vsel %vm5659_vm11, %v5640_v12, %v10946_v63  ;;  %v21163_v33 = vld [vmem:[#allocation59_spill] sm:$0xff] }
 0x773   : > { %v10969_v34 = vpop.permute.xlu1 %10968  ;;  %v21165_v61 = vpack.c.bf16 %v21163_v33, %v21164_v5  ;;  %v5608_v25 = vsel %vm1336_vm1, %v5576_v57, %v10960_v14  ;;  %v5609_v2 = vsel %vm1336_vm1, %v5577_v38, %v10961_v45  ;;  %v10956_v45 = vunpack.i.h.bf16 %v16655_v44 }
 0x774   : > { %v10964_v10 = vpop.permute.xlu0 %10963  ;;  %v10971_v18 = vunpack.i.h.bf16 %v10969_v34  ;;  %v10970_v6 = vunpack.i.l.bf16 %v10969_v34 }
 0x775   : > { %v10966_v62 = vunpack.i.h.bf16 %v10964_v10  ;;  %v10965_v19 = vunpack.i.l.bf16 %v10964_v10 }
 0x776   : > { %v5705_v15 = vsel %vm5692_vm12, %v5672_v13, %v10970_v6  ;;  %v5706_v1 = vsel %vm5692_vm12, %v5673_v20, %v10971_v18 }
 0x777   : > { %v10974_v35 = vpop.permute.xlu1 %10973  ;;  %v5737_v29 = vpack.c.bf16 %v5706_v1, %v5705_v15  ;;  %v5641_v39 = vsel %vm5626_vm10, %v5608_v25, %v10965_v19  ;;  %v5642_v43 = vsel %vm5626_vm10, %v5609_v2, %v10966_v62  ;;  %v21166_v1 = vld [vmem:[#allocation15_spill] sm:$0xff] }
 0x778   : > { %v10979_v24 = vpop.permute.xlu0 %10978  ;;  %v21167_v31 = vpack.c.bf16 %v16050_v48, %v21166_v1  ;;  %v10975_v14 = vunpack.i.l.bf16 %v10974_v35  ;;  %v10976_v5 = vunpack.i.h.bf16 %v10974_v35 }
 0x779   : > { %5963 = vmatmul.mubr.bf16.gmra.mxu0 %v5737_v29  ;;  %v10981_v58 = vunpack.i.h.bf16 %v10979_v24  ;;  %v10980_v63 = vunpack.i.l.bf16 %v10979_v24  ;;  %v21168_v24 = vld [vmem:[#allocation93_spill] sm:$0xff] }
 0x77a   : > { %9693 = vmatprep.mubr.msk.bf16.mxu0 %vm2388_vm6, %v21165_v61 }
 0x77b   : > { %v10984_v8 = vpop.permute.xlu1 %10983  ;;  %v5675_v12 = vsel %vm5659_vm11, %v5642_v43, %v10981_v58  ;;  %v5674_v10 = vsel %vm5659_vm11, %v5641_v39, %v10980_v63  ;;  %v21169_v63 = vld [vmem:[#allocation110_spill] sm:$0xff] }
 0x77c   : > { %v11004_v46 = vpop.permute.xlu0 %11003  ;;  %v10985_v51 = vunpack.i.l.bf16 %v10984_v8  ;;  %v5513_v33 = vsel %vm2388_vm6, %v21169_v63, %v10951_v42 }
 0x77d   : > { %v11006_v34 = vunpack.i.h.bf16 %v11004_v46  ;;  %v11005_v27 = vunpack.i.l.bf16 %v11004_v46  ;;  %v5545_v38 = vsel %vm5529_vm8, %v5513_v33, %v10956_v45  ;;  %v10986_v46 = vunpack.i.h.bf16 %v10984_v8  ;;  %v21171_v45 = vld [vmem:[#allocation112_spill] sm:$0xff] }
 0x77e   : > { %v5514_v54 = vsel %vm2388_vm6, %v21168_v24, %v10985_v51  ;;  %v5578_v2 = vsel %vm5561_vm9, %v5545_v38, %v10975_v14 }
 0x77f   : > { %v5708_v18 = vsel %vm5692_vm12, %v5675_v12, %v11006_v34  ;;  %v5707_v6 = vsel %vm5692_vm12, %v5674_v10, %v11005_v27  ;;  %v10989_v13 = vpop.permute.xlu1 %10988 }
 0x780   : > { %v16703_v20 = vpop.permute.xlu0 %11008  ;;  %v5739_v15 = vpack.c.bf16 %v5708_v18, %v5707_v6  ;;  %v10990_v28 = vunpack.i.l.bf16 %v10989_v13  ;;  %v10991_v39 = vunpack.i.h.bf16 %v10989_v13 }
 0x781   : > { %v11010_v42 = vunpack.i.l.bf16 %v16703_v20  ;;  %v11011_v33 = vunpack.i.h.bf16 %v16703_v20 }
 0x782   : > { %5971 = vmatmul.mubr.bf16.gmra.mxu0 %v5739_v15  ;;  %v5546_v48 = vsel %vm5529_vm8, %v5514_v54, %v10990_v28  ;;  %v21170_v28 = vld [vmem:[#allocation114_spill] sm:$0xff] }
 0x783   : > { %9694 = vmatprep.mubr.msk.bf16.mxu0 %vm2388_vm6, %v21167_v31  ;;  %v10994_v55 = vpop.permute.xlu1 %10993  ;;  %v5579_v43 = vsel %vm5561_vm9, %v5546_v48, %v10976_v5 }
 0x784   : > { %v16709_v53 = vpop.permute.xlu0 %11018  ;;  %v10996_v62 = vunpack.i.h.bf16 %v10994_v55  ;;  %v10995_v19 = vunpack.i.l.bf16 %v10994_v55 }
 0x785   : > { %v11020_v34 = vunpack.i.l.bf16 %v16709_v53 }
 0x786   : > { %v5610_v27 = vsel %vm1336_vm1, %v5578_v2, %v10995_v19  ;;  %v5611_v12 = vsel %vm1336_vm1, %v5579_v43, %v10996_v62  ;;  %v16753_v43 = vstv %s9675_s24  ;;  %s9469_s24 = sshll.u32 %s581_s23, 4  ;;  %s9470_s24 = int_to_ptr.vmem [resolvable:$true] %s9469_s24 }
 0x787   : > { %v10999_v29 = vpop.permute.xlu1 %10998  ;;  %v5516_v14 = vsel %vm2388_vm6, %v21171_v45, %v11020_v34  ;;  %21173 = vst [vmem:[#allocation20_spill] sm:$0xff] %v16753_v43 }
 0x788   : > { %v16712_v17 = vpop.permute.xlu0 %11023  ;;  %v11001_v61 = vunpack.i.h.bf16 %v10999_v29  ;;  %v11000_v57 = vunpack.i.l.bf16 %v10999_v29  ;;  %v5515_v29 = vsel %vm2388_vm6, %v21170_v28, %v10986_v46  ;;  %v21175_v28 = vpack.c.bf16 %v16124_v41, %v16118_v22  ;;  %v21178_v22 = vld [vmem:[#allocation63_spill] sm:$0xff] }
 0x789   : > { %v11025_v35 = vunpack.i.l.bf16 %v16712_v17  ;;  %v5547_v48 = vsel %vm5529_vm8, %v5515_v29, %v10991_v39 }
 0x78a   : > { %v5643_v18 = vsel %vm5626_vm10, %v5610_v27, %v11000_v57  ;;  %v5644_v6 = vsel %vm5626_vm10, %v5611_v12, %v11001_v61 }
 0x78b   : > { %v11014_v58 = vpop.permute.xlu1 %11013  ;;  %v5548_v62 = vsel %vm5529_vm8, %v5516_v14, %v11025_v35 }
 0x78c   : > { %v11029_v47 = vpop.permute.xlu0 %11028  ;;  %v11016_v25 = vunpack.i.h.bf16 %v11014_v58  ;;  %v11015_v44 = vunpack.i.l.bf16 %v11014_v58  ;;  %v5581_v2 = vsel %vm5561_vm9, %v5548_v62, %v11011_v33  ;;  %v21176_v62 = vld [vmem:[#allocation40_spill] sm:$0xff] }
 0x78d   : > { %v11031_v19 = vunpack.i.h.bf16 %v11029_v47  ;;  %v11030_v58 = vunpack.i.l.bf16 %v11029_v47 }
 0x78e   : > { %v5676_v8 = vsel %vm5659_vm11, %v5643_v18, %v11015_v44  ;;  %v5677_v13 = vsel %vm5659_vm11, %v5644_v6, %v11016_v25  ;;  %v21172_v25 = vpack.c.bf16 %v16096_v52, %v16086_v7  ;;  %v5580_v44 = vsel %vm5561_vm9, %v5547_v48, %v11010_v42 }
 0x78f   : > { %v11039_v10 = vpop.permute.xlu1 %11038  ;;  %v5612_v47 = vsel %vm1336_vm1, %v5580_v44, %v11030_v58  ;;  %v5613_v20 = vsel %vm1336_vm1, %v5581_v2, %v11031_v19 }
 0x790   : > { %v11034_v15 = vpop.permute.xlu0 %11033  ;;  %v11041_v1 = vunpack.i.h.bf16 %v11039_v10  ;;  %v11040_v31 = vunpack.i.l.bf16 %v11039_v10 }
 0x791   : > { %v11036_v5 = vunpack.i.h.bf16 %v11034_v15  ;;  %v11035_v61 = vunpack.i.l.bf16 %v11034_v15 }
 0x792   : > { %v5709_v55 = vsel %vm5692_vm12, %v5676_v8, %v11040_v31  ;;  %v5710_v51 = vsel %vm5692_vm12, %v5677_v13, %v11041_v1 }
 0x793   : > { %v16738_v24 = vpop.permute.xlu1 %11043  ;;  %v5741_v54 = vpack.c.bf16 %v5710_v51, %v5709_v55  ;;  %v5645_v34 = vsel %vm5626_vm10, %v5612_v47, %v11035_v61  ;;  %v5646_v27 = vsel %vm5626_vm10, %v5613_v20, %v11036_v5  ;;  %v21174_v55 = vld [vmem:[#allocation42_spill] sm:$0xff] }
 0x794   : > { %v11049_v63 = vpop.permute.xlu0 %11048 }
 0x795   : > { %5979 = vmatmul.mubr.bf16.gmra.mxu0 %v5741_v54  ;;  %v11051_v57 = vunpack.i.h.bf16 %v11049_v63  ;;  %v11050_v38 = vunpack.i.l.bf16 %v11049_v63 }
 0x796   : > { %9695 = vmatprep.mubr.msk.bf16.mxu0 %vm2388_vm6, %v21172_v25  ;;  %v21180_v25 = vmov 0.0  }
 0x797   : > { %v16749_v46 = vpop.permute.xlu1 %11053  ;;  %v5679_v12 = vsel %vm5659_vm11, %v5646_v27, %v11051_v57  ;;  %v5678_v35 = vsel %vm5659_vm11, %v5645_v34, %v11050_v38  ;;  %v21179_v57 = vld [vmem:[#allocation51_spill] sm:$0xff]  ;;  %v11021_v34 = vunpack.i.h.bf16 %v16709_v53 }
 0x798   : > { %v11074_v39 = vpop.permute.xlu0 %11073  ;;  %v11055_v27 = vunpack.i.l.bf16 %v16749_v46 }
 0x799   : > { %v11076_v7 = vunpack.i.h.bf16 %v11074_v39  ;;  %v11075_v52 = vunpack.i.l.bf16 %v11074_v39 }
 0x79b   : > { %v5712_v10 = vsel %vm5692_vm12, %v5679_v12, %v11076_v7  ;;  %v5711_v18 = vsel %vm5692_vm12, %v5678_v35, %v11075_v52  ;;  %v10347_v6 = vpop.f32.mrf.mxu1  ;;  %v16761_v15 = vpop.permute.xlu1 %11058  ;;  %v11026_v52 = vunpack.i.h.bf16 %v16712_v17  ;;  %v11045_v35 = vunpack.i.l.bf16 %v16738_v24 }
 0x79c   : > { %v4267_v1 = vmul.f32 %v10347_v6, %v16753_v43  ;;  %v5743_v31 = vpack.c.bf16 %v5712_v10, %v5711_v18  ;;  %v16764_v13 = vpop.permute.xlu0 %11078  ;;  %v11060_v12 = vunpack.i.l.bf16 %v16761_v15 }
 0x79d   : > { %v4136_v8 = vpop.f32.mrf.mxu1 }
 0x79e   : > { %v4427_v51 = vadd.f32 %v21174_v55, %v4267_v1  ;;  %5987 = vmatmul.mubr.bf16.gmra.mxu0 %v5743_v31  ;;  %v4265_v63 = vmul.f32 %v16753_v43, %v4136_v8  ;;  %v21183_v1 = vld [vmem:[#allocation60_spill] sm:$0xff]  ;;  %v21184_v31 = vld [vmem:[#allocation111_spill] sm:$0xff] }
 0x79f   : > { %9696 = vmatprep.mubr.msk.bf16.mxu0 %vm2388_vm6, %v21175_v28  ;;  %v10348_v29 = vpop.f32.mrf.mxu1  ;;  %v11064_v42 = vpop.permute.xlu1 %11063  ;;  %v5517_v53 = vsel %vm2388_vm6, %v21183_v1, %v11021_v34  ;;  %v5518_v8 = vsel %vm2388_vm6, %v21184_v31, %v11055_v27 }
 0x7a0   : > { %v4268_v45 = vmul.f32 %v10348_v29, %v16753_v43  ;;  %v6110_v54 = vrot.slane %v4427_v51, 7  ;;  %v16772_v48 = vpop.permute.xlu0 %11088  ;;  %v4425_v38 = vadd.f32 %v21179_v57, %v4265_v63  ;;  %v5549_v28 = vsel %vm5529_vm8, %v5517_v53, %v11026_v52 }
 0x7a1   : > { %v4139_v14 = vpop.f32.mrf.mxu1  ;;  %v5550_v29 = vsel %vm5529_vm8, %v5518_v8, %v11060_v12  ;;  %v11065_v63 = vunpack.i.l.bf16 %v11064_v42 }
 0x7a2   : > { %v4428_v19 = vadd.f32 %v21176_v62, %v4268_v45  ;;  %v4266_v58 = vmul.f32 %v16753_v43, %v4139_v14  ;;  %v16778_v5 = vsel %vm652_vm0, 0.0, %v6110_v54  ;;  %v6107_v7 = vrot.slane %v4425_v38, 7 }
 0x7a3   : > { %v11069_v33 = vpop.permute.xlu1 %11068  ;;  %21177 = vst [vmem:[#allocation17_spill] sm:$0xff] %v16778_v5  ;;  %v11242_v44 = vpack.i.bf16 %v16778_v5, %v21180_v25  ;;  %v16816_v14 = vpop.f32.mrf.mxu1  ;;  %v11046_v62 = vunpack.i.h.bf16 %v16738_v24 }
 0x7a4   : > { %v4426_v41 = vadd.f32 %v21178_v22, %v4266_v58  ;;  %v6111_v61 = vrot.slane %v4428_v19, 7  ;;  %v16784_v2 = vpop.permute.xlu0 %11093  ;;  %v16807_v17 = vsel %vm652_vm0, 0.0, %v6107_v7  ;;  %v5582_v19 = vsel %vm5561_vm9, %v5549_v28, %v11045_v35 }
 0x7a5   : > { %11243 = vrot.lane.b32.xlu0 %v11242_v44, %s12682_s22  ;;  %21185 = vst [vmem:[#allocation22_spill] sm:$0xff] %v16807_v17  ;;  %v11066_v58 = vunpack.i.h.bf16 %v11064_v42  ;;  %v6344_v22 = vrot.slane %v16778_v5, 2  ;;  %v11070_v57 = vunpack.i.l.bf16 %v11069_v33  ;;  %v5583_v38 = vsel %vm5561_vm9, %v5550_v29, %v11046_v62  ;;  %v4152_v27 = vpop.f32.mrf.mxu1 }
 0x7a6   : > { %v6108_v47 = vrot.slane %v4426_v41, 7  ;;  %v16788_v39 = vsel %vm652_vm0, %v6110_v54, %v6111_v61  ;;  %v16810_v55 = vsel %vm652_vm0, %v6111_v61, 0.0  ;;  %v11071_v61 = vunpack.i.h.bf16 %v11069_v33 }
 0x7a7   : > { %v11084_v20 = vpop.permute.xlu1 %11083  ;;  %21181 = vst [vmem:[#allocation25_spill] sm:$0xff] %v16788_v39  ;;  %v11247_v18 = vpack.i.bf16 %v16788_v39, %v16778_v5  ;;  %v6345_v45 = vrot.slane %v16788_v39, 2  ;;  %v6347_v41 = vrot.slane %v16810_v55, 2  ;;  %v6270_v24 = vrot.slane %v16788_v39, 1  ;;  %v10352_v62 = vpop.f32.mrf.mxu1 }
 0x7a8   : > { %v16796_v10 = vsel %vm652_vm0, %v6107_v7, %v6108_v47  ;;  %v16800_v6 = vpop.permute.xlu0 %11098  ;;  %v16827_v25 = vsel %vm652_vm0, %v6108_v47, 0.0  ;;  %v11086_v44 = vunpack.i.h.bf16 %v11084_v20  ;;  %v11085_v34 = vunpack.i.l.bf16 %v11084_v20 }
 0x7a9   : > { %21182 = vst [vmem:[#allocation24_spill] sm:$0xff] %v16796_v10  ;;  %11248 = vrot.lane.b32.xlu1 %v11247_v18, %s12678_s1  ;;  %v11252_v54 = vpack.i.bf16 %v16796_v10, %v16807_v17  ;;  %v16833_v12 = vsel %vm890_vm3, %v6344_v22, %v6345_v45  ;;  %v6269_v33 = vrot.slane %v16778_v5, 1  ;;  %v5614_v35 = vsel %vm1336_vm1, %v5582_v19, %v11065_v63 }
 0x7aa   : > { %v5615_v18 = vsel %vm1336_vm1, %v5583_v38, %v11066_v58  ;;  %v6265_v47 = vrot.slane %v16796_v10, 1  ;;  %v6267_v20 = vrot.slane %v16827_v25, 1  ;;  %v5647_v53 = vsel %vm5626_vm10, %v5614_v35, %v11070_v57  ;;  %v12369_v38 = vld [vmem:[%s20309_s10 + $0x38] sm:$0xff]   ;;  %v16871_v35 = vpop.f32.mrf.mxu1 }
 0x7ab   : > { %v11109_v51 = vpop.permute.xlu1 %11108  ;;  %11253 = vrot.lane.b32.xlu0 %v11252_v54, %s12678_s1  ;;  %v5648_v31 = vsel %vm5626_vm10, %v5615_v18, %v11071_v61  ;;  %v16845_v8 = vsel %vm890_vm3, %v6345_v45, %v6347_v41  ;;  %v6271_v63 = vsel %vm812_vm2, %v6269_v33, %v6270_v24  ;;  %v4269_v45 = vmul.f32 %v16753_v43, %v4152_v27  ;;  %v21186_v61 = vld [vmem:[#allocation14_spill] sm:$0xff] }
 0x7ac   : > { %v16830_v7 = vpop.permute.xlu0 %11103  ;;  %v11111_v42 = vunpack.i.h.bf16 %v11109_v51  ;;  %v11110_v52 = vunpack.i.l.bf16 %v11109_v51  ;;  %v5680_v51 = vsel %vm5659_vm11, %v5647_v53, %v11085_v34  ;;  %v5681_v28 = vsel %vm5659_vm11, %v5648_v31, %v11086_v44  ;;  %7480 = vmatpush1.bf16.msra.mxu1 %v12369_v38  ;;  %v21187_v53 = vld [vmem:[#allocation65_spill] sm:$0xff]  ;;  %v16894_v38 = vpop.f32.mrf.mxu1 }
 0x7ad   : > { %v7325_v29 = vpack.c.bf16 %v16845_v8, %v16833_v12  ;;  %v11267_v54 = vpack.i.bf16 %v16845_v8, %v16833_v12  ;;  %v11056_v22 = vunpack.i.h.bf16 %v16749_v46  ;;  %v11257_v57 = vpack.i.bf16 %v6271_v63, %v21186_v61 }
 0x7ae   : > { %v5713_v19 = vsel %vm5692_vm12, %v5680_v51, %v11110_v52  ;;  %v5714_v58 = vsel %vm5692_vm12, %v5681_v28, %v11111_v42  ;;  %v11061_v44 = vunpack.i.h.bf16 %v16761_v15  ;;  %v11090_v34 = vunpack.i.l.bf16 %v16772_v48 }
 0x7af   : > { %v16839_v1 = vpop.permute.xlu1 %11113  ;;  %9712 = vmatprep.mubr.msk.bf16.mxu1 %vm2388_vm6, %v7325_v29  ;;  %11268 = vrot.lane.b32.xlu1 %v11267_v54, %s12681_s25  ;;  %v6268_v42 = vsel %vm812_vm2, %v6265_v47, %v6267_v20  ;;  %v5745_v27 = vpack.c.bf16 %v5714_v58, %v5713_v19  ;;  %v6272_v33 = vrot.slane %v16810_v55, 1  ;;  %v11095_v46 = vunpack.i.l.bf16 %v16784_v2  ;;  %v21189_v20 = vld [vmem:[#allocation69_spill] sm:$0xff]  ;;  %v21191_v58 = vld [vmem:[#allocation56_spill] sm:$0xff] }
 0x7b0   : > { %v11119_v41 = vpop.permute.xlu0 %11118  ;;  %11258 = vrot.lane.b32.xlu0 %v11257_v57, %s12676_s30  ;;  %v11282_v18 = vpack.i.bf16 %v6271_v63, %v6268_v42  ;;  %v16875_v31 = vadd.f32 %v21187_v53, %v4269_v45  ;;  %v21188_v15 = vmov 0   ;;  %v5519_v51 = vsel %vm2388_vm6, %v21189_v20, %v11056_v22 }
 0x7b1   : > { %5995 = vmatmul.mubr.bf16.gmra.mxu0 %v5745_v27  ;;  %7481 = vmatprep.subr.bf16.mxu1 %v21188_v15  ;;  %v11081_v28 = vunpack.i.h.bf16 %v16764_v13  ;;  %v21190_v55 = vpack.c.bf16 %v16173_v11, %v16170_v16  ;;  %v11080_v29 = vunpack.i.l.bf16 %v16764_v13  ;;  %v5551_v54 = vsel %vm5529_vm8, %v5519_v51, %v11061_v44 }
 0x7b2   : > { %v6264_v19 = vrot.slane %v16807_v17, 1  ;;  %v5520_v45 = vsel %vm2388_vm6, %v21191_v58, %v11090_v34  ;;  %v11101_v61 = vunpack.i.h.bf16 %v16800_v6  ;;  %v11100_v57 = vunpack.i.l.bf16 %v16800_v6  ;;  %v21193_v58 = vld [vmem:[#allocation72_spill] sm:$0xff] }
 0x7b3   : > { %v16867_v52 = vpop.permute.xlu1 %11123  ;;  %11283 = vrot.lane.b32.xlu1 %v11282_v18, %s12679_s19  ;;  %9697 = vmatprep.mubr.msk.bf16.mxu0 %vm2388_vm6, %v21190_v55  ;;  %v5552_v22 = vsel %vm5529_vm8, %v5520_v45, %v11095_v46  ;;  %v16897_v11 = vsel %vm812_vm2, %v6270_v24, %v6272_v33  ;;  %v6113_v13 = vrot.slane %v16875_v31, 7  ;;  %v11106_v44 = vunpack.i.h.bf16 %v16830_v7  ;;  %v12370_v24 = vld [vmem:[%s20309_s10 + $0x30] sm:$0xff]  }
 0x7b4   : > { %v11144_v16 = vpop.permute.xlu0 %11143  ;;  %v11105_v27 = vunpack.i.l.bf16 %v16830_v7  ;;  %v11262_v34 = vpack.i.bf16 %v16897_v11, %v6271_v63  ;;  %v4272_v46 = vmul.f32 %v10352_v62, %v16753_v43  ;;  %v11121_v53 = vunpack.i.h.bf16 %v11119_v41  ;;  %7482 = vmatpush1.bf16.msra.mxu1 %v12370_v24 }
 0x7b5   : > { %v11120_v6 = vunpack.i.l.bf16 %v11119_v41  ;;  %v6266_v20 = vsel %vm812_vm2, %v6264_v19, %v6265_v47  ;;  %v5584_v33 = vsel %vm5561_vm9, %v5551_v54, %v11080_v29  ;;  %v5585_v51 = vsel %vm5561_vm9, %v5552_v22, %v11081_v28  ;;  %v16917_v47 = vpop.f32.mrf.mxu1  ;;  %7483 = vmatprep.subr.bf16.mxu1 %v21188_v15 }
 0x7b6   : > { %v11146_v55 = vunpack.i.h.bf16 %v11144_v16  ;;  %v11145_v7 = vunpack.i.l.bf16 %v11144_v16  ;;  %11263 = vrot.lane.b32.xlu0 %v11262_v34, %s12674_s27  ;;  %v4271_v63 = vmul.f32 %v16816_v14, %v16753_v43  ;;  %v5616_v62 = vsel %vm1336_vm1, %v5584_v33, %v11100_v57  ;;  %v12371_v33 = vld [vmem:[%s20309_s10 + $0x28] sm:$0xff]  }
 0x7b7   : > { %v16903_v18 = vpop.permute.xlu1 %11128  ;;  %v5617_v41 = vsel %vm1336_vm1, %v5585_v51, %v11101_v61  ;;  %v5649_v19 = vsel %vm5626_vm10, %v5616_v62, %v11105_v27  ;;  %v11292_v54 = vpack.i.bf16 %v6268_v42, %v6266_v20  ;;  %v11272_v28 = vpack.i.bf16 %v6266_v20, %v16561_v49  ;;  %v16939_v34 = vpop.f32.mrf.mxu1 }
 0x7b8   : > { %v5650_v29 = vsel %vm5626_vm10, %v5617_v41, %v11106_v44  ;;  %v16926_v14 = vsel %vm652_vm0, 0.0, %v6113_v13  ;;  %v4432_v45 = vadd.f32 %v21193_v58, %v4272_v46  ;;  %v5682_v61 = vsel %vm5659_vm11, %v5649_v19, %v11120_v6  ;;  %v21194_v44 = vld [vmem:[#allocation52_spill] sm:$0xff]  ;;  %7484 = vmatpush1.bf16.msra.mxu1 %v12371_v33 }
 0x7b9   : > { %21192 = vst [vmem:[#allocation19_spill] sm:$0xff] %v16926_v14  ;;  %v5683_v22 = vsel %vm5659_vm11, %v5650_v29, %v11121_v53  ;;  %v6340_v57 = vrot.slane %v16796_v10, 2  ;;  %v5715_v42 = vsel %vm5692_vm12, %v5682_v61, %v11145_v7  ;;  %11293 = vrot.lane.b32.xlu1 %v11292_v54, %s12674_s27  ;;  %v4431_v27 = vadd.f32 %v21194_v44, %v4271_v63  ;;  %v16942_v53 = vpop.permute.xlu0 %11148  ;;  %v16953_v63 = vpop.f32.mrf.mxu1 }
 0x7ba   : > { %v5716_v16 = vsel %vm5692_vm12, %v5683_v22, %v11146_v55  ;;  %11273 = vrot.lane.b32.xlu0 %v11272_v28, %s12679_s19  ;;  %v6339_v46 = vrot.slane %v16807_v17, 2  ;;  %v11302_v6 = vpack.i.bf16 %v16926_v14, %v16788_v39  ;;  %v6117_v20 = vrot.slane %v4432_v45, 7  ;;  %7485 = vmatprep.subr.bf16.mxu1 %v21188_v15 }
 0x7bb   : > { %v16936_v49 = vpop.permute.xlu1 %11133  ;;  %v5747_v24 = vpack.c.bf16 %v5716_v16, %v5715_v42  ;;  %v6116_v55 = vrot.slane %v4431_v27, 7  ;;  %v4270_v7 = vmul.f32 %v16753_v43, %v16871_v35  ;;  %v21195_v62 = vpack.c.bf16 %v21148_v59, %v16187_v21  ;;  %v21198_v59 = vld [vmem:[#allocation64_spill] sm:$0xff]  ;;  %v16976_v45 = vpop.f32.mrf.mxu1  ;;  %v12372_v42 = vld [vmem:[%s20309_s10 + $0x20] sm:$0xff]  }
 0x7bc   : > { %v6341_v51 = vsel %vm890_vm3, %v6339_v46, %v6340_v57  ;;  %v6342_v19 = vrot.slane %v16827_v25, 2  ;;  %v16967_v35 = vsel %vm652_vm0, %v6117_v20, 0.0  ;;  %7486 = vmatpush1.bf16.msra.mxu1 %v12372_v42  ;;  %v11130_v42 = vunpack.i.l.bf16 %v16903_v18 }
 0x7bd   : > { %11303 = vrot.lane.b32.xlu1 %v11302_v6, %s12682_s22  ;;  %6003 = vmatmul.mubr.bf16.gmra.mxu0 %v5747_v24  ;;  %v16964_v29 = vsel %vm652_vm0, %v6116_v55, %v6117_v20  ;;  %v11277_v54 = vpack.i.bf16 %v6341_v51, %v16637_v32  ;;  %v16970_v28 = vpop.permute.xlu0 %11158  ;;  %v16973_v21 = vsel %vm652_vm0, 0.0, %v6116_v55  ;;  %v4430_v58 = vadd.f32 %v21198_v59, %v4270_v7  ;;  %v16991_v6 = vpop.f32.mrf.mxu1 }
 0x7be   : > { %9698 = vmatprep.mubr.msk.bf16.mxu0 %vm2388_vm6, %v21195_v62  ;;  %21196 = vst [vmem:[#allocation67_spill] sm:$0xff] %v16964_v29  ;;  %21197 = vst [vmem:[#allocation66_spill] sm:$0xff] %v16973_v21  ;;  %v6355_v25 = vrot.slane %v16964_v29, 2  ;;  %v6357_v22 = vrot.slane %v16967_v35, 2  ;;  %v11307_v61 = vpack.i.bf16 %v16964_v29, %v16973_v21  ;;  %v6343_v16 = vsel %vm890_vm3, %v6340_v57, %v6342_v19 }
 0x7bf   : > { %v16959_v41 = vpop.permute.xlu1 %11138  ;;  %11278 = vrot.lane.b32.xlu0 %v11277_v54, %s12680_s20  ;;  %v6354_v44 = vrot.slane %v16973_v21, 2  ;;  %v6114_v46 = vrot.slane %v4430_v58, 7  ;;  %v11287_v20 = vpack.i.bf16 %v16833_v12, %v6343_v16  ;;  %7487 = vmatprep.subr.bf16.mxu1 %v21188_v15  ;;  %v12373_v12 = vld [vmem:[%s20309_s10 + $0x18] sm:$0xff]   ;;  %v17017_v19 = vpop.f32.mrf.mxu1  ;;  %v11297_v54 = vpack.i.bf16 %v6343_v16, %v6341_v51 }
 0x7c0   : > { %v17000_v33 = vsel %vm890_vm3, %v6355_v25, %v6357_v22  ;;  %7488 = vmatpush1.bf16.msra.mxu1 %v12373_v12  ;;  %v20568_v58 = vrot.slane %v16964_v29, 1  ;;  %v6279_v51 = vrot.slane %v16973_v21, 1  ;;  %v11125_v16 = vunpack.i.l.bf16 %v16867_v52 }
 0x7c1   : > { %11308 = vrot.lane.b32.xlu1 %v11307_v61, %s12678_s1  ;;  %v16994_v24 = vpop.permute.xlu0 %11163  ;;  %v16997_v57 = vsel %vm890_vm3, %v6354_v44, %v6355_v25  ;;  %21200 = vst [vmem:[#allocation29_spill] sm:$0xff] %v17000_v33  ;;  %v17012_v7 = vsel %vm652_vm0, %v6113_v13, %v6114_v46  ;;  %v17015_v62 = vsel %vm652_vm0, %v6114_v46, 0.0  ;;  %7489 = vmatprep.subr.bf16.mxu1 %v21188_v15  ;;  %v17029_v22 = vpop.f32.mrf.mxu1  ;;  %v11091_v61 = vunpack.i.h.bf16 %v16772_v48  ;;  %v12374_v44 = vld [vmem:[%s20309_s10 + $0x10] sm:$0xff]  }
 0x7c2   : > { %21199 = vst [vmem:[#allocation30_spill] sm:$0xff] %v16997_v57  ;;  %v11327_v55 = vpack.i.bf16 %v17000_v33, %v16997_v57  ;;  %21201 = vst [vmem:[#allocation32_spill] sm:$0xff] %v17012_v7  ;;  %v20567_v31 = vrot.slane %v17012_v7, 1  ;;  %v6277_v13 = vrot.slane %v17015_v62, 1  ;;  %v17047_v48 = vsel %vm812_vm2, %v6279_v51, %v20568_v58 }
 0x7c3   : > { %v16989_v27 = vpop.permute.xlu1 %11153  ;;  %11288 = vrot.lane.b32.xlu0 %v11287_v20, %s12680_s20  ;;  %v11096_v12 = vunpack.i.h.bf16 %v16784_v2  ;;  %v11115_v46 = vunpack.i.l.bf16 %v16839_v1  ;;  %v5522_v51 = vsel %vm2388_vm6, %v16089_v23, %v11125_v16  ;;  %v11136_v5 = vunpack.i.h.bf16 %v16936_v49 }
 0x7c4   : > { %v17042_v20 = vsel %vm812_vm2, %v20567_v31, %v6277_v13  ;;  %7490 = vmatpush1.bf16.msra.mxu1 %v12374_v44  ;;  %v5521_v13 = vsel %vm2388_vm6, %v16080_v3, %v11091_v61  ;;  %v6349_v31 = vrot.slane %v16926_v14, 2  ;;  %v5554_v2 = vsel %vm5529_vm8, %v5522_v51, %v11130_v42 }
 0x7c5   : > { %11328 = vrot.lane.b32.xlu1 %v11327_v55, %s12681_s25  ;;  %v17026_v25 = vpop.permute.xlu0 %11168  ;;  %v17056_v9 = vpack.i.bf16 %v17047_v48, %v17042_v20  ;;  %7491 = vmatprep.subr.bf16.mxu1 %v21188_v15  ;;  %v11135_v44 = vunpack.i.l.bf16 %v16936_v49  ;;  %v11312_v3 = vpack.i.bf16 %v16973_v21, %v17012_v7  ;;  %v11116_v61 = vunpack.i.h.bf16 %v16839_v1 }
 0x7c6   : > { %v11141_v23 = vunpack.i.h.bf16 %v16959_v41  ;;  %v11140_v16 = vunpack.i.l.bf16 %v16959_v41  ;;  %v21202_v39 = vrot.slane %v17012_v7, 2  ;;  %v5553_v49 = vsel %vm5529_vm8, %v5521_v13, %v11096_v12 }
 0x7c7   : > { %v17020_v59 = vpop.permute.xlu1 %11178  ;;  %11298 = vrot.lane.b32.xlu0 %v11297_v54, %s12681_s25  ;;  %v17052_v54 = vpop.f32.mrf.mxu1  ;;  %v11156_v17 = vunpack.i.h.bf16 %v16989_v27  ;;  %v11155_v21 = vunpack.i.l.bf16 %v16989_v27  ;;  %v5586_v41 = vsel %vm5561_vm9, %v5553_v49, %v11115_v46  ;;  %v4275_v26 = vmul.f32 %v16894_v38, %v16753_v43  ;;  %v12375_v46 = vld [vmem:[%s20309_s10 + $0x8] sm:$0xff]  }
 0x7c8   : > { %v17080_v42 = vsel %vm890_vm3, %v6349_v31, %v21202_v39  ;;  %v5587_v39 = vsel %vm5561_vm9, %v5554_v2, %v11116_v61  ;;  %v11181_v31 = vunpack.i.h.bf16 %v17020_v59  ;;  %v5618_v27 = vsel %vm1336_vm1, %v5586_v41, %v11135_v44  ;;  %7492 = vmatpush1.bf16.msra.mxu1 %v12375_v46 }
 0x7c9   : > { %v17064_v58 = vpop.permute.xlu0 %11173  ;;  %11338 = vrot.lane.b32.xlu1 %v17056_v9, %s12679_s19  ;;  %21203 = vst [vmem:[#allocation34_spill] sm:$0xff] %v17080_v42  ;;  %v17085_v10 = vpop.f32.mrf.mxu1  ;;  %v11342_v1 = vpack.i.bf16 %v17080_v42, %v16845_v8  ;;  %v11317_v8 = vpack.i.bf16 %v17012_v7, %v16926_v14  ;;  %v11126_v2 = vunpack.i.h.bf16 %v16867_v52  ;;  %v5651_v38 = vsel %vm5626_vm10, %v5618_v27, %v11140_v16  ;;  %v21206_v27 = vld [vmem:[#allocation75_spill] sm:$0xff] }
 0x7ca   : > { %v11131_v49 = vunpack.i.h.bf16 %v16903_v18  ;;  %v5684_v41 = vsel %vm5659_vm11, %v5651_v38, %v11155_v21  ;;  %v6282_v52 = vrot.slane %v16967_v35, 1  ;;  %7493 = vmatprep.subr.bf16.mxu1 %v21188_v15  ;;  %v6274_v21 = vrot.slane %v16926_v14, 1  ;;  %v21207_v35 = vld [vmem:[#allocation73_spill] sm:$0xff] }
 0x7cb   : > { %v17049_v55 = vpop.permute.xlu1 %11183  ;;  %11313 = vrot.lane.b32.xlu0 %v11312_v3, %s12682_s22  ;;  %v5619_v3 = vsel %vm1336_vm1, %v5587_v39, %v11136_v5  ;;  %v4276_v46 = vmul.f32 %v16939_v34, %v16753_v43  ;;  %v11171_v34 = vunpack.i.h.bf16 %v17026_v25 }
 0x7cc   : > { %v5652_v44 = vsel %vm5626_vm10, %v5619_v3, %v11141_v23  ;;  %v17124_v23 = vpop.f32.mrf.mxu1  ;;  %v5752_v3 = vpack.c.bf16 %v16637_v32, %v16571_v37 }
 0x7cd   : > { %11343 = vrot.lane.b32.xlu1 %v11342_v1, %s12680_s20  ;;  %v17113_v61 = vpop.permute.xlu0 %11188  ;;  %v11160_v1 = vunpack.i.l.bf16 %v16970_v28  ;;  %v5685_v39 = vsel %vm5659_vm11, %v5652_v44, %v11156_v17  ;;  %v17131_v17 = vadd.f32 %v21206_v27, %v4275_v26 }
 0x7cf   : > { %v17096_v12 = vpop.permute.xlu1 %11193  ;;  %11318 = vrot.lane.b32.xlu0 %v11317_v8, %s12678_s1  ;;  %v5524_v26 = vsel %vm2388_vm6, %v16133_v40, %v11160_v1  ;;  %v11176_v40 = vunpack.i.h.bf16 %v17064_v58  ;;  %v11175_v1 = vunpack.i.l.bf16 %v17064_v58  ;;  %v11190_v58 = vunpack.i.l.bf16 %v17113_v61 }
 0x7d1   : > { %11358 = vrot.lane.b32.xlu1 %v17056_v9, %s12676_s30 }
 0x7d3   : > { %v17143_v38 = vpop.permute.xlu1 %11198 }
 0x7e5   : > { %v17082_v51 = vpop.f32.mrf.mxu0 }
 0x7e6   : > { %21204 = vst [vmem:[#allocation35_spill] sm:$0xff] %v17082_v51  ;;  %v11180_v51 = vunpack.i.l.bf16 %v17020_v59  ;;  %v4273_v59 = vmul.f32 %v16753_v43, %v16917_v47  ;;  %v11165_v47 = vunpack.i.l.bf16 %v16994_v24 }
 0x7e7   : > { %v5918_v13 = vpop.f32.mrf.mxu0 }
 0x7e8   : > { %v5717_v16 = vsel %vm5692_vm12, %v5684_v41, %v11180_v51  ;;  %v5718_v13 = vsel %vm5692_vm12, %v5685_v39, %v11181_v31  ;;  %v17136_v8 = vadd.f32 %v21207_v35, %v4273_v59  ;;  %v5523_v51 = vsel %vm2388_vm6, %v16145_v60, %v11126_v2  ;;  %v17151_v59 = vpop.f32.mrf.mxu1  ;;  %v11214_v2 = vpop.permute.xlu0 %11213 }
 0x7e9   : > { %v17115_v5 = vpop.f32.mrf.mxu0  ;;  %v11150_v31 = vunpack.i.l.bf16 %v16942_v53  ;;  %v5555_v44 = vsel %vm5529_vm8, %v5523_v51, %v11131_v49  ;;  %v5749_v41 = vpack.c.bf16 %v5718_v13, %v5717_v16  ;;  %v5556_v32 = vsel %vm5529_vm8, %v5524_v26, %v11165_v47  ;;  %v12376_v16 = vld [vmem:[%s20309_s10] sm:$0xff]  }
 0x7ea   : > { %21205 = vst [vmem:[#allocation71_spill] sm:$0xff] %v17115_v5  ;;  %v11170_v60 = vunpack.i.l.bf16 %v17026_v25  ;;  %v21209_v39 = vrot.slane %v16964_v29, 1  ;;  %v11151_v49 = vunpack.i.h.bf16 %v16942_v53  ;;  %v4274_v53 = vmul.f32 %v16753_v43, %v16953_v63  ;;  %7494 = vmatpush1.bf16.msra.mxu1 %v12376_v16  ;;  %v12377_v16 = vld [vmem:[%s20309_s10 + $0x40] sm:$0xff]  }
 0x7eb   : > { %v5921_v18 = vpop.f32.mrf.mxu0  ;;  %6011 = vmatmul.mubr.bf16.gmra.mxu0 %v5749_v41  ;;  %v11191_v13 = vunpack.i.h.bf16 %v17113_v61  ;;  %v5588_v9 = vsel %vm5561_vm9, %v5555_v44, %v11150_v31  ;;  %v11216_v27 = vunpack.i.h.bf16 %v11214_v2  ;;  %v11215_v35 = vunpack.i.l.bf16 %v11214_v2  ;;  %v17184_v61 = vpop.f32.mrf.mxu1  ;;  %7509 = vmatprep.subr.bf16.mxu1 %v21188_v15  ;;  %v21265_v15 = vld [vmem:[#allocation101_spill] sm:$0xff] }
 0x7ec   : > { %v17158_v18 = vsel %vm812_vm2, %v21209_v39, %v6282_v52  ;;  %v6119_v52 = vrot.slane %v17136_v8, 7  ;;  %9699 = vmatprep.mubr.msk.bf16.mxu0 %vm2388_vm6, %v5752_v3  ;;  %v21211_v8 = vld [vmem:[#allocation76_spill] sm:$0xff]  ;;  %v5620_v63 = vsel %vm1336_vm1, %v5588_v9, %v11170_v60  ;;  %v21212_v3 = vrot.slane %v17012_v7, 1  ;;  %v17189_v44 = vpop.permute.xlu1 %11203 }
 0x7ed   : > { %v17148_v37 = vpop.f32.mrf.mxu0  ;;  %v11322_v47 = vpack.i.bf16 %v17158_v18, %v17047_v48  ;;  %v5589_v48 = vsel %vm5561_vm9, %v5556_v32, %v11151_v49  ;;  %v4436_v26 = vadd.f32 %v21211_v8, %v4276_v46  ;;  %v6122_v32 = vrot.slane %v17131_v17, 7 }
 0x7ee   : > { %21208 = vst [vmem:[#allocation61_spill] sm:$0xff] %v17148_v37  ;;  %v5621_v41 = vsel %vm1336_vm1, %v5589_v48, %v11171_v34  ;;  %v6276_v31 = vsel %vm812_vm2, %v6274_v21, %v21212_v3  ;;  %v5653_v2 = vsel %vm5626_vm10, %v5620_v63, %v11175_v1  ;;  %v21213_v34 = vld [vmem:[#allocation74_spill] sm:$0xff]  ;;  %v17204_v17 = vsel %vm652_vm0, 0.0, %v6119_v52  ;;  %7510 = vmatpush2.bf16.msra.mxu1 %v12377_v16 }
 0x7ef   : > { %v5926_v25 = vpop.f32.mrf.mxu0  ;;  %11323 = vrot.lane.b32.xlu0 %v11322_v47, %s12674_s27  ;;  %v5654_v46 = vsel %vm5626_vm10, %v5621_v41, %v11176_v40  ;;  %v11362_v60 = vpack.i.bf16 %v17042_v20, %v6276_v31  ;;  %v4434_v49 = vadd.f32 %v21213_v34, %v4274_v53  ;;  %v11332_v21 = vpack.i.bf16 %v6276_v31, %v16897_v11  ;;  %v17209_v53 = vpop.f32.mrf.mxu1 }
 0x7f0   : > { %v5687_v47 = vsel %vm5659_vm11, %v5654_v46, %v11191_v13  ;;  %v5686_v25 = vsel %vm5659_vm11, %v5653_v2, %v11190_v58  ;;  %21214 = vst [vmem:[#allocation70_spill] sm:$0xff] %v17204_v17  ;;  %v6123_v1 = vrot.slane %v4436_v26, 7  ;;  %v6352_v11 = vrot.slane %v17015_v62, 2  ;;  %v21221_v46 = vld [vmem:[#allocation79_spill] sm:$0xff] }
 0x7f1   : > { %v17179_v51 = vpop.f32.mrf.mxu0  ;;  %v5720_v40 = vsel %vm5692_vm12, %v5687_v47, %v11216_v27  ;;  %v5719_v20 = vsel %vm5692_vm12, %v5686_v25, %v11215_v35  ;;  %11363 = vrot.lane.b32.xlu1 %v11362_v60, %s12674_s27  ;;  %v17214_v13 = vsel %vm652_vm0, 0.0, %v6122_v32  ;;  %v6120_v58 = vrot.slane %v4434_v49, 7  ;;  %v17220_v35 = vpop.permute.xlu1 %11208 }
 0x7f2   : > { %21210 = vst [vmem:[#allocation27_spill] sm:$0xff] %v17179_v51  ;;  %21215 = vst [vmem:[#allocation68_spill] sm:$0xff] %v17214_v13  ;;  %v4279_v9 = vmul.f32 %v16976_v45, %v16753_v43  ;;  %v11372_v48 = vpack.i.bf16 %v17204_v17, %v16964_v29  ;;  %v5751_v27 = vpack.c.bf16 %v5720_v40, %v5719_v20  ;;  %v17225_v26 = vpop.f32.mrf.mxu1  ;;  %v6289_v62 = vrot.slane %v17214_v13, 1 }
 0x7f3   : > { %v5929_v39 = vpop.f32.mrf.mxu0  ;;  %11333 = vrot.lane.b32.xlu0 %v11332_v21, %s12679_s19  ;;  %v17223_v8 = vsel %vm652_vm0, %v6122_v32, %v6123_v1  ;;  %v17230_v63 = vsel %vm652_vm0, %v6123_v1, 0.0  ;;  %v4277_v45 = vmul.f32 %v16753_v43, %v16991_v6  ;;  %v21217_v41 = vpack.c.bf16 %v16468_v0, %v16461_v56 }
 0x7f4   : > { %21216 = vst [vmem:[#allocation49_spill] sm:$0xff] %v17223_v8  ;;  %6019 = vmatmul.mubr.bf16.gmra.mxu0 %v5751_v27  ;;  %v21218_v3 = vrot.slane %v17012_v7, 2  ;;  %v17244_v32 = vsel %vm652_vm0, %v6119_v52, %v6120_v58  ;;  %v17247_v2 = vsel %vm652_vm0, %v6120_v58, 0.0  ;;  %v17250_v60 = vadd.f32 %v21221_v46, %v4279_v9  ;;  %v17260_v47 = vpop.f32.mrf.mxu1  ;;  %v21222_v58 = vld [vmem:[#allocation77_spill] sm:$0xff] }
 0x7f5   : > { %11373 = vrot.lane.b32.xlu1 %v11372_v48, %s12682_s22  ;;  %9700 = vmatprep.mubr.msk.bf16.mxu0 %vm2388_vm6, %v21217_v41  ;;  %21220 = vst [vmem:[#allocation21_spill] sm:$0xff] %v17244_v32  ;;  %v6364_v56 = vrot.slane %v17214_v13, 2  ;;  %v6290_v39 = vrot.slane %v17223_v8, 1  ;;  %v11195_v34 = vunpack.i.l.bf16 %v17096_v12  ;;  %v6365_v52 = vrot.slane %v17223_v8, 2  ;;  %v11224_v40 = vpop.permute.xlu1 %11223 }
 0x7f6   : > { %v17241_v31 = vsel %vm890_vm3, %v21218_v3, %v6352_v11  ;;  %v6367_v49 = vrot.slane %v17230_v63, 2  ;;  %v11200_v25 = vunpack.i.l.bf16 %v17143_v38  ;;  %v11377_v16 = vpack.i.bf16 %v17223_v8, %v17214_v13 }
 0x7f7   : > { %21219 = vst [vmem:[#allocation48_spill] sm:$0xff] %v17241_v31  ;;  %v11347_v6 = vpack.i.bf16 %v16997_v57, %v17241_v31  ;;  %v20576_v1 = vrot.slane %v17244_v32, 1  ;;  %v6287_v11 = vrot.slane %v17247_v2, 1  ;;  %v17270_v9 = vadd.f32 %v21222_v58, %v4277_v45  ;;  %v17284_v58 = vpop.f32.mrf.mxu1 }
 0x7f8   : > { %v4280_v41 = vmul.f32 %v17017_v19, %v16753_v43  ;;  %v11161_v3 = vunpack.i.h.bf16 %v16970_v28  ;;  %v11166_v46 = vunpack.i.h.bf16 %v16994_v24  ;;  %v5526_v20 = vsel %vm2388_vm6, %v16163_v36, %v11195_v34 }
 0x7f9   : > { %11348 = vrot.lane.b32.xlu0 %v11347_v6, %s12680_s20  ;;  %11378 = vrot.lane.b32.xlu1 %v11377_v16, %s12678_s1  ;;  %v11185_v6 = vunpack.i.l.bf16 %v17049_v55  ;;  %v5558_v27 = vsel %vm5529_vm8, %v5526_v20, %v11200_v25  ;;  %v11206_v0 = vunpack.i.h.bf16 %v17189_v44  ;;  %v17289_v19 = vsel %vm890_vm3, %v6364_v56, %v6365_v52  ;;  %v21225_v25 = vld [vmem:[#allocation80_spill] sm:$0xff]  ;;  %v11239_v24 = vpop.permute.xlu1 %11238 }
 0x7fa   : > { %21224 = vst [vmem:[#allocation23_spill] sm:$0xff] %v17289_v19  ;;  %v17292_v28 = vsel %vm890_vm3, %v6365_v52, %v6367_v49  ;;  %v11186_v16 = vunpack.i.h.bf16 %v17049_v55  ;;  %v11205_v36 = vunpack.i.l.bf16 %v17189_v44  ;;  %v11211_v34 = vunpack.i.h.bf16 %v17220_v35 }
 0x7fb   : > { %v17300_v20 = vadd.f32 %v21225_v25, %v4280_v41  ;;  %v4278_v56 = vmul.f32 %v16753_v43, %v17029_v22  ;;  %v5525_v52 = vsel %vm2388_vm6, %v16158_v4, %v11161_v3  ;;  %v11210_v49 = vunpack.i.l.bf16 %v17220_v35  ;;  %v17316_v25 = vpop.f32.mrf.mxu1 }
 0x7fc   : > { %v5557_v55 = vsel %vm5529_vm8, %v5525_v52, %v11166_v46  ;;  %v5591_v44 = vsel %vm5561_vm9, %v5558_v27, %v11186_v16  ;;  %v11226_v35 = vunpack.i.h.bf16 %v11224_v40  ;;  %v11225_v3 = vunpack.i.l.bf16 %v11224_v40 }
 0x7fd   : > { %11353 = vrot.lane.b32.xlu0 %v11332_v21, %s12676_s30  ;;  %v11397_v21 = vpack.i.bf16 %v17292_v28, %v17289_v19  ;;  %v5590_v22 = vsel %vm5561_vm9, %v5557_v55, %v11185_v6  ;;  %v5623_v4 = vsel %vm1336_vm1, %v5591_v44, %v11206_v0  ;;  %v17326_v16 = vsel %vm812_vm2, %v20576_v1, %v6287_v11  ;;  %v21240_v1 = vld [vmem:[#allocation81_spill] sm:$0xff] }
 0x7fe   : > { %v5622_v46 = vsel %vm1336_vm1, %v5590_v22, %v11205_v36  ;;  %v5656_v27 = vsel %vm5626_vm10, %v5623_v4, %v11211_v34  ;;  %v11241_v6 = vunpack.i.h.bf16 %v11239_v24  ;;  %v6291_v40 = vsel %vm812_vm2, %v6289_v62, %v6290_v39 }
 0x7ff   : > { %11398 = vrot.lane.b32.xlu1 %v11397_v21, %s12681_s25  ;;  %v5655_v55 = vsel %vm5626_vm10, %v5622_v46, %v11210_v49  ;;  %v5689_v0 = vsel %vm5659_vm11, %v5656_v27, %v11226_v35  ;;  %v11240_v36 = vunpack.i.l.bf16 %v11239_v24  ;;  %v11407_v44 = vpack.i.bf16 %v6291_v40, %v17326_v16  ;;  %v21228_v49 = vld [vmem:[#allocation78_spill] sm:$0xff]  ;;  %v17345_v35 = vpop.f32.mrf.mxu1 }
 0x800   : > { %v5688_v34 = vsel %vm5659_vm11, %v5655_v55, %v11225_v3  ;;  %v11382_v11 = vpack.i.bf16 %v17214_v13, %v17244_v32  ;;  %v5722_v21 = vsel %vm5692_vm12, %v5689_v0, %v11241_v6  ;;  %v4438_v22 = vadd.f32 %v21228_v49, %v4278_v56 }
 0x801   : > { %v17282_v45 = vpop.f32.mrf.mxu0  ;;  %v4283_v4 = vmul.f32 %v17052_v54, %v16753_v43  ;;  %v5721_v62 = vsel %vm5692_vm12, %v5688_v34, %v11240_v36  ;;  %v21229_v24 = vrot.slane %v17244_v32, 2  ;;  %v21230_v3 = vrot.slane %v17204_v17, 2 }
 0x802   : > { %21223 = vst [vmem:[#allocation50_spill] sm:$0xff] %v17282_v45  ;;  %v4281_v27 = vmul.f32 %v16753_v43, %v17085_v10  ;;  %v4284_v56 = vmul.f32 %v17124_v23, %v16753_v43  ;;  %v5753_v54 = vpack.c.bf16 %v5722_v21, %v5721_v62  ;;  %v6129_v0 = vrot.slane %v17300_v20, 7  ;;  %v21237_v62 = vld [vmem:[#allocation86_spill] sm:$0xff]  ;;  %v17380_v20 = vpop.f32.mrf.mxu1 }
 0x803   : > { %v5934_v48 = vpop.f32.mrf.mxu0  ;;  %v17353_v46 = vsel %vm890_vm3, %v21230_v3, %v21229_v24  ;;  %11408 = vrot.lane.b32.xlu1 %v11407_v44, %s12679_s19  ;;  %v21234_v36 = vrot.slane %v17270_v9, 7  ;;  %v11387_v34 = vpack.i.bf16 %v17244_v32, %v17204_v17  ;;  %v6284_v21 = vrot.slane %v17204_v17, 1 }
 0x804   : > { %v11367_v48 = vpack.i.bf16 %v17241_v31, %v17080_v42  ;;  %21231 = vst [vmem:[#allocation37_spill] sm:$0xff] %v17353_v46  ;;  %v11412_v23 = vpack.i.bf16 %v17353_v46, %v17000_v33  ;;  %6027 = vmatmul.mubr.bf16.gmra.mxu0 %v5753_v54  ;;  %v6126_v49 = vrot.slane %v4438_v22, 7  ;;  %v4443_v24 = vadd.f32 %v21237_v62, %v4283_v4  ;;  %v21241_v4 = vld [vmem:[#allocation89_spill] sm:$0xff] }
 0x805   : > { %v17313_v41 = vpop.f32.mrf.mxu0  ;;  %v17370_v10 = vsel %vm652_vm0, 0.0, %v21234_v36  ;;  %v21238_v3 = vrot.slane %v17230_v63, 1  ;;  %v6362_v54 = vrot.slane %v17247_v2, 2  ;;  %v17394_v22 = vadd.f32 %v21240_v1, %v4281_v27 }
 0x806   : > { %21226 = vst [vmem:[#allocation28_spill] sm:$0xff] %v17313_v41  ;;  %11368 = vrot.lane.b32.xlu0 %v11367_v48, %s12681_s25  ;;  %21235 = vst [vmem:[#allocation33_spill] sm:$0xff] %v17370_v10  ;;  %v4444_v62 = vadd.f32 %v21241_v4, %v4284_v56  ;;  %v4282_v1 = vmul.f32 %v16753_v43, %v17151_v59  ;;  %v17410_v56 = vsel %vm652_vm0, %v6129_v0, 0.0  ;;  %v21246_v59 = vrot.slane %v17244_v32, 1 }
 0x807   : > { %v5937_v52 = vpop.f32.mrf.mxu0  ;;  %11413 = vrot.lane.b32.xlu1 %v11412_v23, %s12680_s20  ;;  %v6131_v27 = vrot.slane %v17394_v22, 7  ;;  %v4285_v9 = vmul.f32 %v16753_v43, %v17209_v53  ;;  %v17466_v22 = vpop.permute.xlu0 %11218  ;;  %v4289_v45 = vmul.f32 %v16753_v43, %v17316_v25  ;;  %v21289_v33 = vrot.slane %v17370_v10, 1 }
 0x808   : > { %v21232_v52 = vrot.slane %v17250_v60, 7 }
 0x809   : > { %v17340_v48 = vpop.f32.mrf.mxu0  ;;  %v4449_v51 = vadd.f32 %v21265_v15, %v4289_v45 }
 0x80a   : > { %21227 = vst [vmem:[#allocation53_spill] sm:$0xff] %v17340_v48  ;;  %11383 = vrot.lane.b32.xlu0 %v11382_v11, %s12682_s22  ;;  %v17364_v55 = vsel %vm652_vm0, 0.0, %v21232_v52  ;;  %v21239_v52 = vld [vmem:[#allocation36_spill] sm:$0xff] }
 0x80b   : > { %v5942_v6 = vpop.f32.mrf.mxu0  ;;  %21233 = vst [vmem:[#allocation41_spill] sm:$0xff] %v17364_v55  ;;  %9701 = vmatprep.mubr.msk.bf16.mxu0 %vm2388_vm6, %v21239_v52  ;;  %v21242_v52 = vrot.slane %v17250_v60, 7  ;;  %v4287_v60 = vmul.f32 %v17184_v61, %v16753_v43  ;;  %11428 = vrot.lane.b32.xlu1 %v11407_v44, %s12676_s30  ;;  %v17507_v25 = vpop.permute.xlu0 %11228 }
 0x80c   : > { %v17387_v6 = vsel %vm812_vm2, %v6290_v39, %v21238_v3  ;;  %v6286_v3 = vsel %vm812_vm2, %v6284_v21, %v21246_v59  ;;  %v21247_v21 = vld [vmem:[#allocation84_spill] sm:$0xff]  ;;  %v4286_v39 = vmul.f32 %v16753_v43, %v17260_v47 }
 0x80d   : > { %v17376_v11 = vpop.f32.mrf.mxu0  ;;  %v17404_v2 = vsel %vm652_vm0, %v21242_v52, %v6129_v0  ;;  %v11392_v23 = vpack.i.bf16 %v17387_v6, %v6291_v40  ;;  %v17420_v52 = vpop.f32.mrf.mxu1  ;;  %v6135_v40 = vrot.slane %v4444_v62, 7  ;;  %v4442_v59 = vadd.f32 %v21247_v21, %v4282_v1 }
 0x80e   : > { %21236 = vst [vmem:[#allocation55_spill] sm:$0xff] %v17376_v11  ;;  %11388 = vrot.lane.b32.xlu0 %v11387_v34, %s12678_s1  ;;  %21243 = vst [vmem:[#allocation43_spill] sm:$0xff] %v17404_v2  ;;  %v21244_v34 = vmov %v21234_v36  ;;  %v6377_v36 = vrot.slane %v17410_v56, 2  ;;  %v11432_v62 = vpack.i.bf16 %v17326_v16, %v6286_v3  ;;  %v11402_v53 = vpack.i.bf16 %v6286_v3, %v17158_v18 }
 0x80f   : > { %v5945_v63 = vpop.f32.mrf.mxu0  ;;  %v17416_v4 = vsel %vm652_vm0, %v21244_v34, %v6126_v49  ;;  %v17434_v34 = vsel %vm652_vm0, %v6126_v49, 0.0  ;;  %v4288_v49 = vmul.f32 %v17225_v26, %v16753_v43  ;;  %v17449_v0 = vpop.f32.mrf.mxu1  ;;  %v21251_v1 = vrot.slane %v17244_v32, 2 }
 0x810   : > { %21245 = vst [vmem:[#allocation44_spill] sm:$0xff] %v17416_v4  ;;  %v6134_v63 = vrot.slane %v4443_v24, 7  ;;  %v6375_v24 = vrot.slane %v17404_v2, 2  ;;  %21250 = vst [vmem:[#allocation57_spill] sm:$0xff] %v17449_v0  ;;  %v6297_v16 = vrot.slane %v17434_v34, 1  ;;  %v17458_v18 = vsel %vm652_vm0, 0.0, %v6131_v27  ;;  %11433 = vrot.lane.b32.xlu1 %v11432_v62, %s12674_s27 }
 0x811   : > { %v17454_v21 = vsel %vm890_vm3, %v21251_v1, %v6362_v54  ;;  %21252 = vst [vmem:[#allocation38_spill] sm:$0xff] %v17458_v18  ;;  %v17472_v54 = vsel %vm652_vm0, %v6135_v40, 0.0  ;;  %v6132_v1 = vrot.slane %v4442_v59, 7  ;;  %v21255_v59 = vld [vmem:[#allocation99_spill] sm:$0xff]  ;;  %v10376_v41 = vpop.f32.mrf.mxu1  ;;  %v4295_v37 = vmul.f32 %v17420_v52, %v16753_v43 }
 0x812   : > { %11393 = vrot.lane.b32.xlu0 %v11392_v23, %s12674_s27  ;;  %v17442_v44 = vsel %vm652_vm0, 0.0, %v6134_v63  ;;  %v21249_v23 = vld [vmem:[#allocation96_spill] sm:$0xff]  ;;  %v17461_v3 = vsel %vm652_vm0, %v6134_v63, %v6135_v40  ;;  %v11417_v62 = vpack.i.bf16 %v17289_v19, %v17454_v21  ;;  %v4448_v48 = vadd.f32 %v21255_v59, %v4288_v49 }
 0x813   : > { %21248 = vst [vmem:[#allocation45_spill] sm:$0xff] %v17442_v44  ;;  %v17445_v61 = vadd.f32 %v21249_v23, %v4287_v60  ;;  %21253 = vst [vmem:[#allocation16_spill] sm:$0xff] %v17461_v3  ;;  %v21254_v60 = vld [vmem:[#allocation91_spill] sm:$0xff]  ;;  %v17495_v11 = vsel %vm652_vm0, %v6131_v27, %v6132_v1  ;;  %v4292_v59 = vmul.f32 %v17345_v35, %v16753_v43  ;;  %v21260_v35 = vrot.slane %v17364_v55, 2 }
 0x814   : > { %v17464_v23 = vadd.f32 %v21254_v60, %v4285_v9  ;;  %v11442_v60 = vpack.i.bf16 %v17370_v10, %v17223_v8  ;;  %v4291_v9 = vmul.f32 %v17284_v58, %v16753_v43  ;;  %21256 = vst [vmem:[#allocation26_spill] sm:$0xff] %v17495_v11  ;;  %v17505_v58 = vsel %vm652_vm0, %v6132_v1, 0.0 }
 0x815   : > { %v6140_v40 = vrot.slane %v17445_v61, 7  ;;  %v21257_v61 = vld [vmem:[#allocation94_spill] sm:$0xff]  ;;  %v11447_v27 = vpack.i.bf16 %v17404_v2, %v17364_v55  ;;  %v11437_v52 = vpack.i.bf16 %v17454_v21, %v17353_v46  ;;  %v21287_v29 = vrot.slane %v17404_v2, 1 }
 0x816   : > { %11403 = vrot.lane.b32.xlu0 %v11402_v53, %s12679_s19  ;;  %v6137_v63 = vrot.slane %v17464_v23, 7  ;;  %11443 = vrot.lane.b32.xlu1 %v11442_v60, %s12682_s22  ;;  %v4446_v49 = vadd.f32 %v21257_v61, %v4286_v39  ;;  %v4290_v23 = vmul.f32 %v16753_v43, %v17380_v20  ;;  %v4296_v60 = vmul.f32 %v10376_v41, %v16753_v43  ;;  %v21264_v41 = vld [vmem:[#allocation105_spill] sm:$0xff] }
 0x817   : > { %v17513_v39 = vsel %vm652_vm0, 0.0, %v6140_v40  ;;  %v17518_v20 = vsel %vm890_vm3, %v21260_v35, %v6375_v24  ;;  %v17521_v61 = vsel %vm890_vm3, %v6375_v24, %v6377_v36  ;;  %v21266_v36 = vld [vmem:[#allocation107_spill] sm:$0xff]  ;;  %v21288_v14 = vrot.slane %v17416_v4, 1 }
 0x818   : > { %21259 = vst [vmem:[#allocation39_spill] sm:$0xff] %v17513_v39  ;;  %21261 = vst [vmem:[#allocation47_spill] sm:$0xff] %v17518_v20  ;;  %v17524_v26 = vsel %vm652_vm0, 0.0, %v6137_v63  ;;  %v6138_v35 = vrot.slane %v4446_v49, 7  ;;  %v4452_v24 = vadd.f32 %v21266_v36, %v4292_v59  ;;  %v11467_v45 = vpack.i.bf16 %v17521_v61, %v17518_v20 }
 0x819   : > { %21262 = vst [vmem:[#allocation54_spill] sm:$0xff] %v17521_v61  ;;  %21263 = vst [vmem:[#allocation58_spill] sm:$0xff] %v17524_v26  ;;  %v6296_v57 = vsel %vm812_vm2, %v21289_v33, %v21288_v14 }
 0x81a   : > { %11418 = vrot.lane.b32.xlu0 %v11417_v62, %s12680_s20  ;;  %v6141_v62 = vrot.slane %v4448_v48, 7  ;;  %11448 = vrot.lane.b32.xlu1 %v11447_v27, %s12678_s1 }
 0x81b   : > { %v17635_v42 = vpop.permute.xlu1 %11248 }
 0x81c   : > { %v17546_v59 = vsel %vm652_vm0, %v6140_v40, %v6141_v62  ;;  %v17562_v40 = vsel %vm652_vm0, %v6137_v63, %v6138_v35  ;;  %21290 = vst [vmem:[#allocation88_spill] sm:$0xff] %v17635_v42 }
 0x81d   : > { %v17502_v47 = vpop.f32.mrf.mxu0  ;;  %21270 = vst [vmem:[#allocation102_spill] sm:$0xff] %v17546_v59  ;;  %21273 = vst [vmem:[#allocation100_spill] sm:$0xff] %v17562_v40 }
 0x81e   : > { %21258 = vst [vmem:[#allocation31_spill] sm:$0xff] %v17502_v47  ;;  %v4451_v47 = vadd.f32 %v21264_v41, %v4291_v9  ;;  %11423 = vrot.lane.b32.xlu0 %v11402_v53, %s12676_s30  ;;  %v21269_v41 = vld [vmem:[#allocation97_spill] sm:$0xff]  ;;  %v21272_v9 = vld [vmem:[#allocation98_spill] sm:$0xff]  ;;  %11468 = vrot.lane.b32.xlu1 %v11467_v45, %s12681_s25  ;;  %v6147_v53 = vrot.slane %v4452_v24, 7  ;;  %v6395_v24 = vrot.slane %v17546_v59, 2 }
 0x81f   : > { %v5950_v1 = vpop.f32.mrf.mxu0  ;;  %v4456_v15 = vadd.f32 %v21269_v41, %v4296_v60  ;;  %v17554_v60 = vsel %vm652_vm0, %v6141_v62, 0.0  ;;  %v6143_v41 = vrot.slane %v4449_v51, 7  ;;  %v4455_v48 = vadd.f32 %v21272_v9, %v4295_v37 }
 0x820   : > { %v21267_v1 = vld [vmem:[#allocation103_spill] sm:$0xff]  ;;  %v21275_v62 = vrot.slane %v17364_v55, 1  ;;  %v11452_v9 = vpack.i.bf16 %v17364_v55, %v17416_v4 }
 0x821   : > { %v4450_v5 = vadd.f32 %v21267_v1, %v4290_v23  ;;  %v17535_v13 = vpop.f32.mrf.mxu0  ;;  %v21271_v23 = vrot.slane %v17416_v4, 1  ;;  %v6146_v1 = vrot.slane %v4451_v47, 7  ;;  %v6153_v51 = vrot.slane %v4456_v15, 7 }
 0x822   : > { %21268 = vst [vmem:[#allocation18_spill] sm:$0xff] %v17535_v13  ;;  %v17557_v13 = vpop.permute.xlu0 %11233  ;;  %11438 = vrot.lane.b32.xlu0 %v11437_v52, %s12681_s25  ;;  %v17579_v52 = vsel %vm652_vm0, %v6138_v35, 0.0  ;;  %v21278_v15 = vrot.slane %v17370_v10, 2  ;;  %v17593_v63 = vsel %vm652_vm0, 0.0, %v6143_v41 }
 0x823   : > { %v17551_v27 = vsel %vm812_vm2, %v21271_v23, %v6297_v16  ;;  %v5953_v36 = vpop.f32.mrf.mxu0  ;;  %v6144_v16 = vrot.slane %v4450_v5, 7  ;;  %v21274_v23 = vrot.slane %v17404_v2, 1  ;;  %v6397_v5 = vrot.slane %v17554_v60, 2 }
 0x824   : > { %v21277_v36 = vrot.slane %v17416_v4, 2  ;;  %v17590_v49 = vsel %vm652_vm0, 0.0, %v6146_v1  ;;  %v17600_v8 = vsel %vm652_vm0, %v6146_v1, %v6147_v53  ;;  %v11457_v1 = vpack.i.bf16 %v17416_v4, %v17370_v10 }
 0x825   : > { %v6301_v47 = vsel %vm812_vm2, %v21275_v62, %v21274_v23  ;;  %v6390_v62 = vrot.slane %v17562_v40, 2  ;;  %21280 = vst [vmem:[#allocation106_spill] sm:$0xff] %v17590_v49  ;;  %21281 = vst [vmem:[#allocation104_spill] sm:$0xff] %v17600_v8  ;;  %v17609_v32 = vsel %vm652_vm0, %v6144_v16, 0.0  ;;  %v6233_v14 = vsel %vm652_vm0, %v6153_v51, 0.0 }
 0x826   : > { %v11477_v37 = vpack.i.bf16 %v6301_v47, %v17551_v27  ;;  %v17572_v45 = vpop.f32.mrf.mxu0  ;;  %v17586_v23 = vsel %vm890_vm3, %v21278_v15, %v21277_v36  ;;  %11453 = vrot.lane.b32.xlu0 %v11452_v9, %s12682_s22  ;;  %v17597_v35 = vpop.permute.xlu0 %11243  ;;  %v17603_v36 = vsel %vm652_vm0, %v6147_v53, 0.0  ;;  %v17606_v15 = vsel %vm652_vm0, %v6143_v41, %v6144_v16  ;;  %21283 = vst [vmem:[#allocation92_spill] sm:$0xff] %v17609_v32 }
 0x827   : > { %21276 = vst [vmem:[#allocation83_spill] sm:$0xff] %v17572_v45  ;;  %21279 = vst [vmem:[#allocation82_spill] sm:$0xff] %v17586_v23  ;;  %v6152_v45 = vrot.slane %v4455_v48, 7  ;;  %v6392_v48 = vrot.slane %v17579_v52, 2  ;;  %v6404_v53 = vrot.slane %v17590_v49, 2  ;;  %v6399_v41 = vrot.slane %v17593_v63, 2  ;;  %v17700_v49 = vpop.permute.xlu1 %11268 }
 0x828   : > { %11478 = vrot.lane.b32.xlu1 %v11477_v37, %s12679_s19  ;;  %v5958_v55 = vpop.f32.mrf.mxu0  ;;  %21282 = vst [vmem:[#allocation95_spill] sm:$0xff] %v17606_v15  ;;  %v21286_v16 = vrot.slane %v17410_v56, 1  ;;  %v6407_v31 = vrot.slane %v17603_v36, 2  ;;  %v6400_v43 = vrot.slane %v17606_v15, 2  ;;  %v6402_v56 = vrot.slane %v17609_v32, 2 }
 0x829   : > { %v17613_v17 = vsel %vm652_vm0, %v6152_v45, %v6153_v51  ;;  %v11482_v55 = vpack.i.bf16 %v17586_v23, %v17292_v28  ;;  %v17646_v10 = vsel %vm652_vm0, 0.0, %v6152_v45  ;;  %v11502_v42 = vpack.i.bf16 %v17551_v27, %v6296_v57 }
 0x82a   : > { %21284 = vst [vmem:[#allocation87_spill] sm:$0xff] %v17613_v17  ;;  %v17619_v9 = vpop.f32.mrf.mxu0  ;;  %v17628_v7 = vsel %vm812_vm2, %v21287_v29, %v21286_v16  ;;  %11458 = vrot.lane.b32.xlu0 %v11457_v1, %s12678_s1  ;;  %v17643_v29 = vpop.permute.xlu0 %11253  ;;  %v6422_v33 = vrot.slane %v17613_v17, 2  ;;  %v11472_v32 = vpack.i.bf16 %v6296_v57, %v17387_v6  ;;  %v21292_v1 = vrot.slane %v17416_v4, 2 }
 0x82b   : > { %21285 = vst [vmem:[#allocation90_spill] sm:$0xff] %v17619_v9  ;;  %v6405_v9 = vrot.slane %v17600_v8, 2  ;;  %v11462_v0 = vpack.i.bf16 %v17628_v7, %v6301_v47  ;;  %v21294_v45 = vrot.slane %v17461_v3, 2  ;;  %v21297_v47 = vrot.slane %v17472_v54, 2 }
 0x82c   : > { %11483 = vrot.lane.b32.xlu1 %v11482_v55, %s12680_s20  ;;  %v5961_v16 = vpop.f32.mrf.mxu0  ;;  %v21291_v55 = vrot.slane %v17434_v34, 2  ;;  %v21300_v6 = vrot.slane %v17495_v11, 2  ;;  %v21301_v34 = vrot.slane %v17458_v18, 2  ;;  %v11236_v19 = vunpack.i.h.bf16 %v17557_v13 }
 0x82d   : > { %v21295_v16 = vrot.slane %v17442_v44, 2  ;;  %v21298_v27 = vmov %v21294_v45  ;;  %v17727_v46 = vsel %vm890_vm3, %v6404_v53, %v6405_v9  ;;  %v11512_v53 = vpack.i.bf16 %v17458_v18, %v17404_v2 }
 0x82e   : > { %v17658_v15 = vsel %vm890_vm3, %v21292_v1, %v21291_v55  ;;  %v17672_v57 = vsel %vm890_vm3, %v21298_v27, %v21297_v47  ;;  %v17679_v55 = vsel %vm890_vm3, %v21301_v34, %v21300_v6  ;;  %v21302_v1 = vrot.slane %v17505_v58, 2  ;;  %11463 = vrot.lane.b32.xlu0 %v11462_v0, %s12674_s27 }
 0x82f   : > { %21293 = vst [vmem:[#allocation85_spill] sm:$0xff] %v17658_v15  ;;  %v17665_v51 = vsel %vm890_vm3, %v21295_v16, %v21294_v45  ;;  %21299 = vst [vmem:[#allocation113_spill] sm:$0xff] %v17672_v57  ;;  %v21303_v4 = vmov %v21300_v6  ;;  %v6424_v16 = vrot.slane %v6233_v14, 2  ;;  %v21304_v47 = vrot.slane %v17524_v26, 2 }
 0x830   : > { %21296 = vst [vmem:[#allocation59_spill] sm:$0xff] %v17665_v51  ;;  %v17686_v45 = vsel %vm890_vm3, %v21303_v4, %v21302_v1  ;;  %11498 = vrot.lane.b32.xlu1 %v11477_v37, %s12676_s30  ;;  %v17696_v6 = vsel %vm890_vm3, %v6390_v62, %v6392_v48  ;;  %v21305_v4 = vrot.slane %v17513_v39, 2  ;;  %v17708_v0 = vsel %vm890_vm3, %v6395_v24, %v6397_v5 }
 0x831   : > { %v17693_v27 = vsel %vm890_vm3, %v21304_v47, %v6390_v62  ;;  %v17711_v37 = vsel %vm890_vm3, %v6399_v41, %v6400_v43  ;;  %v6417_v47 = vrot.slane %v17613_v17, 1  ;;  %v17714_v62 = vpop.permute.xlu0 %11258  ;;  %v17717_v48 = vsel %vm890_vm3, %v6400_v43, %v6402_v56 }
 0x832   : > { %v17705_v1 = vsel %vm890_vm3, %v21305_v4, %v6395_v24  ;;  %v6416_v5 = vrot.slane %v17646_v10, 1  ;;  %v6419_v41 = vrot.slane %v6233_v14, 1  ;;  %v17730_v17 = vsel %vm890_vm3, %v6405_v9, %v6407_v31  ;;  %11473 = vrot.lane.b32.xlu0 %v11472_v32, %s12679_s19 }
 0x833   : > { %21306 = vst [vmem:[#allocation15_spill] sm:$0xff] %v17705_v1  ;;  %v6421_v43 = vrot.slane %v17646_v10, 2  ;;  %v11487_v56 = vpack.i.bf16 %v17518_v20, %v17658_v15  ;;  %v17758_v4 = vsel %vm890_vm3, %v6422_v33, %v6424_v16  ;;  %v11507_v24 = vpack.i.bf16 %v17658_v15, %v17586_v23 }
 0x834   : > { %11503 = vrot.lane.b32.xlu1 %v11502_v42, %s12674_s27  ;;  %v17744_v31 = vsel %vm812_vm2, %v6416_v5, %v6417_v47  ;;  %21308 = vst [vmem:[#allocation110_spill] sm:$0xff] %v17758_v4  ;;  %v17760_v5 = vpop.permute.xlu1 %11283  ;;  %v17765_v34 = vsel %vm812_vm2, %v6417_v47, %v6419_v41  ;;  %v11517_v42 = vpack.i.bf16 %v17461_v3, %v17442_v44  ;;  %v6305_v47 = vrot.slane %v17495_v11, 1 }
 0x835   : > { %v17755_v14 = vsel %vm890_vm3, %v6421_v43, %v6422_v33  ;;  %21309 = vst [vmem:[#allocation114_spill] sm:$0xff] %v17765_v34  ;;  %v17771_v43 = vpop.permute.xlu0 %11263  ;;  %v6307_v41 = vrot.slane %v17505_v58, 1  ;;  %v11537_v33 = vpack.i.bf16 %v17672_v57, %v17665_v51  ;;  %v6309_v58 = vrot.slane %v17442_v44, 1 }
 0x836   : > { %21307 = vst [vmem:[#allocation93_spill] sm:$0xff] %v17755_v14  ;;  %11488 = vrot.lane.b32.xlu0 %v11487_v56, %s12680_s20  ;;  %v6310_v56 = vrot.slane %v17461_v3, 1  ;;  %v11201_v14 = vunpack.i.h.bf16 %v17143_v38  ;;  %v11522_v20 = vpack.i.bf16 %v17442_v44, %v17495_v11  ;;  %v11230_v44 = vunpack.i.l.bf16 %v17507_v25 }
 0x837   : > { %v11231_v15 = vunpack.i.h.bf16 %v17507_v25  ;;  %v6304_v25 = vrot.slane %v17458_v18, 1 }
 0x838   : > { %11513 = vrot.lane.b32.xlu1 %v11512_v53, %s12682_s22  ;;  %v17784_v9 = vpop.permute.xlu1 %11293  ;;  %v6311_v4 = vsel %vm812_vm2, %v6309_v58, %v6310_v56  ;;  %v11221_v58 = vunpack.i.h.bf16 %v17466_v22 }
 0x839   : > { %v17775_v16 = vpop.f32.mrf.mxu0 }
 0x83a   : > { %21310 = vst [vmem:[#allocation112_spill] sm:$0xff] %v17775_v16  ;;  %11493 = vrot.lane.b32.xlu0 %v11472_v32, %s12676_s30  ;;  %v17790_v16 = vpop.permute.xlu0 %11273  ;;  %v11196_v32 = vunpack.i.h.bf16 %v17096_v12 }
 0x83b   : > { %v5966_v53 = vpop.f32.mrf.mxu0 }
 0x83c   : > { %11518 = vrot.lane.b32.xlu1 %v11517_v42, %s12678_s1  ;;  %v6308_v42 = vsel %vm812_vm2, %v6305_v47, %v6307_v41  ;;  %v6312_v41 = vrot.slane %v17472_v54, 1  ;;  %v17807_v12 = vpop.permute.xlu1 %11303 }
 0x83d   : > { %v17792_v34 = vpop.f32.mrf.mxu0  ;;  %v11547_v2 = vpack.i.bf16 %v6311_v4, %v6308_v42 }
 0x83e   : > { %21311 = vst [vmem:[#allocation42_spill] sm:$0xff] %v17792_v34  ;;  %11508 = vrot.lane.b32.xlu0 %v11507_v24, %s12681_s25  ;;  %v11275_v34 = vunpack.i.l.bf16 %v17790_v16  ;;  %v5527_v24 = vsel %vm2388_vm6, %v16521_v30, %v11196_v32  ;;  %v17813_v38 = vpop.permute.xlu0 %11278  ;;  %v11552_v30 = vpack.i.bf16 %v17679_v55, %v17521_v61  ;;  %v11527_v32 = vpack.i.bf16 %v17495_v11, %v17458_v18 }
 0x83f   : > { %v5969_v53 = vpop.f32.mrf.mxu0  ;;  %v11280_v54 = vunpack.i.l.bf16 %v17813_v38  ;;  %v17836_v61 = vunpack.i.l.bf16 %v17597_v35 }
 0x840   : > { %11538 = vrot.lane.b32.xlu1 %v11537_v33, %s12681_s25  ;;  %v11220_v53 = vunpack.i.l.bf16 %v17466_v22  ;;  %v11235_v22 = vunpack.i.l.bf16 %v17557_v13 }
 0x841   : > { %21314 = vst [vmem:[#allocation51_spill] sm:$0xff] %v17836_v61 }
 0x842   : > { %v17804_v23 = vpop.f32.mrf.mxu0  ;;  %11523 = vrot.lane.b32.xlu0 %v11522_v20, %s12682_s22  ;;  %v5528_v20 = vsel %vm2388_vm6, %v16512_v50, %v11275_v34 }
 0x843   : > { %21312 = vst [vmem:[#allocation40_spill] sm:$0xff] %v17804_v23  ;;  %v5559_v23 = vsel %vm5529_vm8, %v5527_v24, %v11201_v14  ;;  %v17831_v14 = vsel %vm812_vm2, %v6310_v56, %v6312_v41  ;;  %v5560_v24 = vsel %vm5529_vm8, %v5528_v20, %v11280_v54  ;;  %v17844_v56 = vunpack.i.l.bf16 %v17714_v62  ;;  %v17849_v20 = vpop.permute.xlu1 %11308 }
 0x844   : > { %11548 = vrot.lane.b32.xlu1 %v11547_v2, %s12679_s19  ;;  %v5974_v33 = vpop.f32.mrf.mxu0  ;;  %v5593_v50 = vsel %vm5561_vm9, %v5560_v24, %v11221_v58  ;;  %v11532_v54 = vpack.i.bf16 %v17831_v14, %v6311_v4  ;;  %v17862_v4 = vpop.permute.xlu0 %11288 }
 0x845   : > { %21315 = vst [vmem:[#allocation60_spill] sm:$0xff] %v17844_v56  ;;  %v5625_v41 = vsel %vm1336_vm1, %v5593_v50, %v11231_v15  ;;  %v6319_v50 = vrot.slane %v17513_v39, 1 }
 0x846   : > { %v17826_v33 = vpop.f32.mrf.mxu0  ;;  %11528 = vrot.lane.b32.xlu0 %v11527_v32, %s12678_s1  ;;  %v6306_v32 = vsel %vm812_vm2, %v6304_v25, %v6305_v47  ;;  %v6317_v25 = vrot.slane %v17579_v52, 1 }
 0x847   : > { %21313 = vst [vmem:[#allocation63_spill] sm:$0xff] %v17826_v33  ;;  %v5592_v33 = vsel %vm5561_vm9, %v5559_v23, %v11220_v53  ;;  %v11572_v53 = vpack.i.bf16 %v6308_v42, %v6306_v32  ;;  %v11542_v47 = vpack.i.bf16 %v6306_v32, %v17628_v7  ;;  %v17871_v24 = vpop.permute.xlu1 %11328  ;;  %v11557_v7 = vpack.i.bf16 %v17665_v51, %v17686_v45  ;;  %v21325_v51 = vld [vmem:[#allocation88_spill] sm:$0xff] }
 0x848   : > { %11553 = vrot.lane.b32.xlu1 %v11552_v30, %s12680_s20  ;;  %v5977_v34 = vpop.f32.mrf.mxu0  ;;  %v5624_v13 = vsel %vm1336_vm1, %v5592_v33, %v11230_v44  ;;  %v5658_v30 = vsel %vm5626_vm10, %v5625_v41, %v11236_v19  ;;  %v6315_v42 = vrot.slane %v17562_v40, 1 }
 0x849   : > { %v5657_v58 = vsel %vm5626_vm10, %v5624_v13, %v11235_v22  ;;  %v5691_v23 = vsel %vm5659_vm11, %v5658_v30, %v17836_v61  ;;  %v6320_v22 = vrot.slane %v17546_v59, 1  ;;  %v11582_v34 = vpack.i.bf16 %v17524_v26, %v17461_v3  ;;  %v17884_v13 = vpop.permute.xlu0 %11298 }
 0x84a   : > { %11533 = vrot.lane.b32.xlu0 %v11532_v54, %s12674_s27  ;;  %v5690_v44 = vsel %vm5659_vm11, %v5657_v58, %v17836_v61  ;;  %v5724_v15 = vsel %vm5692_vm12, %v5691_v23, %v17844_v56  ;;  %v6318_v32 = vsel %vm812_vm2, %v6315_v42, %v6317_v25  ;;  %v11592_v25 = vpack.i.bf16 %v17513_v39, %v17562_v40 }
 0x84b   : > { %v5723_v19 = vsel %vm5692_vm12, %v5690_v44, %v17844_v56  ;;  %v17891_v58 = vpop.permute.xlu1 %11338  ;;  %v11652_v56 = vpack.i.bf16 %v17593_v63, %v17546_v59 }
 0x84c   : > { %11568 = vrot.lane.b32.xlu1 %v11547_v2, %s12676_s30  ;;  %v5755_v33 = vpack.c.bf16 %v5724_v15, %v5723_v19  ;;  %v6322_v2 = vrot.slane %v17554_v60, 1  ;;  %v6321_v60 = vsel %vm812_vm2, %v6319_v50, %v6320_v22  ;;  %v11577_v19 = vpack.i.bf16 %v17686_v45, %v17679_v55 }
 0x84d   : > { %v17896_v23 = vpop.permute.xlu0 %11313  ;;  %v11617_v15 = vpack.i.bf16 %v6321_v60, %v6318_v32 }
 0x84e   : > { %11543 = vrot.lane.b32.xlu0 %v11542_v47, %s12679_s19  ;;  %6035 = vmatmul.mubr.bf16.gmra.mxu0 %v5755_v33  ;;  %v17882_v41 = vsel %vm812_vm2, %v6320_v22, %v6322_v2  ;;  %v11622_v22 = vpack.i.bf16 %v17693_v27, %v17672_v57  ;;  %v11250_v57 = vunpack.i.l.bf16 %v21325_v51 }
 0x84f   : > { %v11602_v30 = vpack.i.bf16 %v17882_v41, %v6321_v60  ;;  %v17904_v33 = vpop.permute.xlu1 %11343 }
 0x850   : > { %11573 = vrot.lane.b32.xlu1 %v11572_v53, %s12674_s27 }
 0x851   : > { %v17912_v50 = vpop.permute.xlu0 %11318 }
 0x852   : > { %11558 = vrot.lane.b32.xlu0 %v11557_v7, %s12680_s20  ;;  %v6314_v7 = vrot.slane %v17524_v26, 1 }
 0x853   : > { %v17919_v60 = vpop.permute.xlu1 %11358 }
 0x854   : > { %11583 = vrot.lane.b32.xlu1 %v11582_v34, %s12682_s22 }
 0x855   : > { %v17888_v54 = vpop.f32.mrf.mxu0 }
 0x856   : > { %21316 = vst [vmem:[#allocation111_spill] sm:$0xff] %v17888_v54  ;;  %11563 = vrot.lane.b32.xlu0 %v11542_v47, %s12676_s30  ;;  %v11587_v47 = vpack.i.bf16 %v17546_v59, %v17513_v39  ;;  %v21321_v54 = vld [vmem:[#allocation95_spill] sm:$0xff] }
 0x857   : > { %v5982_v52 = vpop.f32.mrf.mxu0 }
 0x858   : > { %11603 = vrot.lane.b32.xlu1 %v11602_v30, %s12674_s27  ;;  %v6316_v52 = vsel %vm812_vm2, %v6314_v7, %v6315_v42  ;;  %v11647_v42 = vpack.i.bf16 %v17705_v1, %v17696_v6 }
 0x859   : > { %v17898_v44 = vpop.f32.mrf.mxu0  ;;  %v11612_v61 = vpack.i.bf16 %v6316_v52, %v17831_v14 }
 0x85a   : > { %21317 = vst [vmem:[#allocation14_spill] sm:$0xff] %v17898_v44  ;;  %11578 = vrot.lane.b32.xlu0 %v11577_v19, %s12681_s25  ;;  %v11281_v44 = vunpack.i.h.bf16 %v17813_v38  ;;  %v11301_v38 = vunpack.i.h.bf16 %v17884_v13 }
 0x85b   : > { %v5985_v53 = vpop.f32.mrf.mxu0 }
 0x85c   : > { %11618 = vrot.lane.b32.xlu1 %v11617_v15, %s12679_s19 }
 0x85e   : > { %v17910_v2 = vpop.f32.mrf.mxu0  ;;  %11588 = vrot.lane.b32.xlu0 %v11587_v47, %s12678_s1  ;;  %v11597_v47 = vpack.i.bf16 %v17562_v40, %v17524_v26  ;;  %v21322_v40 = vld [vmem:[#allocation92_spill] sm:$0xff] }
 0x85f   : > { %21318 = vst [vmem:[#allocation65_spill] sm:$0xff] %v17910_v2  ;;  %v6327_v26 = vrot.slane %v21322_v40, 1  ;;  %v11285_v40 = vunpack.i.l.bf16 %v17760_v5 }
 0x860   : > { %11623 = vrot.lane.b32.xlu1 %v11622_v22, %s12680_s20  ;;  %v5990_v34 = vpop.f32.mrf.mxu0  ;;  %v11637_v22 = vpack.i.bf16 %v6318_v32, %v6316_v52  ;;  %v6330_v32 = vrot.slane %v17600_v8, 1  ;;  %v21323_v52 = vld [vmem:[#allocation62_spill] sm:$0xff] }
 0x861   : > { %v17926_v53 = vpop.permute.xlu0 %11323 }
 0x862   : > { %v17921_v30 = vpop.f32.mrf.mxu0  ;;  %11593 = vrot.lane.b32.xlu0 %v11592_v25, %s12682_s22  ;;  %v6332_v25 = vrot.slane %v17603_v36, 1  ;;  %v11300_v36 = vunpack.i.l.bf16 %v17884_v13  ;;  %v11290_v13 = vunpack.i.l.bf16 %v17862_v4 }
 0x863   : > { %21319 = vst [vmem:[#allocation69_spill] sm:$0xff] %v17921_v30  ;;  %v17932_v34 = vpop.permute.xlu1 %11363 }
 0x864   : > { %11633 = vrot.lane.b32.xlu1 %v11617_v15, %s12676_s30  ;;  %v5993_v19 = vpop.f32.mrf.mxu0  ;;  %v11607_v15 = vpack.i.bf16 %v17708_v0, %v17705_v1  ;;  %v21324_v1 = vld [vmem:[#allocation22_spill] sm:$0xff]  ;;  %v17974_v3 = vsel %vm812_vm2, %v6330_v32, %v6332_v25  ;;  %v11642_v25 = vpack.i.bf16 %v17696_v6, %v17693_v27 }
 0x865   : > { %v17938_v7 = vpop.permute.xlu0 %11333  ;;  %v11255_v19 = vunpack.i.l.bf16 %v17643_v29 }
 0x866   : > { %11598 = vrot.lane.b32.xlu0 %v11597_v47, %s12678_s1  ;;  %v11276_v47 = vunpack.i.h.bf16 %v17790_v16  ;;  %v11296_v16 = vunpack.i.h.bf16 %v17784_v9 }
 0x867   : > { %v17950_v30 = vpop.permute.xlu1 %11373 }
 0x868   : > { %11638 = vrot.lane.b32.xlu1 %v11637_v22, %s12674_s27  ;;  %v11295_v22 = vunpack.i.l.bf16 %v17784_v9 }
 0x86a   : > { %11608 = vrot.lane.b32.xlu0 %v11607_v15, %s12681_s25  ;;  %v11256_v15 = vunpack.i.h.bf16 %v17643_v29  ;;  %v7164_v29 = vsel %vm5561_vm9, %v21323_v52, %v11255_v19 }
 0x86b   : > { %v17966_v59 = vpop.permute.xlu0 %11348  ;;  %v7196_v9 = vsel %vm1336_vm1, %v7164_v29, %v11295_v22  ;;  %v11261_v29 = vunpack.i.h.bf16 %v17714_v62 }
 0x86c   : > { %11648 = vrot.lane.b32.xlu1 %v11647_v42, %s12680_s20  ;;  %v21320_v42 = vld [vmem:[#allocation106_spill] sm:$0xff]  ;;  %v7165_v11 = vsel %vm5561_vm9, %v21323_v52, %v11256_v15  ;;  %v7228_v18 = vsel %vm5626_vm10, %v7196_v9, %v11300_v36  ;;  %v21327_v15 = vld [vmem:[#allocation24_spill] sm:$0xff]  ;;  %v11305_v36 = vunpack.i.l.bf16 %v17807_v12  ;;  %v21342_v52 = vld [vmem:[#allocation19_spill] sm:$0xff] }
 0x86d   : > { %v6329_v2 = vrot.slane %v21320_v42, 1  ;;  %v11662_v14 = vpack.i.bf16 %v21320_v42, %v21321_v54  ;;  %v7197_v22 = vsel %vm1336_vm1, %v7165_v11, %v11296_v16  ;;  %v7105_v11 = vsel %vm2388_vm6, %v21327_v15, %v11285_v40  ;;  %v4251_v40 = vpop.f32.mrf.mxu1  ;;  %v21329_v15 = vld [vmem:[#allocation20_spill] sm:$0xff] }
 0x86e   : > { %11613 = vrot.lane.b32.xlu0 %v11612_v61, %s12679_s19  ;;  %v7135_v9 = vsel %vm5529_vm8, %v7105_v11, %v11290_v13  ;;  %v11270_v13 = vunpack.i.l.bf16 %v17700_v49 }
 0x86f   : > { %v6331_v39 = vsel %vm812_vm2, %v6329_v2, %v6330_v32  ;;  %v11246_v2 = vunpack.i.h.bf16 %v17597_v35  ;;  %v7229_v32 = vsel %vm5626_vm10, %v7197_v22, %v11301_v38  ;;  %v11265_v38 = vunpack.i.l.bf16 %v17771_v43 }
 0x870   : > { %11653 = vrot.lane.b32.xlu1 %v11652_v56, %s12682_s22  ;;  %v7104_v56 = vsel %vm2388_vm6, %v21324_v1, %v11276_v47  ;;  %v17986_v1 = vpop.permute.xlu1 %11378  ;;  %v21326_v47 = vrot.slane %v21321_v54, 1  ;;  %v7261_v22 = vsel %vm5659_vm11, %v7229_v32, %v11305_v36  ;;  %v11266_v36 = vunpack.i.h.bf16 %v17771_v43 }
 0x871   : > { %v7134_v19 = vsel %vm5529_vm8, %v7104_v56, %v11281_v44  ;;  %v11672_v44 = vpack.i.bf16 %v17974_v3, %v6331_v39  ;;  %v7260_v16 = vsel %vm5659_vm11, %v7228_v18, %v11246_v2  ;;  %v11271_v43 = vunpack.i.h.bf16 %v17700_v49 }
 0x872   : > { %11628 = vrot.lane.b32.xlu0 %v11612_v61, %s12676_s30  ;;  %v17995_v35 = vsel %vm812_vm2, %v21326_v47, %v6327_v26  ;;  %v7166_v61 = vsel %vm5561_vm9, %v7134_v19, %v11250_v57  ;;  %v11251_v26 = vunpack.i.h.bf16 %v21325_v51  ;;  %v7292_v18 = vsel %vm5692_vm12, %v7260_v16, %v11261_v29  ;;  %v21328_v47 = vld [vmem:[#allocation57_spill] sm:$0xff] }
 0x873   : > { %v7198_v57 = vsel %vm1336_vm1, %v7166_v61, %v11265_v38  ;;  %v11657_v19 = vpack.i.bf16 %v17600_v8, %v21320_v42  ;;  %v4293_v11 = vmul.f32 %v21329_v15, %v21328_v47  ;;  %v4294_v61 = vmul.f32 %v21329_v15, %v4251_v40  ;;  %v21331_v40 = vld [vmem:[#allocation34_spill] sm:$0xff]  ;;  %v18054_v47 = vpop.f32.mrf.mxu0  ;;  %v21336_v15 = vld [vmem:[#allocation109_spill] sm:$0xff] }
 0x874   : > { %11663 = vrot.lane.b32.xlu1 %v11662_v14, %s12682_s22  ;;  %v11354_v14 = vpop.permute.xlu0 %11353  ;;  %v7167_v51 = vsel %vm5561_vm9, %v7135_v9, %v11251_v26  ;;  %v18016_v32 = vpop.permute.xlu1 %11398  ;;  %v7230_v29 = vsel %vm5626_vm10, %v7198_v57, %v11270_v13  ;;  %v6324_v38 = vrot.slane %v17593_v63, 1  ;;  %v11315_v9 = vunpack.i.l.bf16 %v17896_v23  ;;  %21335 = vst [vmem:[#allocation56_spill] sm:$0xff] %v18054_v47  ;;  %v21343_v47 = vld [vmem:[#allocation32_spill] sm:$0xff] }
 0x875   : > { %v11355_v56 = vunpack.i.l.bf16 %v11354_v14  ;;  %v11356_v16 = vunpack.i.h.bf16 %v11354_v14  ;;  %v11360_v14 = vunpack.i.l.bf16 %v17919_v60 }
 0x876   : > { %11643 = vrot.lane.b32.xlu0 %v11642_v25, %s12681_s25  ;;  %v18021_v25 = vpack.i.bf16 %v6331_v39, %v17995_v35  ;;  %v11306_v39 = vunpack.i.h.bf16 %v17807_v12  ;;  %v11702_v12 = vpack.i.bf16 %v17711_v37, %v17708_v0 }
 0x877   : > { %v7293_v62 = vsel %vm5692_vm12, %v7261_v22, %v11355_v56  ;;  %v7199_v56 = vsel %vm1336_vm1, %v7167_v51, %v11266_v36  ;;  %v21330_v22 = vld [vmem:[#allocation48_spill] sm:$0xff]  ;;  %v21334_v51 = vrot.slane %v21321_v54, 1  ;;  %v4454_v36 = vadd.f32 %v21336_v15, %v4294_v61 }
 0x878   : > { %11673 = vrot.lane.b32.xlu1 %v11672_v44, %s12674_s27  ;;  %v7324_v2 = vpack.c.bf16 %v7293_v62, %v7292_v18  ;;  %v18018_v44 = vpop.permute.xlu0 %11368  ;;  %v18037_v26 = vpop.permute.xlu1 %11408  ;;  %v21332_v57 = vpack.c.bf16 %v21330_v22, %v21331_v40  ;;  %v11667_v62 = vpack.i.bf16 %v21321_v54, %v17593_v63  ;;  %v7262_v49 = vsel %vm5659_vm11, %v7230_v29, %v11306_v39 }
 0x879   : > { %v7231_v22 = vsel %vm5626_vm10, %v7199_v56, %v11271_v43  ;;  %v7294_v40 = vsel %vm5692_vm12, %v7262_v49, %v11356_v16  ;;  %v11677_v61 = vpack.i.bf16 %v17730_v17, %v17727_v46  ;;  %v11717_v15 = vpack.i.bf16 %v17727_v46, %v17717_v48 }
 0x87a   : > { %11658 = vrot.lane.b32.xlu0 %v11657_v19, %s12678_s1  ;;  %7512 = vmatmul.mubr.bf16.vlgmr.msra.gmra.mxu1 %v7324_v2  ;;  %v21333_v19 = vld [vmem:[#allocation108_spill] sm:$0xff]  ;;  %v6326_v2 = vsel %vm812_vm2, %v6324_v38, %v21334_v51 }
 0x87b   : > { %9713 = vmatprep.mubr.msk.bf16.mxu1 %vm2388_vm6, %v21332_v57  ;;  %v4453_v13 = vadd.f32 %v21333_v19, %v4293_v11  ;;  %v7263_v11 = vsel %vm5659_vm11, %v7231_v22, %v11315_v9  ;;  %v5998_v57 = vpop.f32.mrf.mxu0  ;;  %v11707_v19 = vpack.i.bf16 %v17995_v35, %v6326_v2  ;;  %v21338_v9 = vld [vmem:[#allocation30_spill] sm:$0xff] }
 0x87c   : > { %11688 = vrot.lane.b32.xlu1 %v18021_v25, %s12679_s19  ;;  %v18043_v18 = vpop.permute.xlu0 %11383  ;;  %v7295_v29 = vsel %vm5692_vm12, %v7263_v11, %v11360_v14  ;;  %v18063_v39 = vpop.permute.xlu1 %11413  ;;  %v21339_v14 = vld [vmem:[#allocation29_spill] sm:$0xff] }
 0x87d   : > { %v6149_v56 = vrot.slane %v4453_v13, 7  ;;  %v7326_v16 = vpack.c.bf16 %v7295_v29, %v7294_v40  ;;  %v18070_v43 = vpop.f32.mrf.mxu0  ;;  %v7329_v49 = vpack.c.bf16 %v21339_v14, %v21338_v9  ;;  %v21340_v11 = vld [vmem:[#allocation25_spill] sm:$0xff] }
 0x87e   : > { %11668 = vrot.lane.b32.xlu0 %v11667_v62, %s12678_s1  ;;  %21337 = vst [vmem:[#allocation72_spill] sm:$0xff] %v18070_v43  ;;  %v11335_v62 = vunpack.i.l.bf16 %v17938_v7 }
 0x87f   : > { %v6001_v51 = vpop.f32.mrf.mxu0  ;;  %v18086_v22 = vsel %vm652_vm0, 0.0, %v6149_v56 }
 0x880   : > { %11703 = vrot.lane.b32.xlu1 %v11702_v12, %s12680_s20  ;;  %v18065_v38 = vpop.permute.xlu0 %11388  ;;  %v6150_v12 = vrot.slane %v4454_v36, 7  ;;  %v18077_v35 = vpop.permute.xlu1 %11428  ;;  %v11682_v36 = vpack.i.bf16 %v6326_v2, %v17882_v41  ;;  %v7107_v57 = vsel %vm2388_vm6, %v21340_v11, %v11335_v62  ;;  %v11345_v41 = vunpack.i.l.bf16 %v17904_v33 }
 0x881   : > { %v11336_v2 = vunpack.i.h.bf16 %v17938_v7  ;;  %v11722_v62 = vpack.i.bf16 %v18086_v22, %v17600_v8  ;;  %v6334_v14 = vrot.slane %v18086_v22, 1  ;;  %v11365_v7 = vunpack.i.l.bf16 %v17932_v34 }
 0x882   : > { %11678 = vrot.lane.b32.xlu0 %v11677_v61, %s12681_s25  ;;  %7520 = vmatmul.mubr.bf16.gmra.mxu1 %v7326_v16  ;;  %v18089_v40 = vsel %vm652_vm0, %v6150_v12, 0.0  ;;  %v18096_v29 = vsel %vm652_vm0, %v6149_v56, %v6150_v12  ;;  %v11291_v61 = vunpack.i.h.bf16 %v17862_v4  ;;  %v11320_v12 = vunpack.i.l.bf16 %v17912_v50 }
 0x883   : > { %9714 = vmatprep.mubr.msk.bf16.mxu1 %vm2388_vm6, %v7329_v49  ;;  %v6337_v56 = vrot.slane %v18089_v40, 1  ;;  %v11321_v49 = vunpack.i.h.bf16 %v17912_v50  ;;  %v11727_v4 = vpack.i.bf16 %v17646_v10, %v18096_v29  ;;  %v6335_v51 = vrot.slane %v18096_v29, 1 }
 0x884   : > { %11708 = vrot.lane.b32.xlu1 %v11707_v19, %s12674_s27  ;;  %v18080_v13 = vpop.permute.xlu0 %11393  ;;  %v11286_v19 = vunpack.i.h.bf16 %v17760_v5  ;;  %v18102_v16 = vpop.permute.xlu1 %11433  ;;  %v7137_v5 = vsel %vm5529_vm8, %v7107_v57, %v11345_v41  ;;  %v7108_v8 = vsel %vm2388_vm6, %v21342_v52, %v11336_v2  ;;  %v11370_v57 = vunpack.i.l.bf16 %v18018_v44 }
 0x885   : > { %v11346_v41 = vunpack.i.h.bf16 %v17904_v33  ;;  %v11366_v2 = vunpack.i.h.bf16 %v17932_v34  ;;  %v6409_v33 = vrot.slane %v18086_v22, 2 }
 0x886   : > { %11683 = vrot.lane.b32.xlu0 %v11682_v36, %s12679_s19 }
 0x888   : > { %11718 = vrot.lane.b32.xlu1 %v11717_v15, %s12680_s20  ;;  %v18104_v9 = vpop.permute.xlu0 %11403  ;;  %v21341_v15 = vld [vmem:[#allocation17_spill] sm:$0xff]  ;;  %v18128_v42 = vpop.permute.xlu1 %11443 }
 0x889   : > { %v7106_v11 = vsel %vm2388_vm6, %v21341_v15, %v11286_v19  ;;  %v11340_v19 = vunpack.i.l.bf16 %v17891_v58  ;;  %v18136_v15 = vpop.f32.mrf.mxu0 }
 0x88a   : > { %11693 = vrot.lane.b32.xlu0 %v11682_v36, %s12676_s30  ;;  %v7136_v50 = vsel %vm5529_vm8, %v7106_v11, %v11291_v61  ;;  %v7169_v36 = vsel %vm5561_vm9, %v7137_v5, %v11321_v49  ;;  %v7138_v61 = vsel %vm5529_vm8, %v7108_v8, %v11346_v41  ;;  %v11350_v5 = vunpack.i.l.bf16 %v17966_v59 }
 0x88b   : > { %v7168_v52 = vsel %vm5561_vm9, %v7136_v50, %v11320_v12  ;;  %v11310_v49 = vunpack.i.l.bf16 %v17849_v20  ;;  %v7201_v12 = vsel %vm1336_vm1, %v7169_v36, %v11366_v2  ;;  %v18149_v11 = vsel %vm812_vm2, %v6335_v51, %v6337_v56  ;;  %v6006_v50 = vpop.f32.mrf.mxu0 }
 0x88c   : > { %11723 = vrot.lane.b32.xlu1 %v11722_v62, %s12682_s22  ;;  %v11371_v62 = vunpack.i.h.bf16 %v18018_v44  ;;  %v18130_v43 = vpop.permute.xlu0 %11418  ;;  %v7200_v44 = vsel %vm1336_vm1, %v7168_v52, %v11365_v7  ;;  %v11316_v7 = vunpack.i.h.bf16 %v17896_v23  ;;  %v18153_v41 = vpop.permute.xlu1 %11448  ;;  %v6336_v52 = vsel %vm812_vm2, %v6334_v14, %v6335_v51 }
 0x88d   : > { %v7232_v34 = vsel %vm5626_vm10, %v7200_v44, %v11370_v57  ;;  %v7109_v36 = vsel %vm2388_vm6, %v21343_v47, %v11340_v19  ;;  %v7170_v57 = vsel %vm5561_vm9, %v7138_v61, %v11310_v49  ;;  %v11375_v56 = vunpack.i.l.bf16 %v17950_v30 }
 0x88e   : > { %11698 = vrot.lane.b32.xlu0 %v18021_v25, %s12676_s30  ;;  %v7233_v8 = vsel %vm5626_vm10, %v7201_v12, %v11371_v62  ;;  %v11712_v25 = vpack.i.bf16 %v17717_v48, %v17711_v37  ;;  %v21344_v2 = vrot.slane %v18096_v29, 2  ;;  %v18167_v62 = vpop.f32.mrf.mxu0  ;;  %v11325_v44 = vunpack.i.l.bf16 %v17926_v53 }
 0x88f   : > { %v7139_v14 = vsel %vm5529_vm8, %v7109_v36, %v11350_v5  ;;  %v7264_v51 = vsel %vm5659_vm11, %v7232_v34, %v11316_v7  ;;  %v11311_v47 = vunpack.i.h.bf16 %v17849_v20  ;;  %v11361_v19 = vunpack.i.h.bf16 %v17919_v60 }
 0x890   : > { %11728 = vrot.lane.b32.xlu1 %v11727_v4, %s12682_s22  ;;  %v11424_v4 = vpop.permute.xlu0 %11423  ;;  %v18165_v23 = vsel %vm890_vm3, %v6409_v33, %v21344_v2  ;;  %v7265_v33 = vsel %vm5659_vm11, %v7233_v8, %v11375_v56  ;;  %v6009_v61 = vpop.f32.mrf.mxu0  ;;  %v7202_v49 = vsel %vm1336_vm1, %v7170_v57, %v11325_v44  ;;  %v11330_v20 = vunpack.i.l.bf16 %v17871_v24 }
 0x891   : > { %v11425_v12 = vunpack.i.l.bf16 %v11424_v4  ;;  %v18180_v5 = vpop.permute.xlu1 %11468  ;;  %v11752_v7 = vpack.i.bf16 %v18165_v23, %v17730_v17  ;;  %v7171_v60 = vsel %vm5561_vm9, %v7139_v14, %v11311_v47  ;;  %v7296_v8 = vsel %vm5692_vm12, %v7264_v51, %v11361_v19 }
 0x892   : > { %11713 = vrot.lane.b32.xlu0 %v11712_v25, %s12681_s25  ;;  %v11732_v25 = vpack.i.bf16 %v6336_v52, %v17974_v3  ;;  %v11326_v36 = vunpack.i.h.bf16 %v17926_v53  ;;  %v7234_v56 = vsel %vm5626_vm10, %v7202_v49, %v11330_v20  ;;  %v11426_v2 = vunpack.i.h.bf16 %v11424_v4 }
 0x893   : > { %v7297_v50 = vsel %vm5692_vm12, %v7265_v33, %v11425_v12  ;;  %v11757_v44 = vpack.i.bf16 %v18149_v11, %v6336_v52  ;;  %v11376_v3 = vunpack.i.h.bf16 %v17950_v30  ;;  %v11385_v12 = vunpack.i.l.bf16 %v18043_v18  ;;  %v21345_v33 = vld [vmem:[#allocation37_spill] sm:$0xff] }
 0x894   : > { %6514 = vrot.lane.b32.xlu1 %v18149_v11, %s12679_s19  ;;  %v18182_v34 = vpop.permute.xlu0 %11438  ;;  %v7328_v57 = vpack.c.bf16 %v7297_v50, %v7296_v8  ;;  %v7203_v14 = vsel %vm1336_vm1, %v7171_v60, %v11326_v36  ;;  %v11331_v51 = vunpack.i.h.bf16 %v17871_v24  ;;  %v11430_v19 = vunpack.i.l.bf16 %v18077_v35 }
 0x895   : > { %v21346_v4 = vpack.c.bf16 %v17454_v21, %v21345_v33  ;;  %v7266_v30 = vsel %vm5659_vm11, %v7234_v56, %v11376_v3  ;;  %v11742_v21 = vpack.i.bf16 %v18096_v29, %v18086_v22  ;;  %v11405_v60 = vunpack.i.l.bf16 %v18104_v9  ;;  %v21347_v56 = vld [vmem:[#allocation23_spill] sm:$0xff] }
 0x896   : > { %11733 = vrot.lane.b32.xlu0 %v11732_v25, %s12679_s19  ;;  %7528 = vmatmul.mubr.bf16.gmra.mxu1 %v7328_v57  ;;  %v7235_v52 = vsel %vm5626_vm10, %v7203_v14, %v11331_v51  ;;  %v7298_v61 = vsel %vm5692_vm12, %v7266_v30, %v11426_v2  ;;  %v11747_v8 = vpack.i.bf16 %v17744_v31, %v18149_v11  ;;  %v21350_v3 = vld [vmem:[#allocation67_spill] sm:$0xff]  ;;  %v11341_v11 = vunpack.i.h.bf16 %v17891_v58 }
 0x897   : > { %9715 = vmatprep.mubr.msk.bf16.mxu1 %vm2388_vm6, %v21346_v4  ;;  %v7267_v49 = vsel %vm5659_vm11, %v7235_v52, %v11385_v12  ;;  %v21348_v2 = vpack.c.bf16 %v17292_v28, %v21347_v56  ;;  %v7111_v12 = vsel %vm2388_vm6, %v21350_v3, %v11405_v60  ;;  %v11415_v14 = vunpack.i.l.bf16 %v18063_v39 }
 0x898   : > { %11753 = vrot.lane.b32.xlu1 %v11752_v7, %s12680_s20  ;;  %v18200_v53 = vpop.permute.xlu0 %11453  ;;  %v6412_v7 = vrot.slane %v18089_v40, 2  ;;  %v7299_v20 = vsel %vm5692_vm12, %v7267_v49, %v11430_v19  ;;  %v21349_v40 = vrot.slane %v18096_v29, 2  ;;  %v11406_v51 = vunpack.i.h.bf16 %v18104_v9  ;;  %v21351_v9 = vld [vmem:[#allocation66_spill] sm:$0xff] }
 0x899   : > { %v11351_v28 = vunpack.i.h.bf16 %v17966_v59  ;;  %v11390_v30 = vunpack.i.l.bf16 %v18065_v38  ;;  %v7141_v52 = vsel %vm5529_vm8, %v7111_v12, %v11415_v14  ;;  %v11435_v58 = vunpack.i.l.bf16 %v18102_v16  ;;  %v21352_v49 = vld [vmem:[#allocation70_spill] sm:$0xff] }
 0x89a   : > { %v18198_v47 = vpop.permute.xlu1 %11478  ;;  %11738 = vrot.lane.b32.xlu0 %v11732_v25, %s12676_s30  ;;  %v7330_v25 = vpack.c.bf16 %v7299_v20, %v7298_v61  ;;  %v11391_v61 = vunpack.i.h.bf16 %v18065_v38  ;;  %v7110_v59 = vsel %vm2388_vm6, %v21351_v9, %v11341_v11  ;;  %v11416_v60 = vunpack.i.h.bf16 %v18063_v39 }
 0x89b   : > { %v7140_v20 = vsel %vm5529_vm8, %v7110_v59, %v11351_v28  ;;  %v11436_v3 = vunpack.i.h.bf16 %v18102_v16  ;;  %v11420_v39 = vunpack.i.l.bf16 %v18130_v43  ;;  %v11386_v28 = vunpack.i.h.bf16 %v18043_v18  ;;  %v21353_v16 = vld [vmem:[#allocation21_spill] sm:$0xff] }
 0x89c   : > { %11758 = vrot.lane.b32.xlu1 %v11757_v44, %s12674_s27  ;;  %v18216_v50 = vpop.permute.xlu0 %11458  ;;  %v18237_v44 = vsel %vm890_vm3, %v21349_v40, %v6412_v7  ;;  %v11440_v7 = vunpack.i.l.bf16 %v18182_v34  ;;  %v7173_v38 = vsel %vm5561_vm9, %v7141_v52, %v11391_v61  ;;  %v7172_v40 = vsel %vm5561_vm9, %v7140_v20, %v11390_v30 }
 0x89d   : > { %v11762_v4 = vpack.i.bf16 %v18237_v44, %v18165_v23  ;;  %v7204_v12 = vsel %vm1336_vm1, %v7172_v40, %v11435_v58  ;;  %v7205_v14 = vsel %vm1336_vm1, %v7173_v38, %v11436_v3  ;;  %v11445_v9 = vunpack.i.l.bf16 %v18128_v42 }
 0x89e   : > { %v18214_v24 = vpop.permute.xlu1 %11483  ;;  %11743 = vrot.lane.b32.xlu0 %v11742_v21, %s12678_s1  ;;  %7536 = vmatmul.mubr.bf16.gmra.mxu1 %v7330_v25  ;;  %v7112_v21 = vsel %vm2388_vm6, %v21352_v49, %v11406_v51  ;;  %v11441_v25 = vunpack.i.h.bf16 %v18182_v34  ;;  %v11380_v34 = vunpack.i.l.bf16 %v17986_v1  ;;  %v7236_v51 = vsel %vm5626_vm10, %v7204_v12, %v11440_v7 }
 0x89f   : > { %9716 = vmatprep.mubr.msk.bf16.mxu1 %vm2388_vm6, %v21348_v2  ;;  %v11410_v2 = vunpack.i.l.bf16 %v18037_v26  ;;  %v7142_v11 = vsel %vm5529_vm8, %v7112_v21, %v11416_v60  ;;  %v11395_v59 = vunpack.i.l.bf16 %v18080_v13  ;;  %v7268_v21 = vsel %vm5659_vm11, %v7236_v51, %v11386_v28 }
 0x8a0   : > { %v18228_v57 = vpop.permute.xlu0 %11463  ;;  %v7174_v58 = vsel %vm5561_vm9, %v7142_v11, %v11380_v34  ;;  %v11381_v20 = vunpack.i.h.bf16 %v17986_v1  ;;  %v11431_v60 = vunpack.i.h.bf16 %v18077_v35  ;;  %v11400_v12 = vunpack.i.l.bf16 %v18016_v32 }
 0x8a1   : > { %v7113_v61 = vsel %vm2388_vm6, %v21353_v16, %v11410_v2  ;;  %v7206_v38 = vsel %vm1336_vm1, %v7174_v58, %v11395_v59  ;;  %v11396_v1 = vunpack.i.h.bf16 %v18080_v13  ;;  %v11455_v16 = vunpack.i.l.bf16 %v18200_v53 }
 0x8a2   : > { %v18226_v36 = vpop.permute.xlu1 %11498  ;;  %11748 = vrot.lane.b32.xlu0 %v11747_v8, %s12676_s30  ;;  %v7143_v49 = vsel %vm5529_vm8, %v7113_v61, %v11420_v39  ;;  %v7300_v39 = vsel %vm5692_vm12, %v7268_v21, %v11431_v60  ;;  %v11401_v59 = vunpack.i.h.bf16 %v18016_v32  ;;  %v21355_v21 = vld [vmem:[#allocation82_spill] sm:$0xff] }
 0x8a3   : > { %v7175_v11 = vsel %vm5561_vm9, %v7143_v49, %v11381_v20  ;;  %v11500_v13 = vunpack.i.l.bf16 %v18226_v36  ;;  %v21354_v49 = vld [vmem:[#allocation85_spill] sm:$0xff] }
 0x8a4   : > { %v18248_v33 = vpop.permute.xlu0 %11473  ;;  %v7207_v61 = vsel %vm1336_vm1, %v7175_v11, %v11396_v1 }
 0x8a5   : > { %v7239_v20 = vsel %vm5626_vm10, %v7207_v61, %v11401_v59  ;;  %v11475_v11 = vunpack.i.l.bf16 %v18248_v33  ;;  %v21360_v61 = vld [vmem:[#allocation49_spill] sm:$0xff] }
 0x8a6   : > { %v18246_v19 = vpop.permute.xlu1 %11503  ;;  %11763 = vrot.lane.b32.xlu0 %v11762_v4, %s12681_s25  ;;  %v7237_v4 = vsel %vm5626_vm10, %v7205_v14, %v11441_v25  ;;  %v7238_v14 = vsel %vm5626_vm10, %v7206_v38, %v11400_v12 }
 0x8a7   : > { %v7269_v25 = vsel %vm5659_vm11, %v7237_v4, %v11445_v9  ;;  %v11446_v4 = vunpack.i.h.bf16 %v18128_v42  ;;  %v7115_v59 = vsel %vm2388_vm6, %v21360_v61, %v11475_v11  ;;  %v11505_v11 = vunpack.i.l.bf16 %v18246_v19 }
 0x8a8   : > { %v18268_v56 = vpop.permute.xlu0 %11488 }
 0x8a9   : > { %v7270_v42 = vsel %vm5659_vm11, %v7238_v14, %v11446_v4  ;;  %v21357_v14 = vld [vmem:[#allocation54_spill] sm:$0xff] }
 0x8aa   : > { %v18266_v8 = vpop.permute.xlu1 %11513 }
 0x8ab   : > { %v18290_v18 = vpop.f32.mrf.mxu0 }
 0x8ac   : > { %v11494_v30 = vpop.permute.xlu0 %11493 }
 0x8ad   : > { %v11495_v7 = vunpack.i.l.bf16 %v11494_v30  ;;  %v6014_v34 = vpop.f32.mrf.mxu0  ;;  %v11496_v51 = vunpack.i.h.bf16 %v11494_v30  ;;  %v21356_v30 = vpack.c.bf16 %v21354_v49, %v21355_v21  ;;  %v11485_v49 = vunpack.i.l.bf16 %v18214_v24 }
 0x8ae   : > { %v18281_v52 = vpop.permute.xlu1 %11518  ;;  %v11476_v21 = vunpack.i.h.bf16 %v18248_v33 }
 0x8af   : > { %v7301_v2 = vsel %vm5692_vm12, %v7269_v25, %v11495_v7  ;;  %v18306_v28 = vpop.f32.mrf.mxu0  ;;  %v7302_v60 = vsel %vm5692_vm12, %v7270_v42, %v11496_v51  ;;  %v7271_v25 = vsel %vm5659_vm11, %v7239_v20, %v11455_v16  ;;  %v21358_v51 = vld [vmem:[#allocation47_spill] sm:$0xff] }
 0x8b0   : > { %v18299_v3 = vpop.permute.xlu0 %11508  ;;  %v7332_v35 = vpack.c.bf16 %v7301_v2, %v7300_v39  ;;  %v7303_v32 = vsel %vm5692_vm12, %v7271_v25, %v11500_v13  ;;  %v21359_v4 = vpack.c.bf16 %v21357_v14, %v21358_v51  ;;  %v11411_v13 = vunpack.i.h.bf16 %v18037_v26  ;;  %v21361_v26 = vld [vmem:[#allocation68_spill] sm:$0xff] }
 0x8b1   : > { %v6017_v7 = vpop.f32.mrf.mxu0  ;;  %v7334_v39 = vpack.c.bf16 %v7303_v32, %v7302_v60  ;;  %v11460_v60 = vunpack.i.l.bf16 %v18216_v50  ;;  %v7145_v25 = vsel %vm5529_vm8, %v7115_v59, %v11485_v49  ;;  %v11461_v32 = vunpack.i.h.bf16 %v18216_v50 }
 0x8b2   : > { %v18297_v40 = vpop.permute.xlu1 %11538  ;;  %7544 = vmatmul.mubr.bf16.gmra.mxu1 %v7332_v35  ;;  %v11421_v7 = vunpack.i.h.bf16 %v18130_v43  ;;  %v11510_v43 = vunpack.i.l.bf16 %v18299_v3  ;;  %v11486_v51 = vunpack.i.h.bf16 %v18214_v24  ;;  %v11480_v49 = vunpack.i.l.bf16 %v18198_v47 }
 0x8b3   : > { %9717 = vmatprep.mubr.msk.bf16.mxu1 %vm2388_vm6, %v21356_v30  ;;  %v7177_v61 = vsel %vm5561_vm9, %v7145_v25, %v11461_v32  ;;  %v11490_v24 = vunpack.i.l.bf16 %v18268_v56 }
 0x8b4   : > { %v18313_v9 = vpop.permute.xlu0 %11523  ;;  %v18330_v12 = vpop.f32.mrf.mxu0 }
 0x8b6   : > { %v18311_v58 = vpop.permute.xlu1 %11548  ;;  %v6022_v34 = vpop.f32.mrf.mxu0 }
 0x8b7   : > { %v21362_v34 = vld [vmem:[#allocation33_spill] sm:$0xff] }
 0x8b8   : > { %v18327_v2 = vpop.permute.xlu0 %11528  ;;  %v18341_v16 = vpop.f32.mrf.mxu0  ;;  %v7116_v33 = vsel %vm2388_vm6, %v21362_v34, %v11476_v21  ;;  %v11506_v21 = vunpack.i.h.bf16 %v18246_v19  ;;  %v21363_v19 = vld [vmem:[#allocation44_spill] sm:$0xff] }
 0x8ba   : > { %v18325_v38 = vpop.permute.xlu1 %11553  ;;  %7552 = vmatmul.mubr.bf16.gmra.mxu1 %v7334_v39  ;;  %v6025_v30 = vpop.f32.mrf.mxu0  ;;  %v7114_v39 = vsel %vm2388_vm6, %v21361_v26, %v11411_v13  ;;  %v7209_v25 = vsel %vm1336_vm1, %v7177_v61, %v11506_v21  ;;  %v11456_v26 = vunpack.i.h.bf16 %v18200_v53  ;;  %v11451_v53 = vunpack.i.h.bf16 %v18153_v41 }
 0x8bb   : > { %9718 = vmatprep.mubr.msk.bf16.mxu1 %vm2388_vm6, %v21359_v4  ;;  %v7144_v14 = vsel %vm5529_vm8, %v7114_v39, %v11421_v7  ;;  %v11511_v4 = vunpack.i.h.bf16 %v18299_v3  ;;  %v7146_v7 = vsel %vm5529_vm8, %v7116_v33, %v11486_v51  ;;  %v11450_v3 = vunpack.i.l.bf16 %v18153_v41 }
 0x8bc   : > { %v18335_v35 = vpop.permute.xlu0 %11533  ;;  %v7176_v13 = vsel %vm5561_vm9, %v7144_v14, %v11460_v60  ;;  %v11515_v14 = vunpack.i.l.bf16 %v18266_v8  ;;  %v11465_v51 = vunpack.i.l.bf16 %v18228_v57  ;;  %v11466_v41 = vunpack.i.h.bf16 %v18228_v57 }
 0x8bd   : > { %v7208_v30 = vsel %vm1336_vm1, %v7176_v13, %v11505_v11  ;;  %v7241_v39 = vsel %vm5626_vm10, %v7209_v25, %v11511_v4  ;;  %v7117_v11 = vsel %vm2388_vm6, %v21363_v19, %v11480_v49  ;;  %v7178_v33 = vsel %vm5561_vm9, %v7146_v7, %v11450_v3 }
 0x8be   : > { %v18333_v1 = vpop.permute.xlu1 %11568  ;;  %v7240_v32 = vsel %vm5626_vm10, %v7208_v30, %v11510_v43  ;;  %v7147_v61 = vsel %vm5529_vm8, %v7117_v11, %v11490_v24  ;;  %v11501_v4 = vunpack.i.h.bf16 %v18226_v36  ;;  %v7273_v21 = vsel %vm5659_vm11, %v7241_v39, %v11515_v14 }
 0x8bf   : > { %v7272_v43 = vsel %vm5659_vm11, %v7240_v32, %v11456_v26  ;;  %v7210_v30 = vsel %vm1336_vm1, %v7178_v33, %v11465_v51  ;;  %v11470_v25 = vunpack.i.l.bf16 %v18180_v5  ;;  %v7179_v24 = vsel %vm5561_vm9, %v7147_v61, %v11451_v53 }
 0x8c0   : > { %v18351_v20 = vpop.permute.xlu0 %11543  ;;  %v7304_v32 = vsel %vm5692_vm12, %v7272_v43, %v11501_v4  ;;  %v11516_v33 = vunpack.i.h.bf16 %v18266_v8  ;;  %v11525_v14 = vunpack.i.l.bf16 %v18313_v9  ;;  %v7211_v51 = vsel %vm1336_vm1, %v7179_v24, %v11466_v41 }
 0x8c1   : > { %v7242_v39 = vsel %vm5626_vm10, %v7210_v30, %v11470_v25  ;;  %v11471_v43 = vunpack.i.h.bf16 %v18180_v5  ;;  %v11570_v57 = vunpack.i.l.bf16 %v18333_v1  ;;  %v21365_v53 = vpack.c.bf16 %v17686_v45, %v17679_v55 }
 0x8c2   : > { %v18349_v42 = vpop.permute.xlu1 %11573  ;;  %v7274_v8 = vsel %vm5659_vm11, %v7242_v39, %v11516_v33  ;;  %v11545_v55 = vunpack.i.l.bf16 %v18351_v20  ;;  %v21368_v39 = vld [vmem:[#allocation59_spill] sm:$0xff] }
 0x8c3   : > { %v7243_v4 = vsel %vm5626_vm10, %v7211_v51, %v11471_v43  ;;  %v21370_v33 = vld [vmem:[#allocation43_spill] sm:$0xff]  ;;  %v11491_v51 = vunpack.i.h.bf16 %v18268_v56  ;;  %v11555_v43 = vunpack.i.l.bf16 %v18325_v38 }
 0x8c4   : > { %v18368_v50 = vpop.permute.xlu0 %11558  ;;  %v18402_v26 = vpop.f32.mrf.mxu0 }
 0x8c5   : > { %21364 = vst [vmem:[#allocation52_spill] sm:$0xff] %v18402_v26 }
 0x8c6   : > { %v18366_v59 = vpop.permute.xlu1 %11583  ;;  %v6030_v11 = vpop.f32.mrf.mxu0 }
 0x8c7   : > { %v11481_v11 = vunpack.i.h.bf16 %v18198_v47 }
 0x8c8   : > { %v11564_v60 = vpop.permute.xlu0 %11563 }
 0x8c9   : > { %v11565_v13 = vunpack.i.l.bf16 %v11564_v60  ;;  %v11566_v19 = vunpack.i.h.bf16 %v11564_v60  ;;  %v18419_v60 = vpop.f32.mrf.mxu0 }
 0x8ca   : > { %v18381_v34 = vpop.permute.xlu1 %11603  ;;  %21366 = vst [vmem:[#allocation64_spill] sm:$0xff] %v18419_v60 }
 0x8cb   : > { %v7305_v49 = vsel %vm5692_vm12, %v7273_v21, %v11565_v13  ;;  %v7306_v21 = vsel %vm5692_vm12, %v7274_v8, %v11566_v19  ;;  %v6033_v30 = vpop.f32.mrf.mxu0 }
 0x8cc   : > { %v18397_v3 = vpop.permute.xlu0 %11578  ;;  %v7336_v36 = vpack.c.bf16 %v7305_v49, %v7304_v32  ;;  %v7275_v49 = vsel %vm5659_vm11, %v7243_v4, %v11525_v14  ;;  %v7119_v14 = vsel %vm2388_vm6, %v21370_v33, %v11545_v55  ;;  %v11530_v4 = vunpack.i.l.bf16 %v18327_v2  ;;  %v21371_v30 = vld [vmem:[#allocation41_spill] sm:$0xff] }
 0x8cd   : > { %v7307_v24 = vsel %vm5692_vm12, %v7275_v49, %v11570_v57  ;;  %v11546_v57 = vunpack.i.h.bf16 %v18351_v20  ;;  %v7118_v47 = vsel %vm2388_vm6, %v21371_v30, %v11481_v11  ;;  %v11531_v49 = vunpack.i.h.bf16 %v18327_v2  ;;  %v21372_v20 = vld [vmem:[#allocation38_spill] sm:$0xff] }
 0x8ce   : > { %v18395_v7 = vpop.permute.xlu1 %11618  ;;  %7560 = vmatmul.mubr.bf16.gmra.mxu1 %v7336_v36  ;;  %v7338_v45 = vpack.c.bf16 %v7307_v24, %v7306_v21  ;;  %v21367_v36 = vld [vmem:[#allocation113_spill] sm:$0xff]  ;;  %v7149_v21 = vsel %vm5529_vm8, %v7119_v14, %v11555_v43  ;;  %v11575_v24 = vunpack.i.l.bf16 %v18349_v42  ;;  %v7148_v56 = vsel %vm5529_vm8, %v7118_v47, %v11491_v51  ;;  %v21373_v47 = vld [vmem:[#allocation26_spill] sm:$0xff] }
 0x8cf   : > { %9719 = vmatprep.mubr.msk.bf16.mxu1 %vm2388_vm6, %v21365_v53  ;;  %v21369_v19 = vpack.c.bf16 %v21367_v36, %v21368_v39  ;;  %v11550_v55 = vunpack.i.l.bf16 %v18311_v58  ;;  %v11580_v36 = vunpack.i.l.bf16 %v18397_v3  ;;  %v11556_v39 = vunpack.i.h.bf16 %v18325_v38 }
 0x8d0   : > { %v18411_v61 = vpop.permute.xlu0 %11588  ;;  %v11581_v33 = vunpack.i.h.bf16 %v18397_v3  ;;  %v7181_v11 = vsel %vm5561_vm9, %v7149_v21, %v11531_v49  ;;  %v7180_v51 = vsel %vm5561_vm9, %v7148_v56, %v11530_v4  ;;  %v11576_v43 = vunpack.i.h.bf16 %v18349_v42 }
 0x8d1   : > { %v11520_v38 = vunpack.i.l.bf16 %v18281_v52  ;;  %v11526_v49 = vunpack.i.h.bf16 %v18313_v9  ;;  %v11571_v9 = vunpack.i.h.bf16 %v18333_v1 }
 0x8d2   : > { %v18409_v13 = vpop.permute.xlu1 %11623  ;;  %v7213_v3 = vsel %vm1336_vm1, %v7181_v11, %v11576_v43 }
 0x8d3   : > { %v7245_v4 = vsel %vm5626_vm10, %v7213_v3, %v11581_v33 }
 0x8d4   : > { %v18427_v5 = vpop.permute.xlu0 %11593 }
 0x8d6   : > { %v18425_v25 = vpop.permute.xlu1 %11633  ;;  %7568 = vmatmul.mubr.bf16.gmra.mxu1 %v7338_v45  ;;  %v7120_v45 = vsel %vm2388_vm6, %v21372_v20, %v11546_v57  ;;  %v7212_v57 = vsel %vm1336_vm1, %v7180_v51, %v11575_v24  ;;  %v7121_v20 = vsel %vm2388_vm6, %v21373_v47, %v11550_v55  ;;  %v11521_v24 = vunpack.i.h.bf16 %v18281_v52 }
 0x8d7   : > { %9720 = vmatprep.mubr.msk.bf16.mxu1 %vm2388_vm6, %v21369_v19  ;;  %v11560_v19 = vunpack.i.l.bf16 %v18368_v50  ;;  %v7150_v30 = vsel %vm5529_vm8, %v7120_v45, %v11556_v39  ;;  %v7244_v21 = vsel %vm5626_vm10, %v7212_v57, %v11580_v36  ;;  %v11585_v45 = vunpack.i.l.bf16 %v18366_v59 }
 0x8d8   : > { %v18433_v41 = vpop.permute.xlu0 %11598  ;;  %v7182_v56 = vsel %vm5561_vm9, %v7150_v30, %v11520_v38  ;;  %v11535_v55 = vunpack.i.l.bf16 %v18335_v35  ;;  %v7276_v11 = vsel %vm5659_vm11, %v7244_v21, %v11526_v49  ;;  %v11536_v51 = vunpack.i.h.bf16 %v18335_v35 }
 0x8d9   : > { %v7151_v60 = vsel %vm5529_vm8, %v7121_v20, %v11560_v19  ;;  %v7277_v33 = vsel %vm5659_vm11, %v7245_v4, %v11585_v45  ;;  %v11540_v30 = vunpack.i.l.bf16 %v18297_v40  ;;  %v7308_v38 = vsel %vm5692_vm12, %v7276_v11, %v11571_v9 }
 0x8da   : > { %v18431_v32 = vpop.permute.xlu1 %11638  ;;  %v7183_v19 = vsel %vm5561_vm9, %v7151_v60, %v11521_v24  ;;  %v7214_v52 = vsel %vm1336_vm1, %v7182_v56, %v11535_v55  ;;  %v11595_v47 = vunpack.i.l.bf16 %v18427_v5  ;;  %v11541_v60 = vunpack.i.h.bf16 %v18297_v40 }
 0x8db   : > { %v7215_v20 = vsel %vm1336_vm1, %v7183_v19, %v11536_v51  ;;  %v7246_v3 = vsel %vm5626_vm10, %v7214_v52, %v11540_v30  ;;  %v11586_v49 = vunpack.i.h.bf16 %v18366_v59  ;;  %v21374_v56 = vpack.c.bf16 %v17696_v6, %v17693_v27  ;;  %v21375_v19 = vld [vmem:[#allocation16_spill] sm:$0xff] }
 0x8dc   : > { %v18447_v8 = vpop.permute.xlu0 %11608  ;;  %v7247_v24 = vsel %vm5626_vm10, %v7215_v20, %v11541_v60  ;;  %v11635_v55 = vunpack.i.l.bf16 %v18425_v25  ;;  %v11561_v6 = vunpack.i.h.bf16 %v18368_v50  ;;  %v11625_v52 = vunpack.i.l.bf16 %v18409_v13  ;;  %v21377_v50 = vld [vmem:[#allocation15_spill] sm:$0xff] }
 0x8dd   : > { %v7278_v45 = vsel %vm5659_vm11, %v7246_v3, %v11586_v49  ;;  %v7279_v40 = vsel %vm5659_vm11, %v7247_v24, %v11595_v47  ;;  %v11620_v3 = vunpack.i.l.bf16 %v18395_v7  ;;  %v21379_v24 = vld [vmem:[#allocation58_spill] sm:$0xff] }
 0x8de   : > { %v18445_v53 = vpop.permute.xlu1 %11648  ;;  %v7311_v27 = vsel %vm5692_vm12, %v7279_v40, %v11635_v55 }
 0x8df   : > { %v11650_v49 = vunpack.i.l.bf16 %v18445_v53 }
 0x8e0   : > { %v18466_v14 = vpop.permute.xlu0 %11613 }
 0x8e1   : > { %v11616_v30 = vunpack.i.h.bf16 %v18466_v14 }
 0x8e2   : > { %v18464_v2 = vpop.permute.xlu1 %11653 }
 0x8e4   : > { %v11629_v42 = vpop.permute.xlu0 %11628 }
 0x8e5   : > { %v11630_v36 = vunpack.i.l.bf16 %v11629_v42  ;;  %v11631_v21 = vunpack.i.h.bf16 %v11629_v42  ;;  %v11615_v42 = vunpack.i.l.bf16 %v18466_v14 }
 0x8e6   : > { %v18483_v39 = vpop.permute.xlu1 %11663 }
 0x8e7   : > { %v7309_v43 = vsel %vm5692_vm12, %v7277_v33, %v11630_v36  ;;  %v7310_v59 = vsel %vm5692_vm12, %v7278_v45, %v11631_v21  ;;  %v11551_v36 = vunpack.i.h.bf16 %v18311_v58  ;;  %v7123_v33 = vsel %vm2388_vm6, %v21375_v19, %v11615_v42  ;;  %v21376_v58 = vld [vmem:[#allocation45_spill] sm:$0xff] }
 0x8e8   : > { %v11644_v57 = vpop.permute.xlu0 %11643  ;;  %v7340_v1 = vpack.c.bf16 %v7309_v43, %v7308_v38  ;;  %v7342_v51 = vpack.c.bf16 %v7311_v27, %v7310_v59  ;;  %v11600_v43 = vunpack.i.l.bf16 %v18433_v41  ;;  %v7153_v20 = vsel %vm5529_vm8, %v7123_v33, %v11625_v52  ;;  %v21380_v27 = vld [vmem:[#allocation100_spill] sm:$0xff] }
 0x8e9   : > { %v7122_v47 = vsel %vm2388_vm6, %v21376_v58, %v11551_v36  ;;  %v11601_v21 = vunpack.i.h.bf16 %v18433_v41  ;;  %v11645_v45 = vunpack.i.l.bf16 %v11644_v57  ;;  %v11640_v42 = vunpack.i.l.bf16 %v18431_v32 }
 0x8ea   : > { %v18499_v35 = vpop.permute.xlu1 %11673  ;;  %7576 = vmatmul.mubr.bf16.gmra.mxu1 %v7340_v1  ;;  %v21378_v1 = vpack.c.bf16 %v17708_v0, %v21377_v50  ;;  %v7152_v60 = vsel %vm5529_vm8, %v7122_v47, %v11561_v6  ;;  %v11626_v0 = vunpack.i.h.bf16 %v18409_v13  ;;  %v11646_v55 = vunpack.i.h.bf16 %v11644_v57 }
 0x8eb   : > { %9721 = vmatprep.mubr.msk.bf16.mxu1 %vm2388_vm6, %v21374_v56  ;;  %v7184_v14 = vsel %vm5561_vm9, %v7152_v60, %v11600_v43  ;;  %v7124_v56 = vsel %vm2388_vm6, %v21379_v24, %v11616_v30  ;;  %v7185_v59 = vsel %vm5561_vm9, %v7153_v20, %v11601_v21  ;;  %v11641_v41 = vunpack.i.h.bf16 %v18431_v32 }
 0x8ec   : > { %v18502_v4 = vpop.permute.xlu0 %11658  ;;  %v7125_v6 = vsel %vm2388_vm6, %v21380_v27, %v11620_v3  ;;  %v7154_v19 = vsel %vm5529_vm8, %v7124_v56, %v11626_v0  ;;  %v7216_v33 = vsel %vm1336_vm1, %v7184_v14, %v11640_v42  ;;  %v11591_v43 = vunpack.i.h.bf16 %v18411_v61  ;;  %v21382_v27 = vld [vmem:[#allocation39_spill] sm:$0xff] }
 0x8ed   : > { %v7155_v52 = vsel %vm5529_vm8, %v7125_v6, %v11650_v49  ;;  %v7217_v13 = vsel %vm1336_vm1, %v7185_v59, %v11641_v41  ;;  %v7248_v57 = vsel %vm5626_vm10, %v7216_v33, %v11645_v45  ;;  %v11596_v30 = vunpack.i.h.bf16 %v18427_v5  ;;  %v21381_v41 = vld [vmem:[#allocation102_spill] sm:$0xff] }
 0x8ee   : > { %v18517_v9 = vpop.permute.xlu1 %11688  ;;  %v7249_v32 = vsel %vm5626_vm10, %v7217_v13, %v11646_v55  ;;  %v11605_v47 = vunpack.i.l.bf16 %v18381_v34  ;;  %v11655_v20 = vunpack.i.l.bf16 %v18464_v2  ;;  %v11621_v3 = vunpack.i.h.bf16 %v18395_v7 }
 0x8ef   : > { %v7187_v21 = vsel %vm5561_vm9, %v7155_v52, %v11591_v43  ;;  %v7280_v14 = vsel %vm5659_vm11, %v7248_v57, %v11596_v30  ;;  %v11606_v5 = vunpack.i.h.bf16 %v18381_v34  ;;  %v11636_v49 = vunpack.i.h.bf16 %v18425_v25 }
 0x8f0   : > { %v18514_v11 = vpop.permute.xlu0 %11668  ;;  %v11651_v24 = vunpack.i.h.bf16 %v18445_v53  ;;  %v7281_v56 = vsel %vm5659_vm11, %v7249_v32, %v11655_v20  ;;  %v11611_v45 = vunpack.i.h.bf16 %v18447_v8  ;;  %v11610_v0 = vunpack.i.l.bf16 %v18447_v8 }
 0x8f1   : > { %v7219_v59 = vsel %vm1336_vm1, %v7187_v21, %v11606_v5  ;;  %v11670_v34 = vunpack.i.l.bf16 %v18514_v11  ;;  %v7312_v53 = vsel %vm5692_vm12, %v7280_v14, %v11636_v49  ;;  %v7126_v6 = vsel %vm2388_vm6, %v21382_v27, %v11621_v3 }
 0x8f2   : > { %7584 = vmatmul.mubr.bf16.gmra.mxu1 %v7342_v51  ;;  %v18542_v40 = vpop.permute.xlu1 %11703  ;;  %v11590_v51 = vunpack.i.l.bf16 %v18411_v61  ;;  %v11665_v8 = vunpack.i.l.bf16 %v18483_v39  ;;  %v7251_v30 = vsel %vm5626_vm10, %v7219_v59, %v11611_v45  ;;  %v11656_v32 = vunpack.i.h.bf16 %v18464_v2 }
 0x8f3   : > { %9722 = vmatprep.mubr.msk.bf16.mxu1 %vm2388_vm6, %v21378_v1  ;;  %v11690_v2 = vunpack.i.l.bf16 %v18517_v9 }
 0x8f4   : > { %v18526_v38 = vpop.permute.xlu0 %11678  ;;  %v7186_v50 = vsel %vm5561_vm9, %v7154_v19, %v11590_v51  ;;  %v11705_v19 = vunpack.i.l.bf16 %v18542_v40  ;;  %v7156_v51 = vsel %vm5529_vm8, %v7126_v6, %v11651_v24 }
 0x8f5   : > { %v7218_v42 = vsel %vm1336_vm1, %v7186_v50, %v11605_v47  ;;  %v7188_v3 = vsel %vm5561_vm9, %v7156_v51, %v11670_v34 }
 0x8f6   : > { %v11709_v1 = vpop.permute.xlu1 %11708  ;;  %v7250_v57 = vsel %vm5626_vm10, %v7218_v42, %v11610_v0 }
 0x8f7   : > { %v11710_v47 = vunpack.i.l.bf16 %v11709_v1  ;;  %v7282_v5 = vsel %vm5659_vm11, %v7250_v57, %v11656_v32  ;;  %v11675_v57 = vunpack.i.l.bf16 %v18499_v35 }
 0x8f8   : > { %v11684_v36 = vpop.permute.xlu0 %11683 }
 0x8f9   : > { %v11685_v60 = vunpack.i.l.bf16 %v11684_v36  ;;  %v11686_v13 = vunpack.i.h.bf16 %v11684_v36  ;;  %v21383_v36 = vpack.c.bf16 %v17717_v48, %v17711_v37  ;;  %v11711_v37 = vunpack.i.h.bf16 %v11709_v1 }
 0x8fa   : > { %v18585_v52 = vpop.permute.xlu1 %11718  ;;  %v7220_v48 = vsel %vm1336_vm1, %v7188_v3, %v11710_v47  ;;  %v11660_v1 = vunpack.i.l.bf16 %v18502_v4 }
 0x8fb   : > { %v7127_v25 = vsel %vm2388_vm6, %v21381_v41, %v11685_v60  ;;  %v11671_v60 = vunpack.i.h.bf16 %v18514_v11  ;;  %v7128_v49 = vsel %vm2388_vm6, %v17593_v63, %v11686_v13  ;;  %v11720_v45 = vunpack.i.l.bf16 %v18585_v52 }
 0x8fc   : > { %v11694_v58 = vpop.permute.xlu0 %11693  ;;  %v7157_v20 = vsel %vm5529_vm8, %v7127_v25, %v11705_v19  ;;  %v11666_v63 = vunpack.i.h.bf16 %v18483_v39  ;;  %v11661_v39 = vunpack.i.h.bf16 %v18502_v4 }
 0x8fd   : > { %v11695_v61 = vunpack.i.l.bf16 %v11694_v58  ;;  %v11696_v21 = vunpack.i.h.bf16 %v11694_v58  ;;  %v7189_v58 = vsel %vm5561_vm9, %v7157_v20, %v11671_v60  ;;  %v11680_v60 = vunpack.i.l.bf16 %v18526_v38 }
 0x8fe   : > { %v11724_v42 = vpop.permute.xlu1 %11723  ;;  %v7221_v41 = vsel %vm1336_vm1, %v7189_v58, %v11711_v37 }
 0x8ff   : > { %v7313_v7 = vsel %vm5692_vm12, %v7281_v56, %v11695_v61  ;;  %v7283_v61 = vsel %vm5659_vm11, %v7251_v30, %v11665_v8  ;;  %v11706_v56 = vunpack.i.h.bf16 %v18542_v40  ;;  %v7129_v40 = vsel %vm2388_vm6, %v21321_v54, %v11690_v2 }
 0x900   : > { %v18573_v55 = vpop.permute.xlu0 %11698  ;;  %v7344_v33 = vpack.c.bf16 %v7313_v7, %v7312_v53  ;;  %v7314_v7 = vsel %vm5692_vm12, %v7282_v5, %v11696_v21  ;;  %v7159_v27 = vsel %vm5529_vm8, %v7129_v40, %v11720_v45  ;;  %v11725_v6 = vunpack.i.l.bf16 %v11724_v42 }
 0x901   : > { %v11700_v43 = vunpack.i.l.bf16 %v18573_v55  ;;  %v7158_v34 = vsel %vm5529_vm8, %v7128_v49, %v11706_v56  ;;  %v11701_v51 = vunpack.i.h.bf16 %v18573_v55  ;;  %v21384_v54 = vpack.c.bf16 %v17730_v17, %v17727_v46 }
 0x902   : > { %7592 = vmatmul.mubr.bf16.gmra.mxu1 %v7344_v33  ;;  %v7190_v33 = vsel %vm5561_vm9, %v7158_v34, %v11660_v1  ;;  %v7191_v30 = vsel %vm5561_vm9, %v7159_v27, %v11661_v39  ;;  %v18631_v32 = vpop.permute.xlu1 %11728  ;;  %v11676_v55 = vunpack.i.h.bf16 %v18499_v35  ;;  %v7351_v35 = vpack.c.bf16 %v18237_v44, %v18165_v23  ;;  %v18671_v34 = vld [vmem:[%s20310_s11] ss:$0 sm:$0xff] }
 0x903   : > { %9723 = vmatprep.mubr.msk.bf16.mxu1 %vm2388_vm6, %v21383_v36  ;;  %v7315_v11 = vsel %vm5692_vm12, %v7283_v61, %v11700_v43  ;;  %v7222_v17 = vsel %vm1336_vm1, %v7190_v33, %v11675_v57  ;;  %v11730_v21 = vunpack.i.l.bf16 %v18631_v32  ;;  %v11726_v49 = vunpack.i.h.bf16 %v11724_v42  ;;  %v21387_v42 = vld [vmem:[#allocation110_spill] sm:$0xff]  ;;  %v21392_v57 = vld [vmem:[#allocation61_spill] sm:$0xff] }
 0x904   : > { %v11714_v50 = vpop.permute.xlu0 %11713  ;;  %v7346_v25 = vpack.c.bf16 %v7315_v11, %v7314_v7  ;;  %v7223_v36 = vsel %vm1336_vm1, %v7191_v30, %v11676_v55  ;;  %v7254_v61 = vsel %vm5626_vm10, %v7222_v17, %v11680_v60  ;;  %v21388_v7 = vld [vmem:[#allocation93_spill] sm:$0xff] }
 0x905   : > { %v11715_v14 = vunpack.i.l.bf16 %v11714_v50  ;;  %v11716_v24 = vunpack.i.h.bf16 %v11714_v50 }
 0x907   : > { %v7252_v59 = vsel %vm5626_vm10, %v7220_v48, %v11715_v14  ;;  %v7253_v53 = vsel %vm5626_vm10, %v7221_v41, %v11716_v24  ;;  %v11681_v14 = vunpack.i.h.bf16 %v18526_v38  ;;  %v7286_v38 = vsel %vm5659_vm11, %v7254_v61, %v11726_v49  ;;  %v21390_v41 = vld [vmem:[#allocation35_spill] sm:$0xff] }
 0x908   : > { %v18608_v0 = vpop.permute.xlu0 %11733  ;;  %v7284_v8 = vsel %vm5659_vm11, %v7252_v59, %v11666_v63  ;;  %v7285_v43 = vsel %vm5659_vm11, %v7253_v53, %v11725_v6  ;;  %v21389_v59 = vpack.c.bf16 %v21387_v42, %v21388_v7  ;;  %v18666_v63 = vld [vmem:[%s20308_s9] ss:$0 sm:$0xff]  ;;  %v21391_v6 = vld [vmem:[#allocation71_spill] sm:$0xff] }
 0x909   : > { %v7316_v47 = vsel %vm5692_vm12, %v7284_v8, %v11701_v51  ;;  %v7255_v24 = vsel %vm5626_vm10, %v7223_v36, %v11681_v14  ;;  %v5920_v8 = vadd.f32 %v18666_v63, %v21391_v6 }
 0x90a   : > { %7600 = vmatmul.mubr.bf16.gmra.mxu1 %v7346_v25  ;;  %v7287_v37 = vsel %vm5659_vm11, %v7255_v24, %v11730_v21  ;;  %v5917_v25 = vadd.f32 %v18666_v63, %v21390_v41  ;;  %v21394_v41 = vld [vmem:[#allocation87_spill] sm:$0xff] }
 0x90b   : > { %9724 = vmatprep.mubr.msk.bf16.mxu1 %vm2388_vm6, %v21384_v54 }
 0x90c   : > { %v11739_v19 = vpop.permute.xlu0 %11738  ;;  %v6043_v27 = vmax.f32 %v5917_v25, 0.0 }
 0x90d   : > { %v11740_v13 = vunpack.i.l.bf16 %v11739_v19  ;;  %v11741_v2 = vunpack.i.h.bf16 %v11739_v19 }
 0x90e   : > { %v18635_v20 = vpop.f32.mrf.mxu0 }
 0x90f   : > { %v7317_v4 = vsel %vm5692_vm12, %v7285_v43, %v11740_v13  ;;  %21385 = vst [vmem:[#allocation75_spill] sm:$0xff] %v18635_v20  ;;  %v7318_v48 = vsel %vm5692_vm12, %v7286_v38, %v11741_v2  ;;  %v6044_v13 = vmax.f32 %v5920_v8, 0.0  ;;  %v5925_v43 = vadd.f32 %v18666_v63, %v21392_v57  ;;  %v21426_v20 = vld [vmem:[#allocation69_spill] sm:$0xff] }
 0x910   : > { %v18639_v46 = vpop.permute.xlu0 %11743  ;;  %v7348_v50 = vpack.c.bf16 %v7317_v4, %v7316_v47  ;;  %v6038_v3 = vpop.f32.mrf.mxu0 }
 0x911   : > { %v6045_v60 = vmax.f32 %v5925_v43, 0.0  ;;  %v21393_v3 = vld [vmem:[#allocation27_spill] sm:$0xff] }
 0x912   : > { %v18648_v5 = vpop.f32.mrf.mxu0  ;;  %7608 = vmatmul.mubr.bf16.gmra.mxu1 %v7348_v50  ;;  %v5928_v21 = vadd.f32 %v18666_v63, %v21393_v3 }
 0x913   : > { %21386 = vst [vmem:[#allocation73_spill] sm:$0xff] %v18648_v5  ;;  %9725 = vmatprep.mubr.msk.bf16.mxu1 %vm2388_vm6, %v7351_v35  ;;  %v19044_v5 = vpop.permute.xlu1 %6514 }
 0x914   : > { %v18650_v11 = vpop.permute.xlu0 %11748  ;;  %v6041_v56 = vpop.f32.mrf.mxu0  ;;  %v6046_v38 = vmax.f32 %v5928_v21, 0.0 }
 0x915   : > { %v11750_v58 = vunpack.i.l.bf16 %v18650_v11 }
 0x917   : > { %v7319_v23 = vsel %vm5692_vm12, %v7287_v37, %v11750_v58 }
 0x918   : > { %v7350_v45 = vpack.c.bf16 %v7319_v23, %v7318_v48 }
 0x91a   : > { %7616 = vmatmul.mubr.bf16.gmra.mxu1 %v7350_v45 }
 0x91b   : > { %9726 = vmatprep.mubr.msk.bf16.mxu1 %vm2388_vm6, %v21389_v59 }
 0x93a   : > { %v7513_v40 = vpop.f32.mrf.mxu1 }
 0x93b   : > { %v7514_v1 = vadd.f32 %v18671_v34, %v7513_v40 }
 0x93c   : > { %v7515_v53 = vpop.f32.mrf.mxu1 }
 0x93d   : > { %v7640_v19 = vmax.f32 %v7514_v1, 0.0 }
 0x93e   : > { %v7516_v39 = vpop.f32.mrf.mxu1 }
 0x93f   : > { %v7672_v33 = vadd.f32 %v7640_v19, %v6043_v27  ;;  %v7517_v51 = vadd.f32 %v18671_v34, %v7516_v39 }
 0x940   : > { %v7518_v54 = vpop.f32.mrf.mxu1 }
 0x941   : > { %v7641_v30 = vmax.f32 %v7517_v51, 0.0  ;;  %v7736_v47 = vrot.slane %v7672_v33, 7  ;;  %v12378_v54 = vld [vmem:[%s20311_s12 + $0x38] sm:$0xff]  }
 0x942   : > { %v7521_v4 = vpop.f32.mrf.mxu1  ;;  %9109 = vmatpush1.bf16.msra.mxu0 %v12378_v54  ;;  %v21400_v54 = vpack.i.bf16 %v21387_v42, %v21388_v7 }
 0x943   : > { %v7673_v55 = vadd.f32 %v7641_v30, %v6044_v13  ;;  %v7522_v17 = vadd.f32 %v18671_v34, %v7521_v4  ;;  %v18685_v2 = vsel %vm652_vm0, 0.0, %v7736_v47  ;;  %v21395_v4 = vld [vmem:[#allocation114_spill] sm:$0xff] }
 0x944   : > { %v7523_v50 = vpop.f32.mrf.mxu1  ;;  %v7968_v23 = vrot.slane %v18685_v2, 2  ;;  %v21398_v21 = vpack.i.bf16 %v21395_v4, %v17744_v31 }
 0x945   : > { %v7737_v36 = vrot.slane %v7673_v55, 7  ;;  %v7642_v14 = vmax.f32 %v7522_v17, 0.0  ;;  %v21396_v55 = vmov 0   ;;  %v12379_v50 = vld [vmem:[%s20311_s12 + $0x30] sm:$0xff]  }
 0x946   : > { %v7524_v61 = vpop.f32.mrf.mxu1  ;;  %9110 = vmatprep.subr.bf16.mxu0 %v21396_v55 }
 0x947   : > { %v18688_v35 = vsel %vm652_vm0, %v7736_v47, %v7737_v36  ;;  %v7674_v49 = vadd.f32 %v7642_v14, %v6045_v60  ;;  %v7525_v24 = vadd.f32 %v18671_v34, %v7524_v61  ;;  %v7847_v13 = vsel %vm652_vm0, %v7737_v36, 0.0  ;;  %v21397_v60 = vld [vmem:[#allocation50_spill] sm:$0xff]  ;;  %9111 = vmatpush1.bf16.msra.mxu0 %v12379_v50 }
 0x948   : > { %v7969_v58 = vrot.slane %v18688_v35, 2  ;;  %v7526_v56 = vpop.f32.mrf.mxu1  ;;  %v7971_v17 = vrot.slane %v7847_v13, 2  ;;  %v5933_v3 = vadd.f32 %v18666_v63, %v21397_v60  ;;  %v7894_v36 = vrot.slane %v18688_v35, 1  ;;  %9112 = vmatprep.subr.bf16.mxu0 %v21396_v55 }
 0x949   : > { %v7739_v37 = vrot.slane %v7674_v49, 7  ;;  %v7643_v48 = vmax.f32 %v7525_v24, 0.0  ;;  %v7896_v14 = vrot.slane %v7847_v13, 1  ;;  %v11782_v49 = vpack.i.bf16 %v21394_v41, %v17646_v10  ;;  %v12381_v13 = vld [vmem:[%s20311_s12 + $0x20] sm:$0xff]  }
 0x94a   : > { %v7970_v40 = vsel %vm890_vm3, %v7968_v23, %v7969_v58  ;;  %v11797_v56 = vpack.i.bf16 %v18688_v35, %v18685_v2  ;;  %v7972_v31 = vsel %vm890_vm3, %v7969_v58, %v7971_v17  ;;  %v21399_v23 = vld [vmem:[#allocation28_spill] sm:$0xff] }
 0x94b   : > { %v18694_v45 = vsel %vm652_vm0, 0.0, %v7739_v37  ;;  %v7675_v59 = vadd.f32 %v7643_v48, %v6046_v38  ;;  %v11772_v8 = vpack.i.bf16 %v7970_v40, %v18237_v44  ;;  %v7893_v38 = vrot.slane %v18685_v2, 1 }
 0x94c   : > { %v11767_v25 = vpack.i.bf16 %v18694_v45, %v21394_v41  ;;  %v7898_v53 = vrot.slane %v18694_v45, 1  ;;  %v7973_v19 = vrot.slane %v18694_v45, 2  ;;  %v6047_v48 = vmax.f32 %v5933_v3, 0.0  ;;  %v12380_v41 = vld [vmem:[%s20311_s12 + $0x28] sm:$0xff]  }
 0x94d   : > { %v7740_v1 = vrot.slane %v7675_v59, 7  ;;  %v5936_v59 = vadd.f32 %v18666_v63, %v21399_v23  ;;  %9113 = vmatpush1.bf16.msra.mxu0 %v12380_v41 }
 0x94e   : > { %11768 = vrot.lane.b32.xlu1 %v11767_v25, %s12682_s22  ;;  %9114 = vmatprep.subr.bf16.mxu0 %v21396_v55 }
 0x94f   : > { %v18702_v27 = vsel %vm652_vm0, %v7739_v37, %v7740_v1  ;;  %v18705_v6 = vsel %vm652_vm0, %v7740_v1, 0.0  ;;  %v7895_v1 = vsel %vm812_vm2, %v7893_v38, %v7894_v36 }
 0x950   : > { %v7976_v39 = vrot.slane %v18705_v6, 2  ;;  %v7974_v33 = vrot.slane %v18702_v27, 2  ;;  %v7899_v51 = vrot.slane %v18702_v27, 1 }
 0x951   : > { %9115 = vmatpush1.bf16.msra.mxu0 %v12381_v13 }
 0x952   : > { %11773 = vrot.lane.b32.xlu1 %v11772_v8, %s12680_s20  ;;  %v18718_v57 = vsel %vm890_vm3, %v7973_v19, %v7974_v33  ;;  %v18721_v44 = vsel %vm890_vm3, %v7974_v33, %v7976_v39  ;;  %v18724_v43 = vsel %vm812_vm2, %v7898_v53, %v7899_v51  ;;  %v7897_v53 = vsel %vm812_vm2, %v7894_v36, %v7896_v14 }
 0x953   : > { %v8954_v30 = vpack.c.bf16 %v18721_v44, %v18718_v57  ;;  %v11777_v47 = vpack.i.bf16 %v18724_v43, %v21395_v4  ;;  %v7901_v8 = vrot.slane %v18705_v6, 1  ;;  %v11807_v39 = vpack.i.bf16 %v7972_v31, %v7970_v40  ;;  %v21401_v4 = vld [vmem:[#allocation53_spill] sm:$0xff]  ;;  %9116 = vmatprep.subr.bf16.mxu0 %v21396_v55 }
 0x954   : > { %v5941_v6 = vadd.f32 %v18666_v63, %v21401_v4  ;;  %v11802_v50 = vpack.i.bf16 %v7897_v53, %v7895_v1  ;;  %v11822_v7 = vpack.i.bf16 %v18718_v57, %v7972_v31 }
 0x955   : > { %9738 = vmatprep.mubr.msk.bf16.mxu0 %vm2388_vm6, %v8954_v30  ;;  %11778 = vrot.lane.b32.xlu0 %v11777_v47, %s12676_s30  ;;  %v6048_v30 = vmax.f32 %v5936_v59, 0.0  ;;  %v18776_v3 = vsel %vm812_vm2, %v7899_v51, %v7901_v8 }
 0x956   : > { %11788 = vrot.lane.b32.xlu1 %v21398_v21, %s12674_s27  ;;  %v7529_v61 = vpop.f32.mrf.mxu1  ;;  %v21402_v21 = vld [vmem:[#allocation55_spill] sm:$0xff] }
 0x957   : > { %v7530_v24 = vadd.f32 %v18671_v34, %v7529_v61  ;;  %v5944_v36 = vadd.f32 %v18666_v63, %v21402_v21  ;;  %v12382_v61 = vld [vmem:[%s20311_s12 + $0x18] sm:$0xff]  }
 0x958   : > { %v7531_v37 = vpop.f32.mrf.mxu1  ;;  %9117 = vmatpush1.bf16.msra.mxu0 %v12382_v61 }
 0x959   : > { %11783 = vrot.lane.b32.xlu0 %v11782_v49, %s12678_s1  ;;  %v7644_v10 = vmax.f32 %v7530_v24, 0.0  ;;  %v6049_v49 = vmax.f32 %v5941_v6, 0.0  ;;  %v11827_v37 = vpack.i.bf16 %v18776_v3, %v18724_v43  ;;  %9118 = vmatprep.subr.bf16.mxu0 %v21396_v55  ;;  %v12383_v43 = vld [vmem:[%s20311_s12 + $0x10] sm:$0xff]  }
 0x95a   : > { %11798 = vrot.lane.b32.xlu1 %v11797_v56, %s12678_s1  ;;  %v7532_v25 = vpop.f32.mrf.mxu1 }
 0x95b   : > { %v7676_v19 = vadd.f32 %v7644_v10, %v6047_v48  ;;  %v7533_v58 = vadd.f32 %v18671_v34, %v7532_v25  ;;  %v6050_v10 = vmax.f32 %v5944_v36, 0.0 }
 0x95c   : > { %v7534_v33 = vpop.f32.mrf.mxu1  ;;  %9119 = vmatpush1.bf16.msra.mxu0 %v12383_v43 }
 0x95d   : > { %11793 = vrot.lane.b32.xlu0 %v21400_v54, %s12681_s25  ;;  %v7645_v47 = vmax.f32 %v7533_v58, 0.0  ;;  %v7742_v40 = vrot.slane %v7676_v19, 7  ;;  %v11817_v58 = vpack.i.bf16 %v18702_v27, %v18694_v45  ;;  %9120 = vmatprep.subr.bf16.mxu0 %v21396_v55 }
 0x95e   : > { %11808 = vrot.lane.b32.xlu1 %v11807_v39, %s12681_s25  ;;  %v7537_v17 = vpop.f32.mrf.mxu1 }
 0x95f   : > { %v7677_v60 = vadd.f32 %v7645_v47, %v6048_v30  ;;  %v7538_v42 = vadd.f32 %v18671_v34, %v7537_v17  ;;  %v18787_v51 = vsel %vm652_vm0, 0.0, %v7742_v40  ;;  %v11832_v47 = vpack.i.bf16 %v18721_v44, %v18718_v57 }
 0x960   : > { %v7539_v14 = vpop.f32.mrf.mxu1  ;;  %v7978_v1 = vrot.slane %v18787_v51, 2  ;;  %v7903_v6 = vrot.slane %v18787_v51, 1  ;;  %v11842_v61 = vpack.i.bf16 %v18787_v51, %v18702_v27 }
 0x961   : > { %11803 = vrot.lane.b32.xlu0 %v11802_v50, %s12674_s27  ;;  %v7743_v24 = vrot.slane %v7677_v60, 7  ;;  %v7646_v56 = vmax.f32 %v7538_v42, 0.0  ;;  %v12385_v14 = vld [vmem:[%s20311_s12] sm:$0xff]  }
 0x962   : > { %11823 = vrot.lane.b32.xlu1 %v11822_v7, %s12680_s20  ;;  %v7540_v38 = vpop.f32.mrf.mxu1 }
 0x963   : > { %v18792_v31 = vsel %vm652_vm0, %v7742_v40, %v7743_v24  ;;  %v7849_v48 = vsel %vm652_vm0, %v7743_v24, 0.0  ;;  %v7678_v23 = vadd.f32 %v7646_v56, %v6049_v49  ;;  %v7541_v59 = vadd.f32 %v18671_v34, %v7540_v38  ;;  %v12384_v40 = vld [vmem:[%s20311_s12 + $0x8] sm:$0xff]  }
 0x964   : > { %v7981_v41 = vrot.slane %v7849_v48, 2  ;;  %v7542_v25 = vpop.f32.mrf.mxu1  ;;  %v7979_v19 = vrot.slane %v18792_v31, 2  ;;  %v7904_v54 = vrot.slane %v18792_v31, 1  ;;  %v11847_v42 = vpack.i.bf16 %v18792_v31, %v18787_v51  ;;  %9121 = vmatpush1.bf16.msra.mxu0 %v12384_v40 }
 0x965   : > { %11813 = vrot.lane.b32.xlu0 %v11802_v50, %s12679_s19  ;;  %v7745_v53 = vrot.slane %v7678_v23, 7  ;;  %v7647_v8 = vmax.f32 %v7541_v59, 0.0  ;;  %9122 = vmatprep.subr.bf16.mxu0 %v21396_v55  ;;  %v7906_v56 = vrot.slane %v7849_v48, 1  ;;  %v21403_v23 = vld [vmem:[#allocation31_spill] sm:$0xff] }
 0x966   : > { %11828 = vrot.lane.b32.xlu1 %v11827_v37, %s12674_s27  ;;  %v18807_v33 = vsel %vm890_vm3, %v7978_v1, %v7979_v19  ;;  %v18812_v13 = vsel %vm890_vm3, %v7979_v19, %v7981_v41  ;;  %v7905_v57 = vsel %vm812_vm2, %v7903_v6, %v7904_v54  ;;  %v5949_v59 = vadd.f32 %v18666_v63, %v21403_v23 }
 0x967   : > { %v7679_v39 = vadd.f32 %v7647_v8, %v6050_v10  ;;  %v18816_v30 = vsel %vm652_vm0, 0.0, %v7745_v53  ;;  %v11852_v38 = vpack.i.bf16 %v7905_v57, %v18776_v3  ;;  %v11857_v3 = vpack.i.bf16 %v18807_v33, %v18721_v44 }
 0x968   : > { %v7983_v7 = vrot.slane %v18816_v30, 2  ;;  %9123 = vmatpush1.bf16.msra.mxu0 %v12385_v14  ;;  %v11867_v25 = vpack.i.bf16 %v18812_v13, %v18807_v33  ;;  %v7907_v43 = vsel %vm812_vm2, %v7904_v54, %v7906_v56 }
 0x969   : > { %11818 = vrot.lane.b32.xlu0 %v11817_v58, %s12678_s1  ;;  %v7746_v4 = vrot.slane %v7679_v39, 7  ;;  %9138 = vmatprep.subr.bf16.mxu0 %v21396_v55  ;;  %v21404_v55 = vld [vmem:[#allocation18_spill] sm:$0xff]  ;;  %v11862_v44 = vpack.i.bf16 %v7907_v43, %v7905_v57  ;;  %v11877_v39 = vpack.i.bf16 %v18816_v30, %v18792_v31 }
 0x96a   : > { %11838 = vrot.lane.b32.xlu1 %v11827_v37, %s12679_s19  ;;  %v12386_v37 = vld [vmem:[%s20311_s12 + $0x40] sm:$0xff]   ;;  %v5952_v8 = vadd.f32 %v18666_v63, %v21404_v55 }
 0x96b   : > { %v18828_v50 = vsel %vm652_vm0, %v7745_v53, %v7746_v4  ;;  %v7850_v60 = vsel %vm652_vm0, %v7746_v4, 0.0  ;;  %v6051_v53 = vmax.f32 %v5949_v59, 0.0  ;;  %v21406_v59 = vld [vmem:[#allocation90_spill] sm:$0xff] }
 0x96c   : > { %v7986_v21 = vrot.slane %v7850_v60, 2  ;;  %v7984_v36 = vrot.slane %v18828_v50, 2  ;;  %9139 = vmatpush2.bf16.msra.mxu0 %v12386_v37  ;;  %v7911_v4 = vrot.slane %v7850_v60, 1 }
 0x96d   : > { %11833 = vrot.lane.b32.xlu0 %v11832_v47, %s12681_s25  ;;  %v7909_v47 = vrot.slane %v18828_v50, 1 }
 0x96e   : > { %11848 = vrot.lane.b32.xlu1 %v11847_v42, %s12678_s1  ;;  %v18845_v49 = vsel %vm890_vm3, %v7983_v7, %v7984_v36  ;;  %v18848_v24 = vsel %vm890_vm3, %v7984_v36, %v7986_v21  ;;  %v6052_v42 = vmax.f32 %v5952_v8, 0.0  ;;  %v21405_v7 = vld [vmem:[#allocation83_spill] sm:$0xff]  ;;  %v7908_v36 = vrot.slane %v18816_v30, 1 }
 0x96f   : > { %v5957_v21 = vadd.f32 %v18666_v63, %v21405_v7  ;;  %v11892_v60 = vpack.i.bf16 %v18845_v49, %v18812_v13  ;;  %v7912_v23 = vsel %vm812_vm2, %v7909_v47, %v7911_v4  ;;  %v11882_v8 = vpack.i.bf16 %v18828_v50, %v18816_v30 }
 0x970   : > { %v7910_v37 = vsel %vm812_vm2, %v7908_v36, %v7909_v47 }
 0x971   : > { %11843 = vrot.lane.b32.xlu0 %v11842_v61, %s12682_s22  ;;  %v11887_v36 = vpack.i.bf16 %v7910_v37, %v7907_v43  ;;  %v11902_v43 = vpack.i.bf16 %v18848_v24, %v18845_v49 }
 0x972   : > { %11853 = vrot.lane.b32.xlu1 %v11852_v38, %s12676_s30  ;;  %v7545_v48 = vpop.f32.mrf.mxu1 }
 0x973   : > { %v7546_v41 = vadd.f32 %v18671_v34, %v7545_v48  ;;  %v5960_v48 = vadd.f32 %v18666_v63, %v21406_v59 }
 0x974   : > { %v7547_v1 = vpop.f32.mrf.mxu1 }
 0x975   : > { %11858 = vrot.lane.b32.xlu0 %v11857_v3, %s12680_s20  ;;  %v7648_v19 = vmax.f32 %v7546_v41, 0.0  ;;  %v6053_v41 = vmax.f32 %v5957_v21, 0.0 }
 0x976   : > { %11868 = vrot.lane.b32.xlu1 %v11867_v25, %s12681_s25  ;;  %v7548_v58 = vpop.f32.mrf.mxu1 }
 0x977   : > { %v7680_v6 = vadd.f32 %v7648_v19, %v6051_v53  ;;  %v7549_v54 = vadd.f32 %v18671_v34, %v7548_v58  ;;  %v11897_v19 = vpack.i.bf16 %v7912_v23, %v7910_v37 }
 0x978   : > { %v7550_v40 = vpop.f32.mrf.mxu1 }
 0x979   : > { %11863 = vrot.lane.b32.xlu0 %v11862_v44, %s12674_s27  ;;  %v7649_v14 = vmax.f32 %v7549_v54, 0.0  ;;  %v7748_v57 = vrot.slane %v7680_v6, 7  ;;  %v6054_v6 = vmax.f32 %v5960_v48, 0.0 }
 0x97a   : > { %11878 = vrot.lane.b32.xlu1 %v11877_v39, %s12682_s22  ;;  %v7553_v61 = vpop.f32.mrf.mxu1 }
 0x97b   : > { %v7681_v56 = vadd.f32 %v7649_v14, %v6052_v42  ;;  %v7554_v38 = vadd.f32 %v18671_v34, %v7553_v61  ;;  %v18890_v53 = vsel %vm652_vm0, 0.0, %v7748_v57 }
 0x97c   : > { %v7555_v3 = vpop.f32.mrf.mxu1  ;;  %21407 = vst [vmem:[#allocation76_spill] sm:$0xff] %v18890_v53  ;;  %v7988_v40 = vrot.slane %v18890_v53, 2  ;;  %v7913_v59 = vrot.slane %v18890_v53, 1 }
 0x97d   : > { %11873 = vrot.lane.b32.xlu0 %v11862_v44, %s12679_s19  ;;  %v7749_v25 = vrot.slane %v7681_v56, 7  ;;  %v7650_v1 = vmax.f32 %v7554_v38, 0.0 }
 0x97e   : > { %11893 = vrot.lane.b32.xlu1 %v11892_v60, %s12680_s20  ;;  %v7556_v55 = vpop.f32.mrf.mxu1 }
 0x97f   : > { %v18895_v58 = vsel %vm652_vm0, %v7748_v57, %v7749_v25  ;;  %v7851_v39 = vsel %vm652_vm0, %v7749_v25, 0.0  ;;  %v7682_v4 = vadd.f32 %v7650_v1, %v6053_v41  ;;  %v7557_v44 = vadd.f32 %v18671_v34, %v7556_v55 }
 0x980   : > { %21408 = vst [vmem:[#allocation74_spill] sm:$0xff] %v18895_v58  ;;  %v7991_v54 = vrot.slane %v7851_v39, 2  ;;  %v7558_v47 = vpop.f32.mrf.mxu1  ;;  %v7989_v21 = vrot.slane %v18895_v58, 2  ;;  %v7914_v61 = vrot.slane %v18895_v58, 1  ;;  %v11917_v41 = vpack.i.bf16 %v18895_v58, %v18890_v53 }
 0x981   : > { %11883 = vrot.lane.b32.xlu0 %v11882_v8, %s12678_s1  ;;  %v7751_v42 = vrot.slane %v7682_v4, 7  ;;  %v7651_v7 = vmax.f32 %v7557_v44, 0.0 }
 0x982   : > { %11898 = vrot.lane.b32.xlu1 %v11897_v19, %s12674_s27  ;;  %v18904_v57 = vsel %vm890_vm3, %v7988_v40, %v7989_v21  ;;  %v18909_v60 = vsel %vm890_vm3, %v7989_v21, %v7991_v54  ;;  %v7915_v55 = vsel %vm812_vm2, %v7913_v59, %v7914_v61  ;;  %v21413_v40 = vld [vmem:[#allocation112_spill] sm:$0xff]  ;;  %v21414_v59 = vld [vmem:[#allocation42_spill] sm:$0xff] }
 0x983   : > { %v7683_v14 = vadd.f32 %v7651_v7, %v6054_v6  ;;  %v18912_v56 = vsel %vm652_vm0, 0.0, %v7751_v42  ;;  %v7916_v6 = vrot.slane %v7851_v39, 1  ;;  %v11922_v54 = vpack.i.bf16 %v7915_v55, %v7912_v23 }
 0x984   : > { %21409 = vst [vmem:[#allocation79_spill] sm:$0xff] %v18912_v56  ;;  %v7993_v25 = vrot.slane %v18912_v56, 2  ;;  %v11927_v21 = vpack.i.bf16 %v18904_v57, %v18848_v24  ;;  %v11937_v39 = vpack.i.bf16 %v18909_v60, %v18904_v57 }
 0x985   : > { %11888 = vrot.lane.b32.xlu0 %v11887_v36, %s12676_s30  ;;  %v7752_v38 = vrot.slane %v7683_v14, 7  ;;  %v7917_v23 = vsel %vm812_vm2, %v7914_v61, %v7916_v6 }
 0x986   : > { %11908 = vrot.lane.b32.xlu1 %v11897_v19, %s12679_s19  ;;  %v11912_v19 = vpack.i.bf16 %v18890_v53, %v18828_v50 }
 0x987   : > { %v18921_v48 = vsel %vm652_vm0, %v7751_v42, %v7752_v38  ;;  %v7852_v3 = vsel %vm652_vm0, %v7752_v38, 0.0  ;;  %v5965_v42 = vadd.f32 %v18666_v63, %v21413_v40 }
 0x988   : > { %21410 = vst [vmem:[#allocation77_spill] sm:$0xff] %v18921_v48  ;;  %v7996_v1 = vrot.slane %v7852_v3, 2  ;;  %v7994_v8 = vrot.slane %v18921_v48, 2  ;;  %v7919_v61 = vrot.slane %v18921_v48, 1 }
 0x989   : > { %11903 = vrot.lane.b32.xlu0 %v11902_v43, %s12681_s25  ;;  %v6055_v38 = vmax.f32 %v5965_v42, 0.0  ;;  %v5968_v43 = vadd.f32 %v18666_v63, %v21414_v59 }
 0x98a   : > { %11918 = vrot.lane.b32.xlu1 %v11917_v41, %s12678_s1  ;;  %v18934_v4 = vsel %vm890_vm3, %v7993_v25, %v7994_v8  ;;  %v18937_v44 = vsel %vm890_vm3, %v7994_v8, %v7996_v1  ;;  %v11932_v1 = vpack.i.bf16 %v7917_v23, %v7915_v55  ;;  %v11947_v8 = vpack.i.bf16 %v18912_v56, %v18895_v58 }
 0x98b   : > { %21411 = vst [vmem:[#allocation80_spill] sm:$0xff] %v18934_v4  ;;  %21412 = vst [vmem:[#allocation78_spill] sm:$0xff] %v18937_v44  ;;  %v6056_v42 = vmax.f32 %v5968_v43, 0.0 }
 0x98d   : > { %11913 = vrot.lane.b32.xlu0 %v11912_v19, %s12682_s22  ;;  %v7921_v19 = vrot.slane %v7852_v3, 1  ;;  %v11962_v3 = vpack.i.bf16 %v18934_v4, %v18909_v60 }
 0x98e   : > { %11923 = vrot.lane.b32.xlu1 %v11922_v54, %s12676_s30  ;;  %v7561_v7 = vpop.f32.mrf.mxu1 }
 0x98f   : > { %v7562_v36 = vadd.f32 %v18671_v34, %v7561_v7  ;;  %v21415_v7 = vld [vmem:[#allocation40_spill] sm:$0xff]  ;;  %v7922_v43 = vsel %vm812_vm2, %v7919_v61, %v7921_v19 }
 0x990   : > { %v7563_v14 = vpop.f32.mrf.mxu1 }
 0x991   : > { %11928 = vrot.lane.b32.xlu0 %v11927_v21, %s12680_s20  ;;  %v7652_v41 = vmax.f32 %v7562_v36, 0.0  ;;  %v5973_v21 = vadd.f32 %v18666_v63, %v21415_v7  ;;  %v7918_v36 = vrot.slane %v18912_v56, 1 }
 0x992   : > { %11938 = vrot.lane.b32.xlu1 %v11937_v39, %s12681_s25  ;;  %v7564_v25 = vpop.f32.mrf.mxu1 }
 0x993   : > { %v7684_v54 = vadd.f32 %v7652_v41, %v6055_v38  ;;  %v7565_v40 = vadd.f32 %v18671_v34, %v7564_v25  ;;  %v7920_v41 = vsel %vm812_vm2, %v7918_v36, %v7919_v61  ;;  %v21416_v25 = vld [vmem:[#allocation63_spill] sm:$0xff]  ;;  %v11952_v36 = vpack.i.bf16 %v18921_v48, %v18912_v56 }
 0x994   : > { %v7566_v6 = vpop.f32.mrf.mxu1 }
 0x995   : > { %11933 = vrot.lane.b32.xlu0 %v11932_v1, %s12674_s27  ;;  %v7653_v39 = vmax.f32 %v7565_v40, 0.0  ;;  %v7754_v55 = vrot.slane %v7684_v54, 7  ;;  %v5976_v6 = vadd.f32 %v18666_v63, %v21416_v25  ;;  %v6057_v40 = vmax.f32 %v5973_v21, 0.0 }
 0x996   : > { %11948 = vrot.lane.b32.xlu1 %v11947_v8, %s12682_s22  ;;  %v7569_v14 = vpop.f32.mrf.mxu1 }
 0x997   : > { %v7685_v38 = vadd.f32 %v7653_v39, %v6056_v42  ;;  %v7570_v59 = vadd.f32 %v18671_v34, %v7569_v14  ;;  %v18974_v47 = vsel %vm652_vm0, 0.0, %v7754_v55  ;;  %v11967_v39 = vpack.i.bf16 %v7922_v43, %v7920_v41 }
 0x998   : > { %v7571_v7 = vpop.f32.mrf.mxu1  ;;  %21417 = vst [vmem:[#allocation86_spill] sm:$0xff] %v18974_v47  ;;  %v6058_v21 = vmax.f32 %v5976_v6, 0.0 }
 0x999   : > { %11943 = vrot.lane.b32.xlu0 %v11932_v1, %s12679_s19  ;;  %v7755_v8 = vrot.slane %v7685_v38, 7  ;;  %v7654_v54 = vmax.f32 %v7570_v59, 0.0 }
 0x99a   : > { %11963 = vrot.lane.b32.xlu1 %v11962_v3, %s12680_s20  ;;  %v7572_v42 = vpop.f32.mrf.mxu1  ;;  %v7998_v3 = vrot.slane %v18974_v47, 2 }
 0x99b   : > { %v18979_v19 = vsel %vm652_vm0, %v7754_v55, %v7755_v8  ;;  %v7853_v61 = vsel %vm652_vm0, %v7755_v8, 0.0  ;;  %v7686_v14 = vadd.f32 %v7654_v54, %v6057_v40  ;;  %v7573_v1 = vadd.f32 %v18671_v34, %v7572_v42 }
 0x99c   : > { %21418 = vst [vmem:[#allocation81_spill] sm:$0xff] %v18979_v19  ;;  %v8001_v38 = vrot.slane %v7853_v61, 2  ;;  %v7574_v59 = vpop.f32.mrf.mxu1  ;;  %v7999_v37 = vrot.slane %v18979_v19, 2  ;;  %v11957_v55 = vpack.i.bf16 %v7920_v41, %v7917_v23  ;;  %v7924_v6 = vrot.slane %v18979_v19, 1 }
 0x99d   : > { %11953 = vrot.lane.b32.xlu0 %v11952_v36, %s12678_s1  ;;  %v7757_v25 = vrot.slane %v7686_v14, 7  ;;  %v7655_v7 = vmax.f32 %v7573_v1, 0.0  ;;  %v7923_v36 = vrot.slane %v18974_v47, 1  ;;  %v11972_v23 = vpack.i.bf16 %v18937_v44, %v18934_v4 }
 0x99e   : > { %11968 = vrot.lane.b32.xlu1 %v11967_v39, %s12674_s27  ;;  %v18988_v8 = vsel %vm890_vm3, %v7998_v3, %v7999_v37  ;;  %v18993_v40 = vsel %vm890_vm3, %v7999_v37, %v8001_v38  ;;  %v11987_v1 = vpack.i.bf16 %v18979_v19, %v18974_v47  ;;  %v11982_v59 = vpack.i.bf16 %v18974_v47, %v18921_v48 }
 0x99f   : > { %v7687_v10 = vadd.f32 %v7655_v7, %v6058_v21  ;;  %21419 = vst [vmem:[#allocation89_spill] sm:$0xff] %v18988_v8  ;;  %21420 = vst [vmem:[#allocation84_spill] sm:$0xff] %v18993_v40  ;;  %v18996_v54 = vsel %vm652_vm0, 0.0, %v7757_v25  ;;  %v7926_v7 = vrot.slane %v7853_v61, 1  ;;  %v12007_v61 = vpack.i.bf16 %v18993_v40, %v18988_v8 }
 0x9a0   : > { %21421 = vst [vmem:[#allocation96_spill] sm:$0xff] %v18996_v54  ;;  %v7928_v26 = vrot.slane %v18996_v54, 1 }
 0x9a1   : > { %11958 = vrot.lane.b32.xlu0 %v11957_v55, %s12676_s30  ;;  %v7758_v42 = vrot.slane %v7687_v10, 7  ;;  %v8003_v10 = vrot.slane %v18996_v54, 2 }
 0x9a2   : > { %11978 = vrot.lane.b32.xlu1 %v11967_v39, %s12679_s19  ;;  %v7925_v39 = vsel %vm812_vm2, %v7923_v36, %v7924_v6  ;;  %v21423_v36 = vld [vmem:[#allocation111_spill] sm:$0xff] }
 0x9a3   : > { %v19005_v14 = vsel %vm652_vm0, %v7757_v25, %v7758_v42  ;;  %v7854_v37 = vsel %vm652_vm0, %v7758_v42, 0.0  ;;  %v11992_v55 = vpack.i.bf16 %v7925_v39, %v7922_v43  ;;  %v19035_v43 = vsel %vm812_vm2, %v7924_v6, %v7926_v7 }
 0x9a4   : > { %v8006_v21 = vrot.slane %v7854_v37, 2  ;;  %v8004_v38 = vrot.slane %v19005_v14, 2  ;;  %v12002_v17 = vpack.i.bf16 %v19035_v43, %v7925_v39  ;;  %v7931_v6 = vrot.slane %v7854_v37, 1 }
 0x9a5   : > { %11973 = vrot.lane.b32.xlu0 %v11972_v23, %s12681_s25  ;;  %v5981_v23 = vadd.f32 %v18666_v63, %v21423_v36  ;;  %v5992_v39 = vadd.f32 %v18666_v63, %v21426_v20  ;;  %v21427_v20 = vld [vmem:[#allocation56_spill] sm:$0xff] }
 0x9a6   : > { %11988 = vrot.lane.b32.xlu1 %v11987_v1, %s12678_s1  ;;  %v19018_v3 = vsel %vm890_vm3, %v8003_v10, %v8004_v38  ;;  %v19021_v25 = vsel %vm890_vm3, %v8004_v38, %v8006_v21  ;;  %v11997_v10 = vpack.i.bf16 %v18988_v8, %v18937_v44  ;;  %v19064_v48 = vadd.f32 %v18666_v63, %v21427_v20  ;;  %v21431_v44 = vld [vmem:[#allocation104_spill] sm:$0xff] }
 0x9a7   : > { %21422 = vst [vmem:[#allocation91_spill] sm:$0xff] %v19018_v3  ;;  %v6059_v38 = vmax.f32 %v5981_v23, 0.0  ;;  %v7929_v23 = vrot.slane %v19005_v14, 1 }
 0x9a9   : > { %11983 = vrot.lane.b32.xlu0 %v11982_v59, %s12682_s22  ;;  %v21424_v59 = vld [vmem:[#allocation14_spill] sm:$0xff] }
 0x9aa   : > { %11993 = vrot.lane.b32.xlu1 %v11992_v55, %s12676_s30  ;;  %v7577_v1 = vpop.f32.mrf.mxu1  ;;  %v5984_v36 = vadd.f32 %v18666_v63, %v21424_v59 }
 0x9ab   : > { %v7578_v41 = vadd.f32 %v18671_v34, %v7577_v1  ;;  %v12017_v1 = vpack.i.bf16 %v18996_v54, %v18979_v19 }
 0x9ac   : > { %v7579_v21 = vpop.f32.mrf.mxu1 }
 0x9ad   : > { %11998 = vrot.lane.b32.xlu0 %v11997_v10, %s12680_s20  ;;  %v7656_v55 = vmax.f32 %v7578_v41, 0.0  ;;  %v21425_v10 = vld [vmem:[#allocation65_spill] sm:$0xff] }
 0x9ae   : > { %12008 = vrot.lane.b32.xlu1 %v12007_v61, %s12681_s25  ;;  %v7580_v42 = vpop.f32.mrf.mxu1  ;;  %v5989_v59 = vadd.f32 %v18666_v63, %v21425_v10  ;;  %v6060_v61 = vmax.f32 %v5984_v36, 0.0  ;;  %v19060_v36 = vsel %vm812_vm2, %v7929_v23, %v7931_v6 }
 0x9af   : > { %v7688_v7 = vadd.f32 %v7656_v55, %v6059_v38  ;;  %v7581_v21 = vadd.f32 %v18671_v34, %v7580_v42  ;;  %v12032_v42 = vpack.i.bf16 %v19018_v3, %v18993_v40 }
 0x9b0   : > { %v7582_v41 = vpop.f32.mrf.mxu1  ;;  %v6061_v47 = vmax.f32 %v5989_v59, 0.0 }
 0x9b1   : > { %12003 = vrot.lane.b32.xlu0 %v12002_v17, %s12674_s27  ;;  %v7657_v19 = vmax.f32 %v7581_v21, 0.0  ;;  %v7760_v37 = vrot.slane %v7688_v7, 7  ;;  %v7930_v41 = vsel %vm812_vm2, %v7928_v26, %v7929_v23  ;;  %v21428_v21 = vld [vmem:[#allocation72_spill] sm:$0xff]  ;;  %v11721_v23 = vunpack.i.h.bf16 %v18585_v52  ;;  %v11764_v52 = vpop.permute.xlu0 %11763 }
 0x9b2   : > { %12018 = vrot.lane.b32.xlu1 %v12017_v1, %s12682_s22  ;;  %v7585_v38 = vpop.f32.mrf.mxu1  ;;  %v19068_v1 = vadd.f32 %v18666_v63, %v21428_v21  ;;  %v12022_v21 = vpack.i.bf16 %v19005_v14, %v18996_v54 }
 0x9b3   : > { %v7689_v55 = vadd.f32 %v7657_v19, %v6060_v61  ;;  %v7586_v10 = vadd.f32 %v18671_v34, %v7585_v38  ;;  %v6062_v19 = vmax.f32 %v5992_v39, 0.0  ;;  %v11691_v61 = vunpack.i.h.bf16 %v18517_v9  ;;  %v19072_v38 = vpop.permute.xlu1 %11753 }
 0x9b4   : > { %v7587_v7 = vpop.f32.mrf.mxu1  ;;  %v19077_v59 = vsel %vm652_vm0, 0.0, %v7760_v37  ;;  %v11755_v4 = vunpack.i.l.bf16 %v19072_v38 }
 0x9b5   : > { %12013 = vrot.lane.b32.xlu0 %v12002_v17, %s12679_s19  ;;  %v7761_v26 = vrot.slane %v7689_v55, 7  ;;  %v7658_v6 = vmax.f32 %v7586_v10, 0.0  ;;  %21429 = vst [vmem:[#allocation99_spill] sm:$0xff] %v19077_v59  ;;  %v12037_v17 = vpack.i.bf16 %v19060_v36, %v7930_v41  ;;  %v11735_v7 = vunpack.i.l.bf16 %v18608_v0 }
 0x9b6   : > { %12033 = vrot.lane.b32.xlu1 %v12032_v42, %s12680_s20  ;;  %v7588_v20 = vpop.f32.mrf.mxu1  ;;  %v8008_v58 = vrot.slane %v19077_v59, 2 }
 0x9b7   : > { %v19083_v39 = vsel %vm652_vm0, %v7760_v37, %v7761_v26  ;;  %v19086_v9 = vsel %vm652_vm0, %v7761_v26, 0.0  ;;  %v7690_v55 = vadd.f32 %v7658_v6, %v6061_v47  ;;  %v7589_v42 = vadd.f32 %v18671_v34, %v7588_v20  ;;  %v21430_v20 = vld [vmem:[#allocation106_spill] sm:$0xff]  ;;  %v11759_v8 = vpop.permute.xlu1 %11758 }
 0x9b8   : > { %v8011_v56 = vrot.slane %v19086_v9, 2  ;;  %v7590_v54 = vpop.f32.mrf.mxu1  ;;  %v11745_v37 = vunpack.i.l.bf16 %v18639_v46  ;;  %v8009_v47 = vrot.slane %v19083_v39, 2  ;;  %v19100_v6 = vadd.f32 %v18666_v63, %v18136_v15 }
 0x9b9   : > { %12023 = vrot.lane.b32.xlu0 %v12022_v21, %s12678_s1  ;;  %v7659_v26 = vmax.f32 %v7589_v42, 0.0  ;;  %v7130_v10 = vsel %vm2388_vm6, %v21430_v20, %v11691_v61  ;;  %v7763_v54 = vrot.slane %v7690_v55, 7  ;;  %v12027_v21 = vpack.i.bf16 %v7930_v41, %v19035_v43 }
 0x9ba   : > { %12038 = vrot.lane.b32.xlu1 %v12037_v17, %s12674_s27  ;;  %v7160_v53 = vsel %vm5529_vm8, %v7130_v10, %v11721_v23  ;;  %v19107_v42 = vsel %vm890_vm3, %v8008_v58, %v8009_v47  ;;  %v7131_v15 = vsel %vm2388_vm6, %v21431_v44, %v11735_v7  ;;  %v7934_v61 = vrot.slane %v19083_v39, 1 }
 0x9bb   : > { %v7691_v40 = vadd.f32 %v7659_v26, %v6062_v19  ;;  %v19115_v55 = vsel %vm890_vm3, %v8009_v47, %v8011_v56  ;;  %v11746_v43 = vunpack.i.h.bf16 %v18639_v46  ;;  %v7192_v41 = vsel %vm5561_vm9, %v7160_v53, %v11745_v37 }
 0x9bc   : > { %v11765_v19 = vunpack.i.l.bf16 %v11764_v52  ;;  %v7933_v58 = vrot.slane %v19077_v59, 1  ;;  %v19122_v10 = vsel %vm652_vm0, 0.0, %v7763_v54  ;;  %v12042_v44 = vpack.i.bf16 %v19021_v25, %v19018_v3 }
 0x9bd   : > { %12028 = vrot.lane.b32.xlu0 %v12027_v21, %s12676_s30  ;;  %v7764_v23 = vrot.slane %v7691_v40, 7  ;;  %21432 = vst [vmem:[#allocation94_spill] sm:$0xff] %v19122_v10  ;;  %v11760_v7 = vunpack.i.l.bf16 %v11759_v8  ;;  %v11731_v37 = vunpack.i.h.bf16 %v18631_v32  ;;  %v11761_v26 = vunpack.i.h.bf16 %v11759_v8 }
 0x9be   : > { %12048 = vrot.lane.b32.xlu1 %v12037_v17, %s12679_s19  ;;  %v12057_v17 = vpack.i.bf16 %v19083_v39, %v19077_v59  ;;  %v7161_v47 = vsel %vm5529_vm8, %v7131_v15, %v11755_v4  ;;  %v7935_v20 = vsel %vm812_vm2, %v7933_v58, %v7934_v61  ;;  %v8013_v21 = vrot.slane %v19122_v10, 2 }
 0x9bf   : > { %v19129_v46 = vsel %vm652_vm0, %v7763_v54, %v7764_v23  ;;  %v19132_v53 = vsel %vm652_vm0, %v7764_v23, 0.0  ;;  %v7224_v54 = vsel %vm1336_vm1, %v7192_v41, %v11760_v7  ;;  %v7193_v3 = vsel %vm5561_vm9, %v7161_v47, %v11746_v43 }
 0x9c0   : > { %21433 = vst [vmem:[#allocation105_spill] sm:$0xff] %v19129_v46  ;;  %v19134_v40 = vpop.permute.xlu1 %11768  ;;  %v8016_v23 = vrot.slane %v19132_v53, 2  ;;  %v8014_v56 = vrot.slane %v19129_v46, 2  ;;  %v11766_v32 = vunpack.i.h.bf16 %v11764_v52  ;;  %v7256_v8 = vsel %vm5626_vm10, %v7224_v54, %v11765_v19 }
 0x9c1   : > { %12043 = vrot.lane.b32.xlu0 %v12042_v44, %s12681_s25  ;;  %v12052_v15 = vpack.i.bf16 %v19077_v59, %v19005_v14  ;;  %v7936_v58 = vrot.slane %v19086_v9, 1  ;;  %v12062_v7 = vpack.i.bf16 %v7935_v20, %v19060_v36  ;;  %v19162_v52 = vadd.f32 %v18666_v63, %v18167_v62 }
 0x9c2   : > { %12058 = vrot.lane.b32.xlu1 %v12057_v17, %s12678_s1  ;;  %v7593_v4 = vpop.f32.mrf.mxu1  ;;  %v19157_v17 = vsel %vm890_vm3, %v8013_v21, %v8014_v56  ;;  %v11736_v19 = vunpack.i.h.bf16 %v18608_v0  ;;  %v11770_v47 = vunpack.i.l.bf16 %v19134_v40  ;;  %v7225_v54 = vsel %vm1336_vm1, %v7193_v3, %v11761_v26 }
 0x9c3   : > { %v7594_v41 = vadd.f32 %v18671_v34, %v7593_v4  ;;  %v7288_v36 = vsel %vm5659_vm11, %v7256_v8, %v11731_v37  ;;  %v19171_v21 = vsel %vm890_vm3, %v8014_v56, %v8016_v23  ;;  %v11751_v62 = vunpack.i.h.bf16 %v18650_v11 }
 0x9c4   : > { %v19153_v44 = vpop.permute.xlu1 %11773  ;;  %v7595_v9 = vpop.f32.mrf.mxu1  ;;  %v7257_v63 = vsel %vm5626_vm10, %v7225_v54, %v11766_v32  ;;  %v12077_v11 = vpack.i.bf16 %v19115_v55, %v19107_v42  ;;  %v19188_v56 = vsel %vm812_vm2, %v7934_v61, %v7936_v58  ;;  %v6066_v23 = vmax.f32 %v19162_v52, 0.0 }
 0x9c5   : > { %12053 = vrot.lane.b32.xlu0 %v12052_v15, %s12682_s22  ;;  %v7660_v4 = vmax.f32 %v7594_v41, 0.0  ;;  %v12067_v15 = vpack.i.bf16 %v19107_v42, %v19021_v25  ;;  %v11756_v32 = vunpack.i.h.bf16 %v19072_v38  ;;  %v7289_v41 = vsel %vm5659_vm11, %v7257_v63, %v11770_v47 }
 0x9c6   : > { %12063 = vrot.lane.b32.xlu1 %v12062_v7, %s12676_s30  ;;  %v7596_v0 = vpop.f32.mrf.mxu1  ;;  %v7320_v9 = vsel %vm5692_vm12, %v7288_v36, %v11751_v62  ;;  %v21434_v54 = vmax.f32 %v19064_v48, 0.0  ;;  %v11775_v3 = vunpack.i.l.bf16 %v19153_v44  ;;  %v7132_v38 = vsel %vm2388_vm6, %v18086_v22, %v11736_v19 }
 0x9c7   : > { %v19175_v43 = vpop.permute.xlu0 %11778  ;;  %v7597_v37 = vadd.f32 %v18671_v34, %v7596_v0  ;;  %v7939_v36 = vrot.slane %v19129_v46, 1  ;;  %v21435_v48 = vmax.f32 %v19068_v1, 0.0  ;;  %v7133_v22 = vsel %vm2388_vm6, %v18096_v29, %v19044_v5  ;;  %v21436_v29 = vld [vmem:[#allocation36_spill] sm:$0xff] }
 0x9c8   : > { %v11780_v26 = vunpack.i.l.bf16 %v19175_v43  ;;  %v19183_v8 = vpop.permute.xlu1 %11788  ;;  %v7598_v7 = vpop.f32.mrf.mxu1  ;;  %v19197_v0 = vadd.f32 %v7660_v4, %v21434_v54  ;;  %v7941_v19 = vrot.slane %v19132_v53, 1 }
 0x9c9   : > { %12068 = vrot.lane.b32.xlu0 %v12067_v15, %s12680_s20  ;;  %v7661_v59 = vmax.f32 %v7597_v37, 0.0  ;;  %v12072_v15 = vpack.i.bf16 %v19188_v56, %v7935_v20  ;;  %v7938_v20 = vrot.slane %v19122_v10, 1 }
 0x9ca   : > { %v7321_v61 = vsel %vm5692_vm12, %v7289_v41, %v11780_v26  ;;  %12078 = vrot.lane.b32.xlu1 %v12077_v11, %s12681_s25  ;;  %v7601_v58 = vpop.f32.mrf.mxu1  ;;  %v12087_v11 = vpack.i.bf16 %v19122_v10, %v19083_v39 }
 0x9cb   : > { %v11784_v47 = vpop.permute.xlu0 %11783  ;;  %v7352_v63 = vpack.c.bf16 %v7321_v61, %v7320_v9  ;;  %v19208_v4 = vadd.f32 %v7661_v59, %v21435_v48  ;;  %v7602_v62 = vadd.f32 %v18671_v34, %v7601_v58  ;;  %v20647_v34 = vrot.slane %v19197_v0, 7 }
 0x9cc   : > { %v11786_v37 = vunpack.i.h.bf16 %v11784_v47  ;;  %v19211_v26 = vpop.permute.xlu1 %11798  ;;  %v11785_v41 = vunpack.i.l.bf16 %v11784_v47  ;;  %v7603_v1 = vpop.f32.mrf.mxu1  ;;  %v7163_v59 = vsel %vm5529_vm8, %v7133_v22, %v11775_v3  ;;  %v7162_v9 = vsel %vm5529_vm8, %v7132_v38, %v11756_v32 }
 0x9cd   : > { %7624 = vmatmul.mubr.bf16.gmra.mxu1 %v7352_v63  ;;  %12073 = vrot.lane.b32.xlu0 %v12072_v15, %s12674_s27  ;;  %v20646_v7 = vrot.slane %v19208_v4, 7  ;;  %v7662_v5 = vmax.f32 %v7602_v62, 0.0  ;;  %v7940_v58 = vsel %vm812_vm2, %v7938_v20, %v7939_v36  ;;  %v11791_v32 = vunpack.i.h.bf16 %v19183_v8  ;;  %v19247_v62 = vld [vmem:[%s20310_s11] ss:$0 sm:$0xff] }
 0x9ce   : > { %12088 = vrot.lane.b32.xlu1 %v12087_v11, %s12682_s22  ;;  %9727 = vmatprep.mubr.msk.bf16.mxu1 %vm2388_vm6, %v21436_v29  ;;  %v7195_v53 = vsel %vm5561_vm9, %v7163_v59, %v11786_v37  ;;  %v7604_v54 = vpop.f32.mrf.mxu1  ;;  %v7194_v38 = vsel %vm5561_vm9, %v7162_v9, %v11785_v41  ;;  %v12102_v63 = vpack.i.bf16 %v19157_v17, %v19115_v55  ;;  %v11790_v48 = vunpack.i.l.bf16 %v19183_v8  ;;  %v12588_v41 = vld [vmem:[%s20308_s9] ss:$0 sm:$0xff] }
 0x9cf   : > { %v11794_v61 = vpop.permute.xlu0 %11793  ;;  %v19235_v3 = vsel %vm652_vm0, %v20647_v34, %v20646_v7  ;;  %v7605_v37 = vadd.f32 %v19247_v62, %v7604_v54  ;;  %v19252_v20 = vsel %vm812_vm2, %v7939_v36, %v7941_v19  ;;  %v6013_v8 = vadd.f32 %v12588_v41, %v18290_v18 }
 0x9d0   : > { %21437 = vst [vmem:[#allocation101_spill] sm:$0xff] %v19235_v3  ;;  %v19239_v47 = vpop.permute.xlu1 %11808  ;;  %v11796_v11 = vunpack.i.h.bf16 %v11794_v61  ;;  %v7606_v22 = vpop.f32.mrf.mxu1  ;;  %v11795_v1 = vunpack.i.l.bf16 %v11794_v61  ;;  %v7227_v59 = vsel %vm1336_vm1, %v7195_v53, %v11791_v32  ;;  %v12092_v9 = vpack.i.bf16 %v19129_v46, %v19122_v10  ;;  %v21439_v53 = vld [vmem:[#allocation51_spill] sm:$0xff] }
 0x9d1   : > { %12083 = vrot.lane.b32.xlu0 %v12072_v15, %s12679_s19  ;;  %v21438_v54 = vmax.f32 %v19100_v6, 0.0  ;;  %v7663_v36 = vmax.f32 %v7605_v37, 0.0  ;;  %v7226_v19 = vsel %vm1336_vm1, %v7194_v38, %v11790_v48  ;;  %v12107_v6 = vpack.i.bf16 %v19252_v20, %v7940_v58 }
 0x9d2   : > { %12103 = vrot.lane.b32.xlu1 %v12102_v63, %s12680_s20  ;;  %v7259_v22 = vsel %vm5626_vm10, %v7227_v59, %v11796_v11  ;;  %v7609_v7 = vpop.f32.mrf.mxu1  ;;  %v7258_v18 = vsel %vm5626_vm10, %v7226_v19, %v11795_v1  ;;  %v6016_v37 = vadd.f32 %v12588_v41, %v18306_v28  ;;  %v7944_v29 = vrot.slane %v19235_v3, 1 }
 0x9d3   : > { %v19264_v15 = vadd.f32 %v7662_v5, %v21438_v54  ;;  %v19268_v34 = vpop.permute.xlu0 %11803  ;;  %v7291_v61 = vsel %vm5659_vm11, %v7259_v22, %v21439_v53  ;;  %v7610_v32 = vadd.f32 %v19247_v62, %v7609_v7  ;;  %v19279_v5 = vadd.f32 %v7663_v36, %v6066_v23  ;;  %v21440_v23 = vld [vmem:[#allocation60_spill] sm:$0xff] }
 0x9d4   : > { %v19274_v63 = vpop.permute.xlu1 %11823  ;;  %v7290_v38 = vsel %vm5659_vm11, %v7258_v18, %v21439_v53  ;;  %v7611_v48 = vpop.f32.mrf.mxu1  ;;  %v12097_v7 = vpack.i.bf16 %v7940_v58, %v19188_v56  ;;  %v7323_v36 = vsel %vm5692_vm12, %v7291_v61, %v21440_v23 }
 0x9d5   : > { %12093 = vrot.lane.b32.xlu0 %v12092_v9, %s12678_s1  ;;  %v7664_v11 = vmax.f32 %v7610_v32, 0.0  ;;  %v20650_v1 = vrot.slane %v19264_v15, 7  ;;  %v20649_v59 = vrot.slane %v19279_v5, 7  ;;  %v7322_v54 = vsel %vm5692_vm12, %v7290_v38, %v21440_v23 }
 0x9d6   : > { %12108 = vrot.lane.b32.xlu1 %v12107_v6, %s12674_s27  ;;  %v7612_v52 = vpop.f32.mrf.mxu1  ;;  %v6067_v9 = vmax.f32 %v6013_v8, 0.0  ;;  %v7354_v58 = vpack.c.bf16 %v7323_v36, %v7322_v54  ;;  %v6068_v32 = vmax.f32 %v6016_v37, 0.0  ;;  %v21441_v8 = vrot.slane %v19197_v0, 7 }
 0x9d7   : > { %v19293_v19 = vpop.permute.xlu0 %11813  ;;  %v7613_v28 = vadd.f32 %v19247_v62, %v7612_v52  ;;  %v19303_v56 = vsel %vm652_vm0, %v20650_v1, %v20649_v59  ;;  %v12112_v54 = vpack.i.bf16 %v19171_v21, %v19157_v17  ;;  %v6021_v0 = vadd.f32 %v12588_v41, %v18330_v12 }
 0x9d8   : > { %v19296_v22 = vpop.permute.xlu1 %11828  ;;  %v7614_v18 = vpop.f32.mrf.mxu1  ;;  %v19306_v61 = vadd.f32 %v7664_v11, %v6067_v9  ;;  %v19312_v48 = vsel %vm652_vm0, 0.0, %v21441_v8  ;;  %7632 = vmatmul.mubr.bf16.gmra.mxu1 %v7354_v58  ;;  %v11805_v58 = vunpack.i.l.bf16 %v19268_v34 }
 0x9d9   : > { %12098 = vrot.lane.b32.xlu0 %v12097_v7, %s12676_s30  ;;  %v7665_v38 = vmax.f32 %v7613_v28, 0.0  ;;  %21442 = vst [vmem:[#allocation107_spill] sm:$0xff] %v19312_v48  ;;  %v11800_v7 = vunpack.i.l.bf16 %v19211_v26  ;;  %v12122_v12 = vpack.i.bf16 %v19312_v48, %v19129_v46 }
 0x9da   : > { %12118 = vrot.lane.b32.xlu1 %v12107_v6, %s12679_s19  ;;  %v7617_v52 = vpop.f32.mrf.mxu1  ;;  %v12127_v6 = vpack.i.bf16 %v19235_v3, %v19312_v48  ;;  %v20654_v28 = vrot.slane %v19306_v61, 7 }
 0x9db   : > { %v19314_v23 = vpop.permute.xlu0 %11818  ;;  %v19318_v36 = vadd.f32 %v7665_v38, %v6068_v32  ;;  %v7618_v37 = vadd.f32 %v19247_v62, %v7617_v52  ;;  %v6024_v32 = vadd.f32 %v12588_v41, %v18341_v16  ;;  %v21443_v16 = vld [vmem:[#allocation62_spill] sm:$0xff] }
 0x9dc   : > { %v19321_v11 = vpop.permute.xlu1 %11838  ;;  %v7619_v9 = vpop.f32.mrf.mxu1  ;;  %v8793_v41 = vsel %vm5561_vm9, %v21443_v16, %v11800_v7  ;;  %v7943_v7 = vrot.slane %v19312_v48, 1 }
 0x9dd   : > { %12113 = vrot.lane.b32.xlu0 %v12112_v54, %s12681_s25  ;;  %v20653_v18 = vrot.slane %v19318_v36, 7  ;;  %v7666_v38 = vmax.f32 %v7618_v37, 0.0  ;;  %v11801_v9 = vunpack.i.h.bf16 %v19211_v26  ;;  %v11806_v37 = vunpack.i.h.bf16 %v19268_v34 }
 0x9de   : > { %12128 = vrot.lane.b32.xlu1 %v12127_v6, %s12678_s1  ;;  %v7620_v8 = vpop.f32.mrf.mxu1  ;;  %v6069_v6 = vmax.f32 %v6021_v0, 0.0  ;;  %v8825_v26 = vsel %vm1336_vm1, %v8793_v41, %v11805_v58  ;;  %v6070_v46 = vmax.f32 %v6024_v32, 0.0  ;;  %v21444_v34 = vrot.slane %v19208_v4, 7 }
 0x9df   : > { %v19333_v52 = vpop.permute.xlu0 %11833  ;;  %v19343_v54 = vsel %vm652_vm0, %v20654_v28, %v20653_v18  ;;  %v7621_v53 = vadd.f32 %v19247_v62, %v7620_v8  ;;  %v11810_v18 = vunpack.i.l.bf16 %v19239_v47  ;;  %v8794_v58 = vsel %vm5561_vm9, %v21443_v16, %v11801_v9 }
 0x9e0   : > { %v19345_v59 = vpop.permute.xlu1 %11848  ;;  %v7622_v1 = vpop.f32.mrf.mxu1  ;;  %v19355_v28 = vadd.f32 %v7666_v38, %v6069_v6  ;;  %v11771_v32 = vunpack.i.h.bf16 %v19134_v40  ;;  %v11781_v8 = vunpack.i.h.bf16 %v19175_v43  ;;  %v8826_v38 = vsel %vm1336_vm1, %v8794_v58, %v11806_v37 }
 0x9e1   : > { %12123 = vrot.lane.b32.xlu0 %v12122_v12, %s12682_s22  ;;  %v7857_v1 = vsel %vm652_vm0, %v21444_v34, 0.0  ;;  %v7667_v12 = vmax.f32 %v7621_v53, 0.0  ;;  %v8857_v6 = vsel %vm5626_vm10, %v8825_v26, %v11810_v18  ;;  %v8018_v41 = vrot.slane %v19312_v48, 2 }
 0x9e2   : > { %v11811_v4 = vunpack.i.h.bf16 %v19239_v47  ;;  %v7945_v34 = vsel %vm812_vm2, %v7943_v7, %v7944_v29  ;;  %v8021_v9 = vrot.slane %v7857_v1, 2  ;;  %v20658_v53 = vrot.slane %v19355_v28, 7 }
 0x9e3   : > { %v19357_v0 = vpop.permute.xlu0 %11843  ;;  %v19373_v10 = vadd.f32 %v7667_v12, %v6070_v46  ;;  %v12132_v16 = vpack.i.bf16 %v7945_v34, %v19252_v20  ;;  %v8889_v46 = vsel %vm5659_vm11, %v8857_v6, %v11771_v32  ;;  %v7946_v7 = vrot.slane %v7857_v1, 1 }
 0x9e4   : > { %v19365_v62 = vpop.permute.xlu1 %11853  ;;  %v11845_v40 = vunpack.i.l.bf16 %v19357_v0  ;;  %v8858_v18 = vsel %vm5626_vm10, %v8826_v38, %v11811_v4  ;;  %v11815_v58 = vunpack.i.l.bf16 %v19293_v19  ;;  %v8019_v12 = vrot.slane %v19235_v3, 2 }
 0x9e5   : > { %v20657_v37 = vrot.slane %v19373_v10, 7  ;;  %v11855_v26 = vunpack.i.l.bf16 %v19365_v62  ;;  %12133 = vrot.lane.b32.xlu1 %v12132_v16, %s12676_s30  ;;  %v8921_v32 = vsel %vm5692_vm12, %v8889_v46, %v11781_v8  ;;  %v21445_v1 = vrot.slane %v19264_v15, 7 }
 0x9e6   : > { %v8890_v20 = vsel %vm5659_vm11, %v8858_v18, %v11845_v40  ;;  %v19406_v40 = vsel %vm890_vm3, %v8018_v41, %v8019_v12  ;;  %v11816_v48 = vunpack.i.h.bf16 %v19293_v19  ;;  %v19414_v8 = vsel %vm890_vm3, %v8019_v12, %v8021_v9 }
 0x9e7   : > { %v19379_v43 = vpop.permute.xlu0 %11858  ;;  %v19396_v38 = vsel %vm652_vm0, %v20658_v53, %v20657_v37  ;;  %v8922_v6 = vsel %vm5692_vm12, %v8890_v20, %v11855_v26  ;;  %v19403_v4 = vsel %vm652_vm0, 0.0, %v21445_v1  ;;  %v12137_v37 = vpack.i.bf16 %v19406_v40, %v19171_v21 }
 0x9e8   : > { %v19385_v47 = vpop.permute.xlu1 %11868  ;;  %v8953_v16 = vpack.c.bf16 %v8922_v6, %v8921_v32  ;;  %v8733_v15 = vsel %vm2388_vm6, %v18685_v2, %v11815_v58  ;;  %v11820_v46 = vunpack.i.l.bf16 %v19314_v23  ;;  %v12147_v41 = vpack.i.bf16 %v19414_v8, %v19406_v40 }
 0x9e9   : > { %v19424_v20 = vsel %vm812_vm2, %v7944_v29, %v7946_v7  ;;  %v11776_v19 = vunpack.i.h.bf16 %v19153_v44  ;;  %v7948_v32 = vrot.slane %v19403_v4, 1  ;;  %v8023_v9 = vrot.slane %v19403_v4, 2  ;;  %12138 = vrot.lane.b32.xlu0 %v12137_v37, %s12680_s20 }
 0x9ea   : > { %9141 = vmatmul.mubr.bf16.vlgmr.msra.gmra.mxu0 %v8953_v16  ;;  %v21446_v2 = vpack.c.bf16 %v18812_v13, %v18807_v33  ;;  %v21447_v58 = vrot.slane %v19279_v5, 7  ;;  %v11826_v29 = vunpack.i.h.bf16 %v19274_v63  ;;  %v11825_v44 = vunpack.i.l.bf16 %v19274_v63  ;;  %12148 = vrot.lane.b32.xlu1 %v12147_v41, %s12681_s25 }
 0x9eb   : > { %v19408_v18 = vpop.permute.xlu0 %11863  ;;  %v11821_v7 = vunpack.i.h.bf16 %v19314_v23  ;;  %v8734_v33 = vsel %vm2388_vm6, %v18688_v35, %v11816_v48  ;;  %v8763_v13 = vsel %vm5529_vm8, %v8733_v15, %v11776_v19  ;;  %v12142_v5 = vpack.i.bf16 %v19424_v20, %v7945_v34 }
 0x9ec   : > { %v19416_v26 = vpop.permute.xlu1 %11878  ;;  %9739 = vmatprep.mubr.msk.bf16.mxu0 %vm2388_vm6, %v21446_v2  ;;  %v19437_v12 = vsel %vm652_vm0, %v21447_v58, 0.0  ;;  %v8024_v37 = vrot.slane %v19303_v56, 2  ;;  %v8795_v16 = vsel %vm5561_vm9, %v8763_v13, %v11820_v46  ;;  %v11840_v63 = vunpack.i.l.bf16 %v19321_v11 }
 0x9ed   : > { %v11835_v23 = vunpack.i.l.bf16 %v19333_v52  ;;  %v12157_v41 = vpack.i.bf16 %v19403_v4, %v19235_v3  ;;  %v7951_v2 = vrot.slane %v19437_v12, 1  ;;  %v11831_v35 = vunpack.i.h.bf16 %v19296_v22  ;;  %12143 = vrot.lane.b32.xlu0 %v12142_v5, %s12674_s27 }
 0x9ee   : > { %v11830_v48 = vunpack.i.l.bf16 %v19296_v22  ;;  %v19464_v34 = vsel %vm890_vm3, %v8023_v9, %v8024_v37  ;;  %v8764_v15 = vsel %vm5529_vm8, %v8734_v33, %v11825_v44  ;;  %v11841_v46 = vunpack.i.h.bf16 %v19321_v11 }
 0x9ef   : > { %v19443_v6 = vpop.permute.xlu0 %11873  ;;  %v11846_v19 = vunpack.i.h.bf16 %v19357_v0  ;;  %12158 = vrot.lane.b32.xlu1 %v12157_v41, %s12682_s22  ;;  %v7949_v58 = vrot.slane %v19303_v56, 1  ;;  %v8796_v22 = vsel %vm5561_vm9, %v8764_v15, %v11821_v7  ;;  %v11836_v53 = vunpack.i.h.bf16 %v19333_v52 }
 0x9f0   : > { %v19450_v1 = vpop.permute.xlu1 %11893  ;;  %v8827_v3 = vsel %vm1336_vm1, %v8795_v16, %v11830_v48  ;;  %v8735_v44 = vsel %vm2388_vm6, %v18694_v45, %v11840_v63  ;;  %v11880_v0 = vunpack.i.l.bf16 %v19416_v26  ;;  %v12172_v33 = vpack.i.bf16 %v19464_v34, %v19414_v8 }
 0x9f1   : > { %v8859_v11 = vsel %vm5626_vm10, %v8827_v3, %v11835_v23  ;;  %v11856_v41 = vunpack.i.h.bf16 %v19365_v62  ;;  %v11860_v7 = vunpack.i.l.bf16 %v19379_v43  ;;  %12153 = vrot.lane.b32.xlu0 %v12142_v5, %s12679_s19  ;;  %v7950_v52 = vsel %vm812_vm2, %v7948_v32, %v7949_v58 }
 0x9f2   : > { %v19489_v16 = vsel %vm812_vm2, %v7949_v58, %v7951_v2  ;;  %v8026_v45 = vrot.slane %v19437_v12, 2  ;;  %v8828_v3 = vsel %vm1336_vm1, %v8796_v22, %v11831_v35  ;;  %v11850_v63 = vunpack.i.l.bf16 %v19345_v59 }
 0x9f3   : > { %v19471_v13 = vpop.permute.xlu0 %11883  ;;  %v8891_v23 = vsel %vm5659_vm11, %v8859_v11, %v11846_v19  ;;  %12173 = vrot.lane.b32.xlu1 %v12172_v33, %s12680_s20  ;;  %v8860_v48 = vsel %vm5626_vm10, %v8828_v3, %v11836_v53  ;;  %v11865_v5 = vunpack.i.l.bf16 %v19408_v18  ;;  %v12162_v32 = vpack.i.bf16 %v19303_v56, %v19403_v4 }
 0x9f4   : > { %v19476_v9 = vpop.permute.xlu1 %11898  ;;  %v8736_v12 = vsel %vm2388_vm6, %v18702_v27, %v11841_v46  ;;  %v8765_v35 = vsel %vm5529_vm8, %v8735_v44, %v11826_v29  ;;  %v8892_v19 = vsel %vm5659_vm11, %v8860_v48, %v11880_v0  ;;  %v12177_v58 = vpack.i.bf16 %v19489_v16, %v7950_v52 }
 0x9f5   : > { %v8923_v22 = vsel %vm5692_vm12, %v8891_v23, %v11856_v41  ;;  %v8766_v53 = vsel %vm5529_vm8, %v8736_v12, %v11860_v7  ;;  %v11866_v11 = vunpack.i.h.bf16 %v19408_v18  ;;  %12163 = vrot.lane.b32.xlu0 %v12162_v32, %s12678_s1  ;;  %v11851_v3 = vunpack.i.h.bf16 %v19345_v59 }
 0x9f6   : > { %v8797_v27 = vsel %vm5561_vm9, %v8765_v35, %v11850_v63  ;;  %v21448_v44 = vrot.slane %v19306_v61, 7  ;;  %v21449_v18 = vrot.slane %v19318_v36, 7  ;;  %v12167_v59 = vpack.i.bf16 %v7950_v52, %v19424_v20 }
 0x9f7   : > { %v11889_v62 = vpop.permute.xlu0 %11888  ;;  %12178 = vrot.lane.b32.xlu1 %v12177_v58, %s12674_s27  ;;  %v8829_v7 = vsel %vm1336_vm1, %v8797_v27, %v11865_v5  ;;  %v11870_v63 = vunpack.i.l.bf16 %v19385_v47  ;;  %v8798_v48 = vsel %vm5561_vm9, %v8766_v53, %v11851_v3  ;;  %v19534_v61 = vsel %vm890_vm3, %v8024_v37, %v8026_v45 }
 0x9f8   : > { %v11890_v2 = vunpack.i.l.bf16 %v11889_v62  ;;  %v19500_v15 = vpop.permute.xlu1 %11908  ;;  %v19520_v0 = vsel %vm652_vm0, 0.0, %v21448_v44  ;;  %v7859_v41 = vsel %vm652_vm0, %v21449_v18, 0.0  ;;  %v8830_v36 = vsel %vm1336_vm1, %v8798_v48, %v11866_v11 }
 0x9f9   : > { %v11881_v32 = vunpack.i.h.bf16 %v19416_v26  ;;  %12168 = vrot.lane.b32.xlu0 %v12167_v59, %s12676_s30  ;;  %v7954_v20 = vrot.slane %v19343_v54, 1  ;;  %v21450_v52 = vpack.c.bf16 %v18848_v24, %v18845_v49  ;;  %v11871_v5 = vunpack.i.h.bf16 %v19385_v47 }
 0x9fa   : > { %v8924_v33 = vsel %vm5692_vm12, %v8892_v19, %v11890_v2  ;;  %v8861_v2 = vsel %vm5626_vm10, %v8829_v7, %v11870_v63  ;;  %v11891_v37 = vunpack.i.h.bf16 %v11889_v62  ;;  %v7953_v26 = vrot.slane %v19520_v0, 1 }
 0x9fb   : > { %v8955_v29 = vpack.c.bf16 %v8924_v33, %v8923_v22  ;;  %v19515_v46 = vpop.permute.xlu0 %11903  ;;  %12188 = vrot.lane.b32.xlu1 %v12177_v58, %s12679_s19  ;;  %v8031_v12 = vrot.slane %v7859_v41, 2  ;;  %v12182_v35 = vpack.i.bf16 %v19534_v61, %v19464_v34  ;;  %v12197_v24 = vpack.i.bf16 %v19343_v54, %v19520_v0 }
 0x9fc   : > { %v19527_v23 = vpop.permute.xlu1 %11918  ;;  %v8862_v47 = vsel %vm5626_vm10, %v8830_v36, %v11871_v5  ;;  %v8029_v62 = vrot.slane %v19343_v54, 2  ;;  %v8893_v22 = vsel %vm5659_vm11, %v8861_v2, %v11881_v32  ;;  %v7955_v53 = vsel %vm812_vm2, %v7953_v26, %v7954_v20 }
 0x9fd   : > { %9149 = vmatmul.mubr.bf16.gmra.mxu0 %v8955_v29  ;;  %12183 = vrot.lane.b32.xlu0 %v12182_v35, %s12681_s25  ;;  %v8028_v33 = vrot.slane %v19520_v0, 2  ;;  %v8925_v3 = vsel %vm5692_vm12, %v8893_v22, %v11891_v37  ;;  %v8972_v44 = vpack.c.bf16 %v19414_v8, %v19406_v40  ;;  %v7956_v18 = vrot.slane %v7859_v41, 1 }
 0x9fe   : > { %9740 = vmatprep.mubr.msk.bf16.mxu0 %vm2388_vm6, %v21450_v52  ;;  %v12192_v7 = vpack.i.bf16 %v19520_v0, %v19303_v56  ;;  %v11875_v48 = vunpack.i.l.bf16 %v19443_v6  ;;  %v12202_v36 = vpack.i.bf16 %v7955_v53, %v19489_v16  ;;  %v19582_v52 = vsel %vm890_vm3, %v8029_v62, %v8031_v12 }
 0x9ff   : > { %v19547_v45 = vpop.permute.xlu0 %11913  ;;  %12198 = vrot.lane.b32.xlu1 %v12197_v24, %s12678_s1  ;;  %v19579_v32 = vsel %vm890_vm3, %v8028_v33, %v8029_v62  ;;  %v11876_v41 = vunpack.i.h.bf16 %v19443_v6  ;;  %v21451_v2 = vpack.c.bf16 %v18909_v60, %v18904_v57  ;;  %v8974_v16 = vpack.c.bf16 %v19534_v61, %v19464_v34 }
 0xa00   : > { %v11915_v19 = vunpack.i.l.bf16 %v19547_v45  ;;  %v19553_v49 = vpop.permute.xlu1 %11923  ;;  %v21452_v37 = vrot.slane %v19355_v28, 7  ;;  %v12207_v6 = vpack.i.bf16 %v19579_v32, %v19534_v61  ;;  %v8976_v35 = vpack.c.bf16 %v19582_v52, %v19579_v32 }
 0xa01   : > { %v11925_v58 = vunpack.i.l.bf16 %v19553_v49  ;;  %12193 = vrot.lane.b32.xlu0 %v12192_v7, %s12682_s22  ;;  %v8737_v57 = vsel %vm2388_vm6, %v18787_v51, %v11875_v48  ;;  %v11885_v60 = vunpack.i.l.bf16 %v19471_v13  ;;  %v19612_v28 = vsel %vm812_vm2, %v7954_v20, %v7956_v18 }
 0xa02   : > { %v8894_v11 = vsel %vm5659_vm11, %v8862_v47, %v11915_v19  ;;  %v19598_v26 = vsel %vm652_vm0, 0.0, %v21452_v37  ;;  %v12217_v19 = vpack.i.bf16 %v19582_v52, %v19579_v32  ;;  %v11861_v24 = vunpack.i.h.bf16 %v19379_v43  ;;  %v21475_v32 = vld [vmem:[#allocation101_spill] sm:$0xff] }
 0xa03   : > { %v8926_v27 = vsel %vm5692_vm12, %v8894_v11, %v11925_v58  ;;  %v19568_v29 = vpop.permute.xlu0 %11928  ;;  %12203 = vrot.lane.b32.xlu1 %v12202_v36, %s12676_s30  ;;  %v11895_v47 = vunpack.i.l.bf16 %v19450_v1  ;;  %v8034_v58 = vrot.slane %v19396_v38, 2  ;;  %v7958_v62 = vrot.slane %v19598_v26, 1 }
 0xa04   : > { %v8957_v59 = vpack.c.bf16 %v8926_v27, %v8925_v3  ;;  %v19574_v63 = vpop.permute.xlu1 %11938  ;;  %v21453_v51 = vrot.slane %v19373_v10, 7  ;;  %v8738_v11 = vsel %vm2388_vm6, %v18792_v31, %v11876_v41  ;;  %v11886_v20 = vunpack.i.h.bf16 %v19471_v13 }
 0xa05   : > { %12208 = vrot.lane.b32.xlu0 %v12207_v6, %s12680_s20  ;;  %v8033_v33 = vrot.slane %v19598_v26, 2  ;;  %v8767_v3 = vsel %vm5529_vm8, %v8737_v57, %v11861_v24  ;;  %v11900_v27 = vunpack.i.l.bf16 %v19476_v9  ;;  %v12212_v10 = vpack.i.bf16 %v19612_v28, %v7955_v53 }
 0xa06   : > { %9157 = vmatmul.mubr.bf16.gmra.mxu0 %v8957_v59  ;;  %v19622_v22 = vsel %vm652_vm0, %v21453_v51, 0.0  ;;  %v8799_v7 = vsel %vm5561_vm9, %v8767_v3, %v11885_v60  ;;  %v11910_v31 = vunpack.i.l.bf16 %v19500_v15  ;;  %v11905_v13 = vunpack.i.l.bf16 %v19515_v46 }
 0xa07   : > { %v19587_v5 = vpop.permute.xlu0 %11933  ;;  %9741 = vmatprep.mubr.msk.bf16.mxu0 %vm2388_vm6, %v21451_v2  ;;  %12218 = vrot.lane.b32.xlu1 %v12217_v19, %s12681_s25  ;;  %v12227_v59 = vpack.i.bf16 %v19598_v26, %v19343_v54  ;;  %v7961_v48 = vrot.slane %v19622_v22, 1  ;;  %v8768_v36 = vsel %vm5529_vm8, %v8738_v11, %v11895_v47  ;;  %v19647_v53 = vsel %vm890_vm3, %v8033_v33, %v8034_v58 }
 0xa08   : > { %v19602_v12 = vpop.permute.xlu1 %11948  ;;  %v7959_v41 = vrot.slane %v19396_v38, 1  ;;  %v8036_v2 = vrot.slane %v19622_v22, 2  ;;  %v8800_v37 = vsel %vm5561_vm9, %v8768_v36, %v11886_v20  ;;  %v11901_v6 = vunpack.i.h.bf16 %v19476_v9 }
 0xa09   : > { %12213 = vrot.lane.b32.xlu0 %v12212_v10, %s12674_s27  ;;  %v11916_v57 = vunpack.i.h.bf16 %v19547_v45  ;;  %v8831_v19 = vsel %vm1336_vm1, %v8799_v7, %v11900_v27  ;;  %v11911_v24 = vunpack.i.h.bf16 %v19500_v15  ;;  %v11906_v47 = vunpack.i.h.bf16 %v19515_v46 }
 0xa0a   : > { %v8739_v22 = vsel %vm2388_vm6, %v18816_v30, %v11910_v31  ;;  %v8863_v11 = vsel %vm5626_vm10, %v8831_v19, %v11905_v13  ;;  %v11950_v9 = vunpack.i.l.bf16 %v19602_v12  ;;  %v12242_v45 = vpack.i.bf16 %v19647_v53, %v19582_v52 }
 0xa0b   : > { %v19628_v43 = vpop.permute.xlu0 %11943  ;;  %12228 = vrot.lane.b32.xlu1 %v12227_v59, %s12682_s22  ;;  %v11926_v20 = vunpack.i.h.bf16 %v19553_v49  ;;  %v11930_v33 = vunpack.i.l.bf16 %v19568_v29  ;;  %v7960_v15 = vsel %vm812_vm2, %v7958_v62, %v7959_v41  ;;  %v19673_v46 = vsel %vm812_vm2, %v7959_v41, %v7961_v48 }
 0xa0c   : > { %v19634_v18 = vpop.permute.xlu1 %11963  ;;  %v11896_v30 = vunpack.i.h.bf16 %v19450_v1  ;;  %v8832_v3 = vsel %vm1336_vm1, %v8800_v37, %v11901_v6  ;;  %v11920_v27 = vunpack.i.l.bf16 %v19527_v23  ;;  %v8895_v7 = vsel %vm5659_vm11, %v8863_v11, %v11916_v57 }
 0xa0d   : > { %12223 = vrot.lane.b32.xlu0 %v12212_v10, %s12679_s19  ;;  %v8864_v31 = vsel %vm5626_vm10, %v8832_v3, %v11906_v47  ;;  %v11935_v10 = vunpack.i.l.bf16 %v19587_v5  ;;  %v12232_v62 = vpack.i.bf16 %v19396_v38, %v19598_v26  ;;  %v8740_v1 = vsel %vm2388_vm6, %v18828_v50, %v11911_v24  ;;  %v21454_v3 = vld [vmem:[#allocation78_spill] sm:$0xff] }
 0xa0e   : > { %v8769_v48 = vsel %vm5529_vm8, %v8739_v22, %v11896_v30  ;;  %v8896_v36 = vsel %vm5659_vm11, %v8864_v31, %v11950_v9  ;;  %v12247_v41 = vpack.i.bf16 %v19673_v46, %v7960_v15  ;;  %v8927_v37 = vsel %vm5692_vm12, %v8895_v7, %v11926_v20 }
 0xa0f   : > { %v19655_v60 = vpop.permute.xlu0 %11953  ;;  %12243 = vrot.lane.b32.xlu1 %v12242_v45, %s12680_s20  ;;  %v8770_v6 = vsel %vm5529_vm8, %v8740_v1, %v11930_v33  ;;  %v11936_v57 = vunpack.i.h.bf16 %v19587_v5  ;;  %v11921_v47 = vunpack.i.h.bf16 %v19527_v23  ;;  %v8801_v50 = vsel %vm5561_vm9, %v8769_v48, %v11920_v27 }
 0xa10   : > { %v19660_v51 = vpop.permute.xlu1 %11968  ;;  %v8833_v11 = vsel %vm1336_vm1, %v8801_v50, %v11935_v10  ;;  %v12237_v9 = vpack.i.bf16 %v7960_v15, %v19612_v28  ;;  %v11940_v5 = vunpack.i.l.bf16 %v19574_v63  ;;  %v19710_v23 = vsel %vm890_vm3, %v8034_v58, %v8036_v2  ;;  %v21455_v28 = vld [vmem:[#allocation80_spill] sm:$0xff] }
 0xa11   : > { %12233 = vrot.lane.b32.xlu0 %v12232_v62, %s12678_s1  ;;  %v8802_v20 = vsel %vm5561_vm9, %v8770_v6, %v11921_v47  ;;  %v11951_v30 = vunpack.i.h.bf16 %v19602_v12  ;;  %v21456_v15 = vpack.c.bf16 %v21454_v3, %v21455_v28  ;;  %v11941_v27 = vunpack.i.h.bf16 %v19574_v63  ;;  %v21458_v47 = vld [vmem:[#allocation89_spill] sm:$0xff]  ;;  %v21461_v28 = vld [vmem:[#allocation74_spill] sm:$0xff] }
 0xa12   : > { %v8834_v33 = vsel %vm1336_vm1, %v8802_v20, %v11936_v57  ;;  %v8865_v7 = vsel %vm5626_vm10, %v8833_v11, %v11940_v5  ;;  %v12252_v31 = vpack.i.bf16 %v19710_v23, %v19647_v53  ;;  %v11945_v6 = vunpack.i.l.bf16 %v19628_v43 }
 0xa13   : > { %v11959_v49 = vpop.permute.xlu0 %11958  ;;  %12248 = vrot.lane.b32.xlu1 %v12247_v41, %s12674_s27  ;;  %v8866_v62 = vsel %vm5626_vm10, %v8834_v33, %v11941_v27  ;;  %v8897_v1 = vsel %vm5659_vm11, %v8865_v7, %v11951_v30  ;;  %v11955_v20 = vunpack.i.l.bf16 %v19655_v60  ;;  %v11931_v33 = vunpack.i.h.bf16 %v19568_v29 }
 0xa14   : > { %v11960_v13 = vunpack.i.l.bf16 %v11959_v49  ;;  %v19684_v59 = vpop.permute.xlu1 %11978  ;;  %v11961_v58 = vunpack.i.h.bf16 %v11959_v49  ;;  %v11965_v30 = vunpack.i.l.bf16 %v19634_v18  ;;  %v11956_v27 = vunpack.i.h.bf16 %v19655_v60 }
 0xa15   : > { %12238 = vrot.lane.b32.xlu0 %v12237_v9, %s12676_s30  ;;  %v21460_v9 = vld [vmem:[#allocation76_spill] sm:$0xff] }
 0xa16   : > { %v8928_v19 = vsel %vm5692_vm12, %v8896_v36, %v11960_v13  ;;  %v8929_v48 = vsel %vm5692_vm12, %v8897_v1, %v11961_v58  ;;  %v8741_v5 = vsel %vm2388_vm6, %v21460_v9, %v11945_v6  ;;  %v11970_v58 = vunpack.i.l.bf16 %v19660_v51 }
 0xa17   : > { %v8959_v24 = vpack.c.bf16 %v8928_v19, %v8927_v37  ;;  %v19699_v22 = vpop.permute.xlu0 %11973  ;;  %12258 = vrot.lane.b32.xlu1 %v12247_v41, %s12679_s19  ;;  %v21457_v19 = vld [vmem:[#allocation84_spill] sm:$0xff]  ;;  %v11981_v6 = vunpack.i.h.bf16 %v19684_v59  ;;  %v11966_v9 = vunpack.i.h.bf16 %v19634_v18 }
 0xa18   : > { %v19703_v45 = vpop.permute.xlu1 %11988  ;;  %v21459_v50 = vpack.c.bf16 %v21457_v19, %v21458_v47  ;;  %v11975_v29 = vunpack.i.l.bf16 %v19699_v22  ;;  %v21462_v47 = vld [vmem:[#allocation79_spill] sm:$0xff] }
 0xa19   : > { %9165 = vmatmul.mubr.bf16.gmra.mxu0 %v8959_v24  ;;  %12253 = vrot.lane.b32.xlu0 %v12252_v31, %s12681_s25  ;;  %v11946_v24 = vunpack.i.h.bf16 %v19628_v43  ;;  %v8771_v43 = vsel %vm5529_vm8, %v8741_v5, %v11931_v33  ;;  %v11990_v5 = vunpack.i.l.bf16 %v19703_v45 }
 0xa1a   : > { %9742 = vmatprep.mubr.msk.bf16.mxu0 %vm2388_vm6, %v21456_v15  ;;  %v8803_v31 = vsel %vm5561_vm9, %v8771_v43, %v11955_v20 }
 0xa1b   : > { %v11984_v2 = vpop.permute.xlu0 %11983  ;;  %v8742_v15 = vsel %vm2388_vm6, %v21461_v28, %v11946_v24 }
 0xa1c   : > { %v11985_v10 = vunpack.i.l.bf16 %v11984_v2  ;;  %v11994_v12 = vpop.permute.xlu1 %11993  ;;  %v11986_v1 = vunpack.i.h.bf16 %v11984_v2 }
 0xa1d   : > { %v11995_v13 = vunpack.i.l.bf16 %v11994_v12  ;;  %v11996_v2 = vunpack.i.h.bf16 %v11994_v12 }
 0xa1e   : > { %v8898_v63 = vsel %vm5659_vm11, %v8866_v62, %v11985_v10  ;;  %v11980_v10 = vunpack.i.l.bf16 %v19684_v59  ;;  %v8772_v62 = vsel %vm5529_vm8, %v8742_v15, %v11965_v30 }
 0xa1f   : > { %v8930_v36 = vsel %vm5692_vm12, %v8898_v63, %v11995_v13  ;;  %v19730_v49 = vpop.permute.xlu0 %11998  ;;  %v11971_v13 = vunpack.i.h.bf16 %v19660_v51  ;;  %v8804_v60 = vsel %vm5561_vm9, %v8772_v62, %v11956_v27  ;;  %v21463_v27 = vld [vmem:[#allocation77_spill] sm:$0xff]  ;;  %v11991_v62 = vunpack.i.h.bf16 %v19703_v45 }
 0xa20   : > { %v8961_v41 = vpack.c.bf16 %v8930_v36, %v8929_v48  ;;  %v19732_v37 = vpop.permute.xlu1 %12008  ;;  %v11976_v48 = vunpack.i.h.bf16 %v19699_v22  ;;  %v12000_v24 = vunpack.i.l.bf16 %v19730_v49  ;;  %v8744_v12 = vsel %vm2388_vm6, %v21463_v27, %v11981_v6 }
 0xa21   : > { %v8836_v22 = vsel %vm1336_vm1, %v8804_v60, %v11971_v13  ;;  %v12010_v6 = vunpack.i.l.bf16 %v19732_v37 }
 0xa22   : > { %9173 = vmatmul.mubr.bf16.gmra.mxu0 %v8961_v41  ;;  %v8835_v41 = vsel %vm1336_vm1, %v8803_v31, %v11970_v58  ;;  %v8868_v59 = vsel %vm5626_vm10, %v8836_v22, %v11976_v48  ;;  %v8774_v31 = vsel %vm5529_vm8, %v8744_v12, %v12000_v24 }
 0xa23   : > { %v12004_v57 = vpop.permute.xlu0 %12003  ;;  %9743 = vmatprep.mubr.msk.bf16.mxu0 %vm2388_vm6, %v21459_v50  ;;  %v8743_v50 = vsel %vm2388_vm6, %v21462_v47, %v11980_v10  ;;  %v8867_v51 = vsel %vm5626_vm10, %v8835_v41, %v11975_v29 }
 0xa24   : > { %v19740_v11 = vpop.permute.xlu1 %12018  ;;  %v8899_v20 = vsel %vm5659_vm11, %v8867_v51, %v11986_v1  ;;  %v12005_v30 = vunpack.i.l.bf16 %v12004_v57  ;;  %v8773_v43 = vsel %vm5529_vm8, %v8743_v50, %v11966_v9  ;;  %v12006_v10 = vunpack.i.h.bf16 %v12004_v57  ;;  %v21464_v50 = vld [vmem:[#allocation91_spill] sm:$0xff] }
 0xa25   : > { %v12020_v19 = vunpack.i.l.bf16 %v19740_v11  ;;  %v8931_v58 = vsel %vm5692_vm12, %v8899_v20, %v11996_v2  ;;  %v8805_v13 = vsel %vm5561_vm9, %v8773_v43, %v11990_v5  ;;  %v12021_v57 = vunpack.i.h.bf16 %v19740_v11 }
 0xa26   : > { %v8837_v48 = vsel %vm1336_vm1, %v8805_v13, %v12005_v30  ;;  %v21465_v45 = vpack.c.bf16 %v19021_v25, %v21464_v50  ;;  %v12011_v51 = vunpack.i.h.bf16 %v19732_v37  ;;  %v12001_v13 = vunpack.i.h.bf16 %v19730_v49 }
 0xa27   : > { %v19747_v3 = vpop.permute.xlu0 %12013  ;;  %v8900_v18 = vsel %vm5659_vm11, %v8868_v59, %v12020_v19  ;;  %v8806_v19 = vsel %vm5561_vm9, %v8774_v31, %v11991_v62  ;;  %v8869_v2 = vsel %vm5626_vm10, %v8837_v48, %v12010_v6  ;;  %v21468_v6 = vld [vmem:[#allocation81_spill] sm:$0xff] }
 0xa28   : > { %v19752_v7 = vpop.permute.xlu1 %12033  ;;  %v8838_v47 = vsel %vm1336_vm1, %v8806_v19, %v12006_v10  ;;  %v8901_v30 = vsel %vm5659_vm11, %v8869_v2, %v12021_v57  ;;  %v21467_v10 = vld [vmem:[#allocation86_spill] sm:$0xff] }
 0xa29   : > { %v8870_v20 = vsel %vm5626_vm10, %v8838_v47, %v12011_v51 }
 0xa2b   : > { %v19761_v63 = vpop.permute.xlu0 %12023 }
 0xa2c   : > { %v19765_v36 = vpop.permute.xlu1 %12038  ;;  %v12025_v62 = vunpack.i.l.bf16 %v19761_v63 }
 0xa2d   : > { %v12040_v47 = vunpack.i.l.bf16 %v19765_v36 }
 0xa2f   : > { %v12029_v33 = vpop.permute.xlu0 %12028 }
 0xa30   : > { %v12030_v28 = vunpack.i.l.bf16 %v12029_v33  ;;  %v19779_v15 = vpop.permute.xlu1 %12048  ;;  %v12031_v24 = vunpack.i.h.bf16 %v12029_v33  ;;  %v12015_v33 = vunpack.i.l.bf16 %v19747_v3 }
 0xa32   : > { %v8932_v29 = vsel %vm5692_vm12, %v8900_v18, %v12030_v28  ;;  %v8933_v28 = vsel %vm5692_vm12, %v8901_v30, %v12031_v24  ;;  %v21466_v18 = vpack.c.bf16 %v19115_v55, %v19107_v42  ;;  %v12026_v55 = vunpack.i.h.bf16 %v19761_v63 }
 0xa33   : > { %v8963_v1 = vpack.c.bf16 %v8932_v29, %v8931_v58  ;;  %v12044_v60 = vpop.permute.xlu0 %12043  ;;  %v12016_v58 = vunpack.i.h.bf16 %v19747_v3  ;;  %v8745_v29 = vsel %vm2388_vm6, %v21467_v10, %v12015_v33 }
 0xa34   : > { %v19791_v41 = vpop.permute.xlu1 %12058  ;;  %v8775_v3 = vsel %vm5529_vm8, %v8745_v29, %v12001_v13  ;;  %v12045_v50 = vunpack.i.l.bf16 %v12044_v60 }
 0xa35   : > { %9181 = vmatmul.mubr.bf16.gmra.mxu0 %v8963_v1  ;;  %v12035_v1 = vunpack.i.l.bf16 %v19752_v7  ;;  %v8746_v42 = vsel %vm2388_vm6, %v21468_v6, %v12016_v58  ;;  %v8807_v57 = vsel %vm5561_vm9, %v8775_v3, %v12025_v62  ;;  %v21469_v6 = vld [vmem:[#allocation96_spill] sm:$0xff]  ;;  %v12036_v3 = vunpack.i.h.bf16 %v19752_v7 }
 0xa36   : > { %9744 = vmatprep.mubr.msk.bf16.mxu0 %vm2388_vm6, %v21465_v45  ;;  %v12041_v45 = vunpack.i.h.bf16 %v19765_v36  ;;  %v8839_v63 = vsel %vm1336_vm1, %v8807_v57, %v12040_v47 }
 0xa37   : > { %v12054_v9 = vpop.permute.xlu0 %12053  ;;  %v8776_v49 = vsel %vm5529_vm8, %v8746_v42, %v12035_v1  ;;  %v8871_v30 = vsel %vm5626_vm10, %v8839_v63, %v12045_v50 }
 0xa38   : > { %v12055_v22 = vunpack.i.l.bf16 %v12054_v9  ;;  %v12064_v5 = vpop.permute.xlu1 %12063  ;;  %v12056_v51 = vunpack.i.h.bf16 %v12054_v9  ;;  %v8808_v24 = vsel %vm5561_vm9, %v8776_v49, %v12026_v55  ;;  %v21470_v55 = vpack.c.bf16 %v19171_v21, %v19157_v17 }
 0xa39   : > { %v12065_v59 = vunpack.i.l.bf16 %v12064_v5  ;;  %v12061_v49 = vunpack.i.h.bf16 %v19791_v41 }
 0xa3a   : > { %v8902_v11 = vsel %vm5659_vm11, %v8870_v20, %v12055_v22  ;;  %v12046_v22 = vunpack.i.h.bf16 %v12044_v60  ;;  %v12051_v60 = vunpack.i.h.bf16 %v19779_v15 }
 0xa3b   : > { %v8934_v25 = vsel %vm5692_vm12, %v8902_v11, %v12065_v59  ;;  %v19808_v27 = vpop.permute.xlu0 %12068  ;;  %v12066_v11 = vunpack.i.h.bf16 %v12064_v5 }
 0xa3c   : > { %v8965_v37 = vpack.c.bf16 %v8934_v25, %v8933_v28  ;;  %v19810_v12 = vpop.permute.xlu1 %12078  ;;  %v8840_v28 = vsel %vm1336_vm1, %v8808_v24, %v12041_v45  ;;  %v8903_v25 = vsel %vm5659_vm11, %v8871_v30, %v12056_v51  ;;  %v12070_v5 = vunpack.i.l.bf16 %v19808_v27 }
 0xa3d   : > { %v8872_v9 = vsel %vm5626_vm10, %v8840_v28, %v12046_v22  ;;  %v8935_v58 = vsel %vm5692_vm12, %v8903_v25, %v12066_v11  ;;  %v8748_v1 = vsel %vm2388_vm6, %v19005_v14, %v12051_v60  ;;  %v12081_v63 = vunpack.i.h.bf16 %v19810_v12 }
 0xa3e   : > { %9189 = vmatmul.mubr.bf16.gmra.mxu0 %v8965_v37  ;;  %v8778_v47 = vsel %vm5529_vm8, %v8748_v1, %v12070_v5 }
 0xa3f   : > { %v12074_v43 = vpop.permute.xlu0 %12073  ;;  %9745 = vmatprep.mubr.msk.bf16.mxu0 %vm2388_vm6, %v21466_v18  ;;  %v12050_v18 = vunpack.i.l.bf16 %v19779_v15  ;;  %v12060_v15 = vunpack.i.l.bf16 %v19791_v41  ;;  %v8810_v22 = vsel %vm5561_vm9, %v8778_v47, %v12061_v49 }
 0xa40   : > { %v19818_v31 = vpop.permute.xlu1 %12088  ;;  %v12076_v57 = vunpack.i.h.bf16 %v12074_v43  ;;  %v12075_v50 = vunpack.i.l.bf16 %v12074_v43  ;;  %v12080_v43 = vunpack.i.l.bf16 %v19810_v12 }
 0xa41   : > { %v12090_v20 = vunpack.i.l.bf16 %v19818_v31  ;;  %v8747_v42 = vsel %vm2388_vm6, %v21469_v6, %v12050_v18  ;;  %v12091_v41 = vunpack.i.h.bf16 %v19818_v31 }
 0xa42   : > { %v8777_v14 = vsel %vm5529_vm8, %v8747_v42, %v12036_v3  ;;  %v8842_v21 = vsel %vm1336_vm1, %v8810_v22, %v12076_v57  ;;  %v12071_v42 = vunpack.i.h.bf16 %v19808_v27 }
 0xa43   : > { %v19825_v48 = vpop.permute.xlu0 %12083  ;;  %v8904_v33 = vsel %vm5659_vm11, %v8872_v9, %v12090_v20  ;;  %v8809_v24 = vsel %vm5561_vm9, %v8777_v14, %v12060_v15  ;;  %v8874_v11 = vsel %vm5626_vm10, %v8842_v21, %v12081_v63 }
 0xa44   : > { %v19830_v19 = vpop.permute.xlu1 %12103  ;;  %v8841_v17 = vsel %vm1336_vm1, %v8809_v24, %v12075_v50  ;;  %v12085_v31 = vunpack.i.l.bf16 %v19825_v48 }
 0xa45   : > { %v8873_v20 = vsel %vm5626_vm10, %v8841_v17, %v12080_v43  ;;  %v12105_v15 = vunpack.i.l.bf16 %v19830_v19  ;;  %v21472_v43 = vld [vmem:[#allocation94_spill] sm:$0xff] }
 0xa47   : > { %v19837_v2 = vpop.permute.xlu0 %12093 }
 0xa48   : > { %v19842_v59 = vpop.permute.xlu1 %12108  ;;  %v12095_v6 = vunpack.i.l.bf16 %v19837_v2  ;;  %v12096_v8 = vunpack.i.h.bf16 %v19837_v2 }
 0xa49   : > { %v12111_v14 = vunpack.i.h.bf16 %v19842_v59 }
 0xa4b   : > { %v12099_v36 = vpop.permute.xlu0 %12098 }
 0xa4c   : > { %v12100_v37 = vunpack.i.l.bf16 %v12099_v36  ;;  %v19854_v62 = vpop.permute.xlu1 %12118  ;;  %v12101_v30 = vunpack.i.h.bf16 %v12099_v36 }
 0xa4d   : > { %v12120_v27 = vunpack.i.l.bf16 %v19854_v62  ;;  %v12121_v22 = vunpack.i.h.bf16 %v19854_v62 }
 0xa4e   : > { %v8936_v10 = vsel %vm5692_vm12, %v8904_v33, %v12100_v37  ;;  %v8905_v37 = vsel %vm5659_vm11, %v8873_v20, %v12091_v41 }
 0xa4f   : > { %v8967_v29 = vpack.c.bf16 %v8936_v10, %v8935_v58  ;;  %v19856_v13 = vpop.permute.xlu0 %12113  ;;  %v8937_v33 = vsel %vm5692_vm12, %v8905_v37, %v12101_v30  ;;  %v12086_v10 = vunpack.i.h.bf16 %v19825_v48  ;;  %v12110_v48 = vunpack.i.l.bf16 %v19842_v59 }
 0xa50   : > { %v19871_v51 = vpop.permute.xlu1 %12128  ;;  %v12115_v57 = vunpack.i.l.bf16 %v19856_v13  ;;  %v12116_v17 = vunpack.i.h.bf16 %v19856_v13  ;;  %v8751_v59 = vsel %vm2388_vm6, %v21472_v43, %v12120_v27  ;;  %v12106_v30 = vunpack.i.h.bf16 %v19830_v19 }
 0xa51   : > { %9197 = vmatmul.mubr.bf16.gmra.mxu0 %v8967_v29  ;;  %v21471_v29 = vld [vmem:[#allocation99_spill] sm:$0xff]  ;;  %v8750_v40 = vsel %vm2388_vm6, %v19083_v39, %v12086_v10  ;;  %v12130_v13 = vunpack.i.l.bf16 %v19871_v51 }
 0xa52   : > { %9746 = vmatprep.mubr.msk.bf16.mxu0 %vm2388_vm6, %v21470_v55  ;;  %v8749_v1 = vsel %vm2388_vm6, %v21471_v29, %v12085_v31  ;;  %v8780_v49 = vsel %vm5529_vm8, %v8750_v40, %v12105_v15  ;;  %v12131_v15 = vunpack.i.h.bf16 %v19871_v51 }
 0xa53   : > { %v12124_v45 = vpop.permute.xlu0 %12123  ;;  %v8812_v2 = vsel %vm5561_vm9, %v8780_v49, %v12096_v8 }
 0xa54   : > { %v12125_v7 = vunpack.i.l.bf16 %v12124_v45  ;;  %v12126_v50 = vunpack.i.h.bf16 %v12124_v45  ;;  %v8844_v62 = vsel %vm1336_vm1, %v8812_v2, %v12111_v14 }
 0xa56   : > { %v8906_v28 = vsel %vm5659_vm11, %v8874_v11, %v12125_v7 }
 0xa57   : > { %v12134_v25 = vpop.permute.xlu1 %12133 }
 0xa58   : > { %v12135_v9 = vunpack.i.l.bf16 %v12134_v25  ;;  %v12136_v63 = vunpack.i.h.bf16 %v12134_v25  ;;  %v8876_v25 = vsel %vm5626_vm10, %v8844_v62, %v12116_v17 }
 0xa5a   : > { %v8938_v60 = vsel %vm5692_vm12, %v8906_v28, %v12135_v9  ;;  %v21473_v28 = vld [vmem:[#allocation105_spill] sm:$0xff] }
 0xa5b   : > { %v8969_v18 = vpack.c.bf16 %v8938_v60, %v8937_v33  ;;  %v19886_v58 = vpop.permute.xlu0 %12138  ;;  %v8752_v9 = vsel %vm2388_vm6, %v21473_v28, %v12121_v22 }
 0xa5c   : > { %v19888_v12 = vpop.permute.xlu1 %12148  ;;  %v12140_v20 = vunpack.i.l.bf16 %v19886_v58 }
 0xa5d   : > { %9205 = vmatmul.mubr.bf16.gmra.mxu0 %v8969_v18  ;;  %v8781_v18 = vsel %vm5529_vm8, %v8751_v59, %v12106_v30 }
 0xa5e   : > { %9747 = vmatprep.mubr.msk.bf16.mxu0 %vm2388_vm6, %v8972_v44  ;;  %v8779_v44 = vsel %vm5529_vm8, %v8749_v1, %v12071_v42  ;;  %v8782_v29 = vsel %vm5529_vm8, %v8752_v9, %v12140_v20  ;;  %v8813_v40 = vsel %vm5561_vm9, %v8781_v18, %v12130_v13 }
 0xa5f   : > { %v12144_v36 = vpop.permute.xlu0 %12143  ;;  %v8811_v47 = vsel %vm5561_vm9, %v8779_v44, %v12095_v6 }
 0xa60   : > { %v8843_v24 = vsel %vm1336_vm1, %v8811_v47, %v12110_v48  ;;  %v12145_v37 = vunpack.i.l.bf16 %v12144_v36  ;;  %v12146_v1 = vunpack.i.h.bf16 %v12144_v36  ;;  %v12150_v36 = vunpack.i.l.bf16 %v19888_v12 }
 0xa61   : > { %v19896_v5 = vpop.permute.xlu1 %12158  ;;  %v8875_v7 = vsel %vm5626_vm10, %v8843_v24, %v12115_v57 }
 0xa62   : > { %v12160_v45 = vunpack.i.l.bf16 %v19896_v5  ;;  %v8907_v41 = vsel %vm5659_vm11, %v8875_v7, %v12126_v50  ;;  %v8845_v47 = vsel %vm1336_vm1, %v8813_v40, %v12145_v37  ;;  %v8814_v50 = vsel %vm5561_vm9, %v8782_v29, %v12131_v15  ;;  %v21474_v29 = vld [vmem:[#allocation107_spill] sm:$0xff] }
 0xa63   : > { %v19903_v55 = vpop.permute.xlu0 %12153  ;;  %v8939_v31 = vsel %vm5692_vm12, %v8907_v41, %v12136_v63  ;;  %v8846_v51 = vsel %vm1336_vm1, %v8814_v50, %v12146_v1  ;;  %v12161_v14 = vunpack.i.h.bf16 %v19896_v5  ;;  %v8877_v2 = vsel %vm5626_vm10, %v8845_v47, %v12150_v36 }
 0xa64   : > { %v8908_v10 = vsel %vm5659_vm11, %v8876_v25, %v12160_v45  ;;  %v12156_v9 = vunpack.i.h.bf16 %v19903_v55 }
 0xa65   : > { %v19910_v3 = vpop.permute.xlu1 %12173  ;;  %v8909_v61 = vsel %vm5659_vm11, %v8877_v2, %v12161_v14 }
 0xa66   : > { %v12176_v6 = vunpack.i.h.bf16 %v19910_v3  ;;  %v8754_v52 = vsel %vm2388_vm6, %v21475_v32, %v12156_v9 }
 0xa67   : > { %v19917_v39 = vpop.permute.xlu0 %12163 }
 0xa69   : > { %v19923_v21 = vpop.permute.xlu1 %12178 }
 0xa6a   : > { %v12180_v50 = vunpack.i.l.bf16 %v19923_v21 }
 0xa6b   : > { %v12169_v11 = vpop.permute.xlu0 %12168 }
 0xa6c   : > { %v12170_v33 = vunpack.i.l.bf16 %v12169_v11  ;;  %v12171_v24 = vunpack.i.h.bf16 %v12169_v11  ;;  %v12155_v11 = vunpack.i.l.bf16 %v19903_v55  ;;  %v12165_v55 = vunpack.i.l.bf16 %v19917_v39 }
 0xa6d   : > { %v12189_v60 = vpop.permute.xlu1 %12188 }
 0xa6e   : > { %v12190_v19 = vunpack.i.l.bf16 %v12189_v60  ;;  %v8940_v42 = vsel %vm5692_vm12, %v8908_v10, %v12170_v33  ;;  %v12191_v45 = vunpack.i.h.bf16 %v12189_v60  ;;  %v8753_v1 = vsel %vm2388_vm6, %v21474_v29, %v12155_v11 }
 0xa6f   : > { %v8971_v8 = vpack.c.bf16 %v8940_v42, %v8939_v31  ;;  %v19947_v48 = vpop.permute.xlu0 %12183 }
 0xa70   : > { %v8755_v44 = vsel %vm2388_vm6, %v19403_v4, %v12190_v19  ;;  %v12151_v4 = vunpack.i.h.bf16 %v19888_v12  ;;  %v8941_v12 = vsel %vm5692_vm12, %v8909_v61, %v12171_v24  ;;  %v8756_v62 = vsel %vm2388_vm6, %v19303_v56, %v12191_v45 }
 0xa71   : > { %v12199_v57 = vpop.permute.xlu1 %12198  ;;  %v8785_v27 = vsel %vm5529_vm8, %v8755_v44, %v12176_v6  ;;  %9213 = vmatmul.mubr.bf16.gmra.mxu0 %v8971_v8  ;;  %v12141_v56 = vunpack.i.h.bf16 %v19886_v58  ;;  %v12166_v8 = vunpack.i.h.bf16 %v19917_v39  ;;  %v12185_v14 = vunpack.i.l.bf16 %v19947_v48 }
 0xa72   : > { %v12200_v49 = vunpack.i.l.bf16 %v12199_v57  ;;  %9748 = vmatprep.mubr.msk.bf16.mxu0 %vm2388_vm6, %v8974_v16  ;;  %v8878_v5 = vsel %vm5626_vm10, %v8846_v51, %v12151_v4  ;;  %v12201_v13 = vunpack.i.h.bf16 %v12199_v57  ;;  %v12181_v24 = vunpack.i.h.bf16 %v19923_v21 }
 0xa73   : > { %v19962_v17 = vpop.permute.xlu0 %12193  ;;  %v8783_v36 = vsel %vm5529_vm8, %v8753_v1, %v12141_v56 }
 0xa74   : > { %v8817_v22 = vsel %vm5561_vm9, %v8785_v27, %v12200_v49  ;;  %v12195_v7 = vunpack.i.l.bf16 %v19962_v17  ;;  %v8815_v51 = vsel %vm5561_vm9, %v8783_v36, %v12165_v55 }
 0xa75   : > { %v19965_v63 = vpop.permute.xlu1 %12203 }
 0xa76   : > { %v12205_v34 = vunpack.i.l.bf16 %v19965_v63  ;;  %v8910_v16 = vsel %vm5659_vm11, %v8878_v5, %v12195_v7  ;;  %v12206_v21 = vunpack.i.h.bf16 %v19965_v63 }
 0xa77   : > { %v12209_v59 = vpop.permute.xlu0 %12208 }
 0xa78   : > { %v8942_v43 = vsel %vm5692_vm12, %v8910_v16, %v12205_v34  ;;  %v12210_v20 = vunpack.i.l.bf16 %v12209_v59  ;;  %v12211_v49 = vunpack.i.h.bf16 %v12209_v59  ;;  %v12186_v34 = vunpack.i.h.bf16 %v19947_v48  ;;  %v12589_v48 = vld [vmem:[%s20308_s9] ss:$0 sm:$0xff] }
 0xa79   : > { %v8973_v41 = vpack.c.bf16 %v8942_v43, %v8941_v12  ;;  %v12219_v30 = vpop.permute.xlu1 %12218 }
 0xa7a   : > { %v8786_v28 = vsel %vm5529_vm8, %v8756_v62, %v12210_v20  ;;  %v12221_v31 = vunpack.i.h.bf16 %v12219_v30  ;;  %v12220_v10 = vunpack.i.l.bf16 %v12219_v30 }
 0xa7b   : > { %9221 = vmatmul.mubr.bf16.gmra.mxu0 %v8973_v41  ;;  %v12214_v25 = vpop.permute.xlu0 %12213  ;;  %v8818_v37 = vsel %vm5561_vm9, %v8786_v28, %v12201_v13  ;;  %v21476_v41 = vld [vmem:[#allocation52_spill] sm:$0xff] }
 0xa7c   : > { %9749 = vmatprep.mubr.msk.bf16.mxu0 %vm2388_vm6, %v8976_v35  ;;  %v12216_v33 = vunpack.i.h.bf16 %v12214_v25  ;;  %v12215_v60 = vunpack.i.l.bf16 %v12214_v25  ;;  %v12175_v35 = vunpack.i.l.bf16 %v19910_v3  ;;  %v6029_v20 = vadd.f32 %v12589_v48, %v21476_v41 }
 0xa7d   : > { %v12229_v18 = vpop.permute.xlu1 %12228 }
 0xa7e   : > { %v12231_v19 = vunpack.i.h.bf16 %v12229_v18  ;;  %v8849_v6 = vsel %vm1336_vm1, %v8817_v22, %v12215_v60  ;;  %v8850_v42 = vsel %vm1336_vm1, %v8818_v37, %v12216_v33  ;;  %v8784_v2 = vsel %vm5529_vm8, %v8754_v52, %v12175_v35  ;;  %v12590_v37 = vld [vmem:[%s20310_s11] ss:$0 sm:$0xff] }
 0xa7f   : > { %v8881_v15 = vsel %vm5626_vm10, %v8849_v6, %v12220_v10  ;;  %v12224_v58 = vpop.permute.xlu0 %12223  ;;  %v19994_v40 = vsel %vm5626_vm10, %v8850_v42, %v12221_v31  ;;  %v12196_v22 = vunpack.i.h.bf16 %v19962_v17  ;;  %v8816_v5 = vsel %vm5561_vm9, %v8784_v2, %v12166_v8 }
 0xa80   : > { %v8913_v44 = vsel %vm5659_vm11, %v8881_v15, %v12231_v19  ;;  %v12226_v47 = vunpack.i.h.bf16 %v12224_v58  ;;  %v12225_v57 = vunpack.i.l.bf16 %v12224_v58  ;;  %v12230_v12 = vunpack.i.l.bf16 %v12229_v18  ;;  %v21477_v19 = vld [vmem:[#allocation64_spill] sm:$0xff] }
 0xa81   : > { %v19998_v27 = vpop.permute.xlu1 %12243  ;;  %v8848_v30 = vsel %vm1336_vm1, %v8816_v5, %v12181_v24  ;;  %v6071_v10 = vmax.f32 %v6029_v20, 0.0  ;;  %v6032_v29 = vadd.f32 %v12589_v48, %v21477_v19  ;;  %v8978_v6 = vpack.c.bf16 %v19710_v23, %v19647_v53 }
 0xa82   : > { %v12245_v3 = vunpack.i.l.bf16 %v19998_v27  ;;  %v8758_v39 = vsel %vm2388_vm6, %v19343_v54, %v12226_v47  ;;  %v8757_v4 = vsel %vm2388_vm6, %v19520_v0, %v12225_v57  ;;  %v8847_v54 = vsel %vm1336_vm1, %v8815_v51, %v12180_v50  ;;  %v21478_v50 = vld [vmem:[#allocation75_spill] sm:$0xff] }
 0xa83   : > { %v12234_v7 = vpop.permute.xlu0 %12233  ;;  %v8787_v45 = vsel %vm5529_vm8, %v8757_v4, %v12211_v49  ;;  %v8879_v43 = vsel %vm5626_vm10, %v8847_v54, %v12185_v14  ;;  %v8880_v11 = vsel %vm5626_vm10, %v8848_v30, %v12186_v34  ;;  %v6072_v15 = vmax.f32 %v6032_v29, 0.0 }
 0xa84   : > { %v12236_v61 = vunpack.i.h.bf16 %v12234_v7  ;;  %v12235_v16 = vunpack.i.l.bf16 %v12234_v7  ;;  %v8788_v0 = vsel %vm5529_vm8, %v8758_v39, %v12245_v3  ;;  %v8911_v62 = vsel %vm5659_vm11, %v8879_v43, %v12196_v22 }
 0xa85   : > { %v8912_v25 = vsel %vm5659_vm11, %v8880_v11, %v12230_v12  ;;  %v8943_v60 = vsel %vm5692_vm12, %v8911_v62, %v12206_v21  ;;  %v6037_v53 = vadd.f32 %v12589_v48, %v21478_v50 }
 0xa86   : > { %v20020_v17 = vsel %vm5561_vm9, %v8787_v45, %v12235_v16  ;;  %v20023_v59 = vsel %vm5561_vm9, %v8788_v0, %v12236_v61  ;;  %v21479_v45 = vld [vmem:[#allocation73_spill] sm:$0xff] }
 0xa87   : > { %v12239_v13 = vpop.permute.xlu0 %12238  ;;  %v6040_v5 = vadd.f32 %v12589_v48, %v21479_v45  ;;  %v6073_v12 = vmax.f32 %v6037_v53, 0.0 }
 0xa88   : > { %v12241_v63 = vunpack.i.h.bf16 %v12239_v13  ;;  %v12240_v28 = vunpack.i.l.bf16 %v12239_v13 }
 0xa89   : > { %v6074_v13 = vmax.f32 %v6040_v5, 0.0 }
 0xa8a   : > { %v8944_v18 = vsel %vm5692_vm12, %v8912_v25, %v12240_v28  ;;  %v20039_v56 = vsel %vm5692_vm12, %v8913_v44, %v12241_v63 }
 0xa8b   : > { %v8975_v1 = vpack.c.bf16 %v8944_v18, %v8943_v60 }
 0xa8d   : > { %v7625_v9 = vpop.f32.mrf.mxu1  ;;  %9229 = vmatmul.mubr.bf16.gmra.mxu0 %v8975_v1 }
 0xa8e   : > { %v7626_v33 = vadd.f32 %v12590_v37, %v7625_v9  ;;  %9750 = vmatprep.mubr.msk.bf16.mxu0 %vm2388_vm6, %v8978_v6 }
 0xa8f   : > { %v7627_v31 = vpop.f32.mrf.mxu1 }
 0xa90   : > { %v7668_v55 = vmax.f32 %v7626_v33, 0.0 }
 0xa91   : > { %v7628_v42 = vpop.f32.mrf.mxu1 }
 0xa92   : > { %v7700_v32 = vadd.f32 %v7668_v55, %v6071_v10  ;;  %v7629_v52 = vadd.f32 %v12590_v37, %v7628_v42 }
 0xa93   : > { %v7630_v35 = vpop.f32.mrf.mxu1 }
 0xa94   : > { %v7778_v58 = vrot.slane %v7700_v32, 7  ;;  %v7669_v8 = vmax.f32 %v7629_v52, 0.0  ;;  %v20091_v52 = vld [vmem:[%s20312_s13] ss:$0 sm:$0xff] }
 0xa96   : > { %v20046_v44 = vsel %vm652_vm0, 0.0, %v7778_v58  ;;  %v7701_v47 = vadd.f32 %v7669_v8, %v6072_v15 }
 0xa97   : > { %v12262_v57 = vpack.i.bf16 %v20046_v44, %v19396_v38  ;;  %v7963_v49 = vrot.slane %v20046_v44, 1  ;;  %v8038_v3 = vrot.slane %v20046_v44, 2 }
 0xa98   : > { %v7779_v36 = vrot.slane %v7701_v47, 7  ;;  %v7633_v2 = vpop.f32.mrf.mxu1 }
 0xa99   : > { %12263 = vrot.lane.b32.xlu0 %v12262_v57, %s12682_s22  ;;  %v7634_v7 = vadd.f32 %v12590_v37, %v7633_v2 }
 0xa9a   : > { %v20055_v51 = vsel %vm652_vm0, %v7778_v58, %v7779_v36  ;;  %v7861_v14 = vsel %vm652_vm0, %v7779_v36, 0.0  ;;  %v7635_v34 = vpop.f32.mrf.mxu1 }
 0xa9b   : > { %v7966_v39 = vrot.slane %v7861_v14, 1  ;;  %v8041_v4 = vrot.slane %v7861_v14, 2  ;;  %v7964_v24 = vrot.slane %v20055_v51, 1  ;;  %v8039_v22 = vrot.slane %v20055_v51, 2 }
 0xa9c   : > { %v7670_v0 = vmax.f32 %v7634_v7, 0.0  ;;  %v7636_v41 = vpop.f32.mrf.mxu1 }
 0xa9d   : > { %v7965_v61 = vsel %vm812_vm2, %v7963_v49, %v7964_v24  ;;  %v20063_v16 = vsel %vm890_vm3, %v8038_v3, %v8039_v22  ;;  %v20066_v54 = vsel %vm890_vm3, %v8039_v22, %v8041_v4  ;;  %v7967_v20 = vsel %vm812_vm2, %v7964_v24, %v7966_v39 }
 0xa9e   : > { %v12267_v43 = vpack.i.bf16 %v7965_v61, %v19673_v46  ;;  %v12277_v21 = vpack.i.bf16 %v20063_v16, %v19710_v23  ;;  %v8980_v48 = vpack.c.bf16 %v20066_v54, %v20063_v16  ;;  %v7702_v30 = vadd.f32 %v7670_v0, %v6073_v12  ;;  %v7638_v11 = vpop.f32.mrf.mxu1 }
 0xa9f   : > { %v7637_v62 = vadd.f32 %v12590_v37, %v7636_v41  ;;  %v12272_v46 = vpack.i.bf16 %v20055_v51, %v20046_v44  ;;  %v12282_v23 = vpack.i.bf16 %v7967_v20, %v7965_v61  ;;  %v12292_v6 = vpack.i.bf16 %v20066_v54, %v20063_v16 }
 0xaa0   : > { %12268 = vrot.lane.b32.xlu1 %v12267_v43, %s12676_s30  ;;  %12278 = vrot.lane.b32.xlu0 %v12277_v21, %s12680_s20  ;;  %v7781_v63 = vrot.slane %v7702_v30, 7 }
 0xaa1   : > { %v7671_v28 = vmax.f32 %v7637_v62, 0.0 }
 0xaa2   : > { %v7846_v9 = vsel %vm652_vm0, 0.0, %v7781_v63 }
 0xaa3   : > { %v7703_v25 = vadd.f32 %v7671_v28, %v6074_v13  ;;  %v12287_v33 = vpack.i.bf16 %v7846_v9, %v20055_v51  ;;  %v8045_v60 = vrot.slane %v7846_v9, 1  ;;  %v8050_v18 = vrot.slane %v7846_v9, 2 }
 0xaa4   : > { %12273 = vrot.lane.b32.xlu1 %v12272_v46, %s12678_s1  ;;  %12283 = vrot.lane.b32.xlu0 %v12282_v23, %s12674_s27 }
 0xaa5   : > { %v7782_v37 = vrot.slane %v7703_v25, 7 }
 0xaa7   : > { %v7783_v31 = vsel %vm652_vm0, %v7781_v63, %v7782_v37  ;;  %v7862_v10 = vsel %vm652_vm0, %v7782_v37, 0.0 }
 0xaa8   : > { %12288 = vrot.lane.b32.xlu1 %v12287_v33, %s12682_s22  ;;  %v8046_v19 = vrot.slane %v7783_v31, 1  ;;  %v8048_v29 = vrot.slane %v7862_v10, 1  ;;  %v8051_v1 = vrot.slane %v7783_v31, 2  ;;  %v8053_v55 = vrot.slane %v7862_v10, 2 }
 0xaa9   : > { %v12307_v42 = vpack.i.bf16 %v7783_v31, %v7846_v9 }
 0xaaa   : > { %v8047_v32 = vsel %vm812_vm2, %v8045_v60, %v8046_v19  ;;  %v8049_v35 = vsel %vm812_vm2, %v8046_v19, %v8048_v29  ;;  %v20095_v15 = vsel %vm890_vm3, %v8050_v18, %v8051_v1  ;;  %v20098_v58 = vsel %vm890_vm3, %v8051_v1, %v8053_v55  ;;  %v9142_v50 = vpop.f32.mrf.mxu0 }
 0xaab   : > { %v12297_v8 = vpack.i.bf16 %v8047_v32, %v7967_v20  ;;  %v12312_v47 = vpack.i.bf16 %v8049_v35, %v8047_v32  ;;  %v12317_v57 = vpack.i.bf16 %v20098_v58, %v20095_v15  ;;  %v8982_v36 = vpack.c.bf16 %v20098_v58, %v20095_v15 }
 0xaac   : > { %12293 = vrot.lane.b32.xlu1 %v12292_v6, %s12681_s25  ;;  %v9143_v53 = vadd.f32 %v20091_v52, %v9142_v50  ;;  %v9144_v49 = vpop.f32.mrf.mxu0 }
 0xaad   : > { %12298 = vrot.lane.b32.xlu0 %v12297_v8, %s12676_s30 }
 0xaae   : > { %v9145_v3 = vpop.f32.mrf.mxu0  ;;  %v9269_v14 = vmax.f32 %v9143_v53, 0.0 }
 0xaaf   : > { %v9146_v39 = vadd.f32 %v20091_v52, %v9145_v3 }
 0xab0   : > { %8701 = vrot.lane.b32.xlu1 %v8049_v35, %s12676_s30  ;;  %v9147_v4 = vpop.f32.mrf.mxu0  ;;  %v9376_v24 = vsel %vm1336_vm1, %v9269_v14, 0.0 }
 0xab1   : > { %8611 = vrot.lane.b32.xlu0 %v7783_v31, %s12682_s22  ;;  %v9270_v2 = vmax.f32 %v9146_v39, 0.0  ;;  %s12606_s22 = scalar_lea.vmem %s9470_s24, 16 }
 0xab2   : > { %p12607_p9 = scmp.ne.s32.totalorder %s9470_s24, %s12606_s22 }
 0xab3   : > { %v9377_v22 = vsel %vm1336_vm1, %v9270_v2, 0.0 }
 0xab4   : > { %8233 = vrot.lane.b32.xlu1 %v20066_v54, %s12680_s20  ;;  %v9378_v7 = vadd.f32 %v9377_v22, %v9376_v24  ;;  %p12608_p10 = pnand %p12607_p9, %p12817_p5 }
 0xab5   : > { %12303 = vrot.lane.b32.xlu0 %v12282_v23, %s12679_s19  ;;  %s21484_s19 = sld [smem:[#allocation119_spill]] }
 0xab6   : > { %p12609_p12 = pneg %p12608_p10 }
 0xab8   : > { %12313 = vrot.lane.b32.xlu1 %v12312_v47, %s12674_s27 }
 0xab9   : > { %12308 = vrot.lane.b32.xlu0 %v12307_v42, %s12678_s1 }
 0xabd   : > { %v9150_v45 = vpop.f32.mrf.mxu0  ;;  %12318 = vrot.lane.b32.xlu0 %v12317_v57, %s12681_s25  ;;  %s9457_s25 = scalar_lea.sflag [#allocation3], %s580_s29 }
 0xabe   : > { %v9151_v5 = vadd.f32 %v20091_v52, %v9150_v45 }
 0xabf   : > { %v9152_v34 = vpop.f32.mrf.mxu0 }
 0xac0   : > { %v9271_v61 = vmax.f32 %v9151_v5, 0.0 }
 0xac1   : > { %v9153_v12 = vpop.f32.mrf.mxu0 }
 0xac2   : > { %v9379_v0 = vsel %vm1336_vm1, %v9271_v61, 0.0  ;;  %v9154_v43 = vadd.f32 %v20091_v52, %v9153_v12 }
 0xac3   : > { %v9380_v21 = vadd.f32 %v9379_v0, %v9378_v7  ;;  %v9155_v41 = vpop.f32.mrf.mxu0 }
 0xac4   : > { %v9272_v20 = vmax.f32 %v9154_v43, 0.0 }
 0xac6   : > { %v9381_v30 = vsel %vm1336_vm1, %v9272_v20, 0.0  ;;  %v9158_v62 = vpop.f32.mrf.mxu0 }
 0xac7   : > { %v9382_v13 = vadd.f32 %v9381_v30, %v9380_v21  ;;  %v9159_v11 = vadd.f32 %v20091_v52, %v9158_v62 }
 0xac8   : > { %v9160_v63 = vpop.f32.mrf.mxu0 }
 0xac9   : > { %v9273_v28 = vmax.f32 %v9159_v11, 0.0 }
 0xaca   : > { %v9161_v46 = vpop.f32.mrf.mxu0 }
 0xacb   : > { %v9383_v23 = vsel %vm1336_vm1, %v9273_v28, 0.0  ;;  %v9162_v9 = vadd.f32 %v20091_v52, %v9161_v46 }
 0xacc   : > { %v9384_v25 = vadd.f32 %v9383_v23, %v9382_v13  ;;  %v9163_v37 = vpop.f32.mrf.mxu0 }
 0xacd   : > { %v9274_v33 = vmax.f32 %v9162_v9, 0.0 }
 0xacf   : > { %v9385_v60 = vsel %vm1336_vm1, %v9274_v33, 0.0 }
 0xad0   : > { %v9386_v18 = vadd.f32 %v9385_v60, %v9384_v25 }
 0xad9   : > { %v9166_v31 = vpop.f32.mrf.mxu0 }
 0xada   : > { %v9167_v10 = vadd.f32 %v20091_v52, %v9166_v31 }
 0xadb   : > { %v9168_v19 = vpop.f32.mrf.mxu0 }
 0xadc   : > { %v9275_v29 = vmax.f32 %v9167_v10, 0.0  ;;  %v12254_v10 = vpop.permute.xlu0 %12253 }
 0xadd   : > { %v9169_v1 = vpop.f32.mrf.mxu0 }
 0xade   : > { %v9387_v55 = vsel %vm1336_vm1, %v9275_v29, 0.0  ;;  %v9170_v6 = vadd.f32 %v20091_v52, %v9169_v1 }
 0xadf   : > { %v9388_v42 = vadd.f32 %v9387_v55, %v9386_v18  ;;  %v9171_v32 = vpop.f32.mrf.mxu0  ;;  %v12249_v18 = vpop.permute.xlu1 %12248 }
 0xae0   : > { %v9276_v35 = vmax.f32 %v9170_v6, 0.0 }
 0xae2   : > { %v9389_v8 = vsel %vm1336_vm1, %v9276_v35, 0.0  ;;  %v9174_v47 = vpop.f32.mrf.mxu0 }
 0xae3   : > { %v9390_v57 = vadd.f32 %v9389_v8, %v9388_v42  ;;  %v9175_v50 = vadd.f32 %v20091_v52, %v9174_v47  ;;  %v12259_v29 = vpop.permute.xlu1 %12258 }
 0xae4   : > { %v9176_v53 = vpop.f32.mrf.mxu0 }
 0xae5   : > { %v9277_v49 = vmax.f32 %v9175_v50, 0.0 }
 0xae6   : > { %v9177_v3 = vpop.f32.mrf.mxu0 }
 0xae7   : > { %v9391_v14 = vsel %vm1336_vm1, %v9277_v49, 0.0  ;;  %v9178_v39 = vadd.f32 %v20091_v52, %v9177_v3  ;;  %v12260_v49 = vunpack.i.l.bf16 %v12259_v29 }
 0xae8   : > { %v9392_v4 = vadd.f32 %v9391_v14, %v9390_v57  ;;  %v9179_v2 = vpop.f32.mrf.mxu0 }
 0xae9   : > { %v9278_v24 = vmax.f32 %v9178_v39, 0.0 }
 0xaeb   : > { %v9393_v22 = vsel %vm1336_vm1, %v9278_v24, 0.0 }
 0xaec   : > { %v9394_v7 = vadd.f32 %v9393_v22, %v9392_v4  ;;  %v12251_v22 = vunpack.i.h.bf16 %v12249_v18 }
 0xaee   : > { %v8852_v16 = vsel %vm1336_vm1, %v20023_v59, %v12251_v22 }
 0xaf5   : > { %v9182_v45 = vpop.f32.mrf.mxu0 }
 0xaf6   : > { %v9183_v5 = vadd.f32 %v20091_v52, %v9182_v45 }
 0xaf7   : > { %v9184_v34 = vpop.f32.mrf.mxu0 }
 0xaf8   : > { %v9279_v61 = vmax.f32 %v9183_v5, 0.0  ;;  %v8759_v5 = vsel %vm2388_vm6, %v19598_v26, %v12260_v49  ;;  %v12255_v26 = vunpack.i.l.bf16 %v12254_v10 }
 0xaf9   : > { %v9185_v12 = vpop.f32.mrf.mxu0 }
 0xafa   : > { %v9395_v0 = vsel %vm1336_vm1, %v9279_v61, 0.0  ;;  %v9186_v43 = vadd.f32 %v20091_v52, %v9185_v12  ;;  %v12246_v12 = vunpack.i.h.bf16 %v19998_v27 }
 0xafb   : > { %v9396_v21 = vadd.f32 %v9395_v0, %v9394_v7  ;;  %v9187_v41 = vpop.f32.mrf.mxu0  ;;  %v12261_v7 = vunpack.i.h.bf16 %v12259_v29 }
 0xafc   : > { %v9280_v20 = vmax.f32 %v9186_v43, 0.0 }
 0xafd   : > { %v8760_v54 = vsel %vm2388_vm6, %v19396_v38, %v12261_v7 }
 0xafe   : > { %v9397_v30 = vsel %vm1336_vm1, %v9280_v20, 0.0  ;;  %v9190_v62 = vpop.f32.mrf.mxu0  ;;  %v12250_v20 = vunpack.i.l.bf16 %v12249_v18 }
 0xaff   : > { %v9398_v13 = vadd.f32 %v9397_v30, %v9396_v21  ;;  %v9191_v11 = vadd.f32 %v20091_v52, %v9190_v62 }
 0xb00   : > { %v9192_v63 = vpop.f32.mrf.mxu0  ;;  %v8851_v38 = vsel %vm1336_vm1, %v20020_v17, %v12250_v20 }
 0xb01   : > { %v9281_v28 = vmax.f32 %v9191_v11, 0.0 }
 0xb02   : > { %v9193_v46 = vpop.f32.mrf.mxu0 }
 0xb03   : > { %v9399_v23 = vsel %vm1336_vm1, %v9281_v28, 0.0  ;;  %v9194_v9 = vadd.f32 %v20091_v52, %v9193_v46 }
 0xb04   : > { %v9400_v25 = vadd.f32 %v9399_v23, %v9398_v13  ;;  %v9195_v37 = vpop.f32.mrf.mxu0  ;;  %v8789_v13 = vsel %vm5529_vm8, %v8759_v5, %v12246_v12 }
 0xb05   : > { %v9282_v33 = vmax.f32 %v9194_v9, 0.0 }
 0xb07   : > { %v9401_v60 = vsel %vm1336_vm1, %v9282_v33, 0.0 }
 0xb08   : > { %v9402_v31 = vadd.f32 %v9401_v60, %v9400_v25  ;;  %v8883_v60 = vsel %vm5626_vm10, %v8851_v38, %v12255_v26 }
 0xb0b   : > { %v12264_v19 = vpop.permute.xlu0 %12263 }
 0xb0c   : > { %v12265_v1 = vunpack.i.l.bf16 %v12264_v19  ;;  %v12266_v62 = vunpack.i.h.bf16 %v12264_v19 }
 0xb0e   : > { %v8914_v8 = vsel %vm5659_vm11, %v19994_v40, %v12265_v1  ;;  %v12256_v40 = vunpack.i.h.bf16 %v12254_v10  ;;  %v8915_v10 = vsel %vm5659_vm11, %v8883_v60, %v12266_v62 }
 0xb10   : > { %v8884_v30 = vsel %vm5626_vm10, %v8852_v16, %v12256_v40 }
 0xb11   : > { %v9198_v55 = vpop.f32.mrf.mxu0 }
 0xb12   : > { %v9199_v6 = vadd.f32 %v20091_v52, %v9198_v55  ;;  %v12269_v42 = vpop.permute.xlu1 %12268  ;;  %v20146_v50 = vpop.permute.xlu0 %12278 }
 0xb13   : > { %v12270_v32 = vunpack.i.l.bf16 %v12269_v42  ;;  %v9200_v35 = vpop.f32.mrf.mxu0  ;;  %v12271_v11 = vunpack.i.h.bf16 %v12269_v42  ;;  %v12281_v58 = vunpack.i.h.bf16 %v20146_v50 }
 0xb14   : > { %v9283_v47 = vmax.f32 %v9199_v6, 0.0 }
 0xb15   : > { %v8946_v57 = vsel %vm5692_vm12, %v8914_v8, %v12270_v32  ;;  %v9201_v53 = vpop.f32.mrf.mxu0  ;;  %v8947_v6 = vsel %vm5692_vm12, %v8915_v10, %v12271_v11 }
 0xb16   : > { %v9403_v3 = vsel %vm1336_vm1, %v9283_v47, 0.0  ;;  %v8977_v14 = vpack.c.bf16 %v8946_v57, %v20039_v56  ;;  %v9202_v39 = vadd.f32 %v20091_v52, %v9201_v53  ;;  %v12274_v4 = vpop.permute.xlu1 %12273  ;;  %v12280_v56 = vunpack.i.l.bf16 %v20146_v50  ;;  %v12284_v41 = vpop.permute.xlu0 %12283 }
 0xb17   : > { %v9404_v2 = vadd.f32 %v9403_v3, %v9402_v31  ;;  %v9203_v24 = vpop.f32.mrf.mxu0  ;;  %v12276_v43 = vunpack.i.h.bf16 %v12274_v4  ;;  %v12275_v21 = vunpack.i.l.bf16 %v12274_v4  ;;  %v12286_v63 = vunpack.i.h.bf16 %v12284_v41 }
 0xb18   : > { %v9284_v45 = vmax.f32 %v9202_v39, 0.0  ;;  %9237 = vmatmul.mubr.bf16.gmra.mxu0 %v8977_v14  ;;  %v8790_v27 = vsel %vm5529_vm8, %v8760_v54, %v12280_v56  ;;  %v12285_v28 = vunpack.i.l.bf16 %v12284_v41 }
 0xb19   : > { %9751 = vmatprep.mubr.msk.bf16.mxu0 %vm2388_vm6, %v8980_v48  ;;  %v8821_v23 = vsel %vm5561_vm9, %v8789_v13, %v12275_v21  ;;  %v8822_v59 = vsel %vm5561_vm9, %v8790_v27, %v12276_v43  ;;  %v21480_v13 = vld [vmem:[#allocation36_spill] sm:$0xff] }
 0xb1a   : > { %v9405_v34 = vsel %vm1336_vm1, %v9284_v45, 0.0  ;;  %v12289_v61 = vpop.permute.xlu1 %12288  ;;  %v8853_v19 = vsel %vm1336_vm1, %v8821_v23, %v12285_v28  ;;  %v8854_v1 = vsel %vm1336_vm1, %v8822_v59, %v12286_v63  ;;  %v21481_v23 = vld [vmem:[#allocation51_spill] sm:$0xff] }
 0xb1b   : > { %v9406_v0 = vadd.f32 %v9405_v34, %v9404_v2  ;;  %v12290_v48 = vunpack.i.l.bf16 %v12289_v61  ;;  %v12291_v8 = vunpack.i.h.bf16 %v12289_v61 }
 0xb1d   : > { %v8916_v37 = vsel %vm5659_vm11, %v8884_v30, %v12290_v48  ;;  %v9206_v18 = vpop.f32.mrf.mxu0 }
 0xb1e   : > { %v12294_v46 = vpop.permute.xlu1 %12293  ;;  %v9207_v29 = vadd.f32 %v20091_v52, %v9206_v18 }
 0xb1f   : > { %v12296_v9 = vunpack.i.h.bf16 %v12294_v46  ;;  %v12295_v25 = vunpack.i.l.bf16 %v12294_v46  ;;  %v12299_v33 = vpop.permute.xlu0 %12298  ;;  %v9208_v42 = vpop.f32.mrf.mxu0 }
 0xb20   : > { %v12300_v31 = vunpack.i.l.bf16 %v12299_v33  ;;  %v9285_v47 = vmax.f32 %v9207_v29, 0.0  ;;  %v12301_v22 = vunpack.i.h.bf16 %v12299_v33 }
 0xb21   : > { %v8885_v32 = vsel %vm5626_vm10, %v8853_v19, %v12295_v25  ;;  %v8886_v35 = vsel %vm5626_vm10, %v8854_v1, %v12296_v9  ;;  %v9209_v49 = vpop.f32.mrf.mxu0  ;;  %v21482_v25 = vld [vmem:[#allocation60_spill] sm:$0xff] }
 0xb22   : > { %v8702_v55 = vpop.permute.xlu1 %8701  ;;  %v8948_v17 = vsel %vm5692_vm12, %v8916_v37, %v12300_v31  ;;  %v9407_v3 = vsel %vm1336_vm1, %v9285_v47, 0.0  ;;  %v9210_v14 = vadd.f32 %v20091_v52, %v9209_v49  ;;  %v8917_v4 = vsel %vm5659_vm11, %v8885_v32, %v12291_v8 }
 0xb23   : > { %v8979_v57 = vpack.c.bf16 %v8948_v17, %v8947_v6  ;;  %v8612_v53 = vpop.permute.xlu0 %8611  ;;  %v9408_v24 = vadd.f32 %v9407_v3, %v9406_v0  ;;  %v9211_v7 = vpop.f32.mrf.mxu0  ;;  %v8949_v5 = vsel %vm5692_vm12, %v8917_v4, %v12301_v22 }
 0xb24   : > { %v8918_v39 = vsel %vm5659_vm11, %v8886_v35, %v8612_v53  ;;  %v9286_v45 = vmax.f32 %v9210_v14, 0.0 }
 0xb25   : > { %9245 = vmatmul.mubr.bf16.gmra.mxu0 %v8979_v57  ;;  %v8950_v56 = vsel %vm5692_vm12, %v8918_v39, %v8702_v55 }
 0xb26   : > { %v8234_v2 = vpop.permute.xlu1 %8233  ;;  %9752 = vmatprep.mubr.msk.bf16.mxu0 %vm2388_vm6, %v8982_v36  ;;  %v9409_v12 = vsel %vm1336_vm1, %v9286_v45, 0.0  ;;  %v8981_v36 = vpack.c.bf16 %v8950_v56, %v8949_v5 }
 0xb27   : > { %v12304_v40 = vpop.permute.xlu0 %12303  ;;  %v9410_v21 = vadd.f32 %v9409_v12, %v9408_v24 }
 0xb28   : > { %v12306_v34 = vunpack.i.h.bf16 %v12304_v40  ;;  %v12305_v61 = vunpack.i.l.bf16 %v12304_v40 }
 0xb2a   : > { %v12314_v43 = vpop.permute.xlu1 %12313  ;;  %v8761_v0 = vsel %vm2388_vm6, %v20046_v44, %v12305_v61  ;;  %v8762_v15 = vsel %vm2388_vm6, %v20055_v51, %v12306_v34 }
 0xb2b   : > { %v12309_v41 = vpop.permute.xlu0 %12308  ;;  %v12316_v20 = vunpack.i.h.bf16 %v12314_v43  ;;  %v12315_v16 = vunpack.i.l.bf16 %v12314_v43  ;;  %v8792_v26 = vsel %vm5529_vm8, %v8762_v15, %v8234_v2  ;;  %v8791_v30 = vsel %vm5529_vm8, %v8761_v0, %v12281_v58 }
 0xb2c   : > { %v12311_v54 = vunpack.i.h.bf16 %v12309_v41  ;;  %v12310_v48 = vunpack.i.l.bf16 %v12309_v41 }
 0xb2d   : > { %9253 = vmatmul.mubr.bf16.gmra.mxu0 %v8981_v36 }
 0xb2e   : > { %v8823_v62 = vsel %vm5561_vm9, %v8791_v30, %v12310_v48  ;;  %v8824_v44 = vsel %vm5561_vm9, %v8792_v26, %v12311_v54  ;;  %9753 = vmatprep.mubr.msk.bf16.mxu0 %vm2388_vm6, %v21480_v13 }
 0xb2f   : > { %v8855_v51 = vsel %vm1336_vm1, %v8823_v62, %v12315_v16  ;;  %v8856_v50 = vsel %vm1336_vm1, %v8824_v44, %v12316_v20  ;;  %v12319_v11 = vpop.permute.xlu0 %12318 }
 0xb30   : > { %v12321_v27 = vunpack.i.h.bf16 %v12319_v11  ;;  %v12320_v63 = vunpack.i.l.bf16 %v12319_v11 }
 0xb31   : > { %v9214_v33 = vpop.f32.mrf.mxu0 }
 0xb32   : > { %v8887_v28 = vsel %vm5626_vm10, %v8855_v51, %v12320_v63  ;;  %v8888_v46 = vsel %vm5626_vm10, %v8856_v50, %v12321_v27  ;;  %v9215_v18 = vadd.f32 %v20091_v52, %v9214_v33 }
 0xb33   : > { %v8919_v59 = vsel %vm5659_vm11, %v8887_v28, %v21481_v23  ;;  %v8920_v9 = vsel %vm5659_vm11, %v8888_v46, %v21481_v23  ;;  %v9216_v31 = vpop.f32.mrf.mxu0 }
 0xb34   : > { %v8951_v38 = vsel %vm5692_vm12, %v8919_v59, %v21482_v25  ;;  %v8952_v37 = vsel %vm5692_vm12, %v8920_v9, %v21482_v25  ;;  %v9287_v10 = vmax.f32 %v9215_v18, 0.0 }
 0xb35   : > { %v8983_v60 = vpack.c.bf16 %v8952_v37, %v8951_v38  ;;  %v9217_v19 = vpop.f32.mrf.mxu0 }
 0xb36   : > { %v9411_v29 = vsel %vm1336_vm1, %v9287_v10, 0.0  ;;  %v9218_v1 = vadd.f32 %v20091_v52, %v9217_v19 }
 0xb37   : > { %9261 = vmatmul.mubr.bf16.gmra.mxu0 %v8983_v60  ;;  %v9412_v55 = vadd.f32 %v9411_v29, %v9410_v21  ;;  %v9219_v6 = vpop.f32.mrf.mxu0 }
 0xb38   : > { %v9288_v17 = vmax.f32 %v9218_v1, 0.0 }
 0xb3a   : > { %v9413_v42 = vsel %vm1336_vm1, %v9288_v17, 0.0 }
 0xb3b   : > { %v9222_v32 = vpop.f32.mrf.mxu0  ;;  %v9414_v35 = vadd.f32 %v9413_v42, %v9412_v55 }
 0xb3c   : > { %v9223_v8 = vadd.f32 %v20091_v52, %v9222_v32 }
 0xb3d   : > { %v9224_v47 = vpop.f32.mrf.mxu0 }
 0xb3e   : > { %v9289_v57 = vmax.f32 %v9223_v8, 0.0 }
 0xb3f   : > { %v9225_v53 = vpop.f32.mrf.mxu0 }
 0xb40   : > { %v9415_v49 = vsel %vm1336_vm1, %v9289_v57, 0.0  ;;  %v9226_v3 = vadd.f32 %v20091_v52, %v9225_v53 }
 0xb41   : > { %v9416_v14 = vadd.f32 %v9415_v49, %v9414_v35  ;;  %v9227_v39 = vpop.f32.mrf.mxu0 }
 0xb42   : > { %v9290_v4 = vmax.f32 %v9226_v3, 0.0 }
 0xb44   : > { %v9417_v2 = vsel %vm1336_vm1, %v9290_v4, 0.0 }
 0xb45   : > { %v9418_v24 = vadd.f32 %v9417_v2, %v9416_v14 }
 0xb4d   : > { %v9230_v22 = vpop.f32.mrf.mxu0 }
 0xb4e   : > { %v9231_v7 = vadd.f32 %v20091_v52, %v9230_v22 }
 0xb4f   : > { %v9232_v45 = vpop.f32.mrf.mxu0 }
 0xb50   : > { %v9291_v40 = vmax.f32 %v9231_v7, 0.0 }
 0xb51   : > { %v9233_v5 = vpop.f32.mrf.mxu0 }
 0xb52   : > { %v9419_v56 = vsel %vm1336_vm1, %v9291_v40, 0.0  ;;  %v9234_v34 = vadd.f32 %v20091_v52, %v9233_v5  ;;  %v9446_v40 = vld [vmem:[%s20315_s16] sm:$0x1] }
 0xb53   : > { %v9420_v61 = vadd.f32 %v9419_v56, %v9418_v24  ;;  %v9235_v12 = vpop.f32.mrf.mxu0 }
 0xb54   : > { %v9292_v43 = vmax.f32 %v9234_v34, 0.0 }
 0xb56   : > { %v9421_v21 = vsel %vm1336_vm1, %v9292_v43, 0.0 }
 0xb57   : > { %v9422_v0 = vadd.f32 %v9421_v21, %v9420_v61  ;;  %v21483_v61 = vld [vmem:[#allocation46_spill] sm:$0xff] }
 0xb58   : > { %v9364_v12 = vrot.slane %v21483_v61, 4 }
 0xb5a   : > { %v9365_v43 = vadd.f32 %v9364_v12, %v21483_v61 }
 0xb5c   : > { %v9366_v21 = vrot.slane %v9365_v43, 2 }
 0xbd8   : > { %v9238_v15 = vpop.f32.mrf.mxu0 }
 0xbd9   : > { %v9239_v54 = vadd.f32 %v20091_v52, %v9238_v15 }
 0xbda   : > { %v9240_v58 = vpop.f32.mrf.mxu0 }
 0xbdb   : > { %v9293_v62 = vmax.f32 %v9239_v54, 0.0 }
 0xbdc   : > { %v9241_v36 = vpop.f32.mrf.mxu0 }
 0xbdd   : > { %v9242_v26 = vadd.f32 %v20091_v52, %v9241_v36  ;;  %v9423_v27 = vsel %vm1336_vm1, %v9293_v62, 0.0 }
 0xbde   : > { %v9243_v41 = vpop.f32.mrf.mxu0  ;;  %v9424_v25 = vadd.f32 %v9423_v27, %v9422_v0  ;;  %v9367_v0 = vadd.f32 %v9366_v21, %v9365_v43 }
 0xbdf   : > { %v9294_v51 = vmax.f32 %v9242_v26, 0.0  ;;  %v9372_v41 = vld [vmem:[%s20313_s14] sm:$0x1] }
 0xbe0   : > { %v9368_v15 = vrot.slane %v9367_v0, 1 }
 0xbe1   : > { %v9425_v23 = vsel %vm1336_vm1, %v9294_v51, 0.0 }
 0xbe2   : > { %v9426_v60 = vadd.f32 %v9425_v23, %v9424_v25  ;;  %v9369_v58 = vadd.f32 %v9368_v15, %v9367_v0 }
 0xbe4   : > { %v9371_v36 = vmul.f32 0.00390625, %v9369_v58 }
 0xbe5   : > { %v9246_v20 = vpop.f32.mrf.mxu0 }
 0xbe6   : > { %v9247_v44 = vadd.f32 %v20091_v52, %v9246_v20  ;;  %v9373_v20 = vmul.f32 %v9372_v41, %v9371_v36 }
 0xbe7   : > { %v9248_v16 = vpop.f32.mrf.mxu0 }
 0xbe8   : > { %v9295_v63 = vmax.f32 %v9247_v44, 0.0  ;;  %v9374_v16 = vld [vmem:[%s20314_s15] sm:$0x1] }
 0xbe9   : > { %v9249_v48 = vpop.f32.mrf.mxu0  ;;  %v9375_v54 = vadd.f32 %v9374_v16, %v9373_v20 }
 0xbea   : > { %v9250_v50 = vadd.f32 %v20091_v52, %v9249_v48  ;;  %v9427_v37 = vsel %vm1336_vm1, %v9295_v63, 0.0 }
 0xbeb   : > { %v9251_v30 = vpop.f32.mrf.mxu0  ;;  %v9428_v10 = vadd.f32 %v9427_v37, %v9426_v60 }
 0xbec   : > { %v9296_v59 = vmax.f32 %v9250_v50, 0.0 }
 0xbed   : > { %v9254_v13 = vpop.f32.mrf.mxu0 }
 0xbee   : > { %v9255_v28 = vadd.f32 %v20091_v52, %v9254_v13  ;;  %v9429_v18 = vsel %vm1336_vm1, %v9296_v59, 0.0 }
 0xbef   : > { %v9256_v11 = vpop.f32.mrf.mxu0  ;;  %v9430_v55 = vadd.f32 %v9429_v18, %v9428_v10 }
 0xbf0   : > { %v9297_v33 = vmax.f32 %v9255_v28, 0.0 }
 0xbf1   : > { %v9257_v46 = vpop.f32.mrf.mxu0 }
 0xbf2   : > { %v9258_v9 = vadd.f32 %v20091_v52, %v9257_v46  ;;  %v9431_v29 = vsel %vm1336_vm1, %v9297_v33, 0.0 }
 0xbf3   : > { %v9259_v38 = vpop.f32.mrf.mxu0  ;;  %v9432_v32 = vadd.f32 %v9431_v29, %v9430_v55 }
 0xbf4   : > { %v9298_v31 = vmax.f32 %v9258_v9, 0.0 }
 0xbf6   : > { %v9433_v17 = vsel %vm1336_vm1, %v9298_v31, 0.0 }
 0xbf7   : > { %v9262_v19 = vpop.f32.mrf.mxu0  ;;  %v9434_v57 = vadd.f32 %v9433_v17, %v9432_v32 }
 0xbf8   : > { %v9263_v1 = vadd.f32 %v20091_v52, %v9262_v19 }
 0xbf9   : > { %v9264_v6 = vpop.f32.mrf.mxu0 }
 0xbfa   : > { %v9299_v42 = vmax.f32 %v9263_v1, 0.0 }
 0xbfb   : > { %v9265_v35 = vpop.f32.mrf.mxu0 }
 0xbfc   : > { %v9435_v8 = vsel %vm1336_vm1, %v9299_v42, 0.0  ;;  %v9266_v47 = vadd.f32 %v20091_v52, %v9265_v35  ;;  %v9448_v52 = vld [vmem:[%s20316_s17] sm:$0x1] }
 0xbfd   : > { %v9267_v53 = vpop.f32.mrf.mxu0  ;;  %v9436_v3 = vadd.f32 %v9435_v8, %v9434_v57 }
 0xbfe   : > { %v9300_v49 = vmax.f32 %v9266_v47, 0.0 }
 0xc00   : > { %v9437_v14 = vsel %vm1336_vm1, %v9300_v49, 0.0 }
 0xc01   : > { %v9438_v39 = vadd.f32 %v9437_v14, %v9436_v3 }
 0xc03   : > { %v9439_v4 = vrot.slane %v9438_v39, 4 }
 0xc05   : > { %v9440_v2 = vadd.f32 %v9439_v4, %v9438_v39 }
 0xc07   : > { %v9441_v24 = vrot.slane %v9440_v2, 2 }
 0xc09   : > { %v9442_v22 = vadd.f32 %v9441_v24, %v9440_v2 }
 0xc0b   : > { %v9443_v7 = vrot.slane %v9442_v22, 1 }
 0xc0d   : > { %v9444_v45 = vadd.f32 %v9443_v7, %v9442_v22 }
 0xc0f   : > { %v9445_v5 = vmul.f32 0.00390625, %v9444_v45 }
 0xc11   : > { %v9447_v56 = vmul.f32 %v9446_v40, %v9445_v5 }
 0xc13   : > { %v9449_v34 = vadd.f32 %v9448_v52, %v9447_v56 }
 0xc15   : > { %9451 = vrot.lane.b32.xlu1 %v9449_v34, %s12674_s27  ;;  %s9754_s27 = sshll.u32 %s12800_s0, 4  ;;  %s12610_s0 = sshll.u32 %s12683_s26, 4  ;;  %s12611_s0 = int_to_ptr.vmem [resolvable:$false] %s12610_s0 }
 0xc16   : > { %s20263_s20 = scalar_lea.hbm %s21484_s19, %s9754_s27  ;;  %s12612_s18 = scalar_lea.vmem %s12611_s0, 32 }
 0xc17   : > { %p12613_p13 = scmp.lt.s32.totalorder %s9470_s24, %s12611_s0  ;;  %p12614_p0 = scmp.lt.s32.totalorder %s12612_s18, %s12606_s22 }
 0xc19   : > { %p12615_p1 = por %p12614_p0, %p12613_p13 }
 0xc1b   : > { %p12616_p2 = pnand %p12615_p1, %p12609_p12 }
 0xc87   : > { %v9452_v48 = vpop.permute.xlu1 %9451 }
 0xc88   : > { %v9454_v26 = vsel %vm1336_vm1, %v9375_v54, %v9452_v48 }
 0xc89   : > { %9455 = vst [vmem:[%s581_s23] sm:$0x1] %v9454_v26 }
 0xc8a   : > { %12619 = shalt.err (!%p12616_p2)
}
 0xc8b   : > { %s12620_s27 = scalar_lea.hbm %s20263_s20, 16  ;;  %s12624_s30 = scalar_lea.hbm %s21484_s19, 32 }
 0xc8c   : > { %p12621_p3 = scmp.ne.s32.totalorder %s20263_s20, %s12620_s27  ;;  %p12625_p8 = scmp.lt.s32.totalorder %s20263_s20, %s21484_s19 }
 0xc8d   : > { %p12626_p11 = scmp.lt.s32.totalorder %s12624_s30, %s12620_s27 }
 0xc8e   : > { %p12622_p4 = pnand %p12621_p3, %p12817_p5 }
 0xc8f   : > { %p12627_p9 = por %p12626_p11, %p12625_p8 }
 0xc90   : > { %p12623_p7 = pneg %p12622_p4 }
 0xc92   : > { %p12628_p10 = pnand %p12627_p9, %p12623_p7 }
 0xc94   : > { %12631 = shalt.err (!%p12628_p10)
}
 0xc95   : > { %10406 = dma.vmem_to_hbm [thread:$0]  (%p12817_p5), %s9470_s24, 16, %s20263_s20, %s9457_s25  }
 0xc96 PF: > { %s21485_s22 = sld [smem:[#allocation10_spill]] }
 0xc97   : > { %s21486_s0 = sld [smem:[#allocation8_spill]] }
 0xc9c   : > { %p10418_p12 = scmp.ge.s32.totalorder %s21485_s22, 2 }
 0xc9d   : > { %s9481_s3 = sand.u32 1, %s21486_s0  }
 0xc9e   : > { %p10413_p13 = pnand %p10418_p12, %p12821_p6  ;;  %s9482_s29 = scalar_lea.sflag [#allocation3], %s9481_s3 }
 0xca0   : > { %p10414_p0 = pneg %p10413_p13 }
 0xca2   : > { %12653 = dma.done.wait (%p10414_p0), %s9482_s29, 16  }
 0xca3   : > { %12655 = vsyncadd (%p10414_p0), %s9482_s29, 4294967280  ;;  %s21488_s30 = sld [smem:[#allocation11_spill]]  ;;  %s21491_s27 = smov %s12662_s28 }
 0xca4   : > { %s21489_s23 = sld [smem:[#allocation9_spill]] }
 0xca5   : > { %s21490_s29 = sld [smem:[#allocation12_spill]] }
 0xca9   : > { %p29_p1 = scmp.ge.s32.totalorder %s21488_s30, 4  }
 0xcaa   : > { %s21492_s28 = smov %s21489_s23 }
 0xcab   :  { %31 = sbr.rel (!%p29_p1) target bundleno = 10 (0xa), region = 132 }
 0xcb0   :  { %9486 = vsyncpa [#allocation3], 1 }
 0xcb1   :  { %9488 = vsyncpa [#allocation3 + $0x1], 1 }
 0xcb2   :  { %9489 = vsyncpa [#allocation4], 1 }
 0xcb3   :  { %9491 = vsyncpa [#allocation4 + $0x1], 1 }

</bundles_post_ra>
